<compile_context>
chip_gen: v7x
topology: tpu7x:2x2x1
jax: 0.10.0
libtpu: 0.0.40
codegen_flags: <defaults>
</compile_context>

<pallas_src>
import jax
import jax.numpy as jnp
from jax.experimental import pallas as pl
from jax.experimental.pallas import tpu as pltpu


# ----------------------------------------------------------------------------
# Fused MultiCBAM kernel (one batch element per grid step)
# ----------------------------------------------------------------------------
def _make_multicbam_kernel(C, H, W, ksizes):
    HW = H * W
    PMAX = max((k - 1) // 2 for k in ksizes)      # padding of the largest kernel
    PH, PW = H + 2 * PMAX, W + 2 * PMAX

    def kernel(x_ref, w1_ref, b1_ref, w2_ref, b2_ref, wcv_ref, bcv_ref,
               wsp_ref, spsc_ref, o_ref, padbuf_ref, sflat_ref):
        # x_ref:   (1, C, HW) lane-dense block of the input
        # w1_ref:  (NB, HID, C)   channel-MLP layer-1 weights (torch layout)
        # b1_ref:  (NB, HID, 1)
        # w2_ref:  (NB, C, HID)   channel-MLP layer-2 weights (torch layout)
        # b2_ref:  (NB, C, 1)
        # wcv_ref: (NB, C, C)     1x1 fuse-conv weight split per branch
        # bcv_ref: (C, 1)         1x1 fuse-conv bias
        # wsp_ref: (NB, 2*KMAX*KMAX) SMEM  flattened spatial-conv weights
        # spsc_ref:(NB, 6) SMEM   [conv_bias, bn_gamma, bn_beta, bn_mean, bn_var, eps]
        x = x_ref[0].astype(jnp.float32)                      # (C, HW)

        # Global avg / max pool over spatial dims (shared by all three branches).
        avg = jnp.mean(x, axis=1, keepdims=True)              # (C, 1)
        mx = jnp.max(x, axis=1, keepdims=True)                # (C, 1)
        pooled = jnp.concatenate([avg, mx], axis=1)           # (C, 2)

        # Output accumulator: residual + 1x1-conv bias.
        out = x + bcv_ref[...]                                # (C, HW)

        for bi, K in enumerate(ksizes):
            pad = (K - 1) // 2
            base = PMAX - pad

            # -------- Channel attention (shared MLP on stacked avg/max) --------
            h = jnp.dot(w1_ref[bi], pooled,
                        preferred_element_type=jnp.float32) + b1_ref[bi]   # (HID, 2)
            h = jnp.maximum(h, 0.0)                                        # ReLU
            att = jnp.dot(w2_ref[bi], h,
                          preferred_element_type=jnp.float32) + b2_ref[bi]  # (C, 2)
            c_scale = jax.nn.sigmoid(att[:, 0:1] + att[:, 1:2])            # (C, 1)
            x_ca = x * c_scale                                             # (C, HW)

            # -------- ChannelPool: max / mean over channels --------
            pmax = jnp.max(x_ca, axis=0, keepdims=True)       # (1, HW)
            pmean = jnp.mean(x_ca, axis=0, keepdims=True)     # (1, HW)
            pmap = jnp.concatenate([pmax, pmean], axis=0)     # (2, HW)

            # Embed into the zero-padded 2-D spatial scratch (offset PMAX).
            padbuf_ref[...] = jnp.zeros((2, PH, PW), jnp.float32)
            for r in range(H):
                row = pmap[:, r * W:(r + 1) * W]              # (2, W)
                padbuf_ref[:, PMAX + r:PMAX + r + 1, PMAX:PMAX + W] = row[:, None, :]

            # -------- KxK conv (2 -> 1); kw lane-slices hoisted out of kh --------
            acc = jnp.zeros((H, W), jnp.float32) + spsc_ref[bi, 0]   # conv bias
            for c in range(2):
                for kw in range(K):
                    slab = padbuf_ref[c, :, base + kw:base + kw + W]  # (PH, W)
                    for kh in range(K):
                        wgt = wsp_ref[bi, c * K * K + kh * K + kw]
                        acc = acc + slab[base + kh:base + kh + H, :] * wgt

            # -------- BatchNorm + sigmoid --------
            # TODO(synk): BatchNorm uses running statistics (inference mode);
            # training-mode batch statistics are not computed.
            gamma, beta = spsc_ref[bi, 1], spsc_ref[bi, 2]
            rmean, rvar, eps = spsc_ref[bi, 3], spsc_ref[bi, 4], spsc_ref[bi, 5]
            y = (acc - rmean) * jax.lax.rsqrt(rvar + eps) * gamma + beta
            s_gate = jax.nn.sigmoid(y)                         # (H, W)

            # Flatten the tiny gate back to lane-dense (1, HW) via scratch.
            for r in range(H):
                sflat_ref[:, r * W:(r + 1) * W] = s_gate[r:r + 1, :]
            x_cbam = x_ca * sflat_ref[...]                     # (C, HW)

            # -------- fused 1x1 conv contribution of this branch --------
            out = out + jnp.dot(wcv_ref[bi], x_cbam,
                                preferred_element_type=jnp.float32)

        o_ref[0] = out.astype(o_ref.dtype)

    return kernel


# ----------------------------------------------------------------------------
# Wrapper
# ----------------------------------------------------------------------------
def multicbam_forward(x, params, ksizes=(1, 3, 7)):
    B, C, H, W = x.shape
    HW = H * W
    NB = len(ksizes)
    HID = params["w1t"].shape[1]
    PMAX = max((k - 1) // 2 for k in ksizes)
    PH, PW = H + 2 * PMAX, W + 2 * PMAX

    kernel = _make_multicbam_kernel(C, H, W, ksizes)

    # Advisory cost estimate (elementwise gates + conv taps + fused 1x1 matmuls).
    flops = 0
    for K in ksizes:
        flops += B * (6 * C * HW + 4 * K * K * HW + 2 * C * C * HW)
    transcendentals = B * NB * (C + HW)
    param_bytes = sum(int(v.size) * v.dtype.itemsize for v in params.values())
    bytes_accessed = 2 * B * C * HW * 4 + param_bytes

    x_flat = x.reshape(B, C, HW)
    out_flat = pl.pallas_call(
        kernel,
        out_shape=jax.ShapeDtypeStruct((B, C, HW), x.dtype),
        grid=(B,),
        in_specs=[
            pl.BlockSpec((1, C, HW), lambda b: (b, 0, 0)),        # x (lane-dense)
            pl.BlockSpec((NB, HID, C), lambda b: (0, 0, 0)),      # w1t
            pl.BlockSpec((NB, HID, 1), lambda b: (0, 0, 0)),      # b1t
            pl.BlockSpec((NB, C, HID), lambda b: (0, 0, 0)),      # w2t
            pl.BlockSpec((NB, C, 1), lambda b: (0, 0, 0)),        # b2t
            pl.BlockSpec((NB, C, C), lambda b: (0, 0, 0)),        # w1x1 (fuse conv)
            pl.BlockSpec((C, 1), lambda b: (0, 0)),               # b1x1
            pl.BlockSpec(memory_space=pltpu.MemorySpace.SMEM),    # wsp  (3, 98)
            pl.BlockSpec(memory_space=pltpu.MemorySpace.SMEM),    # spsc (3, 6)
        ],
        out_specs=pl.BlockSpec((1, C, HW), lambda b: (b, 0, 0)),
        scratch_shapes=[
            pltpu.VMEM((2, PH, PW), jnp.float32),   # zero-padded pooled map
            pltpu.VMEM((1, HW), jnp.float32),       # flattened spatial gate
        ],
        compiler_params=pltpu.CompilerParams(
            dimension_semantics=("parallel",),          # shard batch over TCs (v7x)
            vmem_limit_bytes=32 * 1024 * 1024,          # safe on v5e/v6e/v7x
        ),
        cost_estimate=pl.CostEstimate(flops=int(flops),
                                      transcendentals=int(transcendentals),
                                      bytes_accessed=int(bytes_accessed)),
    )(x_flat, params["w1t"], params["b1t"], params["w2t"], params["b2t"],
      params["w1x1"], params["b1x1"], params["wsp"], params["spsc"])
    return out_flat.reshape(B, C, H, W)


# ----------------------------------------------------------------------------
# Deterministic parameter init (shapes follow MultiCBAM.__init__ with scalar r)
# ----------------------------------------------------------------------------
def init_multicbam_params(key, channels, ksizes=(1, 3, 7), r=16):
    hid = max(channels // r, 1)     # scalar reduction ratio shared by all branches
    nb = len(ksizes)
    kmax = max(ksizes)
    keys = jax.random.split(key, 8)

    def xavier(kk, shape, fan_in, fan_out):
        std = (2.0 / (fan_in + fan_out)) ** 0.5
        return std * jax.random.normal(kk, shape, jnp.float32)

    # Channel-attention MLP, torch Linear layout (out, in).
    w1t = xavier(keys[0], (nb, hid, channels), channels, hid)
    b1b = 1.0 / (channels ** 0.5)
    b1t = jax.random.uniform(keys[1], (nb, hid, 1), jnp.float32, -b1b, b1b)
    w2t = xavier(keys[2], (nb, channels, hid), hid, channels)
    b2b = 1.0 / (hid ** 0.5)
    b2t = jax.random.uniform(keys[3], (nb, channels, 1), jnp.float32, -b2b, b2b)

    # Per-branch spatial conv (2 -> 1, KxK), flattened & zero-padded to 2*kmax^2.
    wsp = jnp.zeros((nb, 2 * kmax * kmax), jnp.float32)
    wkeys = jax.random.split(keys[4], nb)
    bkeys = jax.random.split(keys[5], nb)
    spsc_rows = []
    for i, K in enumerate(ksizes):
        n = 2 * K * K
        wsp = wsp.at[i, :n].set(xavier(wkeys[i], (n,), n, K * K))
        cb = 1.0 / (n ** 0.5)
        conv_b = float(jax.random.uniform(bkeys[i], (), jnp.float32, -cb, cb))
        # [conv_bias, bn_gamma, bn_beta, bn_running_mean, bn_running_var, eps]
        spsc_rows.append(jnp.array([conv_b, 1.0, 0.0, 0.0, 1.0, 1e-5], jnp.float32))
    spsc = jnp.stack(spsc_rows)

    # Fuse conv: nn.Conv2d(3C, C, 1) -> weight split per branch (nb, C, C), bias (C, 1).
    fan = nb * channels
    w1x1 = (1.0 / fan ** 0.5) * jax.random.normal(keys[6], (nb, channels, channels),
                                                  jnp.float32)
    cb1 = 1.0 / (fan ** 0.5)
    b1x1 = jax.random.uniform(keys[7], (channels, 1), jnp.float32, -cb1, cb1)

    return {"w1t": w1t, "b1t": b1t, "w2t": w2t, "b2t": b2t,
            "wsp": wsp, "spsc": spsc, "w1x1": w1x1, "b1x1": b1x1}


# ----------------------------------------------------------------------------
# Pure-JAX reference (correctness check only)
# ----------------------------------------------------------------------------
def multicbam_reference(x, params, ksizes=(1, 3, 7)):
    hp = jax.lax.Precision.HIGHEST
    B, C, H, W = x.shape
    avg = jnp.mean(x, axis=(2, 3))
    mx = jnp.max(x, axis=(2, 3))

    branch_outs = []
    for i, K in enumerate(ksizes):
        w1t, b1t = params["w1t"][i], params["b1t"][i][:, 0]
        w2t, b2t = params["w2t"][i], params["b2t"][i][:, 0]

        def mlp(v):
            h = jax.nn.relu(jnp.dot(v, w1t.T, precision=hp) + b1t)
            return jnp.dot(h, w2t.T, precision=hp) + b2t

        scale = jax.nn.sigmoid(mlp(avg) + mlp(mx))[:, :, None, None]
        x_ca = x * scale

        pooled = jnp.concatenate([jnp.max(x_ca, axis=1, keepdims=True),
                                  jnp.mean(x_ca, axis=1, keepdims=True)], axis=1)
        w = params["wsp"][i][:2 * K * K].reshape(1, 2, K, K)
        p = (K - 1) // 2
        conv = jax.lax.conv_general_dilated(
            pooled, w, (1, 1), ((p, p), (p, p)),
            dimension_numbers=("NCHW", "OIHW", "NCHW"), precision=hp)
        sc = params["spsc"][i]
        y = (conv + sc[0] - sc[3]) * jax.lax.rsqrt(sc[4] + sc[5]) * sc[1] + sc[2]
        branch_outs.append(x_ca * jax.nn.sigmoid(y))

    final = jnp.broadcast_to(params["b1x1"][:, 0][None, :, None, None], x.shape)
    for i in range(len(ksizes)):
        final = final + jnp.einsum("oi,bihw->bohw", params["w1x1"][i],
                                   branch_outs[i], precision=hp)
    return x + final


if __name__ == "__main__":
    B, C, H, W = 2, 16, 16, 16
    key = jax.random.PRNGKey(0)
    kx, kp = jax.random.split(key)
    x = jax.random.normal(kx, (B, C, H, W), jnp.float32)
    params = init_multicbam_params(kp, C, ksizes=(1, 3, 7), r=16)

    out = multicbam_forward(x, params)
    out = jax.block_until_ready(out)

    ref = multicbam_reference(x, params)
    assert out.shape == x.shape
    err = float(jnp.max(jnp.abs(out - ref)))
    assert err < 2e-4, f"max abs err {err}"
    print("KERNEL_OK")
</pallas_src>

<mosaic_0001>
module attributes {stable_mosaic.version = 11 : i64} {
  func.func @kernel(%arg0: i32, %arg1: memref<1x16x256xf32, #tpu.memory_space<vmem>>, %arg2: memref<3x1x16xf32, #tpu.memory_space<vmem>>, %arg3: memref<3x1x1xf32, #tpu.memory_space<vmem>>, %arg4: memref<3x16x1xf32, #tpu.memory_space<vmem>>, %arg5: memref<3x16x1xf32, #tpu.memory_space<vmem>>, %arg6: memref<3x16x16xf32, #tpu.memory_space<vmem>>, %arg7: memref<16x1xf32, #tpu.memory_space<vmem>>, %arg8: memref<3x98xf32, #tpu.memory_space<smem>>, %arg9: memref<3x6xf32, #tpu.memory_space<smem>>, %arg10: memref<1x16x256xf32, #tpu.memory_space<vmem>>, %arg11: memref<2x22x22xf32, #tpu.memory_space<vmem>>, %arg12: memref<1x256xf32, #tpu.memory_space<vmem>>) attributes {dimension_semantics = [#tpu.dimension_semantics<parallel>], iteration_bounds = array<i64: 2>, scalar_prefetch = 0 : i64, scratch_operands = 2 : i64, tpu.core_type = #tpu.core_type<tc>, window_params = [{transform_indices = @transform_0, window_bounds = array<i64: 1, 16, 256>}, {pipeline_mode = #tpu.pipeline_mode<synchronous>, transform_indices = @transform_1, window_bounds = array<i64: 3, 1, 16>}, {pipeline_mode = #tpu.pipeline_mode<synchronous>, transform_indices = @transform_2, window_bounds = array<i64: 3, 1, 1>}, {pipeline_mode = #tpu.pipeline_mode<synchronous>, transform_indices = @transform_3, window_bounds = array<i64: 3, 16, 1>}, {pipeline_mode = #tpu.pipeline_mode<synchronous>, transform_indices = @transform_4, window_bounds = array<i64: 3, 16, 1>}, {pipeline_mode = #tpu.pipeline_mode<synchronous>, transform_indices = @transform_5, window_bounds = array<i64: 3, 16, 16>}, {pipeline_mode = #tpu.pipeline_mode<synchronous>, transform_indices = @transform_6, window_bounds = array<i64: 16, 1>}, {transform_indices = @transform_7, window_bounds = array<i64: 3, 98>}, {transform_indices = @transform_8, window_bounds = array<i64: 3, 6>}, {transform_indices = @transform_9, window_bounds = array<i64: 1, 16, 256>}]} {
    %c0 = arith.constant 0 : index
    %c0_0 = arith.constant 0 : index
    %c0_1 = arith.constant 0 : index
    %0 = vector.load %arg1[%c0, %c0_0, %c0_1] : memref<1x16x256xf32, #tpu.memory_space<vmem>>, vector<1x16x256xf32>
    %1 = vector.shape_cast %0 : vector<1x16x256xf32> to vector<16x256xf32>
    %cst = arith.constant dense<0.000000e+00> : vector<16xf32>
    %2 = vector.multi_reduction <add>, %1, %cst [1] : vector<16x256xf32> to vector<16xf32>
    %3 = vector.shape_cast %2 : vector<16xf32> to vector<16x1xf32>
    %cst_2 = arith.constant 2.560000e+02 : f32
    %4 = vector.broadcast %cst_2 : f32 to vector<16x1xf32>
    %5 = arith.divf %3, %4 : vector<16x1xf32>
    %cst_3 = arith.constant dense<0xFF800000> : vector<16xf32>
    %6 = vector.multi_reduction <maximumf>, %1, %cst_3 [1] : vector<16x256xf32> to vector<16xf32>
    %7 = vector.shape_cast %6 : vector<16xf32> to vector<16x1xf32>
    %8 = tpu.concatenate %5, %7 in 1 : vector<16x1xf32>, vector<16x1xf32> -> vector<16x2xf32>
    %c0_4 = arith.constant 0 : index
    %c0_5 = arith.constant 0 : index
    %9 = vector.load %arg7[%c0_4, %c0_5] : memref<16x1xf32, #tpu.memory_space<vmem>>, vector<16x1xf32>
    %10 = vector.broadcast %9 : vector<16x1xf32> to vector<16x256xf32>
    %11 = arith.addf %1, %10 : vector<16x256xf32>
    %c0_6 = arith.constant 0 : index
    %c0_7 = arith.constant 0 : index
    %c0_8 = arith.constant 0 : index
    %12 = vector.load %arg2[%c0_6, %c0_7, %c0_8] : memref<3x1x16xf32, #tpu.memory_space<vmem>>, vector<1x1x16xf32>
    %13 = vector.shape_cast %12 : vector<1x1x16xf32> to vector<1x16xf32>
    %cst_9 = arith.constant dense<0.000000e+00> : vector<1x2xf32>
    %14 = tpu.matmul %13, %8, %cst_9 {dimension_numbers = #tpu.dot_dimension_numbers<[1], [0], [0], [1], [0, 0, 1, 1], [], []>} : vector<1x16xf32>, vector<16x2xf32>, vector<1x2xf32> -> vector<1x2xf32>
    %c0_10 = arith.constant 0 : index
    %c0_11 = arith.constant 0 : index
    %c0_12 = arith.constant 0 : index
    %15 = vector.load %arg3[%c0_10, %c0_11, %c0_12] : memref<3x1x1xf32, #tpu.memory_space<vmem>>, vector<1x1x1xf32>
    %16 = vector.shape_cast %15 : vector<1x1x1xf32> to vector<1x1xf32>
    %17 = vector.broadcast %16 : vector<1x1xf32> to vector<1x2xf32>
    %18 = arith.addf %14, %17 : vector<1x2xf32>
    %cst_13 = arith.constant 0.000000e+00 : f32
    %19 = vector.broadcast %cst_13 : f32 to vector<1x2xf32>
    %20 = arith.maximumf %18, %19 : vector<1x2xf32>
    %c0_14 = arith.constant 0 : index
    %c0_15 = arith.constant 0 : index
    %c0_16 = arith.constant 0 : index
    %21 = vector.load %arg4[%c0_14, %c0_15, %c0_16] : memref<3x16x1xf32, #tpu.memory_space<vmem>>, vector<1x16x1xf32>
    %22 = vector.shape_cast %21 : vector<1x16x1xf32> to vector<16x1xf32>
    %cst_17 = arith.constant dense<0.000000e+00> : vector<16x2xf32>
    %23 = tpu.matmul %22, %20, %cst_17 {dimension_numbers = #tpu.dot_dimension_numbers<[1], [0], [0], [1], [0, 0, 1, 1], [], []>} : vector<16x1xf32>, vector<1x2xf32>, vector<16x2xf32> -> vector<16x2xf32>
    %c0_18 = arith.constant 0 : index
    %c0_19 = arith.constant 0 : index
    %c0_20 = arith.constant 0 : index
    %24 = vector.load %arg5[%c0_18, %c0_19, %c0_20] : memref<3x16x1xf32, #tpu.memory_space<vmem>>, vector<1x16x1xf32>
    %25 = vector.shape_cast %24 : vector<1x16x1xf32> to vector<16x1xf32>
    %26 = vector.broadcast %25 : vector<16x1xf32> to vector<16x2xf32>
    %27 = arith.addf %23, %26 : vector<16x2xf32>
    %28 = vector.extract_strided_slice %27 {offsets = [0, 0], sizes = [16, 1], strides = [1, 1]} : vector<16x2xf32> to vector<16x1xf32>
    %29 = vector.extract_strided_slice %27 {offsets = [0, 1], sizes = [16, 1], strides = [1, 1]} : vector<16x2xf32> to vector<16x1xf32>
    %30 = arith.addf %28, %29 : vector<16x1xf32>
    %31 = arith.negf %30 : vector<16x1xf32>
    %32 = math.exp %31 : vector<16x1xf32>
    %cst_21 = arith.constant 1.000000e+00 : f32
    %33 = vector.broadcast %cst_21 : f32 to vector<16x1xf32>
    %34 = arith.addf %33, %32 : vector<16x1xf32>
    %35 = arith.divf %33, %34 : vector<16x1xf32>
    %36 = vector.broadcast %35 : vector<16x1xf32> to vector<16x256xf32>
    %37 = arith.mulf %1, %36 : vector<16x256xf32>
    %cst_22 = arith.constant dense<0xFF800000> : vector<256xf32>
    %38 = vector.multi_reduction <maximumf>, %37, %cst_22 [0] : vector<16x256xf32> to vector<256xf32>
    %39 = vector.shape_cast %38 : vector<256xf32> to vector<1x256xf32>
    %cst_23 = arith.constant dense<0.000000e+00> : vector<256xf32>
    %40 = vector.multi_reduction <add>, %37, %cst_23 [0] : vector<16x256xf32> to vector<256xf32>
    %41 = vector.shape_cast %40 : vector<256xf32> to vector<1x256xf32>
    %cst_24 = arith.constant 1.600000e+01 : f32
    %42 = vector.broadcast %cst_24 : f32 to vector<1x256xf32>
    %43 = arith.divf %41, %42 : vector<1x256xf32>
    %44 = tpu.concatenate %39, %43 in 0 : vector<1x256xf32>, vector<1x256xf32> -> vector<2x256xf32>
    %cst_25 = arith.constant 0.000000e+00 : f32
    %45 = vector.broadcast %cst_25 : f32 to vector<2x22x22xf32>
    %c0_26 = arith.constant 0 : index
    %c0_27 = arith.constant 0 : index
    %c0_28 = arith.constant 0 : index
    %46 = vector.load %arg11[%c0_26, %c0_27, %c0_28] : memref<2x22x22xf32, #tpu.memory_space<vmem>>, vector<2x22x22xf32>
    tpu.vector_store %arg11[%c0_26, %c0_27, %c0_28], %45 {strides = array<i32>} : memref<2x22x22xf32, #tpu.memory_space<vmem>>, vector<2x22x22xf32>,
    %47 = vector.extract_strided_slice %44 {offsets = [0, 0], sizes = [2, 16], strides = [1, 1]} : vector<2x256xf32> to vector<2x16xf32>
    %48 = vector.shape_cast %47 : vector<2x16xf32> to vector<2x1x16xf32>
    %c0_29 = arith.constant 0 : index
    %c3 = arith.constant 3 : index
    %c3_30 = arith.constant 3 : index
    %49 = vector.load %arg11[%c0_29, %c3, %c3_30] : memref<2x22x22xf32, #tpu.memory_space<vmem>>, vector<2x1x16xf32>
    tpu.vector_store %arg11[%c0_29, %c3, %c3_30], %48 {strides = array<i32>} : memref<2x22x22xf32, #tpu.memory_space<vmem>>, vector<2x1x16xf32>,
    %50 = vector.extract_strided_slice %44 {offsets = [0, 16], sizes = [2, 16], strides = [1, 1]} : vector<2x256xf32> to vector<2x16xf32>
    %51 = vector.shape_cast %50 : vector<2x16xf32> to vector<2x1x16xf32>
    %c0_31 = arith.constant 0 : index
    %c4 = arith.constant 4 : index
    %c3_32 = arith.constant 3 : index
    %52 = vector.load %arg11[%c0_31, %c4, %c3_32] : memref<2x22x22xf32, #tpu.memory_space<vmem>>, vector<2x1x16xf32>
    tpu.vector_store %arg11[%c0_31, %c4, %c3_32], %51 {strides = array<i32>} : memref<2x22x22xf32, #tpu.memory_space<vmem>>, vector<2x1x16xf32>,
    %53 = vector.extract_strided_slice %44 {offsets = [0, 32], sizes = [2, 16], strides = [1, 1]} : vector<2x256xf32> to vector<2x16xf32>
    %54 = vector.shape_cast %53 : vector<2x16xf32> to vector<2x1x16xf32>
    %c0_33 = arith.constant 0 : index
    %c5 = arith.constant 5 : index
    %c3_34 = arith.constant 3 : index
    %55 = vector.load %arg11[%c0_33, %c5, %c3_34] : memref<2x22x22xf32, #tpu.memory_space<vmem>>, vector<2x1x16xf32>
    tpu.vector_store %arg11[%c0_33, %c5, %c3_34], %54 {strides = array<i32>} : memref<2x22x22xf32, #tpu.memory_space<vmem>>, vector<2x1x16xf32>,
    %56 = vector.extract_strided_slice %44 {offsets = [0, 48], sizes = [2, 16], strides = [1, 1]} : vector<2x256xf32> to vector<2x16xf32>
    %57 = vector.shape_cast %56 : vector<2x16xf32> to vector<2x1x16xf32>
    %c0_35 = arith.constant 0 : index
    %c6 = arith.constant 6 : index
    %c3_36 = arith.constant 3 : index
    %58 = vector.load %arg11[%c0_35, %c6, %c3_36] : memref<2x22x22xf32, #tpu.memory_space<vmem>>, vector<2x1x16xf32>
    tpu.vector_store %arg11[%c0_35, %c6, %c3_36], %57 {strides = array<i32>} : memref<2x22x22xf32, #tpu.memory_space<vmem>>, vector<2x1x16xf32>,
    %59 = vector.extract_strided_slice %44 {offsets = [0, 64], sizes = [2, 16], strides = [1, 1]} : vector<2x256xf32> to vector<2x16xf32>
    %60 = vector.shape_cast %59 : vector<2x16xf32> to vector<2x1x16xf32>
    %c0_37 = arith.constant 0 : index
    %c7 = arith.constant 7 : index
    %c3_38 = arith.constant 3 : index
    %61 = vector.load %arg11[%c0_37, %c7, %c3_38] : memref<2x22x22xf32, #tpu.memory_space<vmem>>, vector<2x1x16xf32>
    tpu.vector_store %arg11[%c0_37, %c7, %c3_38], %60 {strides = array<i32>} : memref<2x22x22xf32, #tpu.memory_space<vmem>>, vector<2x1x16xf32>,
    %62 = vector.extract_strided_slice %44 {offsets = [0, 80], sizes = [2, 16], strides = [1, 1]} : vector<2x256xf32> to vector<2x16xf32>
    %63 = vector.shape_cast %62 : vector<2x16xf32> to vector<2x1x16xf32>
    %c0_39 = arith.constant 0 : index
    %c8 = arith.constant 8 : index
    %c3_40 = arith.constant 3 : index
    %64 = vector.load %arg11[%c0_39, %c8, %c3_40] : memref<2x22x22xf32, #tpu.memory_space<vmem>>, vector<2x1x16xf32>
    tpu.vector_store %arg11[%c0_39, %c8, %c3_40], %63 {strides = array<i32>} : memref<2x22x22xf32, #tpu.memory_space<vmem>>, vector<2x1x16xf32>,
    %65 = vector.extract_strided_slice %44 {offsets = [0, 96], sizes = [2, 16], strides = [1, 1]} : vector<2x256xf32> to vector<2x16xf32>
    %66 = vector.shape_cast %65 : vector<2x16xf32> to vector<2x1x16xf32>
    %c0_41 = arith.constant 0 : index
    %c9 = arith.constant 9 : index
    %c3_42 = arith.constant 3 : index
    %67 = vector.load %arg11[%c0_41, %c9, %c3_42] : memref<2x22x22xf32, #tpu.memory_space<vmem>>, vector<2x1x16xf32>
    tpu.vector_store %arg11[%c0_41, %c9, %c3_42], %66 {strides = array<i32>} : memref<2x22x22xf32, #tpu.memory_space<vmem>>, vector<2x1x16xf32>,
    %68 = vector.extract_strided_slice %44 {offsets = [0, 112], sizes = [2, 16], strides = [1, 1]} : vector<2x256xf32> to vector<2x16xf32>
    %69 = vector.shape_cast %68 : vector<2x16xf32> to vector<2x1x16xf32>
    %c0_43 = arith.constant 0 : index
    %c10 = arith.constant 10 : index
    %c3_44 = arith.constant 3 : index
    %70 = vector.load %arg11[%c0_43, %c10, %c3_44] : memref<2x22x22xf32, #tpu.memory_space<vmem>>, vector<2x1x16xf32>
    tpu.vector_store %arg11[%c0_43, %c10, %c3_44], %69 {strides = array<i32>} : memref<2x22x22xf32, #tpu.memory_space<vmem>>, vector<2x1x16xf32>,
    %71 = vector.extract_strided_slice %44 {offsets = [0, 128], sizes = [2, 16], strides = [1, 1]} : vector<2x256xf32> to vector<2x16xf32>
    %72 = vector.shape_cast %71 : vector<2x16xf32> to vector<2x1x16xf32>
    %c0_45 = arith.constant 0 : index
    %c11 = arith.constant 11 : index
    %c3_46 = arith.constant 3 : index
    %73 = vector.load %arg11[%c0_45, %c11, %c3_46] : memref<2x22x22xf32, #tpu.memory_space<vmem>>, vector<2x1x16xf32>
    tpu.vector_store %arg11[%c0_45, %c11, %c3_46], %72 {strides = array<i32>} : memref<2x22x22xf32, #tpu.memory_space<vmem>>, vector<2x1x16xf32>,
    %74 = vector.extract_strided_slice %44 {offsets = [0, 144], sizes = [2, 16], strides = [1, 1]} : vector<2x256xf32> to vector<2x16xf32>
    %75 = vector.shape_cast %74 : vector<2x16xf32> to vector<2x1x16xf32>
    %c0_47 = arith.constant 0 : index
    %c12 = arith.constant 12 : index
    %c3_48 = arith.constant 3 : index
    %76 = vector.load %arg11[%c0_47, %c12, %c3_48] : memref<2x22x22xf32, #tpu.memory_space<vmem>>, vector<2x1x16xf32>
    tpu.vector_store %arg11[%c0_47, %c12, %c3_48], %75 {strides = array<i32>} : memref<2x22x22xf32, #tpu.memory_space<vmem>>, vector<2x1x16xf32>,
    %77 = vector.extract_strided_slice %44 {offsets = [0, 160], sizes = [2, 16], strides = [1, 1]} : vector<2x256xf32> to vector<2x16xf32>
    %78 = vector.shape_cast %77 : vector<2x16xf32> to vector<2x1x16xf32>
    %c0_49 = arith.constant 0 : index
    %c13 = arith.constant 13 : index
    %c3_50 = arith.constant 3 : index
    %79 = vector.load %arg11[%c0_49, %c13, %c3_50] : memref<2x22x22xf32, #tpu.memory_space<vmem>>, vector<2x1x16xf32>
    tpu.vector_store %arg11[%c0_49, %c13, %c3_50], %78 {strides = array<i32>} : memref<2x22x22xf32, #tpu.memory_space<vmem>>, vector<2x1x16xf32>,
    %80 = vector.extract_strided_slice %44 {offsets = [0, 176], sizes = [2, 16], strides = [1, 1]} : vector<2x256xf32> to vector<2x16xf32>
    %81 = vector.shape_cast %80 : vector<2x16xf32> to vector<2x1x16xf32>
    %c0_51 = arith.constant 0 : index
    %c14 = arith.constant 14 : index
    %c3_52 = arith.constant 3 : index
    %82 = vector.load %arg11[%c0_51, %c14, %c3_52] : memref<2x22x22xf32, #tpu.memory_space<vmem>>, vector<2x1x16xf32>
    tpu.vector_store %arg11[%c0_51, %c14, %c3_52], %81 {strides = array<i32>} : memref<2x22x22xf32, #tpu.memory_space<vmem>>, vector<2x1x16xf32>,
    %83 = vector.extract_strided_slice %44 {offsets = [0, 192], sizes = [2, 16], strides = [1, 1]} : vector<2x256xf32> to vector<2x16xf32>
    %84 = vector.shape_cast %83 : vector<2x16xf32> to vector<2x1x16xf32>
    %c0_53 = arith.constant 0 : index
    %c15 = arith.constant 15 : index
    %c3_54 = arith.constant 3 : index
    %85 = vector.load %arg11[%c0_53, %c15, %c3_54] : memref<2x22x22xf32, #tpu.memory_space<vmem>>, vector<2x1x16xf32>
    tpu.vector_store %arg11[%c0_53, %c15, %c3_54], %84 {strides = array<i32>} : memref<2x22x22xf32, #tpu.memory_space<vmem>>, vector<2x1x16xf32>,
    %86 = vector.extract_strided_slice %44 {offsets = [0, 208], sizes = [2, 16], strides = [1, 1]} : vector<2x256xf32> to vector<2x16xf32>
    %87 = vector.shape_cast %86 : vector<2x16xf32> to vector<2x1x16xf32>
    %c0_55 = arith.constant 0 : index
    %c16 = arith.constant 16 : index
    %c3_56 = arith.constant 3 : index
    %88 = vector.load %arg11[%c0_55, %c16, %c3_56] : memref<2x22x22xf32, #tpu.memory_space<vmem>>, vector<2x1x16xf32>
    tpu.vector_store %arg11[%c0_55, %c16, %c3_56], %87 {strides = array<i32>} : memref<2x22x22xf32, #tpu.memory_space<vmem>>, vector<2x1x16xf32>,
    %89 = vector.extract_strided_slice %44 {offsets = [0, 224], sizes = [2, 16], strides = [1, 1]} : vector<2x256xf32> to vector<2x16xf32>
    %90 = vector.shape_cast %89 : vector<2x16xf32> to vector<2x1x16xf32>
    %c0_57 = arith.constant 0 : index
    %c17 = arith.constant 17 : index
    %c3_58 = arith.constant 3 : index
    %91 = vector.load %arg11[%c0_57, %c17, %c3_58] : memref<2x22x22xf32, #tpu.memory_space<vmem>>, vector<2x1x16xf32>
    tpu.vector_store %arg11[%c0_57, %c17, %c3_58], %90 {strides = array<i32>} : memref<2x22x22xf32, #tpu.memory_space<vmem>>, vector<2x1x16xf32>,
    %92 = vector.extract_strided_slice %44 {offsets = [0, 240], sizes = [2, 16], strides = [1, 1]} : vector<2x256xf32> to vector<2x16xf32>
    %93 = vector.shape_cast %92 : vector<2x16xf32> to vector<2x1x16xf32>
    %c0_59 = arith.constant 0 : index
    %c18 = arith.constant 18 : index
    %c3_60 = arith.constant 3 : index
    %94 = vector.load %arg11[%c0_59, %c18, %c3_60] : memref<2x22x22xf32, #tpu.memory_space<vmem>>, vector<2x1x16xf32>
    tpu.vector_store %arg11[%c0_59, %c18, %c3_60], %93 {strides = array<i32>} : memref<2x22x22xf32, #tpu.memory_space<vmem>>, vector<2x1x16xf32>,
    %cst_61 = arith.constant 0.000000e+00 : f32
    %95 = vector.broadcast %cst_61 : f32 to vector<16x16xf32>
    %c0_62 = arith.constant 0 : index
    %c0_63 = arith.constant 0 : index
    %96 = memref.load %arg9[%c0_62, %c0_63] : memref<3x6xf32, #tpu.memory_space<smem>>
    %97 = vector.broadcast %96 : f32 to vector<16x16xf32>
    %98 = arith.addf %95, %97 : vector<16x16xf32>
    %c0_64 = arith.constant 0 : index
    %c0_65 = arith.constant 0 : index
    %c3_66 = arith.constant 3 : index
    %99 = vector.load %arg11[%c0_64, %c0_65, %c3_66] : memref<2x22x22xf32, #tpu.memory_space<vmem>>, vector<1x22x16xf32>
    %100 = vector.shape_cast %99 : vector<1x22x16xf32> to vector<22x16xf32>
    %c0_67 = arith.constant 0 : index
    %c0_68 = arith.constant 0 : index
    %101 = memref.load %arg8[%c0_67, %c0_68] : memref<3x98xf32, #tpu.memory_space<smem>>
    %102 = vector.extract_strided_slice %100 {offsets = [3, 0], sizes = [16, 16], strides = [1, 1]} : vector<22x16xf32> to vector<16x16xf32>
    %103 = vector.broadcast %101 : f32 to vector<16x16xf32>
    %104 = arith.mulf %102, %103 : vector<16x16xf32>
    %105 = arith.addf %98, %104 : vector<16x16xf32>
    %c1 = arith.constant 1 : index
    %c0_69 = arith.constant 0 : index
    %c3_70 = arith.constant 3 : index
    %106 = vector.load %arg11[%c1, %c0_69, %c3_70] : memref<2x22x22xf32, #tpu.memory_space<vmem>>, vector<1x22x16xf32>
    %107 = vector.shape_cast %106 : vector<1x22x16xf32> to vector<22x16xf32>
    %c0_71 = arith.constant 0 : index
    %c1_72 = arith.constant 1 : index
    %108 = memref.load %arg8[%c0_71, %c1_72] : memref<3x98xf32, #tpu.memory_space<smem>>
    %109 = vector.extract_strided_slice %107 {offsets = [3, 0], sizes = [16, 16], strides = [1, 1]} : vector<22x16xf32> to vector<16x16xf32>
    %110 = vector.broadcast %108 : f32 to vector<16x16xf32>
    %111 = arith.mulf %109, %110 : vector<16x16xf32>
    %112 = arith.addf %105, %111 : vector<16x16xf32>
    %c0_73 = arith.constant 0 : index
    %c1_74 = arith.constant 1 : index
    %113 = memref.load %arg9[%c0_73, %c1_74] : memref<3x6xf32, #tpu.memory_space<smem>>
    %c0_75 = arith.constant 0 : index
    %c2 = arith.constant 2 : index
    %114 = memref.load %arg9[%c0_75, %c2] : memref<3x6xf32, #tpu.memory_space<smem>>
    %c0_76 = arith.constant 0 : index
    %c3_77 = arith.constant 3 : index
    %115 = memref.load %arg9[%c0_76, %c3_77] : memref<3x6xf32, #tpu.memory_space<smem>>
    %c0_78 = arith.constant 0 : index
    %c4_79 = arith.constant 4 : index
    %116 = memref.load %arg9[%c0_78, %c4_79] : memref<3x6xf32, #tpu.memory_space<smem>>
    %c0_80 = arith.constant 0 : index
    %c5_81 = arith.constant 5 : index
    %117 = memref.load %arg9[%c0_80, %c5_81] : memref<3x6xf32, #tpu.memory_space<smem>>
    %118 = vector.broadcast %115 : f32 to vector<16x16xf32>
    %119 = arith.subf %112, %118 : vector<16x16xf32>
    %120 = arith.addf %116, %117 : f32
    %121 = math.rsqrt %120 : f32
    %122 = vector.broadcast %121 : f32 to vector<16x16xf32>
    %123 = arith.mulf %119, %122 : vector<16x16xf32>
    %124 = vector.broadcast %113 : f32 to vector<16x16xf32>
    %125 = arith.mulf %123, %124 : vector<16x16xf32>
    %126 = vector.broadcast %114 : f32 to vector<16x16xf32>
    %127 = arith.addf %125, %126 : vector<16x16xf32>
    %128 = arith.negf %127 : vector<16x16xf32>
    %129 = math.exp %128 : vector<16x16xf32>
    %cst_82 = arith.constant 1.000000e+00 : f32
    %130 = vector.broadcast %cst_82 : f32 to vector<16x16xf32>
    %131 = arith.addf %130, %129 : vector<16x16xf32>
    %132 = arith.divf %130, %131 : vector<16x16xf32>
    %133 = vector.extract_strided_slice %132 {offsets = [0, 0], sizes = [1, 16], strides = [1, 1]} : vector<16x16xf32> to vector<1x16xf32>
    %c0_83 = arith.constant 0 : index
    %c0_84 = arith.constant 0 : index
    %134 = vector.load %arg12[%c0_83, %c0_84] : memref<1x256xf32, #tpu.memory_space<vmem>>, vector<1x16xf32>
    tpu.vector_store %arg12[%c0_83, %c0_84], %133 {strides = array<i32>} : memref<1x256xf32, #tpu.memory_space<vmem>>, vector<1x16xf32>,
    %135 = vector.extract_strided_slice %132 {offsets = [1, 0], sizes = [1, 16], strides = [1, 1]} : vector<16x16xf32> to vector<1x16xf32>
    %c0_85 = arith.constant 0 : index
    %c16_86 = arith.constant 16 : index
    %136 = vector.load %arg12[%c0_85, %c16_86] : memref<1x256xf32, #tpu.memory_space<vmem>>, vector<1x16xf32>
    tpu.vector_store %arg12[%c0_85, %c16_86], %135 {strides = array<i32>} : memref<1x256xf32, #tpu.memory_space<vmem>>, vector<1x16xf32>,
    %137 = vector.extract_strided_slice %132 {offsets = [2, 0], sizes = [1, 16], strides = [1, 1]} : vector<16x16xf32> to vector<1x16xf32>
    %c0_87 = arith.constant 0 : index
    %c32 = arith.constant 32 : index
    %138 = vector.load %arg12[%c0_87, %c32] : memref<1x256xf32, #tpu.memory_space<vmem>>, vector<1x16xf32>
    tpu.vector_store %arg12[%c0_87, %c32], %137 {strides = array<i32>} : memref<1x256xf32, #tpu.memory_space<vmem>>, vector<1x16xf32>,
    %139 = vector.extract_strided_slice %132 {offsets = [3, 0], sizes = [1, 16], strides = [1, 1]} : vector<16x16xf32> to vector<1x16xf32>
    %c0_88 = arith.constant 0 : index
    %c48 = arith.constant 48 : index
    %140 = vector.load %arg12[%c0_88, %c48] : memref<1x256xf32, #tpu.memory_space<vmem>>, vector<1x16xf32>
    tpu.vector_store %arg12[%c0_88, %c48], %139 {strides = array<i32>} : memref<1x256xf32, #tpu.memory_space<vmem>>, vector<1x16xf32>,
    %141 = vector.extract_strided_slice %132 {offsets = [4, 0], sizes = [1, 16], strides = [1, 1]} : vector<16x16xf32> to vector<1x16xf32>
    %c0_89 = arith.constant 0 : index
    %c64 = arith.constant 64 : index
    %142 = vector.load %arg12[%c0_89, %c64] : memref<1x256xf32, #tpu.memory_space<vmem>>, vector<1x16xf32>
    tpu.vector_store %arg12[%c0_89, %c64], %141 {strides = array<i32>} : memref<1x256xf32, #tpu.memory_space<vmem>>, vector<1x16xf32>,
    %143 = vector.extract_strided_slice %132 {offsets = [5, 0], sizes = [1, 16], strides = [1, 1]} : vector<16x16xf32> to vector<1x16xf32>
    %c0_90 = arith.constant 0 : index
    %c80 = arith.constant 80 : index
    %144 = vector.load %arg12[%c0_90, %c80] : memref<1x256xf32, #tpu.memory_space<vmem>>, vector<1x16xf32>
    tpu.vector_store %arg12[%c0_90, %c80], %143 {strides = array<i32>} : memref<1x256xf32, #tpu.memory_space<vmem>>, vector<1x16xf32>,
    %145 = vector.extract_strided_slice %132 {offsets = [6, 0], sizes = [1, 16], strides = [1, 1]} : vector<16x16xf32> to vector<1x16xf32>
    %c0_91 = arith.constant 0 : index
    %c96 = arith.constant 96 : index
    %146 = vector.load %arg12[%c0_91, %c96] : memref<1x256xf32, #tpu.memory_space<vmem>>, vector<1x16xf32>
    tpu.vector_store %arg12[%c0_91, %c96], %145 {strides = array<i32>} : memref<1x256xf32, #tpu.memory_space<vmem>>, vector<1x16xf32>,
    %147 = vector.extract_strided_slice %132 {offsets = [7, 0], sizes = [1, 16], strides = [1, 1]} : vector<16x16xf32> to vector<1x16xf32>
    %c0_92 = arith.constant 0 : index
    %c112 = arith.constant 112 : index
    %148 = vector.load %arg12[%c0_92, %c112] : memref<1x256xf32, #tpu.memory_space<vmem>>, vector<1x16xf32>
    tpu.vector_store %arg12[%c0_92, %c112], %147 {strides = array<i32>} : memref<1x256xf32, #tpu.memory_space<vmem>>, vector<1x16xf32>,
    %149 = vector.extract_strided_slice %132 {offsets = [8, 0], sizes = [1, 16], strides = [1, 1]} : vector<16x16xf32> to vector<1x16xf32>
    %c0_93 = arith.constant 0 : index
    %c128 = arith.constant 128 : index
    %150 = vector.load %arg12[%c0_93, %c128] : memref<1x256xf32, #tpu.memory_space<vmem>>, vector<1x16xf32>
    tpu.vector_store %arg12[%c0_93, %c128], %149 {strides = array<i32>} : memref<1x256xf32, #tpu.memory_space<vmem>>, vector<1x16xf32>,
    %151 = vector.extract_strided_slice %132 {offsets = [9, 0], sizes = [1, 16], strides = [1, 1]} : vector<16x16xf32> to vector<1x16xf32>
    %c0_94 = arith.constant 0 : index
    %c144 = arith.constant 144 : index
    %152 = vector.load %arg12[%c0_94, %c144] : memref<1x256xf32, #tpu.memory_space<vmem>>, vector<1x16xf32>
    tpu.vector_store %arg12[%c0_94, %c144], %151 {strides = array<i32>} : memref<1x256xf32, #tpu.memory_space<vmem>>, vector<1x16xf32>,
    %153 = vector.extract_strided_slice %132 {offsets = [10, 0], sizes = [1, 16], strides = [1, 1]} : vector<16x16xf32> to vector<1x16xf32>
    %c0_95 = arith.constant 0 : index
    %c160 = arith.constant 160 : index
    %154 = vector.load %arg12[%c0_95, %c160] : memref<1x256xf32, #tpu.memory_space<vmem>>, vector<1x16xf32>
    tpu.vector_store %arg12[%c0_95, %c160], %153 {strides = array<i32>} : memref<1x256xf32, #tpu.memory_space<vmem>>, vector<1x16xf32>,
    %155 = vector.extract_strided_slice %132 {offsets = [11, 0], sizes = [1, 16], strides = [1, 1]} : vector<16x16xf32> to vector<1x16xf32>
    %c0_96 = arith.constant 0 : index
    %c176 = arith.constant 176 : index
    %156 = vector.load %arg12[%c0_96, %c176] : memref<1x256xf32, #tpu.memory_space<vmem>>, vector<1x16xf32>
    tpu.vector_store %arg12[%c0_96, %c176], %155 {strides = array<i32>} : memref<1x256xf32, #tpu.memory_space<vmem>>, vector<1x16xf32>,
    %157 = vector.extract_strided_slice %132 {offsets = [12, 0], sizes = [1, 16], strides = [1, 1]} : vector<16x16xf32> to vector<1x16xf32>
    %c0_97 = arith.constant 0 : index
    %c192 = arith.constant 192 : index
    %158 = vector.load %arg12[%c0_97, %c192] : memref<1x256xf32, #tpu.memory_space<vmem>>, vector<1x16xf32>
    tpu.vector_store %arg12[%c0_97, %c192], %157 {strides = array<i32>} : memref<1x256xf32, #tpu.memory_space<vmem>>, vector<1x16xf32>,
    %159 = vector.extract_strided_slice %132 {offsets = [13, 0], sizes = [1, 16], strides = [1, 1]} : vector<16x16xf32> to vector<1x16xf32>
    %c0_98 = arith.constant 0 : index
    %c208 = arith.constant 208 : index
    %160 = vector.load %arg12[%c0_98, %c208] : memref<1x256xf32, #tpu.memory_space<vmem>>, vector<1x16xf32>
    tpu.vector_store %arg12[%c0_98, %c208], %159 {strides = array<i32>} : memref<1x256xf32, #tpu.memory_space<vmem>>, vector<1x16xf32>,
    %161 = vector.extract_strided_slice %132 {offsets = [14, 0], sizes = [1, 16], strides = [1, 1]} : vector<16x16xf32> to vector<1x16xf32>
    %c0_99 = arith.constant 0 : index
    %c224 = arith.constant 224 : index
    %162 = vector.load %arg12[%c0_99, %c224] : memref<1x256xf32, #tpu.memory_space<vmem>>, vector<1x16xf32>
    tpu.vector_store %arg12[%c0_99, %c224], %161 {strides = array<i32>} : memref<1x256xf32, #tpu.memory_space<vmem>>, vector<1x16xf32>,
    %163 = vector.extract_strided_slice %132 {offsets = [15, 0], sizes = [1, 16], strides = [1, 1]} : vector<16x16xf32> to vector<1x16xf32>
    %c0_100 = arith.constant 0 : index
    %c240 = arith.constant 240 : index
    %164 = vector.load %arg12[%c0_100, %c240] : memref<1x256xf32, #tpu.memory_space<vmem>>, vector<1x16xf32>
    tpu.vector_store %arg12[%c0_100, %c240], %163 {strides = array<i32>} : memref<1x256xf32, #tpu.memory_space<vmem>>, vector<1x16xf32>,
    %c0_101 = arith.constant 0 : index
    %c0_102 = arith.constant 0 : index
    %165 = vector.load %arg12[%c0_101, %c0_102] : memref<1x256xf32, #tpu.memory_space<vmem>>, vector<1x256xf32>
    %166 = vector.broadcast %165 : vector<1x256xf32> to vector<16x256xf32>
    %167 = arith.mulf %37, %166 : vector<16x256xf32>
    %c0_103 = arith.constant 0 : index
    %c0_104 = arith.constant 0 : index
    %c0_105 = arith.constant 0 : index
    %168 = vector.load %arg6[%c0_103, %c0_104, %c0_105] : memref<3x16x16xf32, #tpu.memory_space<vmem>>, vector<1x16x16xf32>
    %169 = vector.shape_cast %168 : vector<1x16x16xf32> to vector<16x16xf32>
    %cst_106 = arith.constant dense<0.000000e+00> : vector<16x256xf32>
    %170 = tpu.matmul %169, %167, %cst_106 {dimension_numbers = #tpu.dot_dimension_numbers<[1], [0], [0], [1], [0, 0, 1, 1], [], []>} : vector<16x16xf32>, vector<16x256xf32>, vector<16x256xf32> -> vector<16x256xf32>
    %171 = arith.addf %11, %170 : vector<16x256xf32>
    %c1_107 = arith.constant 1 : index
    %c0_108 = arith.constant 0 : index
    %c0_109 = arith.constant 0 : index
    %172 = vector.load %arg2[%c1_107, %c0_108, %c0_109] : memref<3x1x16xf32, #tpu.memory_space<vmem>>, vector<1x1x16xf32>
    %173 = vector.shape_cast %172 : vector<1x1x16xf32> to vector<1x16xf32>
    %cst_110 = arith.constant dense<0.000000e+00> : vector<1x2xf32>
    %174 = tpu.matmul %173, %8, %cst_110 {dimension_numbers = #tpu.dot_dimension_numbers<[1], [0], [0], [1], [0, 0, 1, 1], [], []>} : vector<1x16xf32>, vector<16x2xf32>, vector<1x2xf32> -> vector<1x2xf32>
    %c1_111 = arith.constant 1 : index
    %c0_112 = arith.constant 0 : index
    %c0_113 = arith.constant 0 : index
    %175 = vector.load %arg3[%c1_111, %c0_112, %c0_113] : memref<3x1x1xf32, #tpu.memory_space<vmem>>, vector<1x1x1xf32>
    %176 = vector.shape_cast %175 : vector<1x1x1xf32> to vector<1x1xf32>
    %177 = vector.broadcast %176 : vector<1x1xf32> to vector<1x2xf32>
    %178 = arith.addf %174, %177 : vector<1x2xf32>
    %cst_114 = arith.constant 0.000000e+00 : f32
    %179 = vector.broadcast %cst_114 : f32 to vector<1x2xf32>
    %180 = arith.maximumf %178, %179 : vector<1x2xf32>
    %c1_115 = arith.constant 1 : index
    %c0_116 = arith.constant 0 : index
    %c0_117 = arith.constant 0 : index
    %181 = vector.load %arg4[%c1_115, %c0_116, %c0_117] : memref<3x16x1xf32, #tpu.memory_space<vmem>>, vector<1x16x1xf32>
    %182 = vector.shape_cast %181 : vector<1x16x1xf32> to vector<16x1xf32>
    %cst_118 = arith.constant dense<0.000000e+00> : vector<16x2xf32>
    %183 = tpu.matmul %182, %180, %cst_118 {dimension_numbers = #tpu.dot_dimension_numbers<[1], [0], [0], [1], [0, 0, 1, 1], [], []>} : vector<16x1xf32>, vector<1x2xf32>, vector<16x2xf32> -> vector<16x2xf32>
    %c1_119 = arith.constant 1 : index
    %c0_120 = arith.constant 0 : index
    %c0_121 = arith.constant 0 : index
    %184 = vector.load %arg5[%c1_119, %c0_120, %c0_121] : memref<3x16x1xf32, #tpu.memory_space<vmem>>, vector<1x16x1xf32>
    %185 = vector.shape_cast %184 : vector<1x16x1xf32> to vector<16x1xf32>
    %186 = vector.broadcast %185 : vector<16x1xf32> to vector<16x2xf32>
    %187 = arith.addf %183, %186 : vector<16x2xf32>
    %188 = vector.extract_strided_slice %187 {offsets = [0, 0], sizes = [16, 1], strides = [1, 1]} : vector<16x2xf32> to vector<16x1xf32>
    %189 = vector.extract_strided_slice %187 {offsets = [0, 1], sizes = [16, 1], strides = [1, 1]} : vector<16x2xf32> to vector<16x1xf32>
    %190 = arith.addf %188, %189 : vector<16x1xf32>
    %191 = arith.negf %190 : vector<16x1xf32>
    %192 = math.exp %191 : vector<16x1xf32>
    %cst_122 = arith.constant 1.000000e+00 : f32
    %193 = vector.broadcast %cst_122 : f32 to vector<16x1xf32>
    %194 = arith.addf %193, %192 : vector<16x1xf32>
    %195 = arith.divf %193, %194 : vector<16x1xf32>
    %196 = vector.broadcast %195 : vector<16x1xf32> to vector<16x256xf32>
    %197 = arith.mulf %1, %196 : vector<16x256xf32>
    %cst_123 = arith.constant dense<0xFF800000> : vector<256xf32>
    %198 = vector.multi_reduction <maximumf>, %197, %cst_123 [0] : vector<16x256xf32> to vector<256xf32>
    %199 = vector.shape_cast %198 : vector<256xf32> to vector<1x256xf32>
    %cst_124 = arith.constant dense<0.000000e+00> : vector<256xf32>
    %200 = vector.multi_reduction <add>, %197, %cst_124 [0] : vector<16x256xf32> to vector<256xf32>
    %201 = vector.shape_cast %200 : vector<256xf32> to vector<1x256xf32>
    %cst_125 = arith.constant 1.600000e+01 : f32
    %202 = vector.broadcast %cst_125 : f32 to vector<1x256xf32>
    %203 = arith.divf %201, %202 : vector<1x256xf32>
    %204 = tpu.concatenate %199, %203 in 0 : vector<1x256xf32>, vector<1x256xf32> -> vector<2x256xf32>
    %cst_126 = arith.constant 0.000000e+00 : f32
    %205 = vector.broadcast %cst_126 : f32 to vector<2x22x22xf32>
    %c0_127 = arith.constant 0 : index
    %c0_128 = arith.constant 0 : index
    %c0_129 = arith.constant 0 : index
    %206 = vector.load %arg11[%c0_127, %c0_128, %c0_129] : memref<2x22x22xf32, #tpu.memory_space<vmem>>, vector<2x22x22xf32>
    tpu.vector_store %arg11[%c0_127, %c0_128, %c0_129], %205 {strides = array<i32>} : memref<2x22x22xf32, #tpu.memory_space<vmem>>, vector<2x22x22xf32>,
    %207 = vector.extract_strided_slice %204 {offsets = [0, 0], sizes = [2, 16], strides = [1, 1]} : vector<2x256xf32> to vector<2x16xf32>
    %208 = vector.shape_cast %207 : vector<2x16xf32> to vector<2x1x16xf32>
    %c0_130 = arith.constant 0 : index
    %c3_131 = arith.constant 3 : index
    %c3_132 = arith.constant 3 : index
    %209 = vector.load %arg11[%c0_130, %c3_131, %c3_132] : memref<2x22x22xf32, #tpu.memory_space<vmem>>, vector<2x1x16xf32>
    tpu.vector_store %arg11[%c0_130, %c3_131, %c3_132], %208 {strides = array<i32>} : memref<2x22x22xf32, #tpu.memory_space<vmem>>, vector<2x1x16xf32>,
    %210 = vector.extract_strided_slice %204 {offsets = [0, 16], sizes = [2, 16], strides = [1, 1]} : vector<2x256xf32> to vector<2x16xf32>
    %211 = vector.shape_cast %210 : vector<2x16xf32> to vector<2x1x16xf32>
    %c0_133 = arith.constant 0 : index
    %c4_134 = arith.constant 4 : index
    %c3_135 = arith.constant 3 : index
    %212 = vector.load %arg11[%c0_133, %c4_134, %c3_135] : memref<2x22x22xf32, #tpu.memory_space<vmem>>, vector<2x1x16xf32>
    tpu.vector_store %arg11[%c0_133, %c4_134, %c3_135], %211 {strides = array<i32>} : memref<2x22x22xf32, #tpu.memory_space<vmem>>, vector<2x1x16xf32>,
    %213 = vector.extract_strided_slice %204 {offsets = [0, 32], sizes = [2, 16], strides = [1, 1]} : vector<2x256xf32> to vector<2x16xf32>
    %214 = vector.shape_cast %213 : vector<2x16xf32> to vector<2x1x16xf32>
    %c0_136 = arith.constant 0 : index
    %c5_137 = arith.constant 5 : index
    %c3_138 = arith.constant 3 : index
    %215 = vector.load %arg11[%c0_136, %c5_137, %c3_138] : memref<2x22x22xf32, #tpu.memory_space<vmem>>, vector<2x1x16xf32>
    tpu.vector_store %arg11[%c0_136, %c5_137, %c3_138], %214 {strides = array<i32>} : memref<2x22x22xf32, #tpu.memory_space<vmem>>, vector<2x1x16xf32>,
    %216 = vector.extract_strided_slice %204 {offsets = [0, 48], sizes = [2, 16], strides = [1, 1]} : vector<2x256xf32> to vector<2x16xf32>
    %217 = vector.shape_cast %216 : vector<2x16xf32> to vector<2x1x16xf32>
    %c0_139 = arith.constant 0 : index
    %c6_140 = arith.constant 6 : index
    %c3_141 = arith.constant 3 : index
    %218 = vector.load %arg11[%c0_139, %c6_140, %c3_141] : memref<2x22x22xf32, #tpu.memory_space<vmem>>, vector<2x1x16xf32>
    tpu.vector_store %arg11[%c0_139, %c6_140, %c3_141], %217 {strides = array<i32>} : memref<2x22x22xf32, #tpu.memory_space<vmem>>, vector<2x1x16xf32>,
    %219 = vector.extract_strided_slice %204 {offsets = [0, 64], sizes = [2, 16], strides = [1, 1]} : vector<2x256xf32> to vector<2x16xf32>
    %220 = vector.shape_cast %219 : vector<2x16xf32> to vector<2x1x16xf32>
    %c0_142 = arith.constant 0 : index
    %c7_143 = arith.constant 7 : index
    %c3_144 = arith.constant 3 : index
    %221 = vector.load %arg11[%c0_142, %c7_143, %c3_144] : memref<2x22x22xf32, #tpu.memory_space<vmem>>, vector<2x1x16xf32>
    tpu.vector_store %arg11[%c0_142, %c7_143, %c3_144], %220 {strides = array<i32>} : memref<2x22x22xf32, #tpu.memory_space<vmem>>, vector<2x1x16xf32>,
    %222 = vector.extract_strided_slice %204 {offsets = [0, 80], sizes = [2, 16], strides = [1, 1]} : vector<2x256xf32> to vector<2x16xf32>
    %223 = vector.shape_cast %222 : vector<2x16xf32> to vector<2x1x16xf32>
    %c0_145 = arith.constant 0 : index
    %c8_146 = arith.constant 8 : index
    %c3_147 = arith.constant 3 : index
    %224 = vector.load %arg11[%c0_145, %c8_146, %c3_147] : memref<2x22x22xf32, #tpu.memory_space<vmem>>, vector<2x1x16xf32>
    tpu.vector_store %arg11[%c0_145, %c8_146, %c3_147], %223 {strides = array<i32>} : memref<2x22x22xf32, #tpu.memory_space<vmem>>, vector<2x1x16xf32>,
    %225 = vector.extract_strided_slice %204 {offsets = [0, 96], sizes = [2, 16], strides = [1, 1]} : vector<2x256xf32> to vector<2x16xf32>
    %226 = vector.shape_cast %225 : vector<2x16xf32> to vector<2x1x16xf32>
    %c0_148 = arith.constant 0 : index
    %c9_149 = arith.constant 9 : index
    %c3_150 = arith.constant 3 : index
    %227 = vector.load %arg11[%c0_148, %c9_149, %c3_150] : memref<2x22x22xf32, #tpu.memory_space<vmem>>, vector<2x1x16xf32>
    tpu.vector_store %arg11[%c0_148, %c9_149, %c3_150], %226 {strides = array<i32>} : memref<2x22x22xf32, #tpu.memory_space<vmem>>, vector<2x1x16xf32>,
    %228 = vector.extract_strided_slice %204 {offsets = [0, 112], sizes = [2, 16], strides = [1, 1]} : vector<2x256xf32> to vector<2x16xf32>
    %229 = vector.shape_cast %228 : vector<2x16xf32> to vector<2x1x16xf32>
    %c0_151 = arith.constant 0 : index
    %c10_152 = arith.constant 10 : index
    %c3_153 = arith.constant 3 : index
    %230 = vector.load %arg11[%c0_151, %c10_152, %c3_153] : memref<2x22x22xf32, #tpu.memory_space<vmem>>, vector<2x1x16xf32>
    tpu.vector_store %arg11[%c0_151, %c10_152, %c3_153], %229 {strides = array<i32>} : memref<2x22x22xf32, #tpu.memory_space<vmem>>, vector<2x1x16xf32>,
    %231 = vector.extract_strided_slice %204 {offsets = [0, 128], sizes = [2, 16], strides = [1, 1]} : vector<2x256xf32> to vector<2x16xf32>
    %232 = vector.shape_cast %231 : vector<2x16xf32> to vector<2x1x16xf32>
    %c0_154 = arith.constant 0 : index
    %c11_155 = arith.constant 11 : index
    %c3_156 = arith.constant 3 : index
    %233 = vector.load %arg11[%c0_154, %c11_155, %c3_156] : memref<2x22x22xf32, #tpu.memory_space<vmem>>, vector<2x1x16xf32>
    tpu.vector_store %arg11[%c0_154, %c11_155, %c3_156], %232 {strides = array<i32>} : memref<2x22x22xf32, #tpu.memory_space<vmem>>, vector<2x1x16xf32>,
    %234 = vector.extract_strided_slice %204 {offsets = [0, 144], sizes = [2, 16], strides = [1, 1]} : vector<2x256xf32> to vector<2x16xf32>
    %235 = vector.shape_cast %234 : vector<2x16xf32> to vector<2x1x16xf32>
    %c0_157 = arith.constant 0 : index
    %c12_158 = arith.constant 12 : index
    %c3_159 = arith.constant 3 : index
    %236 = vector.load %arg11[%c0_157, %c12_158, %c3_159] : memref<2x22x22xf32, #tpu.memory_space<vmem>>, vector<2x1x16xf32>
    tpu.vector_store %arg11[%c0_157, %c12_158, %c3_159], %235 {strides = array<i32>} : memref<2x22x22xf32, #tpu.memory_space<vmem>>, vector<2x1x16xf32>,
    %237 = vector.extract_strided_slice %204 {offsets = [0, 160], sizes = [2, 16], strides = [1, 1]} : vector<2x256xf32> to vector<2x16xf32>
    %238 = vector.shape_cast %237 : vector<2x16xf32> to vector<2x1x16xf32>
    %c0_160 = arith.constant 0 : index
    %c13_161 = arith.constant 13 : index
    %c3_162 = arith.constant 3 : index
    %239 = vector.load %arg11[%c0_160, %c13_161, %c3_162] : memref<2x22x22xf32, #tpu.memory_space<vmem>>, vector<2x1x16xf32>
    tpu.vector_store %arg11[%c0_160, %c13_161, %c3_162], %238 {strides = array<i32>} : memref<2x22x22xf32, #tpu.memory_space<vmem>>, vector<2x1x16xf32>,
    %240 = vector.extract_strided_slice %204 {offsets = [0, 176], sizes = [2, 16], strides = [1, 1]} : vector<2x256xf32> to vector<2x16xf32>
    %241 = vector.shape_cast %240 : vector<2x16xf32> to vector<2x1x16xf32>
    %c0_163 = arith.constant 0 : index
    %c14_164 = arith.constant 14 : index
    %c3_165 = arith.constant 3 : index
    %242 = vector.load %arg11[%c0_163, %c14_164, %c3_165] : memref<2x22x22xf32, #tpu.memory_space<vmem>>, vector<2x1x16xf32>
    tpu.vector_store %arg11[%c0_163, %c14_164, %c3_165], %241 {strides = array<i32>} : memref<2x22x22xf32, #tpu.memory_space<vmem>>, vector<2x1x16xf32>,
    %243 = vector.extract_strided_slice %204 {offsets = [0, 192], sizes = [2, 16], strides = [1, 1]} : vector<2x256xf32> to vector<2x16xf32>
    %244 = vector.shape_cast %243 : vector<2x16xf32> to vector<2x1x16xf32>
    %c0_166 = arith.constant 0 : index
    %c15_167 = arith.constant 15 : index
    %c3_168 = arith.constant 3 : index
    %245 = vector.load %arg11[%c0_166, %c15_167, %c3_168] : memref<2x22x22xf32, #tpu.memory_space<vmem>>, vector<2x1x16xf32>
    tpu.vector_store %arg11[%c0_166, %c15_167, %c3_168], %244 {strides = array<i32>} : memref<2x22x22xf32, #tpu.memory_space<vmem>>, vector<2x1x16xf32>,
    %246 = vector.extract_strided_slice %204 {offsets = [0, 208], sizes = [2, 16], strides = [1, 1]} : vector<2x256xf32> to vector<2x16xf32>
    %247 = vector.shape_cast %246 : vector<2x16xf32> to vector<2x1x16xf32>
    %c0_169 = arith.constant 0 : index
    %c16_170 = arith.constant 16 : index
    %c3_171 = arith.constant 3 : index
    %248 = vector.load %arg11[%c0_169, %c16_170, %c3_171] : memref<2x22x22xf32, #tpu.memory_space<vmem>>, vector<2x1x16xf32>
    tpu.vector_store %arg11[%c0_169, %c16_170, %c3_171], %247 {strides = array<i32>} : memref<2x22x22xf32, #tpu.memory_space<vmem>>, vector<2x1x16xf32>,
    %249 = vector.extract_strided_slice %204 {offsets = [0, 224], sizes = [2, 16], strides = [1, 1]} : vector<2x256xf32> to vector<2x16xf32>
    %250 = vector.shape_cast %249 : vector<2x16xf32> to vector<2x1x16xf32>
    %c0_172 = arith.constant 0 : index
    %c17_173 = arith.constant 17 : index
    %c3_174 = arith.constant 3 : index
    %251 = vector.load %arg11[%c0_172, %c17_173, %c3_174] : memref<2x22x22xf32, #tpu.memory_space<vmem>>, vector<2x1x16xf32>
    tpu.vector_store %arg11[%c0_172, %c17_173, %c3_174], %250 {strides = array<i32>} : memref<2x22x22xf32, #tpu.memory_space<vmem>>, vector<2x1x16xf32>,
    %252 = vector.extract_strided_slice %204 {offsets = [0, 240], sizes = [2, 16], strides = [1, 1]} : vector<2x256xf32> to vector<2x16xf32>
    %253 = vector.shape_cast %252 : vector<2x16xf32> to vector<2x1x16xf32>
    %c0_175 = arith.constant 0 : index
    %c18_176 = arith.constant 18 : index
    %c3_177 = arith.constant 3 : index
    %254 = vector.load %arg11[%c0_175, %c18_176, %c3_177] : memref<2x22x22xf32, #tpu.memory_space<vmem>>, vector<2x1x16xf32>
    tpu.vector_store %arg11[%c0_175, %c18_176, %c3_177], %253 {strides = array<i32>} : memref<2x22x22xf32, #tpu.memory_space<vmem>>, vector<2x1x16xf32>,
    %cst_178 = arith.constant 0.000000e+00 : f32
    %255 = vector.broadcast %cst_178 : f32 to vector<16x16xf32>
    %c1_179 = arith.constant 1 : index
    %c0_180 = arith.constant 0 : index
    %256 = memref.load %arg9[%c1_179, %c0_180] : memref<3x6xf32, #tpu.memory_space<smem>>
    %257 = vector.broadcast %256 : f32 to vector<16x16xf32>
    %258 = arith.addf %255, %257 : vector<16x16xf32>
    %c0_181 = arith.constant 0 : index
    %c0_182 = arith.constant 0 : index
    %c2_183 = arith.constant 2 : index
    %259 = vector.load %arg11[%c0_181, %c0_182, %c2_183] : memref<2x22x22xf32, #tpu.memory_space<vmem>>, vector<1x22x16xf32>
    %260 = vector.shape_cast %259 : vector<1x22x16xf32> to vector<22x16xf32>
    %c1_184 = arith.constant 1 : index
    %c0_185 = arith.constant 0 : index
    %261 = memref.load %arg8[%c1_184, %c0_185] : memref<3x98xf32, #tpu.memory_space<smem>>
    %262 = vector.extract_strided_slice %260 {offsets = [2, 0], sizes = [16, 16], strides = [1, 1]} : vector<22x16xf32> to vector<16x16xf32>
    %263 = vector.broadcast %261 : f32 to vector<16x16xf32>
    %264 = arith.mulf %262, %263 : vector<16x16xf32>
    %265 = arith.addf %258, %264 : vector<16x16xf32>
    %c1_186 = arith.constant 1 : index
    %c3_187 = arith.constant 3 : index
    %266 = memref.load %arg8[%c1_186, %c3_187] : memref<3x98xf32, #tpu.memory_space<smem>>
    %267 = vector.extract_strided_slice %260 {offsets = [3, 0], sizes = [16, 16], strides = [1, 1]} : vector<22x16xf32> to vector<16x16xf32>
    %268 = vector.broadcast %266 : f32 to vector<16x16xf32>
    %269 = arith.mulf %267, %268 : vector<16x16xf32>
    %270 = arith.addf %265, %269 : vector<16x16xf32>
    %c1_188 = arith.constant 1 : index
    %c6_189 = arith.constant 6 : index
    %271 = memref.load %arg8[%c1_188, %c6_189] : memref<3x98xf32, #tpu.memory_space<smem>>
    %272 = vector.extract_strided_slice %260 {offsets = [4, 0], sizes = [16, 16], strides = [1, 1]} : vector<22x16xf32> to vector<16x16xf32>
    %273 = vector.broadcast %271 : f32 to vector<16x16xf32>
    %274 = arith.mulf %272, %273 : vector<16x16xf32>
    %275 = arith.addf %270, %274 : vector<16x16xf32>
    %c0_190 = arith.constant 0 : index
    %c0_191 = arith.constant 0 : index
    %c3_192 = arith.constant 3 : index
    %276 = vector.load %arg11[%c0_190, %c0_191, %c3_192] : memref<2x22x22xf32, #tpu.memory_space<vmem>>, vector<1x22x16xf32>
    %277 = vector.shape_cast %276 : vector<1x22x16xf32> to vector<22x16xf32>
    %c1_193 = arith.constant 1 : index
    %c1_194 = arith.constant 1 : index
    %278 = memref.load %arg8[%c1_193, %c1_194] : memref<3x98xf32, #tpu.memory_space<smem>>
    %279 = vector.extract_strided_slice %277 {offsets = [2, 0], sizes = [16, 16], strides = [1, 1]} : vector<22x16xf32> to vector<16x16xf32>
    %280 = vector.broadcast %278 : f32 to vector<16x16xf32>
    %281 = arith.mulf %279, %280 : vector<16x16xf32>
    %282 = arith.addf %275, %281 : vector<16x16xf32>
    %c1_195 = arith.constant 1 : index
    %c4_196 = arith.constant 4 : index
    %283 = memref.load %arg8[%c1_195, %c4_196] : memref<3x98xf32, #tpu.memory_space<smem>>
    %284 = vector.extract_strided_slice %277 {offsets = [3, 0], sizes = [16, 16], strides = [1, 1]} : vector<22x16xf32> to vector<16x16xf32>
    %285 = vector.broadcast %283 : f32 to vector<16x16xf32>
    %286 = arith.mulf %284, %285 : vector<16x16xf32>
    %287 = arith.addf %282, %286 : vector<16x16xf32>
    %c1_197 = arith.constant 1 : index
    %c7_198 = arith.constant 7 : index
    %288 = memref.load %arg8[%c1_197, %c7_198] : memref<3x98xf32, #tpu.memory_space<smem>>
    %289 = vector.extract_strided_slice %277 {offsets = [4, 0], sizes = [16, 16], strides = [1, 1]} : vector<22x16xf32> to vector<16x16xf32>
    %290 = vector.broadcast %288 : f32 to vector<16x16xf32>
    %291 = arith.mulf %289, %290 : vector<16x16xf32>
    %292 = arith.addf %287, %291 : vector<16x16xf32>
    %c0_199 = arith.constant 0 : index
    %c0_200 = arith.constant 0 : index
    %c4_201 = arith.constant 4 : index
    %293 = vector.load %arg11[%c0_199, %c0_200, %c4_201] : memref<2x22x22xf32, #tpu.memory_space<vmem>>, vector<1x22x16xf32>
    %294 = vector.shape_cast %293 : vector<1x22x16xf32> to vector<22x16xf32>
    %c1_202 = arith.constant 1 : index
    %c2_203 = arith.constant 2 : index
    %295 = memref.load %arg8[%c1_202, %c2_203] : memref<3x98xf32, #tpu.memory_space<smem>>
    %296 = vector.extract_strided_slice %294 {offsets = [2, 0], sizes = [16, 16], strides = [1, 1]} : vector<22x16xf32> to vector<16x16xf32>
    %297 = vector.broadcast %295 : f32 to vector<16x16xf32>
    %298 = arith.mulf %296, %297 : vector<16x16xf32>
    %299 = arith.addf %292, %298 : vector<16x16xf32>
    %c1_204 = arith.constant 1 : index
    %c5_205 = arith.constant 5 : index
    %300 = memref.load %arg8[%c1_204, %c5_205] : memref<3x98xf32, #tpu.memory_space<smem>>
    %301 = vector.extract_strided_slice %294 {offsets = [3, 0], sizes = [16, 16], strides = [1, 1]} : vector<22x16xf32> to vector<16x16xf32>
    %302 = vector.broadcast %300 : f32 to vector<16x16xf32>
    %303 = arith.mulf %301, %302 : vector<16x16xf32>
    %304 = arith.addf %299, %303 : vector<16x16xf32>
    %c1_206 = arith.constant 1 : index
    %c8_207 = arith.constant 8 : index
    %305 = memref.load %arg8[%c1_206, %c8_207] : memref<3x98xf32, #tpu.memory_space<smem>>
    %306 = vector.extract_strided_slice %294 {offsets = [4, 0], sizes = [16, 16], strides = [1, 1]} : vector<22x16xf32> to vector<16x16xf32>
    %307 = vector.broadcast %305 : f32 to vector<16x16xf32>
    %308 = arith.mulf %306, %307 : vector<16x16xf32>
    %309 = arith.addf %304, %308 : vector<16x16xf32>
    %c1_208 = arith.constant 1 : index
    %c0_209 = arith.constant 0 : index
    %c2_210 = arith.constant 2 : index
    %310 = vector.load %arg11[%c1_208, %c0_209, %c2_210] : memref<2x22x22xf32, #tpu.memory_space<vmem>>, vector<1x22x16xf32>
    %311 = vector.shape_cast %310 : vector<1x22x16xf32> to vector<22x16xf32>
    %c1_211 = arith.constant 1 : index
    %c9_212 = arith.constant 9 : index
    %312 = memref.load %arg8[%c1_211, %c9_212] : memref<3x98xf32, #tpu.memory_space<smem>>
    %313 = vector.extract_strided_slice %311 {offsets = [2, 0], sizes = [16, 16], strides = [1, 1]} : vector<22x16xf32> to vector<16x16xf32>
    %314 = vector.broadcast %312 : f32 to vector<16x16xf32>
    %315 = arith.mulf %313, %314 : vector<16x16xf32>
    %316 = arith.addf %309, %315 : vector<16x16xf32>
    %c1_213 = arith.constant 1 : index
    %c12_214 = arith.constant 12 : index
    %317 = memref.load %arg8[%c1_213, %c12_214] : memref<3x98xf32, #tpu.memory_space<smem>>
    %318 = vector.extract_strided_slice %311 {offsets = [3, 0], sizes = [16, 16], strides = [1, 1]} : vector<22x16xf32> to vector<16x16xf32>
    %319 = vector.broadcast %317 : f32 to vector<16x16xf32>
    %320 = arith.mulf %318, %319 : vector<16x16xf32>
    %321 = arith.addf %316, %320 : vector<16x16xf32>
    %c1_215 = arith.constant 1 : index
    %c15_216 = arith.constant 15 : index
    %322 = memref.load %arg8[%c1_215, %c15_216] : memref<3x98xf32, #tpu.memory_space<smem>>
    %323 = vector.extract_strided_slice %311 {offsets = [4, 0], sizes = [16, 16], strides = [1, 1]} : vector<22x16xf32> to vector<16x16xf32>
    %324 = vector.broadcast %322 : f32 to vector<16x16xf32>
    %325 = arith.mulf %323, %324 : vector<16x16xf32>
    %326 = arith.addf %321, %325 : vector<16x16xf32>
    %c1_217 = arith.constant 1 : index
    %c0_218 = arith.constant 0 : index
    %c3_219 = arith.constant 3 : index
    %327 = vector.load %arg11[%c1_217, %c0_218, %c3_219] : memref<2x22x22xf32, #tpu.memory_space<vmem>>, vector<1x22x16xf32>
    %328 = vector.shape_cast %327 : vector<1x22x16xf32> to vector<22x16xf32>
    %c1_220 = arith.constant 1 : index
    %c10_221 = arith.constant 10 : index
    %329 = memref.load %arg8[%c1_220, %c10_221] : memref<3x98xf32, #tpu.memory_space<smem>>
    %330 = vector.extract_strided_slice %328 {offsets = [2, 0], sizes = [16, 16], strides = [1, 1]} : vector<22x16xf32> to vector<16x16xf32>
    %331 = vector.broadcast %329 : f32 to vector<16x16xf32>
    %332 = arith.mulf %330, %331 : vector<16x16xf32>
    %333 = arith.addf %326, %332 : vector<16x16xf32>
    %c1_222 = arith.constant 1 : index
    %c13_223 = arith.constant 13 : index
    %334 = memref.load %arg8[%c1_222, %c13_223] : memref<3x98xf32, #tpu.memory_space<smem>>
    %335 = vector.extract_strided_slice %328 {offsets = [3, 0], sizes = [16, 16], strides = [1, 1]} : vector<22x16xf32> to vector<16x16xf32>
    %336 = vector.broadcast %334 : f32 to vector<16x16xf32>
    %337 = arith.mulf %335, %336 : vector<16x16xf32>
    %338 = arith.addf %333, %337 : vector<16x16xf32>
    %c1_224 = arith.constant 1 : index
    %c16_225 = arith.constant 16 : index
    %339 = memref.load %arg8[%c1_224, %c16_225] : memref<3x98xf32, #tpu.memory_space<smem>>
    %340 = vector.extract_strided_slice %328 {offsets = [4, 0], sizes = [16, 16], strides = [1, 1]} : vector<22x16xf32> to vector<16x16xf32>
    %341 = vector.broadcast %339 : f32 to vector<16x16xf32>
    %342 = arith.mulf %340, %341 : vector<16x16xf32>
    %343 = arith.addf %338, %342 : vector<16x16xf32>
    %c1_226 = arith.constant 1 : index
    %c0_227 = arith.constant 0 : index
    %c4_228 = arith.constant 4 : index
    %344 = vector.load %arg11[%c1_226, %c0_227, %c4_228] : memref<2x22x22xf32, #tpu.memory_space<vmem>>, vector<1x22x16xf32>
    %345 = vector.shape_cast %344 : vector<1x22x16xf32> to vector<22x16xf32>
    %c1_229 = arith.constant 1 : index
    %c11_230 = arith.constant 11 : index
    %346 = memref.load %arg8[%c1_229, %c11_230] : memref<3x98xf32, #tpu.memory_space<smem>>
    %347 = vector.extract_strided_slice %345 {offsets = [2, 0], sizes = [16, 16], strides = [1, 1]} : vector<22x16xf32> to vector<16x16xf32>
    %348 = vector.broadcast %346 : f32 to vector<16x16xf32>
    %349 = arith.mulf %347, %348 : vector<16x16xf32>
    %350 = arith.addf %343, %349 : vector<16x16xf32>
    %c1_231 = arith.constant 1 : index
    %c14_232 = arith.constant 14 : index
    %351 = memref.load %arg8[%c1_231, %c14_232] : memref<3x98xf32, #tpu.memory_space<smem>>
    %352 = vector.extract_strided_slice %345 {offsets = [3, 0], sizes = [16, 16], strides = [1, 1]} : vector<22x16xf32> to vector<16x16xf32>
    %353 = vector.broadcast %351 : f32 to vector<16x16xf32>
    %354 = arith.mulf %352, %353 : vector<16x16xf32>
    %355 = arith.addf %350, %354 : vector<16x16xf32>
    %c1_233 = arith.constant 1 : index
    %c17_234 = arith.constant 17 : index
    %356 = memref.load %arg8[%c1_233, %c17_234] : memref<3x98xf32, #tpu.memory_space<smem>>
    %357 = vector.extract_strided_slice %345 {offsets = [4, 0], sizes = [16, 16], strides = [1, 1]} : vector<22x16xf32> to vector<16x16xf32>
    %358 = vector.broadcast %356 : f32 to vector<16x16xf32>
    %359 = arith.mulf %357, %358 : vector<16x16xf32>
    %360 = arith.addf %355, %359 : vector<16x16xf32>
    %c1_235 = arith.constant 1 : index
    %c1_236 = arith.constant 1 : index
    %361 = memref.load %arg9[%c1_235, %c1_236] : memref<3x6xf32, #tpu.memory_space<smem>>
    %c1_237 = arith.constant 1 : index
    %c2_238 = arith.constant 2 : index
    %362 = memref.load %arg9[%c1_237, %c2_238] : memref<3x6xf32, #tpu.memory_space<smem>>
    %c1_239 = arith.constant 1 : index
    %c3_240 = arith.constant 3 : index
    %363 = memref.load %arg9[%c1_239, %c3_240] : memref<3x6xf32, #tpu.memory_space<smem>>
    %c1_241 = arith.constant 1 : index
    %c4_242 = arith.constant 4 : index
    %364 = memref.load %arg9[%c1_241, %c4_242] : memref<3x6xf32, #tpu.memory_space<smem>>
    %c1_243 = arith.constant 1 : index
    %c5_244 = arith.constant 5 : index
    %365 = memref.load %arg9[%c1_243, %c5_244] : memref<3x6xf32, #tpu.memory_space<smem>>
    %366 = vector.broadcast %363 : f32 to vector<16x16xf32>
    %367 = arith.subf %360, %366 : vector<16x16xf32>
    %368 = arith.addf %364, %365 : f32
    %369 = math.rsqrt %368 : f32
    %370 = vector.broadcast %369 : f32 to vector<16x16xf32>
    %371 = arith.mulf %367, %370 : vector<16x16xf32>
    %372 = vector.broadcast %361 : f32 to vector<16x16xf32>
    %373 = arith.mulf %371, %372 : vector<16x16xf32>
    %374 = vector.broadcast %362 : f32 to vector<16x16xf32>
    %375 = arith.addf %373, %374 : vector<16x16xf32>
    %376 = arith.negf %375 : vector<16x16xf32>
    %377 = math.exp %376 : vector<16x16xf32>
    %cst_245 = arith.constant 1.000000e+00 : f32
    %378 = vector.broadcast %cst_245 : f32 to vector<16x16xf32>
    %379 = arith.addf %378, %377 : vector<16x16xf32>
    %380 = arith.divf %378, %379 : vector<16x16xf32>
    %381 = vector.extract_strided_slice %380 {offsets = [0, 0], sizes = [1, 16], strides = [1, 1]} : vector<16x16xf32> to vector<1x16xf32>
    %c0_246 = arith.constant 0 : index
    %c0_247 = arith.constant 0 : index
    %382 = vector.load %arg12[%c0_246, %c0_247] : memref<1x256xf32, #tpu.memory_space<vmem>>, vector<1x16xf32>
    tpu.vector_store %arg12[%c0_246, %c0_247], %381 {strides = array<i32>} : memref<1x256xf32, #tpu.memory_space<vmem>>, vector<1x16xf32>,
    %383 = vector.extract_strided_slice %380 {offsets = [1, 0], sizes = [1, 16], strides = [1, 1]} : vector<16x16xf32> to vector<1x16xf32>
    %c0_248 = arith.constant 0 : index
    %c16_249 = arith.constant 16 : index
    %384 = vector.load %arg12[%c0_248, %c16_249] : memref<1x256xf32, #tpu.memory_space<vmem>>, vector<1x16xf32>
    tpu.vector_store %arg12[%c0_248, %c16_249], %383 {strides = array<i32>} : memref<1x256xf32, #tpu.memory_space<vmem>>, vector<1x16xf32>,
    %385 = vector.extract_strided_slice %380 {offsets = [2, 0], sizes = [1, 16], strides = [1, 1]} : vector<16x16xf32> to vector<1x16xf32>
    %c0_250 = arith.constant 0 : index
    %c32_251 = arith.constant 32 : index
    %386 = vector.load %arg12[%c0_250, %c32_251] : memref<1x256xf32, #tpu.memory_space<vmem>>, vector<1x16xf32>
    tpu.vector_store %arg12[%c0_250, %c32_251], %385 {strides = array<i32>} : memref<1x256xf32, #tpu.memory_space<vmem>>, vector<1x16xf32>,
    %387 = vector.extract_strided_slice %380 {offsets = [3, 0], sizes = [1, 16], strides = [1, 1]} : vector<16x16xf32> to vector<1x16xf32>
    %c0_252 = arith.constant 0 : index
    %c48_253 = arith.constant 48 : index
    %388 = vector.load %arg12[%c0_252, %c48_253] : memref<1x256xf32, #tpu.memory_space<vmem>>, vector<1x16xf32>
    tpu.vector_store %arg12[%c0_252, %c48_253], %387 {strides = array<i32>} : memref<1x256xf32, #tpu.memory_space<vmem>>, vector<1x16xf32>,
    %389 = vector.extract_strided_slice %380 {offsets = [4, 0], sizes = [1, 16], strides = [1, 1]} : vector<16x16xf32> to vector<1x16xf32>
    %c0_254 = arith.constant 0 : index
    %c64_255 = arith.constant 64 : index
    %390 = vector.load %arg12[%c0_254, %c64_255] : memref<1x256xf32, #tpu.memory_space<vmem>>, vector<1x16xf32>
    tpu.vector_store %arg12[%c0_254, %c64_255], %389 {strides = array<i32>} : memref<1x256xf32, #tpu.memory_space<vmem>>, vector<1x16xf32>,
    %391 = vector.extract_strided_slice %380 {offsets = [5, 0], sizes = [1, 16], strides = [1, 1]} : vector<16x16xf32> to vector<1x16xf32>
    %c0_256 = arith.constant 0 : index
    %c80_257 = arith.constant 80 : index
    %392 = vector.load %arg12[%c0_256, %c80_257] : memref<1x256xf32, #tpu.memory_space<vmem>>, vector<1x16xf32>
    tpu.vector_store %arg12[%c0_256, %c80_257], %391 {strides = array<i32>} : memref<1x256xf32, #tpu.memory_space<vmem>>, vector<1x16xf32>,
    %393 = vector.extract_strided_slice %380 {offsets = [6, 0], sizes = [1, 16], strides = [1, 1]} : vector<16x16xf32> to vector<1x16xf32>
    %c0_258 = arith.constant 0 : index
    %c96_259 = arith.constant 96 : index
    %394 = vector.load %arg12[%c0_258, %c96_259] : memref<1x256xf32, #tpu.memory_space<vmem>>, vector<1x16xf32>
    tpu.vector_store %arg12[%c0_258, %c96_259], %393 {strides = array<i32>} : memref<1x256xf32, #tpu.memory_space<vmem>>, vector<1x16xf32>,
    %395 = vector.extract_strided_slice %380 {offsets = [7, 0], sizes = [1, 16], strides = [1, 1]} : vector<16x16xf32> to vector<1x16xf32>
    %c0_260 = arith.constant 0 : index
    %c112_261 = arith.constant 112 : index
    %396 = vector.load %arg12[%c0_260, %c112_261] : memref<1x256xf32, #tpu.memory_space<vmem>>, vector<1x16xf32>
    tpu.vector_store %arg12[%c0_260, %c112_261], %395 {strides = array<i32>} : memref<1x256xf32, #tpu.memory_space<vmem>>, vector<1x16xf32>,
    %397 = vector.extract_strided_slice %380 {offsets = [8, 0], sizes = [1, 16], strides = [1, 1]} : vector<16x16xf32> to vector<1x16xf32>
    %c0_262 = arith.constant 0 : index
    %c128_263 = arith.constant 128 : index
    %398 = vector.load %arg12[%c0_262, %c128_263] : memref<1x256xf32, #tpu.memory_space<vmem>>, vector<1x16xf32>
    tpu.vector_store %arg12[%c0_262, %c128_263], %397 {strides = array<i32>} : memref<1x256xf32, #tpu.memory_space<vmem>>, vector<1x16xf32>,
    %399 = vector.extract_strided_slice %380 {offsets = [9, 0], sizes = [1, 16], strides = [1, 1]} : vector<16x16xf32> to vector<1x16xf32>
    %c0_264 = arith.constant 0 : index
    %c144_265 = arith.constant 144 : index
    %400 = vector.load %arg12[%c0_264, %c144_265] : memref<1x256xf32, #tpu.memory_space<vmem>>, vector<1x16xf32>
    tpu.vector_store %arg12[%c0_264, %c144_265], %399 {strides = array<i32>} : memref<1x256xf32, #tpu.memory_space<vmem>>, vector<1x16xf32>,
    %401 = vector.extract_strided_slice %380 {offsets = [10, 0], sizes = [1, 16], strides = [1, 1]} : vector<16x16xf32> to vector<1x16xf32>
    %c0_266 = arith.constant 0 : index
    %c160_267 = arith.constant 160 : index
    %402 = vector.load %arg12[%c0_266, %c160_267] : memref<1x256xf32, #tpu.memory_space<vmem>>, vector<1x16xf32>
    tpu.vector_store %arg12[%c0_266, %c160_267], %401 {strides = array<i32>} : memref<1x256xf32, #tpu.memory_space<vmem>>, vector<1x16xf32>,
    %403 = vector.extract_strided_slice %380 {offsets = [11, 0], sizes = [1, 16], strides = [1, 1]} : vector<16x16xf32> to vector<1x16xf32>
    %c0_268 = arith.constant 0 : index
    %c176_269 = arith.constant 176 : index
    %404 = vector.load %arg12[%c0_268, %c176_269] : memref<1x256xf32, #tpu.memory_space<vmem>>, vector<1x16xf32>
    tpu.vector_store %arg12[%c0_268, %c176_269], %403 {strides = array<i32>} : memref<1x256xf32, #tpu.memory_space<vmem>>, vector<1x16xf32>,
    %405 = vector.extract_strided_slice %380 {offsets = [12, 0], sizes = [1, 16], strides = [1, 1]} : vector<16x16xf32> to vector<1x16xf32>
    %c0_270 = arith.constant 0 : index
    %c192_271 = arith.constant 192 : index
    %406 = vector.load %arg12[%c0_270, %c192_271] : memref<1x256xf32, #tpu.memory_space<vmem>>, vector<1x16xf32>
    tpu.vector_store %arg12[%c0_270, %c192_271], %405 {strides = array<i32>} : memref<1x256xf32, #tpu.memory_space<vmem>>, vector<1x16xf32>,
    %407 = vector.extract_strided_slice %380 {offsets = [13, 0], sizes = [1, 16], strides = [1, 1]} : vector<16x16xf32> to vector<1x16xf32>
    %c0_272 = arith.constant 0 : index
    %c208_273 = arith.constant 208 : index
    %408 = vector.load %arg12[%c0_272, %c208_273] : memref<1x256xf32, #tpu.memory_space<vmem>>, vector<1x16xf32>
    tpu.vector_store %arg12[%c0_272, %c208_273], %407 {strides = array<i32>} : memref<1x256xf32, #tpu.memory_space<vmem>>, vector<1x16xf32>,
    %409 = vector.extract_strided_slice %380 {offsets = [14, 0], sizes = [1, 16], strides = [1, 1]} : vector<16x16xf32> to vector<1x16xf32>
    %c0_274 = arith.constant 0 : index
    %c224_275 = arith.constant 224 : index
    %410 = vector.load %arg12[%c0_274, %c224_275] : memref<1x256xf32, #tpu.memory_space<vmem>>, vector<1x16xf32>
    tpu.vector_store %arg12[%c0_274, %c224_275], %409 {strides = array<i32>} : memref<1x256xf32, #tpu.memory_space<vmem>>, vector<1x16xf32>,
    %411 = vector.extract_strided_slice %380 {offsets = [15, 0], sizes = [1, 16], strides = [1, 1]} : vector<16x16xf32> to vector<1x16xf32>
    %c0_276 = arith.constant 0 : index
    %c240_277 = arith.constant 240 : index
    %412 = vector.load %arg12[%c0_276, %c240_277] : memref<1x256xf32, #tpu.memory_space<vmem>>, vector<1x16xf32>
    tpu.vector_store %arg12[%c0_276, %c240_277], %411 {strides = array<i32>} : memref<1x256xf32, #tpu.memory_space<vmem>>, vector<1x16xf32>,
    %c0_278 = arith.constant 0 : index
    %c0_279 = arith.constant 0 : index
    %413 = vector.load %arg12[%c0_278, %c0_279] : memref<1x256xf32, #tpu.memory_space<vmem>>, vector<1x256xf32>
    %414 = vector.broadcast %413 : vector<1x256xf32> to vector<16x256xf32>
    %415 = arith.mulf %197, %414 : vector<16x256xf32>
    %c1_280 = arith.constant 1 : index
    %c0_281 = arith.constant 0 : index
    %c0_282 = arith.constant 0 : index
    %416 = vector.load %arg6[%c1_280, %c0_281, %c0_282] : memref<3x16x16xf32, #tpu.memory_space<vmem>>, vector<1x16x16xf32>
    %417 = vector.shape_cast %416 : vector<1x16x16xf32> to vector<16x16xf32>
    %cst_283 = arith.constant dense<0.000000e+00> : vector<16x256xf32>
    %418 = tpu.matmul %417, %415, %cst_283 {dimension_numbers = #tpu.dot_dimension_numbers<[1], [0], [0], [1], [0, 0, 1, 1], [], []>} : vector<16x16xf32>, vector<16x256xf32>, vector<16x256xf32> -> vector<16x256xf32>
    %419 = arith.addf %171, %418 : vector<16x256xf32>
    %c2_284 = arith.constant 2 : index
    %c0_285 = arith.constant 0 : index
    %c0_286 = arith.constant 0 : index
    %420 = vector.load %arg2[%c2_284, %c0_285, %c0_286] : memref<3x1x16xf32, #tpu.memory_space<vmem>>, vector<1x1x16xf32>
    %421 = vector.shape_cast %420 : vector<1x1x16xf32> to vector<1x16xf32>
    %cst_287 = arith.constant dense<0.000000e+00> : vector<1x2xf32>
    %422 = tpu.matmul %421, %8, %cst_287 {dimension_numbers = #tpu.dot_dimension_numbers<[1], [0], [0], [1], [0, 0, 1, 1], [], []>} : vector<1x16xf32>, vector<16x2xf32>, vector<1x2xf32> -> vector<1x2xf32>
    %c2_288 = arith.constant 2 : index
    %c0_289 = arith.constant 0 : index
    %c0_290 = arith.constant 0 : index
    %423 = vector.load %arg3[%c2_288, %c0_289, %c0_290] : memref<3x1x1xf32, #tpu.memory_space<vmem>>, vector<1x1x1xf32>
    %424 = vector.shape_cast %423 : vector<1x1x1xf32> to vector<1x1xf32>
    %425 = vector.broadcast %424 : vector<1x1xf32> to vector<1x2xf32>
    %426 = arith.addf %422, %425 : vector<1x2xf32>
    %cst_291 = arith.constant 0.000000e+00 : f32
    %427 = vector.broadcast %cst_291 : f32 to vector<1x2xf32>
    %428 = arith.maximumf %426, %427 : vector<1x2xf32>
    %c2_292 = arith.constant 2 : index
    %c0_293 = arith.constant 0 : index
    %c0_294 = arith.constant 0 : index
    %429 = vector.load %arg4[%c2_292, %c0_293, %c0_294] : memref<3x16x1xf32, #tpu.memory_space<vmem>>, vector<1x16x1xf32>
    %430 = vector.shape_cast %429 : vector<1x16x1xf32> to vector<16x1xf32>
    %cst_295 = arith.constant dense<0.000000e+00> : vector<16x2xf32>
    %431 = tpu.matmul %430, %428, %cst_295 {dimension_numbers = #tpu.dot_dimension_numbers<[1], [0], [0], [1], [0, 0, 1, 1], [], []>} : vector<16x1xf32>, vector<1x2xf32>, vector<16x2xf32> -> vector<16x2xf32>
    %c2_296 = arith.constant 2 : index
    %c0_297 = arith.constant 0 : index
    %c0_298 = arith.constant 0 : index
    %432 = vector.load %arg5[%c2_296, %c0_297, %c0_298] : memref<3x16x1xf32, #tpu.memory_space<vmem>>, vector<1x16x1xf32>
    %433 = vector.shape_cast %432 : vector<1x16x1xf32> to vector<16x1xf32>
    %434 = vector.broadcast %433 : vector<16x1xf32> to vector<16x2xf32>
    %435 = arith.addf %431, %434 : vector<16x2xf32>
    %436 = vector.extract_strided_slice %435 {offsets = [0, 0], sizes = [16, 1], strides = [1, 1]} : vector<16x2xf32> to vector<16x1xf32>
    %437 = vector.extract_strided_slice %435 {offsets = [0, 1], sizes = [16, 1], strides = [1, 1]} : vector<16x2xf32> to vector<16x1xf32>
    %438 = arith.addf %436, %437 : vector<16x1xf32>
    %439 = arith.negf %438 : vector<16x1xf32>
    %440 = math.exp %439 : vector<16x1xf32>
    %cst_299 = arith.constant 1.000000e+00 : f32
    %441 = vector.broadcast %cst_299 : f32 to vector<16x1xf32>
    %442 = arith.addf %441, %440 : vector<16x1xf32>
    %443 = arith.divf %441, %442 : vector<16x1xf32>
    %444 = vector.broadcast %443 : vector<16x1xf32> to vector<16x256xf32>
    %445 = arith.mulf %1, %444 : vector<16x256xf32>
    %cst_300 = arith.constant dense<0xFF800000> : vector<256xf32>
    %446 = vector.multi_reduction <maximumf>, %445, %cst_300 [0] : vector<16x256xf32> to vector<256xf32>
    %447 = vector.shape_cast %446 : vector<256xf32> to vector<1x256xf32>
    %cst_301 = arith.constant dense<0.000000e+00> : vector<256xf32>
    %448 = vector.multi_reduction <add>, %445, %cst_301 [0] : vector<16x256xf32> to vector<256xf32>
    %449 = vector.shape_cast %448 : vector<256xf32> to vector<1x256xf32>
    %cst_302 = arith.constant 1.600000e+01 : f32
    %450 = vector.broadcast %cst_302 : f32 to vector<1x256xf32>
    %451 = arith.divf %449, %450 : vector<1x256xf32>
    %452 = tpu.concatenate %447, %451 in 0 : vector<1x256xf32>, vector<1x256xf32> -> vector<2x256xf32>
    %cst_303 = arith.constant 0.000000e+00 : f32
    %453 = vector.broadcast %cst_303 : f32 to vector<2x22x22xf32>
    %c0_304 = arith.constant 0 : index
    %c0_305 = arith.constant 0 : index
    %c0_306 = arith.constant 0 : index
    %454 = vector.load %arg11[%c0_304, %c0_305, %c0_306] : memref<2x22x22xf32, #tpu.memory_space<vmem>>, vector<2x22x22xf32>
    tpu.vector_store %arg11[%c0_304, %c0_305, %c0_306], %453 {strides = array<i32>} : memref<2x22x22xf32, #tpu.memory_space<vmem>>, vector<2x22x22xf32>,
    %455 = vector.extract_strided_slice %452 {offsets = [0, 0], sizes = [2, 16], strides = [1, 1]} : vector<2x256xf32> to vector<2x16xf32>
    %456 = vector.shape_cast %455 : vector<2x16xf32> to vector<2x1x16xf32>
    %c0_307 = arith.constant 0 : index
    %c3_308 = arith.constant 3 : index
    %c3_309 = arith.constant 3 : index
    %457 = vector.load %arg11[%c0_307, %c3_308, %c3_309] : memref<2x22x22xf32, #tpu.memory_space<vmem>>, vector<2x1x16xf32>
    tpu.vector_store %arg11[%c0_307, %c3_308, %c3_309], %456 {strides = array<i32>} : memref<2x22x22xf32, #tpu.memory_space<vmem>>, vector<2x1x16xf32>,
    %458 = vector.extract_strided_slice %452 {offsets = [0, 16], sizes = [2, 16], strides = [1, 1]} : vector<2x256xf32> to vector<2x16xf32>
    %459 = vector.shape_cast %458 : vector<2x16xf32> to vector<2x1x16xf32>
    %c0_310 = arith.constant 0 : index
    %c4_311 = arith.constant 4 : index
    %c3_312 = arith.constant 3 : index
    %460 = vector.load %arg11[%c0_310, %c4_311, %c3_312] : memref<2x22x22xf32, #tpu.memory_space<vmem>>, vector<2x1x16xf32>
    tpu.vector_store %arg11[%c0_310, %c4_311, %c3_312], %459 {strides = array<i32>} : memref<2x22x22xf32, #tpu.memory_space<vmem>>, vector<2x1x16xf32>,
    %461 = vector.extract_strided_slice %452 {offsets = [0, 32], sizes = [2, 16], strides = [1, 1]} : vector<2x256xf32> to vector<2x16xf32>
    %462 = vector.shape_cast %461 : vector<2x16xf32> to vector<2x1x16xf32>
    %c0_313 = arith.constant 0 : index
    %c5_314 = arith.constant 5 : index
    %c3_315 = arith.constant 3 : index
    %463 = vector.load %arg11[%c0_313, %c5_314, %c3_315] : memref<2x22x22xf32, #tpu.memory_space<vmem>>, vector<2x1x16xf32>
    tpu.vector_store %arg11[%c0_313, %c5_314, %c3_315], %462 {strides = array<i32>} : memref<2x22x22xf32, #tpu.memory_space<vmem>>, vector<2x1x16xf32>,
    %464 = vector.extract_strided_slice %452 {offsets = [0, 48], sizes = [2, 16], strides = [1, 1]} : vector<2x256xf32> to vector<2x16xf32>
    %465 = vector.shape_cast %464 : vector<2x16xf32> to vector<2x1x16xf32>
    %c0_316 = arith.constant 0 : index
    %c6_317 = arith.constant 6 : index
    %c3_318 = arith.constant 3 : index
    %466 = vector.load %arg11[%c0_316, %c6_317, %c3_318] : memref<2x22x22xf32, #tpu.memory_space<vmem>>, vector<2x1x16xf32>
    tpu.vector_store %arg11[%c0_316, %c6_317, %c3_318], %465 {strides = array<i32>} : memref<2x22x22xf32, #tpu.memory_space<vmem>>, vector<2x1x16xf32>,
    %467 = vector.extract_strided_slice %452 {offsets = [0, 64], sizes = [2, 16], strides = [1, 1]} : vector<2x256xf32> to vector<2x16xf32>
    %468 = vector.shape_cast %467 : vector<2x16xf32> to vector<2x1x16xf32>
    %c0_319 = arith.constant 0 : index
    %c7_320 = arith.constant 7 : index
    %c3_321 = arith.constant 3 : index
    %469 = vector.load %arg11[%c0_319, %c7_320, %c3_321] : memref<2x22x22xf32, #tpu.memory_space<vmem>>, vector<2x1x16xf32>
    tpu.vector_store %arg11[%c0_319, %c7_320, %c3_321], %468 {strides = array<i32>} : memref<2x22x22xf32, #tpu.memory_space<vmem>>, vector<2x1x16xf32>,
    %470 = vector.extract_strided_slice %452 {offsets = [0, 80], sizes = [2, 16], strides = [1, 1]} : vector<2x256xf32> to vector<2x16xf32>
    %471 = vector.shape_cast %470 : vector<2x16xf32> to vector<2x1x16xf32>
    %c0_322 = arith.constant 0 : index
    %c8_323 = arith.constant 8 : index
    %c3_324 = arith.constant 3 : index
    %472 = vector.load %arg11[%c0_322, %c8_323, %c3_324] : memref<2x22x22xf32, #tpu.memory_space<vmem>>, vector<2x1x16xf32>
    tpu.vector_store %arg11[%c0_322, %c8_323, %c3_324], %471 {strides = array<i32>} : memref<2x22x22xf32, #tpu.memory_space<vmem>>, vector<2x1x16xf32>,
    %473 = vector.extract_strided_slice %452 {offsets = [0, 96], sizes = [2, 16], strides = [1, 1]} : vector<2x256xf32> to vector<2x16xf32>
    %474 = vector.shape_cast %473 : vector<2x16xf32> to vector<2x1x16xf32>
    %c0_325 = arith.constant 0 : index
    %c9_326 = arith.constant 9 : index
    %c3_327 = arith.constant 3 : index
    %475 = vector.load %arg11[%c0_325, %c9_326, %c3_327] : memref<2x22x22xf32, #tpu.memory_space<vmem>>, vector<2x1x16xf32>
    tpu.vector_store %arg11[%c0_325, %c9_326, %c3_327], %474 {strides = array<i32>} : memref<2x22x22xf32, #tpu.memory_space<vmem>>, vector<2x1x16xf32>,
    %476 = vector.extract_strided_slice %452 {offsets = [0, 112], sizes = [2, 16], strides = [1, 1]} : vector<2x256xf32> to vector<2x16xf32>
    %477 = vector.shape_cast %476 : vector<2x16xf32> to vector<2x1x16xf32>
    %c0_328 = arith.constant 0 : index
    %c10_329 = arith.constant 10 : index
    %c3_330 = arith.constant 3 : index
    %478 = vector.load %arg11[%c0_328, %c10_329, %c3_330] : memref<2x22x22xf32, #tpu.memory_space<vmem>>, vector<2x1x16xf32>
    tpu.vector_store %arg11[%c0_328, %c10_329, %c3_330], %477 {strides = array<i32>} : memref<2x22x22xf32, #tpu.memory_space<vmem>>, vector<2x1x16xf32>,
    %479 = vector.extract_strided_slice %452 {offsets = [0, 128], sizes = [2, 16], strides = [1, 1]} : vector<2x256xf32> to vector<2x16xf32>
    %480 = vector.shape_cast %479 : vector<2x16xf32> to vector<2x1x16xf32>
    %c0_331 = arith.constant 0 : index
    %c11_332 = arith.constant 11 : index
    %c3_333 = arith.constant 3 : index
    %481 = vector.load %arg11[%c0_331, %c11_332, %c3_333] : memref<2x22x22xf32, #tpu.memory_space<vmem>>, vector<2x1x16xf32>
    tpu.vector_store %arg11[%c0_331, %c11_332, %c3_333], %480 {strides = array<i32>} : memref<2x22x22xf32, #tpu.memory_space<vmem>>, vector<2x1x16xf32>,
    %482 = vector.extract_strided_slice %452 {offsets = [0, 144], sizes = [2, 16], strides = [1, 1]} : vector<2x256xf32> to vector<2x16xf32>
    %483 = vector.shape_cast %482 : vector<2x16xf32> to vector<2x1x16xf32>
    %c0_334 = arith.constant 0 : index
    %c12_335 = arith.constant 12 : index
    %c3_336 = arith.constant 3 : index
    %484 = vector.load %arg11[%c0_334, %c12_335, %c3_336] : memref<2x22x22xf32, #tpu.memory_space<vmem>>, vector<2x1x16xf32>
    tpu.vector_store %arg11[%c0_334, %c12_335, %c3_336], %483 {strides = array<i32>} : memref<2x22x22xf32, #tpu.memory_space<vmem>>, vector<2x1x16xf32>,
    %485 = vector.extract_strided_slice %452 {offsets = [0, 160], sizes = [2, 16], strides = [1, 1]} : vector<2x256xf32> to vector<2x16xf32>
    %486 = vector.shape_cast %485 : vector<2x16xf32> to vector<2x1x16xf32>
    %c0_337 = arith.constant 0 : index
    %c13_338 = arith.constant 13 : index
    %c3_339 = arith.constant 3 : index
    %487 = vector.load %arg11[%c0_337, %c13_338, %c3_339] : memref<2x22x22xf32, #tpu.memory_space<vmem>>, vector<2x1x16xf32>
    tpu.vector_store %arg11[%c0_337, %c13_338, %c3_339], %486 {strides = array<i32>} : memref<2x22x22xf32, #tpu.memory_space<vmem>>, vector<2x1x16xf32>,
    %488 = vector.extract_strided_slice %452 {offsets = [0, 176], sizes = [2, 16], strides = [1, 1]} : vector<2x256xf32> to vector<2x16xf32>
    %489 = vector.shape_cast %488 : vector<2x16xf32> to vector<2x1x16xf32>
    %c0_340 = arith.constant 0 : index
    %c14_341 = arith.constant 14 : index
    %c3_342 = arith.constant 3 : index
    %490 = vector.load %arg11[%c0_340, %c14_341, %c3_342] : memref<2x22x22xf32, #tpu.memory_space<vmem>>, vector<2x1x16xf32>
    tpu.vector_store %arg11[%c0_340, %c14_341, %c3_342], %489 {strides = array<i32>} : memref<2x22x22xf32, #tpu.memory_space<vmem>>, vector<2x1x16xf32>,
    %491 = vector.extract_strided_slice %452 {offsets = [0, 192], sizes = [2, 16], strides = [1, 1]} : vector<2x256xf32> to vector<2x16xf32>
    %492 = vector.shape_cast %491 : vector<2x16xf32> to vector<2x1x16xf32>
    %c0_343 = arith.constant 0 : index
    %c15_344 = arith.constant 15 : index
    %c3_345 = arith.constant 3 : index
    %493 = vector.load %arg11[%c0_343, %c15_344, %c3_345] : memref<2x22x22xf32, #tpu.memory_space<vmem>>, vector<2x1x16xf32>
    tpu.vector_store %arg11[%c0_343, %c15_344, %c3_345], %492 {strides = array<i32>} : memref<2x22x22xf32, #tpu.memory_space<vmem>>, vector<2x1x16xf32>,
    %494 = vector.extract_strided_slice %452 {offsets = [0, 208], sizes = [2, 16], strides = [1, 1]} : vector<2x256xf32> to vector<2x16xf32>
    %495 = vector.shape_cast %494 : vector<2x16xf32> to vector<2x1x16xf32>
    %c0_346 = arith.constant 0 : index
    %c16_347 = arith.constant 16 : index
    %c3_348 = arith.constant 3 : index
    %496 = vector.load %arg11[%c0_346, %c16_347, %c3_348] : memref<2x22x22xf32, #tpu.memory_space<vmem>>, vector<2x1x16xf32>
    tpu.vector_store %arg11[%c0_346, %c16_347, %c3_348], %495 {strides = array<i32>} : memref<2x22x22xf32, #tpu.memory_space<vmem>>, vector<2x1x16xf32>,
    %497 = vector.extract_strided_slice %452 {offsets = [0, 224], sizes = [2, 16], strides = [1, 1]} : vector<2x256xf32> to vector<2x16xf32>
    %498 = vector.shape_cast %497 : vector<2x16xf32> to vector<2x1x16xf32>
    %c0_349 = arith.constant 0 : index
    %c17_350 = arith.constant 17 : index
    %c3_351 = arith.constant 3 : index
    %499 = vector.load %arg11[%c0_349, %c17_350, %c3_351] : memref<2x22x22xf32, #tpu.memory_space<vmem>>, vector<2x1x16xf32>
    tpu.vector_store %arg11[%c0_349, %c17_350, %c3_351], %498 {strides = array<i32>} : memref<2x22x22xf32, #tpu.memory_space<vmem>>, vector<2x1x16xf32>,
    %500 = vector.extract_strided_slice %452 {offsets = [0, 240], sizes = [2, 16], strides = [1, 1]} : vector<2x256xf32> to vector<2x16xf32>
    %501 = vector.shape_cast %500 : vector<2x16xf32> to vector<2x1x16xf32>
    %c0_352 = arith.constant 0 : index
    %c18_353 = arith.constant 18 : index
    %c3_354 = arith.constant 3 : index
    %502 = vector.load %arg11[%c0_352, %c18_353, %c3_354] : memref<2x22x22xf32, #tpu.memory_space<vmem>>, vector<2x1x16xf32>
    tpu.vector_store %arg11[%c0_352, %c18_353, %c3_354], %501 {strides = array<i32>} : memref<2x22x22xf32, #tpu.memory_space<vmem>>, vector<2x1x16xf32>,
    %cst_355 = arith.constant 0.000000e+00 : f32
    %503 = vector.broadcast %cst_355 : f32 to vector<16x16xf32>
    %c2_356 = arith.constant 2 : index
    %c0_357 = arith.constant 0 : index
    %504 = memref.load %arg9[%c2_356, %c0_357] : memref<3x6xf32, #tpu.memory_space<smem>>
    %505 = vector.broadcast %504 : f32 to vector<16x16xf32>
    %506 = arith.addf %503, %505 : vector<16x16xf32>
    %c0_358 = arith.constant 0 : index
    %c0_359 = arith.constant 0 : index
    %c0_360 = arith.constant 0 : index
    %507 = vector.load %arg11[%c0_358, %c0_359, %c0_360] : memref<2x22x22xf32, #tpu.memory_space<vmem>>, vector<1x22x16xf32>
    %508 = vector.shape_cast %507 : vector<1x22x16xf32> to vector<22x16xf32>
    %c2_361 = arith.constant 2 : index
    %c0_362 = arith.constant 0 : index
    %509 = memref.load %arg8[%c2_361, %c0_362] : memref<3x98xf32, #tpu.memory_space<smem>>
    %510 = vector.extract_strided_slice %508 {offsets = [0, 0], sizes = [16, 16], strides = [1, 1]} : vector<22x16xf32> to vector<16x16xf32>
    %511 = vector.broadcast %509 : f32 to vector<16x16xf32>
    %512 = arith.mulf %510, %511 : vector<16x16xf32>
    %513 = arith.addf %506, %512 : vector<16x16xf32>
    %c2_363 = arith.constant 2 : index
    %c7_364 = arith.constant 7 : index
    %514 = memref.load %arg8[%c2_363, %c7_364] : memref<3x98xf32, #tpu.memory_space<smem>>
    %515 = vector.extract_strided_slice %508 {offsets = [1, 0], sizes = [16, 16], strides = [1, 1]} : vector<22x16xf32> to vector<16x16xf32>
    %516 = vector.broadcast %514 : f32 to vector<16x16xf32>
    %517 = arith.mulf %515, %516 : vector<16x16xf32>
    %518 = arith.addf %513, %517 : vector<16x16xf32>
    %c2_365 = arith.constant 2 : index
    %c14_366 = arith.constant 14 : index
    %519 = memref.load %arg8[%c2_365, %c14_366] : memref<3x98xf32, #tpu.memory_space<smem>>
    %520 = vector.extract_strided_slice %508 {offsets = [2, 0], sizes = [16, 16], strides = [1, 1]} : vector<22x16xf32> to vector<16x16xf32>
    %521 = vector.broadcast %519 : f32 to vector<16x16xf32>
    %522 = arith.mulf %520, %521 : vector<16x16xf32>
    %523 = arith.addf %518, %522 : vector<16x16xf32>
    %c2_367 = arith.constant 2 : index
    %c21 = arith.constant 21 : index
    %524 = memref.load %arg8[%c2_367, %c21] : memref<3x98xf32, #tpu.memory_space<smem>>
    %525 = vector.extract_strided_slice %508 {offsets = [3, 0], sizes = [16, 16], strides = [1, 1]} : vector<22x16xf32> to vector<16x16xf32>
    %526 = vector.broadcast %524 : f32 to vector<16x16xf32>
    %527 = arith.mulf %525, %526 : vector<16x16xf32>
    %528 = arith.addf %523, %527 : vector<16x16xf32>
    %c2_368 = arith.constant 2 : index
    %c28 = arith.constant 28 : index
    %529 = memref.load %arg8[%c2_368, %c28] : memref<3x98xf32, #tpu.memory_space<smem>>
    %530 = vector.extract_strided_slice %508 {offsets = [4, 0], sizes = [16, 16], strides = [1, 1]} : vector<22x16xf32> to vector<16x16xf32>
    %531 = vector.broadcast %529 : f32 to vector<16x16xf32>
    %532 = arith.mulf %530, %531 : vector<16x16xf32>
    %533 = arith.addf %528, %532 : vector<16x16xf32>
    %c2_369 = arith.constant 2 : index
    %c35 = arith.constant 35 : index
    %534 = memref.load %arg8[%c2_369, %c35] : memref<3x98xf32, #tpu.memory_space<smem>>
    %535 = vector.extract_strided_slice %508 {offsets = [5, 0], sizes = [16, 16], strides = [1, 1]} : vector<22x16xf32> to vector<16x16xf32>
    %536 = vector.broadcast %534 : f32 to vector<16x16xf32>
    %537 = arith.mulf %535, %536 : vector<16x16xf32>
    %538 = arith.addf %533, %537 : vector<16x16xf32>
    %c2_370 = arith.constant 2 : index
    %c42 = arith.constant 42 : index
    %539 = memref.load %arg8[%c2_370, %c42] : memref<3x98xf32, #tpu.memory_space<smem>>
    %540 = vector.extract_strided_slice %508 {offsets = [6, 0], sizes = [16, 16], strides = [1, 1]} : vector<22x16xf32> to vector<16x16xf32>
    %541 = vector.broadcast %539 : f32 to vector<16x16xf32>
    %542 = arith.mulf %540, %541 : vector<16x16xf32>
    %543 = arith.addf %538, %542 : vector<16x16xf32>
    %c0_371 = arith.constant 0 : index
    %c0_372 = arith.constant 0 : index
    %c1_373 = arith.constant 1 : index
    %544 = vector.load %arg11[%c0_371, %c0_372, %c1_373] : memref<2x22x22xf32, #tpu.memory_space<vmem>>, vector<1x22x16xf32>
    %545 = vector.shape_cast %544 : vector<1x22x16xf32> to vector<22x16xf32>
    %c2_374 = arith.constant 2 : index
    %c1_375 = arith.constant 1 : index
    %546 = memref.load %arg8[%c2_374, %c1_375] : memref<3x98xf32, #tpu.memory_space<smem>>
    %547 = vector.extract_strided_slice %545 {offsets = [0, 0], sizes = [16, 16], strides = [1, 1]} : vector<22x16xf32> to vector<16x16xf32>
    %548 = vector.broadcast %546 : f32 to vector<16x16xf32>
    %549 = arith.mulf %547, %548 : vector<16x16xf32>
    %550 = arith.addf %543, %549 : vector<16x16xf32>
    %c2_376 = arith.constant 2 : index
    %c8_377 = arith.constant 8 : index
    %551 = memref.load %arg8[%c2_376, %c8_377] : memref<3x98xf32, #tpu.memory_space<smem>>
    %552 = vector.extract_strided_slice %545 {offsets = [1, 0], sizes = [16, 16], strides = [1, 1]} : vector<22x16xf32> to vector<16x16xf32>
    %553 = vector.broadcast %551 : f32 to vector<16x16xf32>
    %554 = arith.mulf %552, %553 : vector<16x16xf32>
    %555 = arith.addf %550, %554 : vector<16x16xf32>
    %c2_378 = arith.constant 2 : index
    %c15_379 = arith.constant 15 : index
    %556 = memref.load %arg8[%c2_378, %c15_379] : memref<3x98xf32, #tpu.memory_space<smem>>
    %557 = vector.extract_strided_slice %545 {offsets = [2, 0], sizes = [16, 16], strides = [1, 1]} : vector<22x16xf32> to vector<16x16xf32>
    %558 = vector.broadcast %556 : f32 to vector<16x16xf32>
    %559 = arith.mulf %557, %558 : vector<16x16xf32>
    %560 = arith.addf %555, %559 : vector<16x16xf32>
    %c2_380 = arith.constant 2 : index
    %c22 = arith.constant 22 : index
    %561 = memref.load %arg8[%c2_380, %c22] : memref<3x98xf32, #tpu.memory_space<smem>>
    %562 = vector.extract_strided_slice %545 {offsets = [3, 0], sizes = [16, 16], strides = [1, 1]} : vector<22x16xf32> to vector<16x16xf32>
    %563 = vector.broadcast %561 : f32 to vector<16x16xf32>
    %564 = arith.mulf %562, %563 : vector<16x16xf32>
    %565 = arith.addf %560, %564 : vector<16x16xf32>
    %c2_381 = arith.constant 2 : index
    %c29 = arith.constant 29 : index
    %566 = memref.load %arg8[%c2_381, %c29] : memref<3x98xf32, #tpu.memory_space<smem>>
    %567 = vector.extract_strided_slice %545 {offsets = [4, 0], sizes = [16, 16], strides = [1, 1]} : vector<22x16xf32> to vector<16x16xf32>
    %568 = vector.broadcast %566 : f32 to vector<16x16xf32>
    %569 = arith.mulf %567, %568 : vector<16x16xf32>
    %570 = arith.addf %565, %569 : vector<16x16xf32>
    %c2_382 = arith.constant 2 : index
    %c36 = arith.constant 36 : index
    %571 = memref.load %arg8[%c2_382, %c36] : memref<3x98xf32, #tpu.memory_space<smem>>
    %572 = vector.extract_strided_slice %545 {offsets = [5, 0], sizes = [16, 16], strides = [1, 1]} : vector<22x16xf32> to vector<16x16xf32>
    %573 = vector.broadcast %571 : f32 to vector<16x16xf32>
    %574 = arith.mulf %572, %573 : vector<16x16xf32>
    %575 = arith.addf %570, %574 : vector<16x16xf32>
    %c2_383 = arith.constant 2 : index
    %c43 = arith.constant 43 : index
    %576 = memref.load %arg8[%c2_383, %c43] : memref<3x98xf32, #tpu.memory_space<smem>>
    %577 = vector.extract_strided_slice %545 {offsets = [6, 0], sizes = [16, 16], strides = [1, 1]} : vector<22x16xf32> to vector<16x16xf32>
    %578 = vector.broadcast %576 : f32 to vector<16x16xf32>
    %579 = arith.mulf %577, %578 : vector<16x16xf32>
    %580 = arith.addf %575, %579 : vector<16x16xf32>
    %c0_384 = arith.constant 0 : index
    %c0_385 = arith.constant 0 : index
    %c2_386 = arith.constant 2 : index
    %581 = vector.load %arg11[%c0_384, %c0_385, %c2_386] : memref<2x22x22xf32, #tpu.memory_space<vmem>>, vector<1x22x16xf32>
    %582 = vector.shape_cast %581 : vector<1x22x16xf32> to vector<22x16xf32>
    %c2_387 = arith.constant 2 : index
    %c2_388 = arith.constant 2 : index
    %583 = memref.load %arg8[%c2_387, %c2_388] : memref<3x98xf32, #tpu.memory_space<smem>>
    %584 = vector.extract_strided_slice %582 {offsets = [0, 0], sizes = [16, 16], strides = [1, 1]} : vector<22x16xf32> to vector<16x16xf32>
    %585 = vector.broadcast %583 : f32 to vector<16x16xf32>
    %586 = arith.mulf %584, %585 : vector<16x16xf32>
    %587 = arith.addf %580, %586 : vector<16x16xf32>
    %c2_389 = arith.constant 2 : index
    %c9_390 = arith.constant 9 : index
    %588 = memref.load %arg8[%c2_389, %c9_390] : memref<3x98xf32, #tpu.memory_space<smem>>
    %589 = vector.extract_strided_slice %582 {offsets = [1, 0], sizes = [16, 16], strides = [1, 1]} : vector<22x16xf32> to vector<16x16xf32>
    %590 = vector.broadcast %588 : f32 to vector<16x16xf32>
    %591 = arith.mulf %589, %590 : vector<16x16xf32>
    %592 = arith.addf %587, %591 : vector<16x16xf32>
    %c2_391 = arith.constant 2 : index
    %c16_392 = arith.constant 16 : index
    %593 = memref.load %arg8[%c2_391, %c16_392] : memref<3x98xf32, #tpu.memory_space<smem>>
    %594 = vector.extract_strided_slice %582 {offsets = [2, 0], sizes = [16, 16], strides = [1, 1]} : vector<22x16xf32> to vector<16x16xf32>
    %595 = vector.broadcast %593 : f32 to vector<16x16xf32>
    %596 = arith.mulf %594, %595 : vector<16x16xf32>
    %597 = arith.addf %592, %596 : vector<16x16xf32>
    %c2_393 = arith.constant 2 : index
    %c23 = arith.constant 23 : index
    %598 = memref.load %arg8[%c2_393, %c23] : memref<3x98xf32, #tpu.memory_space<smem>>
    %599 = vector.extract_strided_slice %582 {offsets = [3, 0], sizes = [16, 16], strides = [1, 1]} : vector<22x16xf32> to vector<16x16xf32>
    %600 = vector.broadcast %598 : f32 to vector<16x16xf32>
    %601 = arith.mulf %599, %600 : vector<16x16xf32>
    %602 = arith.addf %597, %601 : vector<16x16xf32>
    %c2_394 = arith.constant 2 : index
    %c30 = arith.constant 30 : index
    %603 = memref.load %arg8[%c2_394, %c30] : memref<3x98xf32, #tpu.memory_space<smem>>
    %604 = vector.extract_strided_slice %582 {offsets = [4, 0], sizes = [16, 16], strides = [1, 1]} : vector<22x16xf32> to vector<16x16xf32>
    %605 = vector.broadcast %603 : f32 to vector<16x16xf32>
    %606 = arith.mulf %604, %605 : vector<16x16xf32>
    %607 = arith.addf %602, %606 : vector<16x16xf32>
    %c2_395 = arith.constant 2 : index
    %c37 = arith.constant 37 : index
    %608 = memref.load %arg8[%c2_395, %c37] : memref<3x98xf32, #tpu.memory_space<smem>>
    %609 = vector.extract_strided_slice %582 {offsets = [5, 0], sizes = [16, 16], strides = [1, 1]} : vector<22x16xf32> to vector<16x16xf32>
    %610 = vector.broadcast %608 : f32 to vector<16x16xf32>
    %611 = arith.mulf %609, %610 : vector<16x16xf32>
    %612 = arith.addf %607, %611 : vector<16x16xf32>
    %c2_396 = arith.constant 2 : index
    %c44 = arith.constant 44 : index
    %613 = memref.load %arg8[%c2_396, %c44] : memref<3x98xf32, #tpu.memory_space<smem>>
    %614 = vector.extract_strided_slice %582 {offsets = [6, 0], sizes = [16, 16], strides = [1, 1]} : vector<22x16xf32> to vector<16x16xf32>
    %615 = vector.broadcast %613 : f32 to vector<16x16xf32>
    %616 = arith.mulf %614, %615 : vector<16x16xf32>
    %617 = arith.addf %612, %616 : vector<16x16xf32>
    %c0_397 = arith.constant 0 : index
    %c0_398 = arith.constant 0 : index
    %c3_399 = arith.constant 3 : index
    %618 = vector.load %arg11[%c0_397, %c0_398, %c3_399] : memref<2x22x22xf32, #tpu.memory_space<vmem>>, vector<1x22x16xf32>
    %619 = vector.shape_cast %618 : vector<1x22x16xf32> to vector<22x16xf32>
    %c2_400 = arith.constant 2 : index
    %c3_401 = arith.constant 3 : index
    %620 = memref.load %arg8[%c2_400, %c3_401] : memref<3x98xf32, #tpu.memory_space<smem>>
    %621 = vector.extract_strided_slice %619 {offsets = [0, 0], sizes = [16, 16], strides = [1, 1]} : vector<22x16xf32> to vector<16x16xf32>
    %622 = vector.broadcast %620 : f32 to vector<16x16xf32>
    %623 = arith.mulf %621, %622 : vector<16x16xf32>
    %624 = arith.addf %617, %623 : vector<16x16xf32>
    %c2_402 = arith.constant 2 : index
    %c10_403 = arith.constant 10 : index
    %625 = memref.load %arg8[%c2_402, %c10_403] : memref<3x98xf32, #tpu.memory_space<smem>>
    %626 = vector.extract_strided_slice %619 {offsets = [1, 0], sizes = [16, 16], strides = [1, 1]} : vector<22x16xf32> to vector<16x16xf32>
    %627 = vector.broadcast %625 : f32 to vector<16x16xf32>
    %628 = arith.mulf %626, %627 : vector<16x16xf32>
    %629 = arith.addf %624, %628 : vector<16x16xf32>
    %c2_404 = arith.constant 2 : index
    %c17_405 = arith.constant 17 : index
    %630 = memref.load %arg8[%c2_404, %c17_405] : memref<3x98xf32, #tpu.memory_space<smem>>
    %631 = vector.extract_strided_slice %619 {offsets = [2, 0], sizes = [16, 16], strides = [1, 1]} : vector<22x16xf32> to vector<16x16xf32>
    %632 = vector.broadcast %630 : f32 to vector<16x16xf32>
    %633 = arith.mulf %631, %632 : vector<16x16xf32>
    %634 = arith.addf %629, %633 : vector<16x16xf32>
    %c2_406 = arith.constant 2 : index
    %c24 = arith.constant 24 : index
    %635 = memref.load %arg8[%c2_406, %c24] : memref<3x98xf32, #tpu.memory_space<smem>>
    %636 = vector.extract_strided_slice %619 {offsets = [3, 0], sizes = [16, 16], strides = [1, 1]} : vector<22x16xf32> to vector<16x16xf32>
    %637 = vector.broadcast %635 : f32 to vector<16x16xf32>
    %638 = arith.mulf %636, %637 : vector<16x16xf32>
    %639 = arith.addf %634, %638 : vector<16x16xf32>
    %c2_407 = arith.constant 2 : index
    %c31 = arith.constant 31 : index
    %640 = memref.load %arg8[%c2_407, %c31] : memref<3x98xf32, #tpu.memory_space<smem>>
    %641 = vector.extract_strided_slice %619 {offsets = [4, 0], sizes = [16, 16], strides = [1, 1]} : vector<22x16xf32> to vector<16x16xf32>
    %642 = vector.broadcast %640 : f32 to vector<16x16xf32>
    %643 = arith.mulf %641, %642 : vector<16x16xf32>
    %644 = arith.addf %639, %643 : vector<16x16xf32>
    %c2_408 = arith.constant 2 : index
    %c38 = arith.constant 38 : index
    %645 = memref.load %arg8[%c2_408, %c38] : memref<3x98xf32, #tpu.memory_space<smem>>
    %646 = vector.extract_strided_slice %619 {offsets = [5, 0], sizes = [16, 16], strides = [1, 1]} : vector<22x16xf32> to vector<16x16xf32>
    %647 = vector.broadcast %645 : f32 to vector<16x16xf32>
    %648 = arith.mulf %646, %647 : vector<16x16xf32>
    %649 = arith.addf %644, %648 : vector<16x16xf32>
    %c2_409 = arith.constant 2 : index
    %c45 = arith.constant 45 : index
    %650 = memref.load %arg8[%c2_409, %c45] : memref<3x98xf32, #tpu.memory_space<smem>>
    %651 = vector.extract_strided_slice %619 {offsets = [6, 0], sizes = [16, 16], strides = [1, 1]} : vector<22x16xf32> to vector<16x16xf32>
    %652 = vector.broadcast %650 : f32 to vector<16x16xf32>
    %653 = arith.mulf %651, %652 : vector<16x16xf32>
    %654 = arith.addf %649, %653 : vector<16x16xf32>
    %c0_410 = arith.constant 0 : index
    %c0_411 = arith.constant 0 : index
    %c4_412 = arith.constant 4 : index
    %655 = vector.load %arg11[%c0_410, %c0_411, %c4_412] : memref<2x22x22xf32, #tpu.memory_space<vmem>>, vector<1x22x16xf32>
    %656 = vector.shape_cast %655 : vector<1x22x16xf32> to vector<22x16xf32>
    %c2_413 = arith.constant 2 : index
    %c4_414 = arith.constant 4 : index
    %657 = memref.load %arg8[%c2_413, %c4_414] : memref<3x98xf32, #tpu.memory_space<smem>>
    %658 = vector.extract_strided_slice %656 {offsets = [0, 0], sizes = [16, 16], strides = [1, 1]} : vector<22x16xf32> to vector<16x16xf32>
    %659 = vector.broadcast %657 : f32 to vector<16x16xf32>
    %660 = arith.mulf %658, %659 : vector<16x16xf32>
    %661 = arith.addf %654, %660 : vector<16x16xf32>
    %c2_415 = arith.constant 2 : index
    %c11_416 = arith.constant 11 : index
    %662 = memref.load %arg8[%c2_415, %c11_416] : memref<3x98xf32, #tpu.memory_space<smem>>
    %663 = vector.extract_strided_slice %656 {offsets = [1, 0], sizes = [16, 16], strides = [1, 1]} : vector<22x16xf32> to vector<16x16xf32>
    %664 = vector.broadcast %662 : f32 to vector<16x16xf32>
    %665 = arith.mulf %663, %664 : vector<16x16xf32>
    %666 = arith.addf %661, %665 : vector<16x16xf32>
    %c2_417 = arith.constant 2 : index
    %c18_418 = arith.constant 18 : index
    %667 = memref.load %arg8[%c2_417, %c18_418] : memref<3x98xf32, #tpu.memory_space<smem>>
    %668 = vector.extract_strided_slice %656 {offsets = [2, 0], sizes = [16, 16], strides = [1, 1]} : vector<22x16xf32> to vector<16x16xf32>
    %669 = vector.broadcast %667 : f32 to vector<16x16xf32>
    %670 = arith.mulf %668, %669 : vector<16x16xf32>
    %671 = arith.addf %666, %670 : vector<16x16xf32>
    %c2_419 = arith.constant 2 : index
    %c25 = arith.constant 25 : index
    %672 = memref.load %arg8[%c2_419, %c25] : memref<3x98xf32, #tpu.memory_space<smem>>
    %673 = vector.extract_strided_slice %656 {offsets = [3, 0], sizes = [16, 16], strides = [1, 1]} : vector<22x16xf32> to vector<16x16xf32>
    %674 = vector.broadcast %672 : f32 to vector<16x16xf32>
    %675 = arith.mulf %673, %674 : vector<16x16xf32>
    %676 = arith.addf %671, %675 : vector<16x16xf32>
    %c2_420 = arith.constant 2 : index
    %c32_421 = arith.constant 32 : index
    %677 = memref.load %arg8[%c2_420, %c32_421] : memref<3x98xf32, #tpu.memory_space<smem>>
    %678 = vector.extract_strided_slice %656 {offsets = [4, 0], sizes = [16, 16], strides = [1, 1]} : vector<22x16xf32> to vector<16x16xf32>
    %679 = vector.broadcast %677 : f32 to vector<16x16xf32>
    %680 = arith.mulf %678, %679 : vector<16x16xf32>
    %681 = arith.addf %676, %680 : vector<16x16xf32>
    %c2_422 = arith.constant 2 : index
    %c39 = arith.constant 39 : index
    %682 = memref.load %arg8[%c2_422, %c39] : memref<3x98xf32, #tpu.memory_space<smem>>
    %683 = vector.extract_strided_slice %656 {offsets = [5, 0], sizes = [16, 16], strides = [1, 1]} : vector<22x16xf32> to vector<16x16xf32>
    %684 = vector.broadcast %682 : f32 to vector<16x16xf32>
    %685 = arith.mulf %683, %684 : vector<16x16xf32>
    %686 = arith.addf %681, %685 : vector<16x16xf32>
    %c2_423 = arith.constant 2 : index
    %c46 = arith.constant 46 : index
    %687 = memref.load %arg8[%c2_423, %c46] : memref<3x98xf32, #tpu.memory_space<smem>>
    %688 = vector.extract_strided_slice %656 {offsets = [6, 0], sizes = [16, 16], strides = [1, 1]} : vector<22x16xf32> to vector<16x16xf32>
    %689 = vector.broadcast %687 : f32 to vector<16x16xf32>
    %690 = arith.mulf %688, %689 : vector<16x16xf32>
    %691 = arith.addf %686, %690 : vector<16x16xf32>
    %c0_424 = arith.constant 0 : index
    %c0_425 = arith.constant 0 : index
    %c5_426 = arith.constant 5 : index
    %692 = vector.load %arg11[%c0_424, %c0_425, %c5_426] : memref<2x22x22xf32, #tpu.memory_space<vmem>>, vector<1x22x16xf32>
    %693 = vector.shape_cast %692 : vector<1x22x16xf32> to vector<22x16xf32>
    %c2_427 = arith.constant 2 : index
    %c5_428 = arith.constant 5 : index
    %694 = memref.load %arg8[%c2_427, %c5_428] : memref<3x98xf32, #tpu.memory_space<smem>>
    %695 = vector.extract_strided_slice %693 {offsets = [0, 0], sizes = [16, 16], strides = [1, 1]} : vector<22x16xf32> to vector<16x16xf32>
    %696 = vector.broadcast %694 : f32 to vector<16x16xf32>
    %697 = arith.mulf %695, %696 : vector<16x16xf32>
    %698 = arith.addf %691, %697 : vector<16x16xf32>
    %c2_429 = arith.constant 2 : index
    %c12_430 = arith.constant 12 : index
    %699 = memref.load %arg8[%c2_429, %c12_430] : memref<3x98xf32, #tpu.memory_space<smem>>
    %700 = vector.extract_strided_slice %693 {offsets = [1, 0], sizes = [16, 16], strides = [1, 1]} : vector<22x16xf32> to vector<16x16xf32>
    %701 = vector.broadcast %699 : f32 to vector<16x16xf32>
    %702 = arith.mulf %700, %701 : vector<16x16xf32>
    %703 = arith.addf %698, %702 : vector<16x16xf32>
    %c2_431 = arith.constant 2 : index
    %c19 = arith.constant 19 : index
    %704 = memref.load %arg8[%c2_431, %c19] : memref<3x98xf32, #tpu.memory_space<smem>>
    %705 = vector.extract_strided_slice %693 {offsets = [2, 0], sizes = [16, 16], strides = [1, 1]} : vector<22x16xf32> to vector<16x16xf32>
    %706 = vector.broadcast %704 : f32 to vector<16x16xf32>
    %707 = arith.mulf %705, %706 : vector<16x16xf32>
    %708 = arith.addf %703, %707 : vector<16x16xf32>
    %c2_432 = arith.constant 2 : index
    %c26 = arith.constant 26 : index
    %709 = memref.load %arg8[%c2_432, %c26] : memref<3x98xf32, #tpu.memory_space<smem>>
    %710 = vector.extract_strided_slice %693 {offsets = [3, 0], sizes = [16, 16], strides = [1, 1]} : vector<22x16xf32> to vector<16x16xf32>
    %711 = vector.broadcast %709 : f32 to vector<16x16xf32>
    %712 = arith.mulf %710, %711 : vector<16x16xf32>
    %713 = arith.addf %708, %712 : vector<16x16xf32>
    %c2_433 = arith.constant 2 : index
    %c33 = arith.constant 33 : index
    %714 = memref.load %arg8[%c2_433, %c33] : memref<3x98xf32, #tpu.memory_space<smem>>
    %715 = vector.extract_strided_slice %693 {offsets = [4, 0], sizes = [16, 16], strides = [1, 1]} : vector<22x16xf32> to vector<16x16xf32>
    %716 = vector.broadcast %714 : f32 to vector<16x16xf32>
    %717 = arith.mulf %715, %716 : vector<16x16xf32>
    %718 = arith.addf %713, %717 : vector<16x16xf32>
    %c2_434 = arith.constant 2 : index
    %c40 = arith.constant 40 : index
    %719 = memref.load %arg8[%c2_434, %c40] : memref<3x98xf32, #tpu.memory_space<smem>>
    %720 = vector.extract_strided_slice %693 {offsets = [5, 0], sizes = [16, 16], strides = [1, 1]} : vector<22x16xf32> to vector<16x16xf32>
    %721 = vector.broadcast %719 : f32 to vector<16x16xf32>
    %722 = arith.mulf %720, %721 : vector<16x16xf32>
    %723 = arith.addf %718, %722 : vector<16x16xf32>
    %c2_435 = arith.constant 2 : index
    %c47 = arith.constant 47 : index
    %724 = memref.load %arg8[%c2_435, %c47] : memref<3x98xf32, #tpu.memory_space<smem>>
    %725 = vector.extract_strided_slice %693 {offsets = [6, 0], sizes = [16, 16], strides = [1, 1]} : vector<22x16xf32> to vector<16x16xf32>
    %726 = vector.broadcast %724 : f32 to vector<16x16xf32>
    %727 = arith.mulf %725, %726 : vector<16x16xf32>
    %728 = arith.addf %723, %727 : vector<16x16xf32>
    %c0_436 = arith.constant 0 : index
    %c0_437 = arith.constant 0 : index
    %c6_438 = arith.constant 6 : index
    %729 = vector.load %arg11[%c0_436, %c0_437, %c6_438] : memref<2x22x22xf32, #tpu.memory_space<vmem>>, vector<1x22x16xf32>
    %730 = vector.shape_cast %729 : vector<1x22x16xf32> to vector<22x16xf32>
    %c2_439 = arith.constant 2 : index
    %c6_440 = arith.constant 6 : index
    %731 = memref.load %arg8[%c2_439, %c6_440] : memref<3x98xf32, #tpu.memory_space<smem>>
    %732 = vector.extract_strided_slice %730 {offsets = [0, 0], sizes = [16, 16], strides = [1, 1]} : vector<22x16xf32> to vector<16x16xf32>
    %733 = vector.broadcast %731 : f32 to vector<16x16xf32>
    %734 = arith.mulf %732, %733 : vector<16x16xf32>
    %735 = arith.addf %728, %734 : vector<16x16xf32>
    %c2_441 = arith.constant 2 : index
    %c13_442 = arith.constant 13 : index
    %736 = memref.load %arg8[%c2_441, %c13_442] : memref<3x98xf32, #tpu.memory_space<smem>>
    %737 = vector.extract_strided_slice %730 {offsets = [1, 0], sizes = [16, 16], strides = [1, 1]} : vector<22x16xf32> to vector<16x16xf32>
    %738 = vector.broadcast %736 : f32 to vector<16x16xf32>
    %739 = arith.mulf %737, %738 : vector<16x16xf32>
    %740 = arith.addf %735, %739 : vector<16x16xf32>
    %c2_443 = arith.constant 2 : index
    %c20 = arith.constant 20 : index
    %741 = memref.load %arg8[%c2_443, %c20] : memref<3x98xf32, #tpu.memory_space<smem>>
    %742 = vector.extract_strided_slice %730 {offsets = [2, 0], sizes = [16, 16], strides = [1, 1]} : vector<22x16xf32> to vector<16x16xf32>
    %743 = vector.broadcast %741 : f32 to vector<16x16xf32>
    %744 = arith.mulf %742, %743 : vector<16x16xf32>
    %745 = arith.addf %740, %744 : vector<16x16xf32>
    %c2_444 = arith.constant 2 : index
    %c27 = arith.constant 27 : index
    %746 = memref.load %arg8[%c2_444, %c27] : memref<3x98xf32, #tpu.memory_space<smem>>
    %747 = vector.extract_strided_slice %730 {offsets = [3, 0], sizes = [16, 16], strides = [1, 1]} : vector<22x16xf32> to vector<16x16xf32>
    %748 = vector.broadcast %746 : f32 to vector<16x16xf32>
    %749 = arith.mulf %747, %748 : vector<16x16xf32>
    %750 = arith.addf %745, %749 : vector<16x16xf32>
    %c2_445 = arith.constant 2 : index
    %c34 = arith.constant 34 : index
    %751 = memref.load %arg8[%c2_445, %c34] : memref<3x98xf32, #tpu.memory_space<smem>>
    %752 = vector.extract_strided_slice %730 {offsets = [4, 0], sizes = [16, 16], strides = [1, 1]} : vector<22x16xf32> to vector<16x16xf32>
    %753 = vector.broadcast %751 : f32 to vector<16x16xf32>
    %754 = arith.mulf %752, %753 : vector<16x16xf32>
    %755 = arith.addf %750, %754 : vector<16x16xf32>
    %c2_446 = arith.constant 2 : index
    %c41 = arith.constant 41 : index
    %756 = memref.load %arg8[%c2_446, %c41] : memref<3x98xf32, #tpu.memory_space<smem>>
    %757 = vector.extract_strided_slice %730 {offsets = [5, 0], sizes = [16, 16], strides = [1, 1]} : vector<22x16xf32> to vector<16x16xf32>
    %758 = vector.broadcast %756 : f32 to vector<16x16xf32>
    %759 = arith.mulf %757, %758 : vector<16x16xf32>
    %760 = arith.addf %755, %759 : vector<16x16xf32>
    %c2_447 = arith.constant 2 : index
    %c48_448 = arith.constant 48 : index
    %761 = memref.load %arg8[%c2_447, %c48_448] : memref<3x98xf32, #tpu.memory_space<smem>>
    %762 = vector.extract_strided_slice %730 {offsets = [6, 0], sizes = [16, 16], strides = [1, 1]} : vector<22x16xf32> to vector<16x16xf32>
    %763 = vector.broadcast %761 : f32 to vector<16x16xf32>
    %764 = arith.mulf %762, %763 : vector<16x16xf32>
    %765 = arith.addf %760, %764 : vector<16x16xf32>
    %c1_449 = arith.constant 1 : index
    %c0_450 = arith.constant 0 : index
    %c0_451 = arith.constant 0 : index
    %766 = vector.load %arg11[%c1_449, %c0_450, %c0_451] : memref<2x22x22xf32, #tpu.memory_space<vmem>>, vector<1x22x16xf32>
    %767 = vector.shape_cast %766 : vector<1x22x16xf32> to vector<22x16xf32>
    %c2_452 = arith.constant 2 : index
    %c49 = arith.constant 49 : index
    %768 = memref.load %arg8[%c2_452, %c49] : memref<3x98xf32, #tpu.memory_space<smem>>
    %769 = vector.extract_strided_slice %767 {offsets = [0, 0], sizes = [16, 16], strides = [1, 1]} : vector<22x16xf32> to vector<16x16xf32>
    %770 = vector.broadcast %768 : f32 to vector<16x16xf32>
    %771 = arith.mulf %769, %770 : vector<16x16xf32>
    %772 = arith.addf %765, %771 : vector<16x16xf32>
    %c2_453 = arith.constant 2 : index
    %c56 = arith.constant 56 : index
    %773 = memref.load %arg8[%c2_453, %c56] : memref<3x98xf32, #tpu.memory_space<smem>>
    %774 = vector.extract_strided_slice %767 {offsets = [1, 0], sizes = [16, 16], strides = [1, 1]} : vector<22x16xf32> to vector<16x16xf32>
    %775 = vector.broadcast %773 : f32 to vector<16x16xf32>
    %776 = arith.mulf %774, %775 : vector<16x16xf32>
    %777 = arith.addf %772, %776 : vector<16x16xf32>
    %c2_454 = arith.constant 2 : index
    %c63 = arith.constant 63 : index
    %778 = memref.load %arg8[%c2_454, %c63] : memref<3x98xf32, #tpu.memory_space<smem>>
    %779 = vector.extract_strided_slice %767 {offsets = [2, 0], sizes = [16, 16], strides = [1, 1]} : vector<22x16xf32> to vector<16x16xf32>
    %780 = vector.broadcast %778 : f32 to vector<16x16xf32>
    %781 = arith.mulf %779, %780 : vector<16x16xf32>
    %782 = arith.addf %777, %781 : vector<16x16xf32>
    %c2_455 = arith.constant 2 : index
    %c70 = arith.constant 70 : index
    %783 = memref.load %arg8[%c2_455, %c70] : memref<3x98xf32, #tpu.memory_space<smem>>
    %784 = vector.extract_strided_slice %767 {offsets = [3, 0], sizes = [16, 16], strides = [1, 1]} : vector<22x16xf32> to vector<16x16xf32>
    %785 = vector.broadcast %783 : f32 to vector<16x16xf32>
    %786 = arith.mulf %784, %785 : vector<16x16xf32>
    %787 = arith.addf %782, %786 : vector<16x16xf32>
    %c2_456 = arith.constant 2 : index
    %c77 = arith.constant 77 : index
    %788 = memref.load %arg8[%c2_456, %c77] : memref<3x98xf32, #tpu.memory_space<smem>>
    %789 = vector.extract_strided_slice %767 {offsets = [4, 0], sizes = [16, 16], strides = [1, 1]} : vector<22x16xf32> to vector<16x16xf32>
    %790 = vector.broadcast %788 : f32 to vector<16x16xf32>
    %791 = arith.mulf %789, %790 : vector<16x16xf32>
    %792 = arith.addf %787, %791 : vector<16x16xf32>
    %c2_457 = arith.constant 2 : index
    %c84 = arith.constant 84 : index
    %793 = memref.load %arg8[%c2_457, %c84] : memref<3x98xf32, #tpu.memory_space<smem>>
    %794 = vector.extract_strided_slice %767 {offsets = [5, 0], sizes = [16, 16], strides = [1, 1]} : vector<22x16xf32> to vector<16x16xf32>
    %795 = vector.broadcast %793 : f32 to vector<16x16xf32>
    %796 = arith.mulf %794, %795 : vector<16x16xf32>
    %797 = arith.addf %792, %796 : vector<16x16xf32>
    %c2_458 = arith.constant 2 : index
    %c91 = arith.constant 91 : index
    %798 = memref.load %arg8[%c2_458, %c91] : memref<3x98xf32, #tpu.memory_space<smem>>
    %799 = vector.extract_strided_slice %767 {offsets = [6, 0], sizes = [16, 16], strides = [1, 1]} : vector<22x16xf32> to vector<16x16xf32>
    %800 = vector.broadcast %798 : f32 to vector<16x16xf32>
    %801 = arith.mulf %799, %800 : vector<16x16xf32>
    %802 = arith.addf %797, %801 : vector<16x16xf32>
    %c1_459 = arith.constant 1 : index
    %c0_460 = arith.constant 0 : index
    %c1_461 = arith.constant 1 : index
    %803 = vector.load %arg11[%c1_459, %c0_460, %c1_461] : memref<2x22x22xf32, #tpu.memory_space<vmem>>, vector<1x22x16xf32>
    %804 = vector.shape_cast %803 : vector<1x22x16xf32> to vector<22x16xf32>
    %c2_462 = arith.constant 2 : index
    %c50 = arith.constant 50 : index
    %805 = memref.load %arg8[%c2_462, %c50] : memref<3x98xf32, #tpu.memory_space<smem>>
    %806 = vector.extract_strided_slice %804 {offsets = [0, 0], sizes = [16, 16], strides = [1, 1]} : vector<22x16xf32> to vector<16x16xf32>
    %807 = vector.broadcast %805 : f32 to vector<16x16xf32>
    %808 = arith.mulf %806, %807 : vector<16x16xf32>
    %809 = arith.addf %802, %808 : vector<16x16xf32>
    %c2_463 = arith.constant 2 : index
    %c57 = arith.constant 57 : index
    %810 = memref.load %arg8[%c2_463, %c57] : memref<3x98xf32, #tpu.memory_space<smem>>
    %811 = vector.extract_strided_slice %804 {offsets = [1, 0], sizes = [16, 16], strides = [1, 1]} : vector<22x16xf32> to vector<16x16xf32>
    %812 = vector.broadcast %810 : f32 to vector<16x16xf32>
    %813 = arith.mulf %811, %812 : vector<16x16xf32>
    %814 = arith.addf %809, %813 : vector<16x16xf32>
    %c2_464 = arith.constant 2 : index
    %c64_465 = arith.constant 64 : index
    %815 = memref.load %arg8[%c2_464, %c64_465] : memref<3x98xf32, #tpu.memory_space<smem>>
    %816 = vector.extract_strided_slice %804 {offsets = [2, 0], sizes = [16, 16], strides = [1, 1]} : vector<22x16xf32> to vector<16x16xf32>
    %817 = vector.broadcast %815 : f32 to vector<16x16xf32>
    %818 = arith.mulf %816, %817 : vector<16x16xf32>
    %819 = arith.addf %814, %818 : vector<16x16xf32>
    %c2_466 = arith.constant 2 : index
    %c71 = arith.constant 71 : index
    %820 = memref.load %arg8[%c2_466, %c71] : memref<3x98xf32, #tpu.memory_space<smem>>
    %821 = vector.extract_strided_slice %804 {offsets = [3, 0], sizes = [16, 16], strides = [1, 1]} : vector<22x16xf32> to vector<16x16xf32>
    %822 = vector.broadcast %820 : f32 to vector<16x16xf32>
    %823 = arith.mulf %821, %822 : vector<16x16xf32>
    %824 = arith.addf %819, %823 : vector<16x16xf32>
    %c2_467 = arith.constant 2 : index
    %c78 = arith.constant 78 : index
    %825 = memref.load %arg8[%c2_467, %c78] : memref<3x98xf32, #tpu.memory_space<smem>>
    %826 = vector.extract_strided_slice %804 {offsets = [4, 0], sizes = [16, 16], strides = [1, 1]} : vector<22x16xf32> to vector<16x16xf32>
    %827 = vector.broadcast %825 : f32 to vector<16x16xf32>
    %828 = arith.mulf %826, %827 : vector<16x16xf32>
    %829 = arith.addf %824, %828 : vector<16x16xf32>
    %c2_468 = arith.constant 2 : index
    %c85 = arith.constant 85 : index
    %830 = memref.load %arg8[%c2_468, %c85] : memref<3x98xf32, #tpu.memory_space<smem>>
    %831 = vector.extract_strided_slice %804 {offsets = [5, 0], sizes = [16, 16], strides = [1, 1]} : vector<22x16xf32> to vector<16x16xf32>
    %832 = vector.broadcast %830 : f32 to vector<16x16xf32>
    %833 = arith.mulf %831, %832 : vector<16x16xf32>
    %834 = arith.addf %829, %833 : vector<16x16xf32>
    %c2_469 = arith.constant 2 : index
    %c92 = arith.constant 92 : index
    %835 = memref.load %arg8[%c2_469, %c92] : memref<3x98xf32, #tpu.memory_space<smem>>
    %836 = vector.extract_strided_slice %804 {offsets = [6, 0], sizes = [16, 16], strides = [1, 1]} : vector<22x16xf32> to vector<16x16xf32>
    %837 = vector.broadcast %835 : f32 to vector<16x16xf32>
    %838 = arith.mulf %836, %837 : vector<16x16xf32>
    %839 = arith.addf %834, %838 : vector<16x16xf32>
    %c1_470 = arith.constant 1 : index
    %c0_471 = arith.constant 0 : index
    %c2_472 = arith.constant 2 : index
    %840 = vector.load %arg11[%c1_470, %c0_471, %c2_472] : memref<2x22x22xf32, #tpu.memory_space<vmem>>, vector<1x22x16xf32>
    %841 = vector.shape_cast %840 : vector<1x22x16xf32> to vector<22x16xf32>
    %c2_473 = arith.constant 2 : index
    %c51 = arith.constant 51 : index
    %842 = memref.load %arg8[%c2_473, %c51] : memref<3x98xf32, #tpu.memory_space<smem>>
    %843 = vector.extract_strided_slice %841 {offsets = [0, 0], sizes = [16, 16], strides = [1, 1]} : vector<22x16xf32> to vector<16x16xf32>
    %844 = vector.broadcast %842 : f32 to vector<16x16xf32>
    %845 = arith.mulf %843, %844 : vector<16x16xf32>
    %846 = arith.addf %839, %845 : vector<16x16xf32>
    %c2_474 = arith.constant 2 : index
    %c58 = arith.constant 58 : index
    %847 = memref.load %arg8[%c2_474, %c58] : memref<3x98xf32, #tpu.memory_space<smem>>
    %848 = vector.extract_strided_slice %841 {offsets = [1, 0], sizes = [16, 16], strides = [1, 1]} : vector<22x16xf32> to vector<16x16xf32>
    %849 = vector.broadcast %847 : f32 to vector<16x16xf32>
    %850 = arith.mulf %848, %849 : vector<16x16xf32>
    %851 = arith.addf %846, %850 : vector<16x16xf32>
    %c2_475 = arith.constant 2 : index
    %c65 = arith.constant 65 : index
    %852 = memref.load %arg8[%c2_475, %c65] : memref<3x98xf32, #tpu.memory_space<smem>>
    %853 = vector.extract_strided_slice %841 {offsets = [2, 0], sizes = [16, 16], strides = [1, 1]} : vector<22x16xf32> to vector<16x16xf32>
    %854 = vector.broadcast %852 : f32 to vector<16x16xf32>
    %855 = arith.mulf %853, %854 : vector<16x16xf32>
    %856 = arith.addf %851, %855 : vector<16x16xf32>
    %c2_476 = arith.constant 2 : index
    %c72 = arith.constant 72 : index
    %857 = memref.load %arg8[%c2_476, %c72] : memref<3x98xf32, #tpu.memory_space<smem>>
    %858 = vector.extract_strided_slice %841 {offsets = [3, 0], sizes = [16, 16], strides = [1, 1]} : vector<22x16xf32> to vector<16x16xf32>
    %859 = vector.broadcast %857 : f32 to vector<16x16xf32>
    %860 = arith.mulf %858, %859 : vector<16x16xf32>
    %861 = arith.addf %856, %860 : vector<16x16xf32>
    %c2_477 = arith.constant 2 : index
    %c79 = arith.constant 79 : index
    %862 = memref.load %arg8[%c2_477, %c79] : memref<3x98xf32, #tpu.memory_space<smem>>
    %863 = vector.extract_strided_slice %841 {offsets = [4, 0], sizes = [16, 16], strides = [1, 1]} : vector<22x16xf32> to vector<16x16xf32>
    %864 = vector.broadcast %862 : f32 to vector<16x16xf32>
    %865 = arith.mulf %863, %864 : vector<16x16xf32>
    %866 = arith.addf %861, %865 : vector<16x16xf32>
    %c2_478 = arith.constant 2 : index
    %c86 = arith.constant 86 : index
    %867 = memref.load %arg8[%c2_478, %c86] : memref<3x98xf32, #tpu.memory_space<smem>>
    %868 = vector.extract_strided_slice %841 {offsets = [5, 0], sizes = [16, 16], strides = [1, 1]} : vector<22x16xf32> to vector<16x16xf32>
    %869 = vector.broadcast %867 : f32 to vector<16x16xf32>
    %870 = arith.mulf %868, %869 : vector<16x16xf32>
    %871 = arith.addf %866, %870 : vector<16x16xf32>
    %c2_479 = arith.constant 2 : index
    %c93 = arith.constant 93 : index
    %872 = memref.load %arg8[%c2_479, %c93] : memref<3x98xf32, #tpu.memory_space<smem>>
    %873 = vector.extract_strided_slice %841 {offsets = [6, 0], sizes = [16, 16], strides = [1, 1]} : vector<22x16xf32> to vector<16x16xf32>
    %874 = vector.broadcast %872 : f32 to vector<16x16xf32>
    %875 = arith.mulf %873, %874 : vector<16x16xf32>
    %876 = arith.addf %871, %875 : vector<16x16xf32>
    %c1_480 = arith.constant 1 : index
    %c0_481 = arith.constant 0 : index
    %c3_482 = arith.constant 3 : index
    %877 = vector.load %arg11[%c1_480, %c0_481, %c3_482] : memref<2x22x22xf32, #tpu.memory_space<vmem>>, vector<1x22x16xf32>
    %878 = vector.shape_cast %877 : vector<1x22x16xf32> to vector<22x16xf32>
    %c2_483 = arith.constant 2 : index
    %c52 = arith.constant 52 : index
    %879 = memref.load %arg8[%c2_483, %c52] : memref<3x98xf32, #tpu.memory_space<smem>>
    %880 = vector.extract_strided_slice %878 {offsets = [0, 0], sizes = [16, 16], strides = [1, 1]} : vector<22x16xf32> to vector<16x16xf32>
    %881 = vector.broadcast %879 : f32 to vector<16x16xf32>
    %882 = arith.mulf %880, %881 : vector<16x16xf32>
    %883 = arith.addf %876, %882 : vector<16x16xf32>
    %c2_484 = arith.constant 2 : index
    %c59 = arith.constant 59 : index
    %884 = memref.load %arg8[%c2_484, %c59] : memref<3x98xf32, #tpu.memory_space<smem>>
    %885 = vector.extract_strided_slice %878 {offsets = [1, 0], sizes = [16, 16], strides = [1, 1]} : vector<22x16xf32> to vector<16x16xf32>
    %886 = vector.broadcast %884 : f32 to vector<16x16xf32>
    %887 = arith.mulf %885, %886 : vector<16x16xf32>
    %888 = arith.addf %883, %887 : vector<16x16xf32>
    %c2_485 = arith.constant 2 : index
    %c66 = arith.constant 66 : index
    %889 = memref.load %arg8[%c2_485, %c66] : memref<3x98xf32, #tpu.memory_space<smem>>
    %890 = vector.extract_strided_slice %878 {offsets = [2, 0], sizes = [16, 16], strides = [1, 1]} : vector<22x16xf32> to vector<16x16xf32>
    %891 = vector.broadcast %889 : f32 to vector<16x16xf32>
    %892 = arith.mulf %890, %891 : vector<16x16xf32>
    %893 = arith.addf %888, %892 : vector<16x16xf32>
    %c2_486 = arith.constant 2 : index
    %c73 = arith.constant 73 : index
    %894 = memref.load %arg8[%c2_486, %c73] : memref<3x98xf32, #tpu.memory_space<smem>>
    %895 = vector.extract_strided_slice %878 {offsets = [3, 0], sizes = [16, 16], strides = [1, 1]} : vector<22x16xf32> to vector<16x16xf32>
    %896 = vector.broadcast %894 : f32 to vector<16x16xf32>
    %897 = arith.mulf %895, %896 : vector<16x16xf32>
    %898 = arith.addf %893, %897 : vector<16x16xf32>
    %c2_487 = arith.constant 2 : index
    %c80_488 = arith.constant 80 : index
    %899 = memref.load %arg8[%c2_487, %c80_488] : memref<3x98xf32, #tpu.memory_space<smem>>
    %900 = vector.extract_strided_slice %878 {offsets = [4, 0], sizes = [16, 16], strides = [1, 1]} : vector<22x16xf32> to vector<16x16xf32>
    %901 = vector.broadcast %899 : f32 to vector<16x16xf32>
    %902 = arith.mulf %900, %901 : vector<16x16xf32>
    %903 = arith.addf %898, %902 : vector<16x16xf32>
    %c2_489 = arith.constant 2 : index
    %c87 = arith.constant 87 : index
    %904 = memref.load %arg8[%c2_489, %c87] : memref<3x98xf32, #tpu.memory_space<smem>>
    %905 = vector.extract_strided_slice %878 {offsets = [5, 0], sizes = [16, 16], strides = [1, 1]} : vector<22x16xf32> to vector<16x16xf32>
    %906 = vector.broadcast %904 : f32 to vector<16x16xf32>
    %907 = arith.mulf %905, %906 : vector<16x16xf32>
    %908 = arith.addf %903, %907 : vector<16x16xf32>
    %c2_490 = arith.constant 2 : index
    %c94 = arith.constant 94 : index
    %909 = memref.load %arg8[%c2_490, %c94] : memref<3x98xf32, #tpu.memory_space<smem>>
    %910 = vector.extract_strided_slice %878 {offsets = [6, 0], sizes = [16, 16], strides = [1, 1]} : vector<22x16xf32> to vector<16x16xf32>
    %911 = vector.broadcast %909 : f32 to vector<16x16xf32>
    %912 = arith.mulf %910, %911 : vector<16x16xf32>
    %913 = arith.addf %908, %912 : vector<16x16xf32>
    %c1_491 = arith.constant 1 : index
    %c0_492 = arith.constant 0 : index
    %c4_493 = arith.constant 4 : index
    %914 = vector.load %arg11[%c1_491, %c0_492, %c4_493] : memref<2x22x22xf32, #tpu.memory_space<vmem>>, vector<1x22x16xf32>
    %915 = vector.shape_cast %914 : vector<1x22x16xf32> to vector<22x16xf32>
    %c2_494 = arith.constant 2 : index
    %c53 = arith.constant 53 : index
    %916 = memref.load %arg8[%c2_494, %c53] : memref<3x98xf32, #tpu.memory_space<smem>>
    %917 = vector.extract_strided_slice %915 {offsets = [0, 0], sizes = [16, 16], strides = [1, 1]} : vector<22x16xf32> to vector<16x16xf32>
    %918 = vector.broadcast %916 : f32 to vector<16x16xf32>
    %919 = arith.mulf %917, %918 : vector<16x16xf32>
    %920 = arith.addf %913, %919 : vector<16x16xf32>
    %c2_495 = arith.constant 2 : index
    %c60 = arith.constant 60 : index
    %921 = memref.load %arg8[%c2_495, %c60] : memref<3x98xf32, #tpu.memory_space<smem>>
    %922 = vector.extract_strided_slice %915 {offsets = [1, 0], sizes = [16, 16], strides = [1, 1]} : vector<22x16xf32> to vector<16x16xf32>
    %923 = vector.broadcast %921 : f32 to vector<16x16xf32>
    %924 = arith.mulf %922, %923 : vector<16x16xf32>
    %925 = arith.addf %920, %924 : vector<16x16xf32>
    %c2_496 = arith.constant 2 : index
    %c67 = arith.constant 67 : index
    %926 = memref.load %arg8[%c2_496, %c67] : memref<3x98xf32, #tpu.memory_space<smem>>
    %927 = vector.extract_strided_slice %915 {offsets = [2, 0], sizes = [16, 16], strides = [1, 1]} : vector<22x16xf32> to vector<16x16xf32>
    %928 = vector.broadcast %926 : f32 to vector<16x16xf32>
    %929 = arith.mulf %927, %928 : vector<16x16xf32>
    %930 = arith.addf %925, %929 : vector<16x16xf32>
    %c2_497 = arith.constant 2 : index
    %c74 = arith.constant 74 : index
    %931 = memref.load %arg8[%c2_497, %c74] : memref<3x98xf32, #tpu.memory_space<smem>>
    %932 = vector.extract_strided_slice %915 {offsets = [3, 0], sizes = [16, 16], strides = [1, 1]} : vector<22x16xf32> to vector<16x16xf32>
    %933 = vector.broadcast %931 : f32 to vector<16x16xf32>
    %934 = arith.mulf %932, %933 : vector<16x16xf32>
    %935 = arith.addf %930, %934 : vector<16x16xf32>
    %c2_498 = arith.constant 2 : index
    %c81 = arith.constant 81 : index
    %936 = memref.load %arg8[%c2_498, %c81] : memref<3x98xf32, #tpu.memory_space<smem>>
    %937 = vector.extract_strided_slice %915 {offsets = [4, 0], sizes = [16, 16], strides = [1, 1]} : vector<22x16xf32> to vector<16x16xf32>
    %938 = vector.broadcast %936 : f32 to vector<16x16xf32>
    %939 = arith.mulf %937, %938 : vector<16x16xf32>
    %940 = arith.addf %935, %939 : vector<16x16xf32>
    %c2_499 = arith.constant 2 : index
    %c88 = arith.constant 88 : index
    %941 = memref.load %arg8[%c2_499, %c88] : memref<3x98xf32, #tpu.memory_space<smem>>
    %942 = vector.extract_strided_slice %915 {offsets = [5, 0], sizes = [16, 16], strides = [1, 1]} : vector<22x16xf32> to vector<16x16xf32>
    %943 = vector.broadcast %941 : f32 to vector<16x16xf32>
    %944 = arith.mulf %942, %943 : vector<16x16xf32>
    %945 = arith.addf %940, %944 : vector<16x16xf32>
    %c2_500 = arith.constant 2 : index
    %c95 = arith.constant 95 : index
    %946 = memref.load %arg8[%c2_500, %c95] : memref<3x98xf32, #tpu.memory_space<smem>>
    %947 = vector.extract_strided_slice %915 {offsets = [6, 0], sizes = [16, 16], strides = [1, 1]} : vector<22x16xf32> to vector<16x16xf32>
    %948 = vector.broadcast %946 : f32 to vector<16x16xf32>
    %949 = arith.mulf %947, %948 : vector<16x16xf32>
    %950 = arith.addf %945, %949 : vector<16x16xf32>
    %c1_501 = arith.constant 1 : index
    %c0_502 = arith.constant 0 : index
    %c5_503 = arith.constant 5 : index
    %951 = vector.load %arg11[%c1_501, %c0_502, %c5_503] : memref<2x22x22xf32, #tpu.memory_space<vmem>>, vector<1x22x16xf32>
    %952 = vector.shape_cast %951 : vector<1x22x16xf32> to vector<22x16xf32>
    %c2_504 = arith.constant 2 : index
    %c54 = arith.constant 54 : index
    %953 = memref.load %arg8[%c2_504, %c54] : memref<3x98xf32, #tpu.memory_space<smem>>
    %954 = vector.extract_strided_slice %952 {offsets = [0, 0], sizes = [16, 16], strides = [1, 1]} : vector<22x16xf32> to vector<16x16xf32>
    %955 = vector.broadcast %953 : f32 to vector<16x16xf32>
    %956 = arith.mulf %954, %955 : vector<16x16xf32>
    %957 = arith.addf %950, %956 : vector<16x16xf32>
    %c2_505 = arith.constant 2 : index
    %c61 = arith.constant 61 : index
    %958 = memref.load %arg8[%c2_505, %c61] : memref<3x98xf32, #tpu.memory_space<smem>>
    %959 = vector.extract_strided_slice %952 {offsets = [1, 0], sizes = [16, 16], strides = [1, 1]} : vector<22x16xf32> to vector<16x16xf32>
    %960 = vector.broadcast %958 : f32 to vector<16x16xf32>
    %961 = arith.mulf %959, %960 : vector<16x16xf32>
    %962 = arith.addf %957, %961 : vector<16x16xf32>
    %c2_506 = arith.constant 2 : index
    %c68 = arith.constant 68 : index
    %963 = memref.load %arg8[%c2_506, %c68] : memref<3x98xf32, #tpu.memory_space<smem>>
    %964 = vector.extract_strided_slice %952 {offsets = [2, 0], sizes = [16, 16], strides = [1, 1]} : vector<22x16xf32> to vector<16x16xf32>
    %965 = vector.broadcast %963 : f32 to vector<16x16xf32>
    %966 = arith.mulf %964, %965 : vector<16x16xf32>
    %967 = arith.addf %962, %966 : vector<16x16xf32>
    %c2_507 = arith.constant 2 : index
    %c75 = arith.constant 75 : index
    %968 = memref.load %arg8[%c2_507, %c75] : memref<3x98xf32, #tpu.memory_space<smem>>
    %969 = vector.extract_strided_slice %952 {offsets = [3, 0], sizes = [16, 16], strides = [1, 1]} : vector<22x16xf32> to vector<16x16xf32>
    %970 = vector.broadcast %968 : f32 to vector<16x16xf32>
    %971 = arith.mulf %969, %970 : vector<16x16xf32>
    %972 = arith.addf %967, %971 : vector<16x16xf32>
    %c2_508 = arith.constant 2 : index
    %c82 = arith.constant 82 : index
    %973 = memref.load %arg8[%c2_508, %c82] : memref<3x98xf32, #tpu.memory_space<smem>>
    %974 = vector.extract_strided_slice %952 {offsets = [4, 0], sizes = [16, 16], strides = [1, 1]} : vector<22x16xf32> to vector<16x16xf32>
    %975 = vector.broadcast %973 : f32 to vector<16x16xf32>
    %976 = arith.mulf %974, %975 : vector<16x16xf32>
    %977 = arith.addf %972, %976 : vector<16x16xf32>
    %c2_509 = arith.constant 2 : index
    %c89 = arith.constant 89 : index
    %978 = memref.load %arg8[%c2_509, %c89] : memref<3x98xf32, #tpu.memory_space<smem>>
    %979 = vector.extract_strided_slice %952 {offsets = [5, 0], sizes = [16, 16], strides = [1, 1]} : vector<22x16xf32> to vector<16x16xf32>
    %980 = vector.broadcast %978 : f32 to vector<16x16xf32>
    %981 = arith.mulf %979, %980 : vector<16x16xf32>
    %982 = arith.addf %977, %981 : vector<16x16xf32>
    %c2_510 = arith.constant 2 : index
    %c96_511 = arith.constant 96 : index
    %983 = memref.load %arg8[%c2_510, %c96_511] : memref<3x98xf32, #tpu.memory_space<smem>>
    %984 = vector.extract_strided_slice %952 {offsets = [6, 0], sizes = [16, 16], strides = [1, 1]} : vector<22x16xf32> to vector<16x16xf32>
    %985 = vector.broadcast %983 : f32 to vector<16x16xf32>
    %986 = arith.mulf %984, %985 : vector<16x16xf32>
    %987 = arith.addf %982, %986 : vector<16x16xf32>
    %c1_512 = arith.constant 1 : index
    %c0_513 = arith.constant 0 : index
    %c6_514 = arith.constant 6 : index
    %988 = vector.load %arg11[%c1_512, %c0_513, %c6_514] : memref<2x22x22xf32, #tpu.memory_space<vmem>>, vector<1x22x16xf32>
    %989 = vector.shape_cast %988 : vector<1x22x16xf32> to vector<22x16xf32>
    %c2_515 = arith.constant 2 : index
    %c55 = arith.constant 55 : index
    %990 = memref.load %arg8[%c2_515, %c55] : memref<3x98xf32, #tpu.memory_space<smem>>
    %991 = vector.extract_strided_slice %989 {offsets = [0, 0], sizes = [16, 16], strides = [1, 1]} : vector<22x16xf32> to vector<16x16xf32>
    %992 = vector.broadcast %990 : f32 to vector<16x16xf32>
    %993 = arith.mulf %991, %992 : vector<16x16xf32>
    %994 = arith.addf %987, %993 : vector<16x16xf32>
    %c2_516 = arith.constant 2 : index
    %c62 = arith.constant 62 : index
    %995 = memref.load %arg8[%c2_516, %c62] : memref<3x98xf32, #tpu.memory_space<smem>>
    %996 = vector.extract_strided_slice %989 {offsets = [1, 0], sizes = [16, 16], strides = [1, 1]} : vector<22x16xf32> to vector<16x16xf32>
    %997 = vector.broadcast %995 : f32 to vector<16x16xf32>
    %998 = arith.mulf %996, %997 : vector<16x16xf32>
    %999 = arith.addf %994, %998 : vector<16x16xf32>
    %c2_517 = arith.constant 2 : index
    %c69 = arith.constant 69 : index
    %1000 = memref.load %arg8[%c2_517, %c69] : memref<3x98xf32, #tpu.memory_space<smem>>
    %1001 = vector.extract_strided_slice %989 {offsets = [2, 0], sizes = [16, 16], strides = [1, 1]} : vector<22x16xf32> to vector<16x16xf32>
    %1002 = vector.broadcast %1000 : f32 to vector<16x16xf32>
    %1003 = arith.mulf %1001, %1002 : vector<16x16xf32>
    %1004 = arith.addf %999, %1003 : vector<16x16xf32>
    %c2_518 = arith.constant 2 : index
    %c76 = arith.constant 76 : index
    %1005 = memref.load %arg8[%c2_518, %c76] : memref<3x98xf32, #tpu.memory_space<smem>>
    %1006 = vector.extract_strided_slice %989 {offsets = [3, 0], sizes = [16, 16], strides = [1, 1]} : vector<22x16xf32> to vector<16x16xf32>
    %1007 = vector.broadcast %1005 : f32 to vector<16x16xf32>
    %1008 = arith.mulf %1006, %1007 : vector<16x16xf32>
    %1009 = arith.addf %1004, %1008 : vector<16x16xf32>
    %c2_519 = arith.constant 2 : index
    %c83 = arith.constant 83 : index
    %1010 = memref.load %arg8[%c2_519, %c83] : memref<3x98xf32, #tpu.memory_space<smem>>
    %1011 = vector.extract_strided_slice %989 {offsets = [4, 0], sizes = [16, 16], strides = [1, 1]} : vector<22x16xf32> to vector<16x16xf32>
    %1012 = vector.broadcast %1010 : f32 to vector<16x16xf32>
    %1013 = arith.mulf %1011, %1012 : vector<16x16xf32>
    %1014 = arith.addf %1009, %1013 : vector<16x16xf32>
    %c2_520 = arith.constant 2 : index
    %c90 = arith.constant 90 : index
    %1015 = memref.load %arg8[%c2_520, %c90] : memref<3x98xf32, #tpu.memory_space<smem>>
    %1016 = vector.extract_strided_slice %989 {offsets = [5, 0], sizes = [16, 16], strides = [1, 1]} : vector<22x16xf32> to vector<16x16xf32>
    %1017 = vector.broadcast %1015 : f32 to vector<16x16xf32>
    %1018 = arith.mulf %1016, %1017 : vector<16x16xf32>
    %1019 = arith.addf %1014, %1018 : vector<16x16xf32>
    %c2_521 = arith.constant 2 : index
    %c97 = arith.constant 97 : index
    %1020 = memref.load %arg8[%c2_521, %c97] : memref<3x98xf32, #tpu.memory_space<smem>>
    %1021 = vector.extract_strided_slice %989 {offsets = [6, 0], sizes = [16, 16], strides = [1, 1]} : vector<22x16xf32> to vector<16x16xf32>
    %1022 = vector.broadcast %1020 : f32 to vector<16x16xf32>
    %1023 = arith.mulf %1021, %1022 : vector<16x16xf32>
    %1024 = arith.addf %1019, %1023 : vector<16x16xf32>
    %c2_522 = arith.constant 2 : index
    %c1_523 = arith.constant 1 : index
    %1025 = memref.load %arg9[%c2_522, %c1_523] : memref<3x6xf32, #tpu.memory_space<smem>>
    %c2_524 = arith.constant 2 : index
    %c2_525 = arith.constant 2 : index
    %1026 = memref.load %arg9[%c2_524, %c2_525] : memref<3x6xf32, #tpu.memory_space<smem>>
    %c2_526 = arith.constant 2 : index
    %c3_527 = arith.constant 3 : index
    %1027 = memref.load %arg9[%c2_526, %c3_527] : memref<3x6xf32, #tpu.memory_space<smem>>
    %c2_528 = arith.constant 2 : index
    %c4_529 = arith.constant 4 : index
    %1028 = memref.load %arg9[%c2_528, %c4_529] : memref<3x6xf32, #tpu.memory_space<smem>>
    %c2_530 = arith.constant 2 : index
    %c5_531 = arith.constant 5 : index
    %1029 = memref.load %arg9[%c2_530, %c5_531] : memref<3x6xf32, #tpu.memory_space<smem>>
    %1030 = vector.broadcast %1027 : f32 to vector<16x16xf32>
    %1031 = arith.subf %1024, %1030 : vector<16x16xf32>
    %1032 = arith.addf %1028, %1029 : f32
    %1033 = math.rsqrt %1032 : f32
    %1034 = vector.broadcast %1033 : f32 to vector<16x16xf32>
    %1035 = arith.mulf %1031, %1034 : vector<16x16xf32>
    %1036 = vector.broadcast %1025 : f32 to vector<16x16xf32>
    %1037 = arith.mulf %1035, %1036 : vector<16x16xf32>
    %1038 = vector.broadcast %1026 : f32 to vector<16x16xf32>
    %1039 = arith.addf %1037, %1038 : vector<16x16xf32>
    %1040 = arith.negf %1039 : vector<16x16xf32>
    %1041 = math.exp %1040 : vector<16x16xf32>
    %cst_532 = arith.constant 1.000000e+00 : f32
    %1042 = vector.broadcast %cst_532 : f32 to vector<16x16xf32>
    %1043 = arith.addf %1042, %1041 : vector<16x16xf32>
    %1044 = arith.divf %1042, %1043 : vector<16x16xf32>
    %1045 = vector.extract_strided_slice %1044 {offsets = [0, 0], sizes = [1, 16], strides = [1, 1]} : vector<16x16xf32> to vector<1x16xf32>
    %c0_533 = arith.constant 0 : index
    %c0_534 = arith.constant 0 : index
    %1046 = vector.load %arg12[%c0_533, %c0_534] : memref<1x256xf32, #tpu.memory_space<vmem>>, vector<1x16xf32>
    tpu.vector_store %arg12[%c0_533, %c0_534], %1045 {strides = array<i32>} : memref<1x256xf32, #tpu.memory_space<vmem>>, vector<1x16xf32>,
    %1047 = vector.extract_strided_slice %1044 {offsets = [1, 0], sizes = [1, 16], strides = [1, 1]} : vector<16x16xf32> to vector<1x16xf32>
    %c0_535 = arith.constant 0 : index
    %c16_536 = arith.constant 16 : index
    %1048 = vector.load %arg12[%c0_535, %c16_536] : memref<1x256xf32, #tpu.memory_space<vmem>>, vector<1x16xf32>
    tpu.vector_store %arg12[%c0_535, %c16_536], %1047 {strides = array<i32>} : memref<1x256xf32, #tpu.memory_space<vmem>>, vector<1x16xf32>,
    %1049 = vector.extract_strided_slice %1044 {offsets = [2, 0], sizes = [1, 16], strides = [1, 1]} : vector<16x16xf32> to vector<1x16xf32>
    %c0_537 = arith.constant 0 : index
    %c32_538 = arith.constant 32 : index
    %1050 = vector.load %arg12[%c0_537, %c32_538] : memref<1x256xf32, #tpu.memory_space<vmem>>, vector<1x16xf32>
    tpu.vector_store %arg12[%c0_537, %c32_538], %1049 {strides = array<i32>} : memref<1x256xf32, #tpu.memory_space<vmem>>, vector<1x16xf32>,
    %1051 = vector.extract_strided_slice %1044 {offsets = [3, 0], sizes = [1, 16], strides = [1, 1]} : vector<16x16xf32> to vector<1x16xf32>
    %c0_539 = arith.constant 0 : index
    %c48_540 = arith.constant 48 : index
    %1052 = vector.load %arg12[%c0_539, %c48_540] : memref<1x256xf32, #tpu.memory_space<vmem>>, vector<1x16xf32>
    tpu.vector_store %arg12[%c0_539, %c48_540], %1051 {strides = array<i32>} : memref<1x256xf32, #tpu.memory_space<vmem>>, vector<1x16xf32>,
    %1053 = vector.extract_strided_slice %1044 {offsets = [4, 0], sizes = [1, 16], strides = [1, 1]} : vector<16x16xf32> to vector<1x16xf32>
    %c0_541 = arith.constant 0 : index
    %c64_542 = arith.constant 64 : index
    %1054 = vector.load %arg12[%c0_541, %c64_542] : memref<1x256xf32, #tpu.memory_space<vmem>>, vector<1x16xf32>
    tpu.vector_store %arg12[%c0_541, %c64_542], %1053 {strides = array<i32>} : memref<1x256xf32, #tpu.memory_space<vmem>>, vector<1x16xf32>,
    %1055 = vector.extract_strided_slice %1044 {offsets = [5, 0], sizes = [1, 16], strides = [1, 1]} : vector<16x16xf32> to vector<1x16xf32>
    %c0_543 = arith.constant 0 : index
    %c80_544 = arith.constant 80 : index
    %1056 = vector.load %arg12[%c0_543, %c80_544] : memref<1x256xf32, #tpu.memory_space<vmem>>, vector<1x16xf32>
    tpu.vector_store %arg12[%c0_543, %c80_544], %1055 {strides = array<i32>} : memref<1x256xf32, #tpu.memory_space<vmem>>, vector<1x16xf32>,
    %1057 = vector.extract_strided_slice %1044 {offsets = [6, 0], sizes = [1, 16], strides = [1, 1]} : vector<16x16xf32> to vector<1x16xf32>
    %c0_545 = arith.constant 0 : index
    %c96_546 = arith.constant 96 : index
    %1058 = vector.load %arg12[%c0_545, %c96_546] : memref<1x256xf32, #tpu.memory_space<vmem>>, vector<1x16xf32>
    tpu.vector_store %arg12[%c0_545, %c96_546], %1057 {strides = array<i32>} : memref<1x256xf32, #tpu.memory_space<vmem>>, vector<1x16xf32>,
    %1059 = vector.extract_strided_slice %1044 {offsets = [7, 0], sizes = [1, 16], strides = [1, 1]} : vector<16x16xf32> to vector<1x16xf32>
    %c0_547 = arith.constant 0 : index
    %c112_548 = arith.constant 112 : index
    %1060 = vector.load %arg12[%c0_547, %c112_548] : memref<1x256xf32, #tpu.memory_space<vmem>>, vector<1x16xf32>
    tpu.vector_store %arg12[%c0_547, %c112_548], %1059 {strides = array<i32>} : memref<1x256xf32, #tpu.memory_space<vmem>>, vector<1x16xf32>,
    %1061 = vector.extract_strided_slice %1044 {offsets = [8, 0], sizes = [1, 16], strides = [1, 1]} : vector<16x16xf32> to vector<1x16xf32>
    %c0_549 = arith.constant 0 : index
    %c128_550 = arith.constant 128 : index
    %1062 = vector.load %arg12[%c0_549, %c128_550] : memref<1x256xf32, #tpu.memory_space<vmem>>, vector<1x16xf32>
    tpu.vector_store %arg12[%c0_549, %c128_550], %1061 {strides = array<i32>} : memref<1x256xf32, #tpu.memory_space<vmem>>, vector<1x16xf32>,
    %1063 = vector.extract_strided_slice %1044 {offsets = [9, 0], sizes = [1, 16], strides = [1, 1]} : vector<16x16xf32> to vector<1x16xf32>
    %c0_551 = arith.constant 0 : index
    %c144_552 = arith.constant 144 : index
    %1064 = vector.load %arg12[%c0_551, %c144_552] : memref<1x256xf32, #tpu.memory_space<vmem>>, vector<1x16xf32>
    tpu.vector_store %arg12[%c0_551, %c144_552], %1063 {strides = array<i32>} : memref<1x256xf32, #tpu.memory_space<vmem>>, vector<1x16xf32>,
    %1065 = vector.extract_strided_slice %1044 {offsets = [10, 0], sizes = [1, 16], strides = [1, 1]} : vector<16x16xf32> to vector<1x16xf32>
    %c0_553 = arith.constant 0 : index
    %c160_554 = arith.constant 160 : index
    %1066 = vector.load %arg12[%c0_553, %c160_554] : memref<1x256xf32, #tpu.memory_space<vmem>>, vector<1x16xf32>
    tpu.vector_store %arg12[%c0_553, %c160_554], %1065 {strides = array<i32>} : memref<1x256xf32, #tpu.memory_space<vmem>>, vector<1x16xf32>,
    %1067 = vector.extract_strided_slice %1044 {offsets = [11, 0], sizes = [1, 16], strides = [1, 1]} : vector<16x16xf32> to vector<1x16xf32>
    %c0_555 = arith.constant 0 : index
    %c176_556 = arith.constant 176 : index
    %1068 = vector.load %arg12[%c0_555, %c176_556] : memref<1x256xf32, #tpu.memory_space<vmem>>, vector<1x16xf32>
    tpu.vector_store %arg12[%c0_555, %c176_556], %1067 {strides = array<i32>} : memref<1x256xf32, #tpu.memory_space<vmem>>, vector<1x16xf32>,
    %1069 = vector.extract_strided_slice %1044 {offsets = [12, 0], sizes = [1, 16], strides = [1, 1]} : vector<16x16xf32> to vector<1x16xf32>
    %c0_557 = arith.constant 0 : index
    %c192_558 = arith.constant 192 : index
    %1070 = vector.load %arg12[%c0_557, %c192_558] : memref<1x256xf32, #tpu.memory_space<vmem>>, vector<1x16xf32>
    tpu.vector_store %arg12[%c0_557, %c192_558], %1069 {strides = array<i32>} : memref<1x256xf32, #tpu.memory_space<vmem>>, vector<1x16xf32>,
    %1071 = vector.extract_strided_slice %1044 {offsets = [13, 0], sizes = [1, 16], strides = [1, 1]} : vector<16x16xf32> to vector<1x16xf32>
    %c0_559 = arith.constant 0 : index
    %c208_560 = arith.constant 208 : index
    %1072 = vector.load %arg12[%c0_559, %c208_560] : memref<1x256xf32, #tpu.memory_space<vmem>>, vector<1x16xf32>
    tpu.vector_store %arg12[%c0_559, %c208_560], %1071 {strides = array<i32>} : memref<1x256xf32, #tpu.memory_space<vmem>>, vector<1x16xf32>,
    %1073 = vector.extract_strided_slice %1044 {offsets = [14, 0], sizes = [1, 16], strides = [1, 1]} : vector<16x16xf32> to vector<1x16xf32>
    %c0_561 = arith.constant 0 : index
    %c224_562 = arith.constant 224 : index
    %1074 = vector.load %arg12[%c0_561, %c224_562] : memref<1x256xf32, #tpu.memory_space<vmem>>, vector<1x16xf32>
    tpu.vector_store %arg12[%c0_561, %c224_562], %1073 {strides = array<i32>} : memref<1x256xf32, #tpu.memory_space<vmem>>, vector<1x16xf32>,
    %1075 = vector.extract_strided_slice %1044 {offsets = [15, 0], sizes = [1, 16], strides = [1, 1]} : vector<16x16xf32> to vector<1x16xf32>
    %c0_563 = arith.constant 0 : index
    %c240_564 = arith.constant 240 : index
    %1076 = vector.load %arg12[%c0_563, %c240_564] : memref<1x256xf32, #tpu.memory_space<vmem>>, vector<1x16xf32>
    tpu.vector_store %arg12[%c0_563, %c240_564], %1075 {strides = array<i32>} : memref<1x256xf32, #tpu.memory_space<vmem>>, vector<1x16xf32>,
    %c0_565 = arith.constant 0 : index
    %c0_566 = arith.constant 0 : index
    %1077 = vector.load %arg12[%c0_565, %c0_566] : memref<1x256xf32, #tpu.memory_space<vmem>>, vector<1x256xf32>
    %1078 = vector.broadcast %1077 : vector<1x256xf32> to vector<16x256xf32>
    %1079 = arith.mulf %445, %1078 : vector<16x256xf32>
    %c2_567 = arith.constant 2 : index
    %c0_568 = arith.constant 0 : index
    %c0_569 = arith.constant 0 : index
    %1080 = vector.load %arg6[%c2_567, %c0_568, %c0_569] : memref<3x16x16xf32, #tpu.memory_space<vmem>>, vector<1x16x16xf32>
    %1081 = vector.shape_cast %1080 : vector<1x16x16xf32> to vector<16x16xf32>
    %cst_570 = arith.constant dense<0.000000e+00> : vector<16x256xf32>
    %1082 = tpu.matmul %1081, %1079, %cst_570 {dimension_numbers = #tpu.dot_dimension_numbers<[1], [0], [0], [1], [0, 0, 1, 1], [], []>} : vector<16x16xf32>, vector<16x256xf32>, vector<16x256xf32> -> vector<16x256xf32>
    %1083 = arith.addf %419, %1082 : vector<16x256xf32>
    %c0_571 = arith.constant 0 : index
    %c0_572 = arith.constant 0 : index
    %c0_573 = arith.constant 0 : index
    %1084 = vector.load %arg10[%c0_571, %c0_572, %c0_573] : memref<1x16x256xf32, #tpu.memory_space<vmem>>, vector<1x16x256xf32>
    %1085 = vector.shape_cast %1084 : vector<1x16x256xf32> to vector<16x256xf32>
    %1086 = vector.shape_cast %1083 : vector<16x256xf32> to vector<1x16x256xf32>
    tpu.vector_store %arg10[%c0_571, %c0_572, %c0_573], %1086 {strides = array<i32>} : memref<1x16x256xf32, #tpu.memory_space<vmem>>, vector<1x16x256xf32>,
    return
  }
  func.func @transform_0(%arg0: i32) -> (i32, i32, i32) {
    %c0_i32 = arith.constant 0 : i32
    %c0_i32_0 = arith.constant 0 : i32
    %c0_i32_1 = arith.constant 0 : i32
    return %arg0, %c0_i32, %c0_i32_0 : i32, i32, i32
  }
  func.func @transform_1(%arg0: i32) -> (i32, i32, i32) {
    %c0_i32 = arith.constant 0 : i32
    %c0_i32_0 = arith.constant 0 : i32
    %c0_i32_1 = arith.constant 0 : i32
    %c0_i32_2 = arith.constant 0 : i32
    return %c0_i32, %c0_i32_0, %c0_i32_1 : i32, i32, i32
  }
  func.func @transform_2(%arg0: i32) -> (i32, i32, i32) {
    %c0_i32 = arith.constant 0 : i32
    %c0_i32_0 = arith.constant 0 : i32
    %c0_i32_1 = arith.constant 0 : i32
    %c0_i32_2 = arith.constant 0 : i32
    return %c0_i32, %c0_i32_0, %c0_i32_1 : i32, i32, i32
  }
  func.func @transform_3(%arg0: i32) -> (i32, i32, i32) {
    %c0_i32 = arith.constant 0 : i32
    %c0_i32_0 = arith.constant 0 : i32
    %c0_i32_1 = arith.constant 0 : i32
    %c0_i32_2 = arith.constant 0 : i32
    return %c0_i32, %c0_i32_0, %c0_i32_1 : i32, i32, i32
  }
  func.func @transform_4(%arg0: i32) -> (i32, i32, i32) {
    %c0_i32 = arith.constant 0 : i32
    %c0_i32_0 = arith.constant 0 : i32
    %c0_i32_1 = arith.constant 0 : i32
    %c0_i32_2 = arith.constant 0 : i32
    return %c0_i32, %c0_i32_0, %c0_i32_1 : i32, i32, i32
  }
  func.func @transform_5(%arg0: i32) -> (i32, i32, i32) {
    %c0_i32 = arith.constant 0 : i32
    %c0_i32_0 = arith.constant 0 : i32
    %c0_i32_1 = arith.constant 0 : i32
    %c0_i32_2 = arith.constant 0 : i32
    return %c0_i32, %c0_i32_0, %c0_i32_1 : i32, i32, i32
  }
  func.func @transform_6(%arg0: i32) -> (i32, i32) {
    %c0_i32 = arith.constant 0 : i32
    %c0_i32_0 = arith.constant 0 : i32
    %c0_i32_1 = arith.constant 0 : i32
    return %c0_i32, %c0_i32_0 : i32, i32
  }
  func.func @transform_7(%arg0: i32) -> (i32, i32) {
    %c0_i32 = arith.constant 0 : i32
    %c0_i32_0 = arith.constant 0 : i32
    %c0_i32_1 = arith.constant 0 : i32
    return %c0_i32, %c0_i32_0 : i32, i32
  }
  func.func @transform_8(%arg0: i32) -> (i32, i32) {
    %c0_i32 = arith.constant 0 : i32
    %c0_i32_0 = arith.constant 0 : i32
    %c0_i32_1 = arith.constant 0 : i32
    return %c0_i32, %c0_i32_0 : i32, i32
  }
  func.func @transform_9(%arg0: i32) -> (i32, i32, i32) {
    %c0_i32 = arith.constant 0 : i32
    %c0_i32_0 = arith.constant 0 : i32
    %c0_i32_1 = arith.constant 0 : i32
    return %arg0, %c0_i32, %c0_i32_0 : i32, i32, i32
  }
}

</mosaic_0001>

<bundles_post_ra>
// kernel: tpu_custom_call.1
= control target key start
LH: loop header
LB: loop body
LE: loop exit
PB: predicated region body
PF: predicated region fallthrough
CT: control target
= control target key end

     0   :  { %s8833_s0 = inlined_call_operand.vmem [shape: f32[2,16,256], index: 0, kind: input, shape index: {}]   ;;  %s8834_s1 = inlined_call_operand.vmem [shape: f32[3,1,16], index: 1, kind: input, shape index: {}]   ;;  %s8835_s2 = inlined_call_operand.vmem [shape: f32[3,1,1], index: 2, kind: input, shape index: {}]   ;;  %s8836_s3 = inlined_call_operand.vmem [shape: f32[3,16,1], index: 3, kind: input, shape index: {}]   ;;  %s8837_s4 = inlined_call_operand.vmem [shape: f32[3,16,1], index: 4, kind: input, shape index: {}]   ;;  %s8838_s5 = inlined_call_operand.vmem [shape: f32[3,16,16], index: 5, kind: input, shape index: {}]   ;;  %s8839_s6 = inlined_call_operand.vmem [shape: f32[16,1], index: 6, kind: input, shape index: {}]   ;;  %s8840_s7 = inlined_call_operand.vmem [shape: f32[3,98], index: 7, kind: input, shape index: {}]   ;;  %s8841_s8 = inlined_call_operand.vmem [shape: f32[3,6], index: 8, kind: input, shape index: {}]   ;;  %s8842_s9 = inlined_call_operand.hbm [shape: f32[2,16,256], index: 9, kind: output, shape index: {}]  }
   0x1   :  { %8919 = sst [smem:[#allocation83_spill]] %s8833_s0 }
   0x2   :  { %8920 = sst [smem:[#allocation84_spill]] %s8834_s1 }
   0x3   :  { %8921 = sst [smem:[#allocation85_spill]] %s8835_s2 }
   0x4   :  { %14 = vsyncpa [#allocation6], 0 }
   0x5   :  { %15 = vsyncpa [#allocation8], 0 }
   0x6   :  { %16 = vsyncpa [#allocation5], 0 }
   0x7   :  { %18 = vsyncpa [#allocation5 + $0x1], 0  ;;  %s5827_s30 = smov 0   ;;  %s5829_s10 = smov 0  }
   0x8   :  { %s5831_s11 = smov 0   ;;  %s5833_s12 = smov 0  }
   0x9 LB: > { %s5848_s13 = sadd.s32 4294967295, %s5731_s12   ;;  %s5157_s14 = sadd.s32 4294967294, %s5731_s12   ;;  %s5731_s12 = sphi %s5833_s12, %s9156_s12   ;;  %s5727_s11 = sphi %s5831_s11, %s9155_s11   ;;  %s5723_s10 = sphi %s5829_s10, %s9154_s10   ;;  %s5719_s30 = sphi %s5827_s30, %s9153_s30  }
   0xa   : > { %s5852_s15 = sadd.s32 1, %s5731_s12   ;;  %s225_s16 = sadd.s32 1, %s5727_s11 }
   0xb   : > { %s222_s17 = ssub.s32 %s5731_s12, %s5852_s15  ;;  %p235_p0 = scmp.ne.s32.totalorder %s5727_s11, %s5723_s10 }
   0xc   : > { %p223_p1 = scmp.eq.s32.totalorder %s222_s17, 0  ;;  %p236_p2 = scmp.eq.s32.totalorder %s5848_s13, 1 }
   0xd   : > { %p241_p3 = scmp.ne.s32.totalorder %s5723_s10, %s5719_s30  ;;  %p242_p4 = scmp.eq.s32.totalorder %s5157_s14, 1 }
   0xe   : > { %s5863_s18 = scalar_select %p223_p1, %s5727_s11, %s225_s16  }
   0xf   : > { %p5865_p5 = por %p236_p2, %p235_p0  ;;  %p5869_p6 = por %p242_p4, %p241_p3 }
  0x10   : > { %p5158_p7 = scmp.ge.s32.totalorder %s5731_s12, 1  ;;  %p249_p8 = scmp.lt.s32.totalorder %s5731_s12, 3 }
  0x11   : > { %s8922_s19 = scalar_select %p5865_p5, 1, 0 }
  0x12   : > { %s8923_s20 = scalar_select %p5869_p6, 1, 0 }
  0x13   : > { %p8843_p9 = scmp.eq.s32.totalorder %s5848_s13, 0  ;;  %p5876_p10 = pnand %p5158_p7, %p249_p8 }
  0x14   : > { %s280_s24 = sshll.u32 %s8840_s7, 4  ;;  %s291_s27 = sshll.u32 %s8841_s8, 4  ;;  %s281_s24 = int_to_ptr.vmem [resolvable:$true] %s280_s24  ;;  %s292_s27 = int_to_ptr.vmem [resolvable:$true] %s291_s27 }
  0x15   : > { %s8924_s21 = scalar_select %p5876_p10, 1, 0 }
  0x16   : > { %p5460_p11 = pneg %p5876_p10  ;;  %s5631_s29 = scalar_lea.vmem %s281_s24, 64 }
  0x17   : > { %p5632_p13 = scmp.ne.s32.totalorder %s281_s24, %s5631_s29  ;;  %p5639_p3 = scmp.lt.s32.totalorder %s281_s24, %s281_s24 }
  0x18   : > { %p5890_p12 = pnand %p8843_p9, %p5460_p11  ;;  %p5640_p4 = scmp.lt.s32.totalorder %s5631_s29, %s5631_s29 }
  0x1a   : > { %p5633_p0 = pneg %p5890_p12  ;;  %p5641_p7 = por %p5640_p4, %p5639_p3 }
  0x1c   : > { %p5634_p1 = pnand %p5633_p0, %p5632_p13 }
  0x1e   : > { %p5635_p2 = pneg %p5634_p1 }
  0x20   : > { %p5642_p8 = pnand %p5641_p7, %p5635_p2 }
  0x22   : > { %5645 = shalt.err (!%p5642_p8)
}
  0x23   : > { %s5733_s14 = smov [#allocation4]   ;;  %s5646_s16 = scalar_lea.vmem %s292_s27, 64 }
  0x24   : > { %5463 = dma.vmem_to_smem (!%p5890_p12), %s281_s24, 64, %s5733_s14, [#allocation6]  }
  0x25   : > { %p5647_p11 = scmp.ne.s32.totalorder %s292_s27, %s5646_s16  ;;  %p5654_p5 = scmp.lt.s32.totalorder %s292_s27, %s292_s27 }
  0x26   : > { %p5655_p10 = scmp.lt.s32.totalorder %s5646_s16, %s5646_s16 }
  0x27   : > { %p5649_p9 = pnand %p5647_p11, %p5633_p0 }
  0x28   : > { %p5656_p13 = por %p5655_p10, %p5654_p5 }
  0x29   : > { %p5650_p6 = pneg %p5649_p9 }
  0x2b   : > { %p5657_p1 = pnand %p5656_p13, %p5650_p6 }
  0x2d   : > { %5660 = shalt.err (!%p5657_p1)
}
  0x2e   : > { %s5734_s17 = smov [#allocation7]   ;;  %p8926_p2 = scmp.ne.s32.totalorder %s8924_s21, 0 }
  0x2f   : > { %5466 = dma.vmem_to_smem (!%p5890_p12), %s292_s27, 64, %s5734_s17, [#allocation8]  }
  0x30   : > { %312 = sbr.rel (%p8926_p2) target bundleno = 2445 (0x98d), region = 56 }
  0x37   : > { %p8927_p3 = scmp.eq.s32.totalorder %s5848_s13, 0 }
  0x39   : > { %5706 = dma.done.wait (%p8927_p3), [#allocation6], 64   ;;  %p8928_p4 = pmov %p8927_p3 }
  0x3a   : > { %p8929_p9 = pmov %p8927_p3 }
  0x3b   : > { %5708 = vsyncadd (%p8928_p4), [#allocation6], 4294967232 }
  0x3c   : > { %5710 = dma.done.wait (%p8929_p9), [#allocation8], 64   ;;  %p8930_p5 = pmov %p8927_p3 }
  0x3e   : > { %5712 = vsyncadd (%p8930_p5), [#allocation8], 4294967232 }
  0x3f   : > { %322 = sfence }
  0x40   : > { %p353_p6 = scmp.lt.s32.totalorder %s5848_s13, 1  ;;  %s8931_s0 = sld [smem:[#allocation83_spill]]  ;;  %v5735_v8 = vmov 0.0|0.0   ;;  %vm5736_vm0 = vmmov 0   ;;  %v8867_v9 = vmov 0.0   ;;  %v5738_v11 = vmov 0  }
  0x41   : > { %5411 = vmatprep.subr.bf16.mxu0 %v5735_v8  ;;  %5379 = vmatprep.mubr.msk.f32.mxu0 %vm5736_vm0, %v8867_v9  ;;  %s8932_s2 = sld [smem:[#allocation85_spill]]  ;;  %v380_v12 = vld [vmem:[%s8839_s6] sm:$0xff]  ;;  %vm377_vm1 = vcmask 7168   ;;  %s8933_s1 = sld [smem:[#allocation84_spill]]  ;;  %vm407_vm2 = vcmask 130048   ;;  %v485_v27 = vld [vmem:[%s8837_s4 + $0x8] sm:$0xff]  ;;  %v8864_v33 = vlaneseq }
  0x42   : > { %s354_s22 = scalar_select %p353_p6, %s5848_s13, 1  ;;  %1211 = vmatprep.mubr.f32.mxu1 %v8867_v9  ;;  %5551 = vset.pattern.permute.xlu0 %v5738_v11  ;;  %v482_v23 = vld [vmem:[%s8836_s3] sm:$0xff]  ;;  %v5190_v28 = vld [vmem:[%s8837_s4 + $0x10] sm:$0xff]  ;;  %v5191_v29 = vld [vmem:[%s8837_s4 + $0x18] sm:$0xff]  ;;  %vm502_vm3 = vcmask 1040384   ;;  %vm650_vm4 = vcmask 179200  }
  0x43   : > { %5552 = vset.pattern.permute.xlu1 %v5738_v11  ;;  %v484_v26 = vld [vmem:[%s8837_s4] sm:$0xff]  ;;  %v5234_v31 = vld [vmem:[%s8837_s4 + $0x28] sm:$0xff]  ;;  %v5988_v34 = vshrl.u32 %v8864_v33, 7  ;;  %v5188_v44 = vld [vmem:[%s8836_s3 + $0x10] sm:$0xff]  ;;  %s8901_s24 = smov 127   ;;  %s5179_s21 = sld [smem:[#allocation7 + $0x5]] }
  0x44   : > { %s5355_s23 = sshll.u32 %s354_s22, 5  ;;  %v5233_v30 = vld [vmem:[%s8837_s4 + $0x20] sm:$0xff]  ;;  %v381_v32 = vld [vmem:[%s8839_s6 + $0x8] sm:$0xff]  ;;  %v5189_v58 = vld [vmem:[%s8836_s3 + $0x18] sm:$0xff]  ;;  %652 = vst.msk [vmem:[#allocation2 + $0x8] sm:$0xff] %vm650_vm4, %v8867_v9  ;;  %vm653_vm5 = vcmask 177152  }
  0x45   : > { %8934 = vst [vmem:[#allocation13_spill] sm:$0xff] %v5988_v34  ;;  %v5991_v35 = vsub.s32 0, %v5988_v34  ;;  %v483_v42 = vld [vmem:[%s8836_s3 + $0x8] sm:$0xff]  ;;  %v5231_v63 = vld [vmem:[%s8836_s3 + $0x20] sm:$0xff]  ;;  %651 = vst.msk [vmem:[#allocation2] sm:$0xff] %vm650_vm4, %v8867_v9  ;;  %s8848_s27 = smov 19  }
  0x46   : > { %s5915_s25 = scalar_lea.vmem %s8931_s0, %s5355_s23  ;;  %s5178_s23 = sld [smem:[#allocation7 + $0x4]]  ;;  %655 = vst.msk [vmem:[#allocation2 + $0x18] sm:$0xff] %vm650_vm4, %v8867_v9  ;;  %656 = vst.msk [vmem:[#allocation2 + $0x20] sm:$0xff] %vm650_vm4, %v8867_v9  ;;  %vm695_vm6 = vcmask 147480   ;;  %vm1701_vm7 = vcmask 1046528   ;;  %vm1721_vm8 = vcmask 1045504  }
  0x47   : > { %v5918_v0 = vld [vmem:[%s5915_s25] sm:$0xff]  ;;  %v5921_v1 = vld [vmem:[%s5915_s25 + $0x8] sm:$0xff]  ;;  %v5924_v2 = vld [vmem:[%s5915_s25 + $0x10] sm:$0xff]  ;;  %8935 = vst [vmem:[#allocation14_spill] sm:$0xff] %v5991_v35  ;;  %s8860_s28 = smov 3   ;;  %s8858_s29 = smov 115  }
  0x48   : > { %v362_v3 = vadd.f32 %v5921_v1, %v5918_v0  ;;  %v371_v4 = vmax.f32 %v5918_v0, %v5921_v1  ;;  %v5931_v5 = vld [vmem:[%s5915_s25 + $0x18] sm:$0xff]  ;;  %v397_v10 = vld [vmem:[%s8932_s2] sm:$0x1]  ;;  %v5186_v24 = vld [vmem:[%s8932_s2 + $0x1] sm:$0x1]  ;;  %s8854_s14 = smov 83  }
  0x49   : > { %v365_v6 = vadd.f32 %v5931_v5, %v5924_v2  ;;  %v374_v7 = vmax.f32 %v5924_v2, %v5931_v5  ;;  %v396_v22 = vld [vmem:[%s8933_s1] sm:$0x1]  ;;  %v5229_v25 = vld [vmem:[%s8932_s2 + $0x2] sm:$0x1]  ;;  %v5185_v43 = vld [vmem:[%s8933_s1 + $0x1] sm:$0x1] }
  0x4a   : > { %363 = vadd.xlane.f32.xlu0 %v362_v3  ;;  %372 = vmax.xlane.f32.xlu1 %v371_v4  ;;  %v5228_v59 = vld [vmem:[%s8933_s1 + $0x2] sm:$0x1]  ;;  %654 = vst.msk [vmem:[#allocation2 + $0x10] sm:$0x3f] %vm653_vm5, %v8867_v9  ;;  %657 = vst.msk [vmem:[#allocation2 + $0x28] sm:$0x3f] %vm653_vm5, %v8867_v9 }
  0x4b   : > { %s8856_s16 = smov 99   ;;  %s8850_s17 = smov 51   ;;  %vm2903_vm9 = vcmask 1044480   ;;  %vm2921_vm10 = vcmask 1043456   ;;  %vm2939_vm11 = vcmask 1042432   ;;  %vm2957_vm12 = vcmask 1041408  }
  0x4c   : > { %s884_s26 = sadd.f32 %s5179_s21, %s5178_s23  ;;  %s8852_s22 = smov 67  }
  0x4d   : > { %s8846_s23 = smov 35   ;;  %s855_s21 = sld [smem:[#allocation4]] }
  0x4e   : > { %366 = vadd.xlane.f32.xlu0 %v365_v6  ;;  %375 = vmax.xlane.f32.xlu1 %v374_v7  ;;  %s7138_s0 = sld [smem:[#allocation4 + $0x114]]  ;;  %s7140_s1 = sld [smem:[#allocation4 + $0x12a]] }
  0x4f   : > { %s7174_s2 = sld [smem:[#allocation4 + $0x122]]  ;;  %p9151_p12 = scmp.ne.s32.totalorder %s8922_s19, 0 }
  0x5f   : > { %1234 = vperm.xlu1 %5552, %v5186_v24  }
  0x63   : > { %2404 = vperm.xlu1 %5552, %v5229_v25  }
  0x64   : > { %400 = vperm.xlu0 %5551, %v397_v10  }
  0x67   : > { %488 = vperm.xlu1 %5552, %v484_v26  }
  0x68   : > { %384 = vperm.xlu0 %5551, %v380_v12  }
  0x6b   : > { %493 = vperm.xlu1 %5552, %v485_v27  }
  0x6f   : > { %1323 = vperm.xlu1 %5552, %v5190_v28  }
  0x73   : > { %1328 = vperm.xlu1 %5552, %v5191_v29   ;;  %v5232_v29 = vld [vmem:[%s8836_s3 + $0x28] sm:$0xff] }
  0x77   : > { %2493 = vperm.xlu1 %5552, %v5233_v30   ;;  %v885_v30 = vstv %s884_s26  ;;  %s849_s26 = sld [smem:[#allocation7]] }
  0x7b   : > { %2498 = vperm.xlu1 %5552, %v5234_v31  }
  0x7f   : > { %389 = vperm.xlu1 %5552, %v381_v32  }
  0xd7   : > { %v364_v13 = vpop.xlane.xlu0 %363  ;;  %v373_v14 = vpop.xlane.xlu1 %372 }
  0xd8   : > { %v369_v15 = vmul.f32 0.00390625, %v364_v13 }
  0xda   : > { %v378_v19 = vsel %vm377_vm1, %v369_v15, %v373_v14 }
  0xdb   : > { %v367_v16 = vpop.xlane.xlu0 %366  ;;  %v376_v17 = vpop.xlane.xlu1 %375 }
  0xdc   : > { %v370_v18 = vmul.f32 0.00390625, %v367_v16 }
  0xde   : > { %v379_v20 = vsel %vm377_vm1, %v370_v18, %v376_v17 }
  0xdf   : > { %v5949_v21 = vpack.c.bf16 %v379_v20, %v378_v19  ;;  %v1235_v45 = vpop.permute.xlu1 %1234 }
  0xe0   : > { %v1240_v53 = vrot.slane %v1235_v45, %v5991_v35 }
  0xe1   : > { %5413 = vmatpush3.bf16.msra.mxu0 %v5949_v21 }
  0xe3   : > { %v401_v36 = vpop.permute.xlu0 %400  ;;  %v2405_v46 = vpop.permute.xlu1 %2404 }
  0xe4   : > { %5380 = vmatmul.mubr.msk.f32.vlgmr.msra.gmra.mrb[0].mxu0 %vm407_vm2, %v396_v22  ;;  %v406_v37 = vrot.slane %v401_v36, %v5991_v35  ;;  %v2410_v24 = vrot.slane %v2405_v46, %v5991_v35 }
  0xe5   : > { %5384 = vmatprep.mubr.msk.f32.mxu0 %vm377_vm1, %v482_v23 }
  0xe7   : > { %v489_v47 = vpop.permute.xlu1 %488  ;;  %v6039_v6 = vpop.permute.xlu0 %384 }
  0xe8   : > { %8937 = vst [vmem:[#allocation16_spill] sm:$0xff] %v6039_v6 }
  0xeb   : > { %v494_v48 = vpop.permute.xlu1 %493 }
  0xef   : > { %v1324_v60 = vpop.permute.xlu1 %1323 }
  0xf3   : > { %v1329_v61 = vpop.permute.xlu1 %1328 }
  0xf7   : > { %v6029_v62 = vpop.permute.xlu1 %2493 }
  0xfb   : > { %v6035_v3 = vpop.permute.xlu1 %2498 }
  0xff   : > { %v6037_v4 = vpop.permute.xlu1 %389 }
 0x100   : > { %8936 = vst [vmem:[#allocation15_spill] sm:$0xff] %v6037_v4 }
 0x1b7   : > { %v477_v38 = vpop.f32.mrb[0].mxu0 }
 0x1b8   : > { %v478_v39 = vadd.f32 %v477_v38, %v406_v37  ;;  %v5381_v40 = vpop.f32.mrb[1].mxu0 }
 0x1ba   : > { %v481_v41 = vmax.f32 %v478_v39, 0.0 }
 0x1bc   : > { %5382 = vmatprep.subr.msk.mxu0 %vm502_vm3, %v481_v41 }
 0x1bd   : > { %5383 = vmatpush3.msk.msra.mxu0 %vm502_vm3, %v481_v41 }
 0x1be   : > { %5385 = vmatmul.mubr.msk.f32.vlgmr.msra.gmra.mrb[2].mxu0 %vm377_vm1, %v483_v42  ;;  %5418 = vmatprep.subr.bf16.mxu0 %v5735_v8 }
 0x1bf   : > { %5420 = vmatpush3.bf16.msra.mxu0 %v5949_v21  ;;  %5391 = vmatprep.mubr.msk.f32.mxu0 %vm5736_vm0, %v8867_v9 }
 0x1c2   : > { %5392 = vmatmul.mubr.msk.f32.vlgmr.msra.gmra.mrb[4].mxu0 %vm407_vm2, %v5185_v43 }
 0x1c3   : > { %5396 = vmatprep.mubr.msk.f32.mxu0 %vm377_vm1, %v5188_v44 }
 0x291   : > { %v5386_v49 = vpop.f32.mrb[2].mxu0 }
 0x292   : > { %v578_v50 = vadd.f32 %v5386_v49, %v494_v48  ;;  %v572_v51 = vpop.f32.mrb[3].mxu0 }
 0x293   : > { %v573_v52 = vadd.f32 %v572_v51, %v489_v47 }
 0x294   : > { %585 = vrot.lane.b32.xlu1 %v578_v50, %s8901_s24 }
 0x295   : > { %v1310_v54 = vpop.f32.mrb[4].mxu0  ;;  %583 = vrot.lane.b32.xlu0 %v573_v52, %s8901_s24 }
 0x296   : > { %v1311_v55 = vadd.f32 %v1310_v54, %v1240_v53  ;;  %v5393_v56 = vpop.f32.mrb[5].mxu0  ;;  %v5740_v53 = vmov 1966171168  }
 0x297   : > { %v660_v54 = vunpack.c.l.s4 %v5740_v53 }
 0x298   : > { %v1314_v57 = vmax.f32 %v1311_v55, 0.0 }
 0x29a   : > { %5394 = vmatprep.subr.msk.mxu0 %vm502_vm3, %v1314_v57 }
 0x29b   : > { %5395 = vmatpush3.msk.msra.mxu0 %vm502_vm3, %v1314_v57 }
 0x29c   : > { %5397 = vmatmul.mubr.msk.f32.vlgmr.msra.gmra.mrb[6].mxu0 %vm377_vm1, %v5189_v58  ;;  %5425 = vmatprep.subr.bf16.mxu0 %v5735_v8 }
 0x29d   : > { %5427 = vmatpush3.bf16.msra.mxu0 %v5949_v21  ;;  %5403 = vmatprep.mubr.msk.f32.mxu0 %vm5736_vm0, %v8867_v9 }
 0x2a0   : > { %5404 = vmatmul.mubr.msk.f32.vlgmr.msra.gmra.mrb[8].mxu0 %vm407_vm2, %v5228_v59 }
 0x2a1   : > { %5408 = vmatprep.mubr.msk.f32.mxu0 %vm377_vm1, %v5231_v63 }
 0x306   : > { %v586_v7 = vpop.permute.xlu1 %585 }
 0x307   : > { %v590_v8 = vadd.f32 %v586_v7, %v578_v50  ;;  %v584_v10 = vpop.permute.xlu0 %583  ;;  %v661_v7 = vunpack.c.0.s8 %v660_v54 }
 0x308   : > { %v589_v11 = vadd.f32 %v584_v10, %v573_v52 }
 0x309   : > { %v5173_v12 = vmul.f32 -1.442695, %v590_v8 }
 0x30a   : > { %v5172_v13 = vmul.f32 -1.442695, %v589_v11 }
 0x30b   : > { %5553 = vpow2.f32 %v5173_v12 }
 0x30c   : > { %5555 = vpow2.f32 %v5172_v13 }
 0x315   : > { %v5554_v14 = vpop.eup %5553 }
 0x316   : > { %v5556_v15 = vpop.eup %5555  ;;  %v598_v16 = vadd.f32 1.0, %v5554_v14 }
 0x317   : > { %v597_v17 = vadd.f32 1.0, %v5556_v15  ;;  %v6085_v15 = vsub.s32 %v661_v7, %v5988_v34 }
 0x318   : > { %5557 = vrcp.f32 %v598_v16 }
 0x319   : > { %5559 = vrcp.f32 %v597_v17  ;;  %8942 = vst [vmem:[#allocation21_spill] sm:$0xff] %v6085_v15 }
 0x31a   : > { %5561 = vrsqrt.f32 %v885_v30 }
 0x322   : > { %v5558_v18 = vpop.eup %5557 }
 0x323   : > { %v5560_v19 = vpop.eup %5559  ;;  %610 = vperm.xlu1 %5552, %v5558_v18  }
 0x324   : > { %605 = vperm.xlu0 %5551, %v5560_v19   ;;  %v5562_v31 = vpop.eup %5561 }
 0x325   : > { %5444 = vpush %v5562_v31 }
 0x36f   : > { %v5398_v20 = vpop.f32.mrb[6].mxu0 }
 0x370   : > { %v6041_v21 = vadd.f32 %v5398_v20, %v1329_v61  ;;  %v1406_v22 = vpop.f32.mrb[7].mxu0 }
 0x371   : > { %v6043_v23 = vadd.f32 %v1406_v22, %v1324_v60 }
 0x372   : > { %1419 = vrot.lane.b32.xlu1 %v6041_v21, %s8901_s24 }
 0x373   : > { %v2480_v25 = vpop.f32.mrb[8].mxu0  ;;  %1417 = vrot.lane.b32.xlu0 %v6043_v23, %s8901_s24 }
 0x374   : > { %v2481_v26 = vadd.f32 %v2480_v25, %v2410_v24  ;;  %v5405_v27 = vpop.f32.mrb[9].mxu0 }
 0x376   : > { %v2484_v28 = vmax.f32 %v2481_v26, 0.0 }
 0x378   : > { %5406 = vmatprep.subr.msk.mxu0 %vm502_vm3, %v2484_v28 }
 0x379   : > { %5407 = vmatpush3.msk.msra.mxu0 %vm502_vm3, %v2484_v28 }
 0x37a   : > { %5409 = vmatmul.mubr.msk.f32.vlgmr.msra.gmra.mrb[10].mxu0 %vm377_vm1, %v5232_v29 }
 0x3a2   : > { %v611_v32 = vpop.permute.xlu1 %610 }
 0x3a3   : > { %v6065_v36 = vmul.f32 %v611_v32, %v5924_v2  ;;  %v6068_v37 = vmul.f32 %v611_v32, %v5931_v5  ;;  %v606_v38 = vpop.permute.xlu0 %605 }
 0x3a4   : > { %v6071_v39 = vmul.f32 %v606_v38, %v5918_v0  ;;  %v6074_v40 = vmul.f32 %v606_v38, %v5921_v1 }
 0x3a5   : > { %8938 = vst [vmem:[#allocation17_spill] sm:$0xff] %v6065_v36  ;;  %8939 = vst [vmem:[#allocation18_spill] sm:$0xff] %v6068_v37 }
 0x3a6   : > { %8940 = vst [vmem:[#allocation19_spill] sm:$0xff] %v6071_v39  ;;  %8941 = vst [vmem:[#allocation20_spill] sm:$0xff] %v6074_v40  ;;  %v617_v41 = vmax.f32 %v6071_v39, %v6065_v36  ;;  %v624_v42 = vmax.f32 %v6074_v40, %v6068_v37  ;;  %v631_v43 = vadd.f32 %v6065_v36, %v6071_v39 }
 0x3a7   : > { %v638_v44 = vadd.f32 %v6068_v37, %v6074_v40 }
 0x3a8   : > { %v618_v45 = vrot.slane %v617_v41, 4  ;;  %v625_v46 = vrot.slane %v624_v42, 4  ;;  %v632_v47 = vrot.slane %v631_v43, 4 }
 0x3a9   : > { %v639_v48 = vrot.slane %v638_v44, 4 }
 0x3aa   : > { %v619_v49 = vmax.f32 %v617_v41, %v618_v45  ;;  %v626_v50 = vmax.f32 %v624_v42, %v625_v46  ;;  %v633_v51 = vadd.f32 %v632_v47, %v631_v43 }
 0x3ab   : > { %v640_v52 = vadd.f32 %v639_v48, %v638_v44 }
 0x3ac   : > { %v620_v55 = vrot.slane %v619_v49, 2  ;;  %v627_v56 = vrot.slane %v626_v50, 2  ;;  %v634_v57 = vrot.slane %v633_v51, 2 }
 0x3ad   : > { %v641_v58 = vrot.slane %v640_v52, 2 }
 0x3ae   : > { %v621_v59 = vmax.f32 %v619_v49, %v620_v55  ;;  %v628_v60 = vmax.f32 %v626_v50, %v627_v56  ;;  %v635_v61 = vadd.f32 %v634_v57, %v633_v51 }
 0x3af   : > { %v642_v63 = vadd.f32 %v641_v58, %v640_v52 }
 0x3b0   : > { %v622_v8 = vrot.slane %v621_v59, 1  ;;  %v629_v10 = vrot.slane %v628_v60, 1  ;;  %v636_v11 = vrot.slane %v635_v61, 1 }
 0x3b1   : > { %v643_v12 = vrot.slane %v642_v63, 1 }
 0x3b2   : > { %v637_v13 = vadd.f32 %v636_v11, %v635_v61  ;;  %v623_v16 = vmax.f32 %v621_v59, %v622_v8  ;;  %v630_v17 = vmax.f32 %v628_v60, %v629_v10 }
 0x3b3   : > { %v644_v14 = vadd.f32 %v643_v12, %v642_v63 }
 0x3b4   : > { %v646_v18 = vmul.f32 0.0625, %v637_v13 }
 0x3b5   : > { %v647_v19 = vmul.f32 0.0625, %v644_v14 }
 0x3b6   : > { %v648_v20 = vsel %vm502_vm3, %v623_v16, %v646_v18 }
 0x3b7   : > { %v649_v22 = vsel %vm502_vm3, %v630_v17, %v647_v19  ;;  %v665_v24 = vrot.slane %v648_v20, %v6085_v15 }
 0x3b8   : > { %v761_v25 = vrot.slane %v649_v22, %v6085_v15 }
 0x3b9   : > { %v673_v26 = vrot.slane %v665_v24, %v6085_v15  ;;  %v666_v30 = vcombine.high %v665_v24, %v665_v24 }
 0x3ba   : > { %v769_v28 = vrot.slane %v761_v25, %v6085_v15  ;;  %v762_v38 = vcombine.high %v761_v25, %v761_v25 }
 0x3bb   : > { %v684_v27 = vrot.slane %v673_v26, %v5991_v35  ;;  %v680_v31 = vrot.slane %v666_v30, %v6085_v15 }
 0x3bc   : > { %v780_v29 = vrot.slane %v769_v28, %v5991_v35  ;;  %v776_v45 = vrot.slane %v762_v38, %v6085_v15  ;;  %v6174_v28 = vstv %s849_s26  ;;  %s5204_s26 = sld [smem:[#allocation4 + $0x82]] }
 0x3bd   : > { %746 = vrot.lane.b32.xlu1 %v684_v27, %s8848_s27  ;;  %689 = vrot.lane.b32.xlu0 %v684_v27, %s8860_s28  ;;  %v688_v32 = vrot.slane %v680_v31, %v5991_v35 }
 0x3be   : > { %v784_v48 = vrot.slane %v776_v45, %v5991_v35 }
 0x3c1   : > { %793 = vrot.lane.b32.xlu1 %v780_v29, %s8858_s29  ;;  %698 = vrot.lane.b32.xlu0 %v684_v27, %s8858_s29 }
 0x3c5   : > { %809 = vrot.lane.b32.xlu1 %v780_v29, %s8854_s14  ;;  %706 = vrot.lane.b32.xlu0 %v684_v27, %s8856_s16 }
 0x3c9   : > { %825 = vrot.lane.b32.xlu1 %v780_v29, %s8850_s17  ;;  %714 = vrot.lane.b32.xlu0 %v684_v27, %s8854_s14 }
 0x3cd   : > { %841 = vrot.lane.b32.xlu1 %v780_v29, %s8848_s27  ;;  %722 = vrot.lane.b32.xlu0 %v684_v27, %s8852_s22 }
 0x3d1   : > { %730 = vrot.lane.b32.xlu0 %v684_v27, %s8850_s17  ;;  %691 = vrot.lane.b32.xlu1 %v688_v32, %s8860_s28 }
 0x3d5   : > { %738 = vrot.lane.b32.xlu0 %v684_v27, %s8846_s23  ;;  %700 = vrot.lane.b32.xlu1 %v688_v32, %s8858_s29 }
 0x3d9   : > { %785 = vrot.lane.b32.xlu0 %v780_v29, %s8860_s28  ;;  %708 = vrot.lane.b32.xlu1 %v688_v32, %s8856_s16 }
 0x3dd   : > { %801 = vrot.lane.b32.xlu0 %v780_v29, %s8856_s16  ;;  %716 = vrot.lane.b32.xlu1 %v688_v32, %s8854_s14 }
 0x3e1   : > { %817 = vrot.lane.b32.xlu0 %v780_v29, %s8852_s22  ;;  %724 = vrot.lane.b32.xlu1 %v688_v32, %s8852_s22 }
 0x3e4   : > { %v1420_v41 = vpop.permute.xlu1 %1419 }
 0x3e5   : > { %v1424_v42 = vadd.f32 %v1420_v41, %v6041_v21  ;;  %833 = vrot.lane.b32.xlu0 %v780_v29, %s8846_s23  ;;  %732 = vrot.lane.b32.xlu1 %v688_v32, %s8850_s17  ;;  %v1418_v43 = vpop.permute.xlu0 %1417 }
 0x3e6   : > { %v1423_v44 = vadd.f32 %v1418_v43, %v6043_v23 }
 0x3e7   : > { %v5196_v46 = vmul.f32 -1.442695, %v1424_v42 }
 0x3e8   : > { %v5195_v47 = vmul.f32 -1.442695, %v1423_v44 }
 0x3e9   : > { %5563 = vpow2.f32 %v5196_v46  ;;  %740 = vrot.lane.b32.xlu0 %v688_v32, %s8846_s23  ;;  %748 = vrot.lane.b32.xlu1 %v688_v32, %s8848_s27 }
 0x3ea   : > { %5565 = vpow2.f32 %v5195_v47 }
 0x3ed   : > { %787 = vrot.lane.b32.xlu0 %v784_v48, %s8860_s28  ;;  %795 = vrot.lane.b32.xlu1 %v784_v48, %s8858_s29 }
 0x3f1   : > { %803 = vrot.lane.b32.xlu0 %v784_v48, %s8856_s16  ;;  %811 = vrot.lane.b32.xlu1 %v784_v48, %s8854_s14 }
 0x3f3   : > { %v5564_v21 = vpop.eup %5563 }
 0x3f4   : > { %v5566_v23 = vpop.eup %5565  ;;  %v1432_v49 = vadd.f32 1.0, %v5564_v21 }
 0x3f5   : > { %v1431_v50 = vadd.f32 1.0, %v5566_v23  ;;  %819 = vrot.lane.b32.xlu0 %v784_v48, %s8852_s22  ;;  %827 = vrot.lane.b32.xlu1 %v784_v48, %s8850_s17 }
 0x3f6   : > { %5567 = vrcp.f32 %v1432_v49 }
 0x3f7   : > { %5569 = vrcp.f32 %v1431_v50 }
 0x3f9   : > { %835 = vrot.lane.b32.xlu0 %v784_v48, %s8846_s23  ;;  %843 = vrot.lane.b32.xlu1 %v784_v48, %s8848_s27  ;;  %s5174_s23 = sld [smem:[#allocation4 + $0x1]] }
 0x3ff   : > { %v6176_v29 = vstv %s5174_s23  ;;  %s8947_s23 = smov 35  }
 0x400   : > { %v5568_v51 = vpop.eup %5567 }
 0x401   : > { %v5570_v52 = vpop.eup %5569  ;;  %1444 = vperm.xlu1 %5552, %v5568_v51  }
 0x402   : > { %1439 = vperm.xlu0 %5551, %v5570_v52  }
 0x42f   : > { %v747_v53 = vpop.permute.xlu1 %746  ;;  %v690_v54 = vpop.permute.xlu0 %689 }
 0x430   : > { %752 = vst.msk [vmem:[#allocation2 + $0xa] sm:$0x1] %vm695_vm6, %v747_v53  ;;  %696 = vst.msk [vmem:[#allocation2 + $0x3] sm:$0x1] %vm695_vm6, %v690_v54 }
 0x433   : > { %v794_v55 = vpop.permute.xlu1 %793  ;;  %v699_v56 = vpop.permute.xlu0 %698 }
 0x434   : > { %799 = vst.msk [vmem:[#allocation2 + $0xc] sm:$0x1] %vm695_vm6, %v794_v55  ;;  %704 = vst.msk [vmem:[#allocation2 + $0x4] sm:$0x1] %vm695_vm6, %v699_v56 }
 0x437   : > { %v810_v57 = vpop.permute.xlu1 %809  ;;  %v707_v58 = vpop.permute.xlu0 %706 }
 0x438   : > { %815 = vst.msk [vmem:[#allocation2 + $0xe] sm:$0x1] %vm695_vm6, %v810_v57  ;;  %712 = vst.msk [vmem:[#allocation2 + $0x5] sm:$0x1] %vm695_vm6, %v707_v58 }
 0x43b   : > { %v826_v59 = vpop.permute.xlu1 %825  ;;  %v715_v60 = vpop.permute.xlu0 %714 }
 0x43c   : > { %831 = vst.msk [vmem:[#allocation2 + $0x10] sm:$0x1] %vm695_vm6, %v826_v59  ;;  %720 = vst.msk [vmem:[#allocation2 + $0x6] sm:$0x1] %vm695_vm6, %v715_v60 }
 0x43f   : > { %v842_v61 = vpop.permute.xlu1 %841  ;;  %v723_v63 = vpop.permute.xlu0 %722 }
 0x440   : > { %847 = vst.msk [vmem:[#allocation2 + $0x12] sm:$0x1] %vm695_vm6, %v842_v61  ;;  %728 = vst.msk [vmem:[#allocation2 + $0x7] sm:$0x1] %vm695_vm6, %v723_v63 }
 0x443   : > { %v692_v7 = vpop.permute.xlu1 %691  ;;  %v731_v8 = vpop.permute.xlu0 %730 }
 0x444   : > { %697 = vst.msk [vmem:[#allocation2 + $0x1b] sm:$0x1] %vm695_vm6, %v692_v7  ;;  %736 = vst.msk [vmem:[#allocation2 + $0x8] sm:$0x1] %vm695_vm6, %v731_v8 }
 0x447   : > { %v701_v10 = vpop.permute.xlu1 %700  ;;  %v739_v11 = vpop.permute.xlu0 %738  ;;  %v852_v12 = vld [vmem:[#allocation2] sm:$0xff] }
 0x448   : > { %705 = vst.msk [vmem:[#allocation2 + $0x1c] sm:$0x1] %vm695_vm6, %v701_v10  ;;  %744 = vst.msk [vmem:[#allocation2 + $0x9] sm:$0x1] %vm695_vm6, %v739_v11 }
 0x449   : > { %1483 = vst.msk [vmem:[#allocation2] sm:$0xff] %vm650_vm4, %v8867_v9 }
 0x44b   : > { %v709_v13 = vpop.permute.xlu1 %708  ;;  %v786_v14 = vpop.permute.xlu0 %785 }
 0x44c   : > { %713 = vst.msk [vmem:[#allocation2 + $0x1d] sm:$0x1] %vm695_vm6, %v709_v13  ;;  %791 = vst.msk [vmem:[#allocation2 + $0xb] sm:$0x1] %vm695_vm6, %v786_v14 }
 0x44d   : > { %v5410_v16 = vpop.f32.mrb[10].mxu0 }
 0x44e   : > { %v6156_v17 = vadd.f32 %v5410_v16, %v6035_v3  ;;  %v2576_v18 = vpop.f32.mrb[11].mxu0 }
 0x44f   : > { %v6159_v19 = vadd.f32 %v2576_v18, %v6029_v62  ;;  %v717_v20 = vpop.permute.xlu1 %716  ;;  %v802_v22 = vpop.permute.xlu0 %801  ;;  %v6169_v62 = vstv %s855_s21  ;;  %s5201_s21 = sld [smem:[#allocation4 + $0x81]] }
 0x450   : > { %721 = vst.msk [vmem:[#allocation2 + $0x1e] sm:$0x1] %vm695_vm6, %v717_v20  ;;  %807 = vst.msk [vmem:[#allocation2 + $0xd] sm:$0x1] %vm695_vm6, %v802_v22  ;;  %2589 = vrot.lane.b32.xlu1 %v6156_v17, %s8901_s24  ;;  %v857_v27 = vmul.f32 %v6169_v62, %v852_v12 }
 0x451   : > { %2587 = vrot.lane.b32.xlu0 %v6159_v19, %s8901_s24 }
 0x452   : > { %v860_v41 = vadd.f32 %v857_v27, %v6174_v28 }
 0x453   : > { %v725_v3 = vpop.permute.xlu1 %724  ;;  %v818_v24 = vpop.permute.xlu0 %817 }
 0x454   : > { %729 = vst.msk [vmem:[#allocation2 + $0x1f] sm:$0x1] %vm695_vm6, %v725_v3  ;;  %823 = vst.msk [vmem:[#allocation2 + $0xf] sm:$0x1] %vm695_vm6, %v818_v24 }
 0x457   : > { %v733_v25 = vpop.permute.xlu1 %732  ;;  %v834_v26 = vpop.permute.xlu0 %833 }
 0x458   : > { %737 = vst.msk [vmem:[#allocation2 + $0x20] sm:$0x1] %vm695_vm6, %v733_v25  ;;  %839 = vst.msk [vmem:[#allocation2 + $0x11] sm:$0x1] %vm695_vm6, %v834_v26 }
 0x45b   : > { %v749_v30 = vpop.permute.xlu1 %748  ;;  %v741_v31 = vpop.permute.xlu0 %740  ;;  %v853_v32 = vld [vmem:[#allocation2 + $0x8] sm:$0xff]  ;;  %v864_v38 = vld [vmem:[#allocation2 + $0x18] sm:$0xff] }
 0x45c   : > { %753 = vst.msk [vmem:[#allocation2 + $0x22] sm:$0x1] %vm695_vm6, %v749_v30  ;;  %745 = vst.msk [vmem:[#allocation2 + $0x21] sm:$0x1] %vm695_vm6, %v741_v31  ;;  %v869_v42 = vmul.f32 %v6176_v29, %v864_v38  ;;  %v858_v61 = vmul.f32 %v6169_v62, %v853_v32 }
 0x45d   : > { %1484 = vst.msk [vmem:[#allocation2 + $0x8] sm:$0xff] %vm650_vm4, %v8867_v9  ;;  %1486 = vst.msk [vmem:[#allocation2 + $0x18] sm:$0xff] %vm650_vm4, %v8867_v9 }
 0x45e   : > { %v6186_v43 = vadd.f32 %v869_v42, %v860_v41  ;;  %v861_v13 = vadd.f32 %v858_v61, %v6174_v28 }
 0x45f   : > { %v6188_v44 = vld [vmem:[#allocation2 + $0x10] sm:$0x3f]  ;;  %v796_v45 = vpop.permute.xlu1 %795  ;;  %v788_v46 = vpop.permute.xlu0 %787 }
 0x460   : > { %1485 = vst.msk [vmem:[#allocation2 + $0x10] sm:$0x3f] %vm653_vm5, %v8867_v9 }
 0x461   : > { %800 = vst.msk [vmem:[#allocation2 + $0x24] sm:$0x1] %vm695_vm6, %v796_v45  ;;  %792 = vst.msk [vmem:[#allocation2 + $0x23] sm:$0x1] %vm695_vm6, %v788_v46 }
 0x463   : > { %v812_v47 = vpop.permute.xlu1 %811  ;;  %v804_v48 = vpop.permute.xlu0 %803 }
 0x464   : > { %816 = vst.msk [vmem:[#allocation2 + $0x26] sm:$0x1] %vm695_vm6, %v812_v47  ;;  %808 = vst.msk [vmem:[#allocation2 + $0x25] sm:$0x1] %vm695_vm6, %v804_v48 }
 0x467   : > { %v828_v21 = vpop.permute.xlu1 %827  ;;  %v820_v23 = vpop.permute.xlu0 %819 }
 0x468   : > { %832 = vst.msk [vmem:[#allocation2 + $0x28] sm:$0x1] %vm695_vm6, %v828_v21  ;;  %824 = vst.msk [vmem:[#allocation2 + $0x27] sm:$0x1] %vm695_vm6, %v820_v23 }
 0x46b   : > { %v844_v49 = vpop.permute.xlu1 %843  ;;  %v836_v50 = vpop.permute.xlu0 %835 }
 0x46c   : > { %848 = vst.msk [vmem:[#allocation2 + $0x2a] sm:$0x1] %vm695_vm6, %v844_v49  ;;  %840 = vst.msk [vmem:[#allocation2 + $0x29] sm:$0x1] %vm695_vm6, %v836_v50 }
 0x46f   : > { %v865_v51 = vld [vmem:[#allocation2 + $0x20] sm:$0xff] }
 0x470   : > { %1487 = vst.msk [vmem:[#allocation2 + $0x20] sm:$0xff] %vm650_vm4, %v8867_v9 }
 0x473   : > { %v6202_v52 = vld [vmem:[#allocation2 + $0x28] sm:$0x3f] }
 0x474   : > { %1488 = vst.msk [vmem:[#allocation2 + $0x28] sm:$0x3f] %vm653_vm5, %v8867_v9 }
 0x480   : > { %v1445_v53 = vpop.permute.xlu1 %1444 }
 0x481   : > { %v6207_v54 = vmul.f32 %v1445_v53, %v5924_v2  ;;  %v6210_v55 = vmul.f32 %v1445_v53, %v5931_v5  ;;  %v1440_v56 = vpop.permute.xlu0 %1439 }
 0x482   : > { %v6213_v57 = vmul.f32 %v1440_v56, %v5918_v0  ;;  %v6216_v58 = vmul.f32 %v1440_v56, %v5921_v1  ;;  %v870_v1 = vmul.f32 %v6176_v29, %v865_v51 }
 0x483   : > { %8943 = vst [vmem:[#allocation22_spill] sm:$0xff] %v6207_v54  ;;  %8944 = vst [vmem:[#allocation23_spill] sm:$0xff] %v6210_v55 }
 0x484   : > { %8945 = vst [vmem:[#allocation24_spill] sm:$0xff] %v6213_v57  ;;  %8946 = vst [vmem:[#allocation25_spill] sm:$0xff] %v6216_v58  ;;  %v1451_v59 = vmax.f32 %v6213_v57, %v6207_v54  ;;  %v1458_v60 = vmax.f32 %v6216_v58, %v6210_v55  ;;  %v1465_v2 = vadd.f32 %v6207_v54, %v6213_v57 }
 0x485   : > { %v1472_v5 = vadd.f32 %v6210_v55, %v6216_v58  ;;  %v6229_v20 = vadd.f32 %v870_v1, %v861_v13 }
 0x486   : > { %v1452_v63 = vrot.slane %v1451_v59, 4  ;;  %v1466_v0 = vrot.slane %v1465_v2, 4  ;;  %v1459_v10 = vrot.slane %v1458_v60, 4 }
 0x487   : > { %v1473_v7 = vrot.slane %v1472_v5, 4 }
 0x488   : > { %v1453_v8 = vmax.f32 %v1451_v59, %v1452_v63  ;;  %v1467_v11 = vadd.f32 %v1466_v0, %v1465_v2  ;;  %v1460_v3 = vmax.f32 %v1458_v60, %v1459_v10 }
 0x489   : > { %v1474_v12 = vadd.f32 %v1473_v7, %v1472_v5 }
 0x48a   : > { %v1454_v14 = vrot.slane %v1453_v8, 2  ;;  %v1468_v16 = vrot.slane %v1467_v11, 2  ;;  %v1461_v30 = vrot.slane %v1460_v3, 2 }
 0x48b   : > { %v1475_v18 = vrot.slane %v1474_v12, 2 }
 0x48c   : > { %v1455_v22 = vmax.f32 %v1453_v8, %v1454_v14  ;;  %v1469_v24 = vadd.f32 %v1468_v16, %v1467_v11  ;;  %v1462_v42 = vmax.f32 %v1460_v3, %v1461_v30 }
 0x48d   : > { %v1476_v27 = vadd.f32 %v1475_v18, %v1474_v12 }
 0x48e   : > { %v1456_v25 = vrot.slane %v1455_v22, 1  ;;  %v1470_v26 = vrot.slane %v1469_v24, 1  ;;  %v1463_v21 = vrot.slane %v1462_v42, 1 }
 0x48f   : > { %v1477_v38 = vrot.slane %v1476_v27, 1 }
 0x490   : > { %v1471_v31 = vadd.f32 %v1470_v26, %v1469_v24  ;;  %v1457_v32 = vmax.f32 %v1455_v22, %v1456_v25  ;;  %v1464_v50 = vmax.f32 %v1462_v42, %v1463_v21 }
 0x491   : > { %v1478_v47 = vadd.f32 %v1477_v38, %v1476_v27 }
 0x492   : > { %v1479_v41 = vmul.f32 0.0625, %v1471_v31 }
 0x493   : > { %v1480_v49 = vmul.f32 0.0625, %v1478_v47 }
 0x494   : > { %v1481_v45 = vsel %vm502_vm3, %v1457_v32, %v1479_v41  ;;  %v6285_v32 = vstv %s5201_s21  ;;  %s8862_s21 = smov 126  }
 0x495   : > { %v1496_v46 = vrot.slane %v1481_v45, %v6085_v15  ;;  %v1482_v51 = vsel %vm502_vm3, %v1464_v50, %v1480_v49 }
 0x496   : > { %v1591_v53 = vrot.slane %v1482_v51, %v6085_v15 }
 0x497   : > { %v1504_v48 = vrot.slane %v1496_v46, %v6085_v15  ;;  %v1497_v60 = vcombine.high %v1496_v46, %v1496_v46  ;;  %v6295_v46 = vstv %s5204_s26  ;;  %s5198_s26 = sld [smem:[#allocation4 + $0x80]] }
 0x498   : > { %v1599_v56 = vrot.slane %v1591_v53, %v6085_v15  ;;  %v1592_v61 = vcombine.high %v1591_v53, %v1591_v53 }
 0x499   : > { %v1515_v23 = vrot.slane %v1504_v48, %v5991_v35  ;;  %v1511_v2 = vrot.slane %v1497_v60, %v6085_v15 }
 0x49a   : > { %v1610_v59 = vrot.slane %v1599_v56, %v5991_v35  ;;  %v1606_v8 = vrot.slane %v1592_v61, %v6085_v15 }
 0x49b   : > { %1528 = vrot.lane.b32.xlu1 %v1515_v23, %s8858_s29  ;;  %1520 = vrot.lane.b32.xlu0 %v1515_v23, %s8860_s28  ;;  %v1519_v5 = vrot.slane %v1511_v2, %v5991_v35 }
 0x49c   : > { %v1614_v12 = vrot.slane %v1606_v8, %v5991_v35 }
 0x49f   : > { %1544 = vrot.lane.b32.xlu1 %v1515_v23, %s8854_s14  ;;  %1536 = vrot.lane.b32.xlu0 %v1515_v23, %s8856_s16 }
 0x4a3   : > { %1560 = vrot.lane.b32.xlu1 %v1515_v23, %s8850_s17  ;;  %1552 = vrot.lane.b32.xlu0 %v1515_v23, %s8852_s22 }
 0x4a7   : > { %1576 = vrot.lane.b32.xlu1 %v1515_v23, %s8848_s27  ;;  %1568 = vrot.lane.b32.xlu0 %v1515_v23, %s8947_s23 }
 0x4ab   : > { %1623 = vrot.lane.b32.xlu1 %v1610_v59, %s8858_s29  ;;  %1615 = vrot.lane.b32.xlu0 %v1610_v59, %s8860_s28 }
 0x4af   : > { %1639 = vrot.lane.b32.xlu1 %v1610_v59, %s8854_s14  ;;  %1631 = vrot.lane.b32.xlu0 %v1610_v59, %s8856_s16 }
 0x4b3   : > { %1655 = vrot.lane.b32.xlu1 %v1610_v59, %s8850_s17  ;;  %1647 = vrot.lane.b32.xlu0 %v1610_v59, %s8852_s22 }
 0x4b7   : > { %1671 = vrot.lane.b32.xlu1 %v1610_v59, %s8848_s27  ;;  %1663 = vrot.lane.b32.xlu0 %v1610_v59, %s8947_s23 }
 0x4bb   : > { %1530 = vrot.lane.b32.xlu1 %v1519_v5, %s8858_s29  ;;  %1522 = vrot.lane.b32.xlu0 %v1519_v5, %s8860_s28 }
 0x4bf   : > { %1546 = vrot.lane.b32.xlu1 %v1519_v5, %s8854_s14  ;;  %1538 = vrot.lane.b32.xlu0 %v1519_v5, %s8856_s16 }
 0x4c2   : > { %v2590_v63 = vpop.permute.xlu1 %2589 }
 0x4c3   : > { %v2594_v0 = vadd.f32 %v2590_v63, %v6156_v17  ;;  %1562 = vrot.lane.b32.xlu1 %v1519_v5, %s8850_s17  ;;  %1554 = vrot.lane.b32.xlu0 %v1519_v5, %s8852_s22  ;;  %v2588_v7 = vpop.permute.xlu0 %2587 }
 0x4c4   : > { %v2593_v1 = vadd.f32 %v2588_v7, %v6159_v19 }
 0x4c5   : > { %v5239_v10 = vmul.f32 -1.442695, %v2594_v0 }
 0x4c6   : > { %v5238_v11 = vmul.f32 -1.442695, %v2593_v1 }
 0x4c7   : > { %5571 = vpow2.f32 %v5239_v10  ;;  %1578 = vrot.lane.b32.xlu1 %v1519_v5, %s8848_s27  ;;  %1570 = vrot.lane.b32.xlu0 %v1519_v5, %s8947_s23  ;;  %v6321_v5 = vstv %s5198_s26  ;;  %s6506_s26 = sld [smem:[#allocation4 + $0x8d]] }
 0x4c8   : > { %5573 = vpow2.f32 %v5238_v11 }
 0x4cb   : > { %1625 = vrot.lane.b32.xlu1 %v1614_v12, %s8858_s29  ;;  %1617 = vrot.lane.b32.xlu0 %v1614_v12, %s8860_s28  ;;  %s6313_s29 = sld [smem:[#allocation7 + $0x84]]  ;;  %s6315_s28 = sld [smem:[#allocation7 + $0x85]] }
 0x4cf   : > { %1641 = vrot.lane.b32.xlu1 %v1614_v12, %s8854_s14  ;;  %1633 = vrot.lane.b32.xlu0 %v1614_v12, %s8856_s16  ;;  %s5197_s14 = sld [smem:[#allocation7 + $0x80]]  ;;  %s6307_s16 = sld [smem:[#allocation4 + $0x84]] }
 0x4d1   : > { %v5572_v17 = vpop.eup %5571 }
 0x4d2   : > { %v5574_v19 = vpop.eup %5573  ;;  %v2602_v13 = vadd.f32 1.0, %v5572_v17 }
 0x4d3   : > { %v2601_v14 = vadd.f32 1.0, %v5574_v19  ;;  %1657 = vrot.lane.b32.xlu1 %v1614_v12, %s8850_s17  ;;  %1649 = vrot.lane.b32.xlu0 %v1614_v12, %s8852_s22  ;;  %s5200_s17 = sld [smem:[#allocation4 + $0x86]]  ;;  %s5203_s22 = sld [smem:[#allocation4 + $0x87]] }
 0x4d4   : > { %5575 = vrcp.f32 %v2602_v13 }
 0x4d5   : > { %5577 = vrcp.f32 %v2601_v14  ;;  %v6350_v19 = vstv %s5197_s14  ;;  %s6366_s14 = sld [smem:[#allocation4 + $0x8a]] }
 0x4d7   : > { %1673 = vrot.lane.b32.xlu1 %v1614_v12, %s8848_s27  ;;  %1665 = vrot.lane.b32.xlu0 %v1614_v12, %s8947_s23  ;;  %s5199_s27 = sld [smem:[#allocation4 + $0x83]] }
 0x4d9   : > { %v6311_v56 = vstv %s5200_s17  ;;  %v6342_v8 = vstv %s5203_s22  ;;  %s8948_s17 = smov 126   ;;  %s2071_s22 = sadd.f32 %s6315_s28, %s6313_s29 }
 0x4da   : > { %s5213_s28 = sld [smem:[#allocation4 + $0x8b]]  ;;  %s5208_s29 = sld [smem:[#allocation4 + $0x8c]] }
 0x4dd   : > { %v6309_v53 = vstv %s5199_s27  ;;  %s6344_s27 = sld [smem:[#allocation4 + $0x88]] }
 0x4de   : > { %v5576_v16 = vpop.eup %5575 }
 0x4df   : > { %v5578_v18 = vpop.eup %5577  ;;  %2614 = vperm.xlu1 %5552, %v5576_v16  }
 0x4e0   : > { %2609 = vperm.xlu0 %5551, %v5578_v18  }
 0x50d   : > { %v1529_v22 = vpop.permute.xlu1 %1528  ;;  %v1521_v3 = vpop.permute.xlu0 %1520 }
 0x50e   : > { %1534 = vst.msk [vmem:[#allocation2 + $0x4] sm:$0x1] %vm695_vm6, %v1529_v22  ;;  %1526 = vst.msk [vmem:[#allocation2 + $0x3] sm:$0x1] %vm695_vm6, %v1521_v3 }
 0x511   : > { %v1545_v24 = vpop.permute.xlu1 %1544  ;;  %v1537_v25 = vpop.permute.xlu0 %1536 }
 0x512   : > { %1550 = vst.msk [vmem:[#allocation2 + $0x6] sm:$0x1] %vm695_vm6, %v1545_v24  ;;  %1542 = vst.msk [vmem:[#allocation2 + $0x5] sm:$0x1] %vm695_vm6, %v1537_v25  ;;  %v6371_v25 = vstv %s6307_s16  ;;  %s5209_s16 = sld [smem:[#allocation4 + $0x8f]] }
 0x515   : > { %v1561_v26 = vpop.permute.xlu1 %1560  ;;  %v1553_v27 = vpop.permute.xlu0 %1552 }
 0x516   : > { %1566 = vst.msk [vmem:[#allocation2 + $0x8] sm:$0x1] %vm695_vm6, %v1561_v26  ;;  %1558 = vst.msk [vmem:[#allocation2 + $0x7] sm:$0x1] %vm695_vm6, %v1553_v27 }
 0x519   : > { %v1577_v30 = vpop.permute.xlu1 %1576  ;;  %v1569_v31 = vpop.permute.xlu0 %1568 }
 0x51a   : > { %1582 = vst.msk [vmem:[#allocation2 + $0xa] sm:$0x1] %vm695_vm6, %v1577_v30  ;;  %1574 = vst.msk [vmem:[#allocation2 + $0x9] sm:$0x1] %vm695_vm6, %v1569_v31 }
 0x51d   : > { %v1624_v38 = vpop.permute.xlu1 %1623  ;;  %v1616_v41 = vpop.permute.xlu0 %1615  ;;  %v6287_v42 = vld [vmem:[#allocation2] sm:$0xff] }
 0x51e   : > { %1629 = vst.msk [vmem:[#allocation2 + $0xc] sm:$0x1] %vm695_vm6, %v1624_v38  ;;  %1621 = vst.msk [vmem:[#allocation2 + $0xb] sm:$0x1] %vm695_vm6, %v1616_v41  ;;  %v1735_v45 = vmul.f32 %v6285_v32, %v6287_v42  ;;  %v1805_v21 = vmul.f32 %v6295_v46, %v6287_v42  ;;  %v1695_v63 = vmul.f32 %v6309_v53, %v6287_v42 }
 0x51f   : > { %2653 = vst.msk [vmem:[#allocation2] sm:$0xff] %vm650_vm4, %v8867_v9  ;;  %v1715_v7 = vmul.f32 %v6311_v56, %v6287_v42  ;;  %v1687_v10 = vmul.f32 %v6321_v5, %v6287_v42 }
 0x520   : > { %1741 = vrot.lane.b32.xlu0 %v1735_v45, %s8901_s24  ;;  %v1702_v3 = vrot.slane %v1695_v63, 1  ;;  %v1923_v63 = vstv %s6366_s14  ;;  %s5215_s14 = sld [smem:[#allocation4 + $0x91]] }
 0x521   : > { %v1640_v47 = vpop.permute.xlu1 %1639  ;;  %v1632_v48 = vpop.permute.xlu0 %1631  ;;  %v1722_v24 = vrot.slane %v1715_v7, 2  ;;  %v1690_v26 = vadd.f32 %v1687_v10, %v6350_v19 }
 0x522   : > { %1645 = vst.msk [vmem:[#allocation2 + $0xe] sm:$0x1] %vm695_vm6, %v1640_v47  ;;  %1637 = vst.msk [vmem:[#allocation2 + $0xd] sm:$0x1] %vm695_vm6, %v1632_v48 }
 0x524   : > { %1811 = vrot.lane.b32.xlu0 %v1805_v21, %s8862_s21  ;;  %s6319_s21 = sld [smem:[#allocation4 + $0x85]] }
 0x525   : > { %v1656_v23 = vpop.permute.xlu1 %1655  ;;  %v1648_v49 = vpop.permute.xlu0 %1647 }
 0x526   : > { %1661 = vst.msk [vmem:[#allocation2 + $0x10] sm:$0x1] %vm695_vm6, %v1656_v23  ;;  %1653 = vst.msk [vmem:[#allocation2 + $0xf] sm:$0x1] %vm695_vm6, %v1648_v49  ;;  %v2072_v23 = vstv %s2071_s22  ;;  %s8956_s22 = smov 3  }
 0x527   : > { %5579 = vrsqrt.f32 %v2072_v23  ;;  %v6444_v23 = vstv %s5208_s29  ;;  %s8958_s29 = smov 99  }
 0x529   : > { %v1672_v50 = vpop.permute.xlu1 %1671  ;;  %v1664_v51 = vpop.permute.xlu0 %1663 }
 0x52a   : > { %1677 = vst.msk [vmem:[#allocation2 + $0x12] sm:$0x1] %vm695_vm6, %v1672_v50  ;;  %1669 = vst.msk [vmem:[#allocation2 + $0x11] sm:$0x1] %vm695_vm6, %v1664_v51  ;;  %v6405_v51 = vstv %s6344_s27  ;;  %s6512_s27 = sld [smem:[#allocation4 + $0x8e]] }
 0x52d   : > { %v1531_v59 = vpop.permute.xlu1 %1530  ;;  %v1523_v60 = vpop.permute.xlu0 %1522  ;;  %v6317_v2 = vld [vmem:[#allocation2 + $0x8] sm:$0xff] }
 0x52e   : > { %1535 = vst.msk [vmem:[#allocation2 + $0x1c] sm:$0x1] %vm695_vm6, %v1531_v59  ;;  %1527 = vst.msk [vmem:[#allocation2 + $0x1b] sm:$0x1] %vm695_vm6, %v1523_v60  ;;  %v1736_v61 = vmul.f32 %v6285_v32, %v6317_v2  ;;  %v6333_v0 = vmul.f32 %v6309_v53, %v6317_v2  ;;  %v6339_v1 = vmul.f32 %v6311_v56, %v6317_v2 }
 0x52f   : > { %2654 = vst.msk [vmem:[#allocation2 + $0x8] sm:$0xff] %vm650_vm4, %v8867_v9  ;;  %v1806_v16 = vmul.f32 %v6295_v46, %v6317_v2 }
 0x530   : > { %1743 = vrot.lane.b32.xlu1 %v1736_v61, %s8901_s24  ;;  %v8869_v13 = vrot.slane %v6333_v0, 1  ;;  %v8866_v14 = vrot.slane %v6339_v1, 2 }
 0x531   : > { %v6348_v11 = vld [vmem:[#allocation2 + $0x10] sm:$0x3f]  ;;  %v1547_v12 = vpop.permute.xlu1 %1546  ;;  %v1539_v17 = vpop.permute.xlu0 %1538 }
 0x532   : > { %2655 = vst.msk [vmem:[#allocation2 + $0x10] sm:$0x3f] %vm653_vm5, %v8867_v9  ;;  %v1737_v18 = vmul.f32 %v6285_v32, %v6348_v11  ;;  %v6364_v22 = vmul.f32 %v6342_v8, %v6348_v11  ;;  %v1807_v31 = vmul.f32 %v6295_v46, %v6348_v11  ;;  %v6379_v32 = vstv %s6319_s21  ;;  %s5212_s21 = sld [smem:[#allocation4 + $0x90]] }
 0x533   : > { %1551 = vst.msk [vmem:[#allocation2 + $0x1e] sm:$0x1] %vm695_vm6, %v1547_v12  ;;  %1543 = vst.msk [vmem:[#allocation2 + $0x1d] sm:$0x1] %vm695_vm6, %v1539_v17  ;;  %v1704_v38 = vsel %vm1701_vm7, %v1702_v3, %v8869_v13  ;;  %v1724_v41 = vsel %vm1721_vm8, %v1722_v24, %v8866_v14  ;;  %v6392_v46 = vmul.f32 %v6371_v25, %v6348_v11 }
 0x534   : > { %1813 = vrot.lane.b32.xlu1 %v1806_v16, %s8948_s17  ;;  %1745 = vrot.lane.b32.xlu0 %v1737_v18, %s8901_s24  ;;  %v1789_v45 = vrot.slane %v6364_v22, 2  ;;  %v6396_v47 = vmul.f32 %v6379_v32, %v6348_v11  ;;  %v1710_v48 = vadd.f32 %v1704_v38, %v1690_v26  ;;  %v6413_v61 = vmul.f32 %v6405_v51, %v6348_v11 }
 0x535   : > { %v1563_v27 = vpop.permute.xlu1 %1562  ;;  %v1555_v30 = vpop.permute.xlu0 %1554  ;;  %v1764_v59 = vrot.slane %v6392_v46, 1  ;;  %v1993_v18 = vstv %s5213_s28  ;;  %s8957_s28 = smov 115  }
 0x536   : > { %1567 = vst.msk [vmem:[#allocation2 + $0x20] sm:$0x1] %vm695_vm6, %v1563_v27  ;;  %1559 = vst.msk [vmem:[#allocation2 + $0x1f] sm:$0x1] %vm695_vm6, %v1555_v30  ;;  %v6402_v21 = vadd.f32 %v1724_v41, %v1710_v48  ;;  %v8871_v60 = vrot.slane %v6396_v47, 1  ;;  %v8870_v17 = vrot.slane %v6413_v61, 2  ;;  %v5580_v27 = vpop.eup %5579 }
 0x537   : > { %5446 = vpush %v5580_v27 }
 0x538   : > { %1815 = vrot.lane.b32.xlu1 %v1807_v31, %s8948_s17  ;;  %1795 = vrot.lane.b32.xlu0 %v1789_v45, %s8901_s24 }
 0x539   : > { %v1579_v49 = vpop.permute.xlu1 %1578  ;;  %v1571_v50 = vpop.permute.xlu0 %1570 }
 0x53a   : > { %1583 = vst.msk [vmem:[#allocation2 + $0x22] sm:$0x1] %vm695_vm6, %v1579_v49  ;;  %1575 = vst.msk [vmem:[#allocation2 + $0x21] sm:$0x1] %vm695_vm6, %v1571_v50  ;;  %v6449_v50 = vstv %s5209_s16  ;;  %s8959_s16 = smov 83  }
 0x53c   : > { %1770 = vrot.lane.b32.xlu1 %v1764_v59, %s8901_s24  ;;  %1840 = vrot.lane.b32.xlu0 %v8871_v60, %s8948_s17 }
 0x53d   : > { %v1626_v7 = vpop.permute.xlu1 %1625  ;;  %v1618_v10 = vpop.permute.xlu0 %1617  ;;  %v6422_v12 = vld [vmem:[#allocation2 + $0x18] sm:$0xff] }
 0x53e   : > { %1630 = vst.msk [vmem:[#allocation2 + $0x24] sm:$0x1] %vm695_vm6, %v1626_v7  ;;  %1622 = vst.msk [vmem:[#allocation2 + $0x23] sm:$0x1] %vm695_vm6, %v1618_v10  ;;  %v1924_v16 = vmul.f32 %v1923_v63, %v6422_v12  ;;  %v1994_v26 = vmul.f32 %v1993_v18, %v6422_v12  ;;  %v1756_v7 = vmul.f32 %v6371_v25, %v6317_v2 }
 0x53f   : > { %2656 = vst.msk [vmem:[#allocation2 + $0x18] sm:$0xff] %vm650_vm4, %v8867_v9  ;;  %v1905_v27 = vmul.f32 %v6449_v50, %v6422_v12 }
 0x540   : > { %1865 = vrot.lane.b32.xlu1 %v8870_v17, %s8948_s17  ;;  %1930 = vrot.lane.b32.xlu0 %v1924_v16, %s8901_s24 }
 0x541   : > { %v1642_v3 = vpop.permute.xlu1 %1641  ;;  %v1634_v24 = vpop.permute.xlu0 %1633  ;;  %v1911_v13 = vrot.slane %v1905_v27, 2  ;;  %v5615_v27 = vld [vmem:[%s5915_s25 + $0x10] sm:$0xff] }
 0x542   : > { %1646 = vst.msk [vmem:[#allocation2 + $0x26] sm:$0x1] %vm695_vm6, %v1642_v3  ;;  %1638 = vst.msk [vmem:[#allocation2 + $0x25] sm:$0x1] %vm695_vm6, %v1634_v24  ;;  %v1886_v3 = vmul.f32 %v6444_v23, %v6422_v12 }
 0x544   : > { %2000 = vrot.lane.b32.xlu0 %v1994_v26, %s8948_s17  ;;  %v1755_v26 = vmul.f32 %v6371_v25, %v6287_v42  ;;  %v1892_v25 = vrot.slane %v1886_v3, 1 }
 0x545   : > { %v1658_v30 = vpop.permute.xlu1 %1657  ;;  %v1650_v31 = vpop.permute.xlu0 %1649 }
 0x546   : > { %1662 = vst.msk [vmem:[#allocation2 + $0x28] sm:$0x1] %vm695_vm6, %v1658_v30  ;;  %1654 = vst.msk [vmem:[#allocation2 + $0x27] sm:$0x1] %vm695_vm6, %v1650_v31  ;;  %v1761_v14 = vrot.slane %v1755_v26, 1  ;;  %v1850_v26 = vmul.f32 %v6405_v51, %v6287_v42 }
 0x549   : > { %v1674_v38 = vpop.permute.xlu1 %1673  ;;  %v1666_v41 = vpop.permute.xlu0 %1665 }
 0x54a   : > { %1678 = vst.msk [vmem:[#allocation2 + $0x2a] sm:$0x1] %vm695_vm6, %v1674_v38  ;;  %1670 = vst.msk [vmem:[#allocation2 + $0x29] sm:$0x1] %vm695_vm6, %v1666_v41  ;;  %v1762_v41 = vrot.slane %v1756_v7, 1 }
 0x54c   : > { %v1763_v17 = vsel %vm1701_vm7, %v1761_v14, %v1762_v41  ;;  %v1851_v14 = vmul.f32 %v6405_v51, %v6317_v2  ;;  %v1765_v3 = vsel %vm1701_vm7, %v1762_v41, %v1764_v59  ;;  %v5616_v41 = vld [vmem:[%s5915_s25 + $0x18] sm:$0xff] }
 0x54d   : > { %v6442_v48 = vld [vmem:[#allocation2 + $0x20] sm:$0xff] }
 0x54e   : > { %v1925_v49 = vmul.f32 %v1923_v63, %v6442_v48  ;;  %2657 = vst.msk [vmem:[#allocation2 + $0x20] sm:$0xff] %vm650_vm4, %v8867_v9  ;;  %v6455_v10 = vmul.f32 %v6449_v50, %v6442_v48  ;;  %v6459_v16 = vmul.f32 %v6444_v23, %v6442_v48  ;;  %v1995_v30 = vmul.f32 %v1993_v18, %v6442_v48 }
 0x54f   : > { %v1857_v59 = vrot.slane %v1851_v14, 2 }
 0x550   : > { %1932 = vrot.lane.b32.xlu1 %v1925_v49, %s8901_s24  ;;  %v8873_v38 = vrot.slane %v6459_v16, 1  ;;  %v1781_v49 = vmul.f32 %v6342_v8, %v6317_v2  ;;  %v8872_v33 = vrot.slane %v6455_v10, 2 }
 0x551   : > { %v6464_v24 = vld [vmem:[#allocation2 + $0x28] sm:$0x3f] }
 0x552   : > { %8949 = vst [vmem:[#allocation26_spill] sm:$0xff] %v6464_v24  ;;  %2658 = vst.msk [vmem:[#allocation2 + $0x28] sm:$0x3f] %vm653_vm5, %v8867_v9  ;;  %v1926_v31 = vmul.f32 %v1923_v63, %v6464_v24  ;;  %v1780_v9 = vmul.f32 %v6342_v8, %v6287_v42  ;;  %v1996_v63 = vmul.f32 %v1993_v18, %v6464_v24  ;;  %v1787_v60 = vrot.slane %v1781_v49, 2 }
 0x553   : > { %v6486_v7 = vsel %vm1701_vm7, %v1892_v25, %v8873_v38  ;;  %v1826_v18 = vmul.f32 %v6379_v32, %v6317_v2 }
 0x554   : > { %2002 = vrot.lane.b32.xlu1 %v1995_v30, %s8948_s17  ;;  %1934 = vrot.lane.b32.xlu0 %v1926_v31, %s8901_s24  ;;  %v6492_v30 = vsel %vm1721_vm8, %v1911_v13, %v8872_v33  ;;  %v1786_v8 = vrot.slane %v1780_v9, 2 }
 0x555   : > { %v1832_v9 = vrot.slane %v1826_v18, 1  ;;  %v5618_v18 = vld [vmem:[%s5915_s25 + $0x8] sm:$0xff] }
 0x556   : > { %v1788_v13 = vsel %vm1721_vm8, %v1786_v8, %v1787_v60 }
 0x558   : > { %2004 = vrot.lane.b32.xlu1 %v1996_v63, %s8948_s17  ;;  %1766 = vrot.lane.b32.xlu0 %v1763_v17, %s8901_s24  ;;  %v1825_v17 = vmul.f32 %v6379_v32, %v6287_v42  ;;  %v1790_v63 = vsel %vm1721_vm8, %v1787_v60, %v1789_v45  ;;  %v8952_v32 = vrot.slane %v6396_v47, 1  ;;  %v5617_v42 = vld [vmem:[%s5915_s25] sm:$0xff]  ;;  %v1968_v45 = vstv %s5212_s21  ;;  %s8960_s21 = smov 67  }
 0x55a   : > { %v1835_v8 = vsel %vm1701_vm7, %v1832_v9, %v8952_v32  ;;  %v1831_v22 = vrot.slane %v1825_v17, 1  ;;  %v2013_v32 = vstv %s6512_s27  ;;  %s8962_s27 = smov 19  }
 0x55b   : > { %v2016_v33 = vmul.f32 %v2013_v32, %v6464_v24 }
 0x55c   : > { %1768 = vrot.lane.b32.xlu1 %v1765_v3, %s8901_s24  ;;  %1791 = vrot.lane.b32.xlu0 %v1788_v13, %s8901_s24  ;;  %v1856_v3 = vrot.slane %v1850_v26, 2  ;;  %v6539_v13 = vmul.f32 %v1968_v45, %v6464_v24  ;;  %v1943_v26 = vstv %s6506_s26  ;;  %s8961_s26 = smov 51  }
 0x55e   : > { %v2615_v46 = vpop.permute.xlu1 %2614 }
 0x55f   : > { %v6515_v31 = vmul.f32 %v5615_v27, %v2615_v46  ;;  %v6518_v49 = vmul.f32 %v5616_v41, %v2615_v46  ;;  %v2610_v25 = vpop.permute.xlu0 %2609  ;;  %v1833_v27 = vsel %vm1701_vm7, %v1831_v22, %v1832_v9  ;;  %v1858_v41 = vsel %vm1721_vm8, %v1856_v3, %v1857_v59 }
 0x560   : > { %v6527_v51 = vmul.f32 %v5617_v42, %v2610_v25  ;;  %v6530_v14 = vmul.f32 %v5618_v18, %v2610_v25  ;;  %1793 = vrot.lane.b32.xlu1 %v1790_v63, %s8901_s24  ;;  %1838 = vrot.lane.b32.xlu0 %v1835_v8, %s8948_s17  ;;  %v1946_v63 = vmul.f32 %v1943_v26, %v6464_v24  ;;  %v1978_v18 = vrot.slane %v6539_v13, 2 }
 0x561   : > { %8950 = vst [vmem:[#allocation27_spill] sm:$0xff] %v6515_v31  ;;  %8951 = vst [vmem:[#allocation28_spill] sm:$0xff] %v6518_v49  ;;  %v8955_v9 = vrot.slane %v6413_v61, 2  ;;  %v1945_v3 = vmul.f32 %v1943_v26, %v6442_v48  ;;  %v1944_v13 = vmul.f32 %v1943_v26, %v6422_v12 }
 0x562   : > { %8953 = vst [vmem:[#allocation29_spill] sm:$0xff] %v6527_v51  ;;  %8954 = vst [vmem:[#allocation30_spill] sm:$0xff] %v6530_v14  ;;  %v2621_v47 = vmax.f32 %v6527_v51, %v6515_v31  ;;  %v2635_v60 = vadd.f32 %v6515_v31, %v6527_v51  ;;  %v2642_v46 = vadd.f32 %v6518_v49, %v6530_v14 }
 0x563   : > { %v1860_v22 = vsel %vm1721_vm8, %v1857_v59, %v8955_v9  ;;  %v2023_v59 = vrot.slane %v2016_v33, 1  ;;  %v1951_v6 = vrot.slane %v1945_v3, 1  ;;  %v1970_v31 = vmul.f32 %v1968_v45, %v6442_v48 }
 0x564   : > { %v2622_v25 = vrot.slane %v2621_v47, 4  ;;  %v2636_v17 = vrot.slane %v2635_v60, 4  ;;  %1836 = vrot.lane.b32.xlu1 %v1833_v27, %s8948_s17  ;;  %1861 = vrot.lane.b32.xlu0 %v1858_v41, %s8948_s17  ;;  %v2643_v38 = vrot.slane %v2642_v46, 4  ;;  %v2038_v41 = vstv %s5215_s14  ;;  %s6738_s14 = sld [smem:[#allocation4 + $0x101]] }
 0x565   : > { %v1976_v33 = vrot.slane %v1970_v31, 2  ;;  %v2015_v3 = vmul.f32 %v2013_v32, %v6442_v48 }
 0x566   : > { %v2623_v8 = vmax.f32 %v2621_v47, %v2622_v25  ;;  %v2637_v42 = vadd.f32 %v2636_v17, %v2635_v60  ;;  %v2628_v47 = vmax.f32 %v6530_v14, %v6518_v49  ;;  %v2041_v60 = vmul.f32 %v2038_v41, %v6464_v24 }
 0x567   : > { %v1953_v17 = vrot.slane %v1946_v63, 1  ;;  %v2644_v9 = vadd.f32 %v2643_v38, %v2642_v46  ;;  %v1950_v49 = vrot.slane %v1944_v13, 1  ;;  %v1969_v14 = vmul.f32 %v1968_v45, %v6422_v12 }
 0x568   : > { %v2624_v27 = vrot.slane %v2623_v8, 2  ;;  %v2638_v4 = vrot.slane %v2637_v42, 2  ;;  %1863 = vrot.lane.b32.xlu1 %v1860_v22, %s8948_s17  ;;  %1984 = vrot.lane.b32.xlu0 %v1978_v18, %s8901_s24  ;;  %v2629_v54 = vrot.slane %v2628_v47, 4  ;;  %v2048_v26 = vrot.slane %v2041_v60, 2 }
 0x569   : > { %v1954_v45 = vsel %vm1701_vm7, %v1951_v6, %v1953_v17  ;;  %v2021_v31 = vrot.slane %v2015_v3, 1 }
 0x56a   : > { %v2625_v25 = vmax.f32 %v2623_v8, %v2624_v27  ;;  %v2639_v61 = vadd.f32 %v2638_v4, %v2637_v42  ;;  %v2645_v8 = vrot.slane %v2644_v9, 2  ;;  %v1952_v4 = vsel %vm1701_vm7, %v1950_v49, %v1951_v6 }
 0x56b   : > { %v2630_v63 = vmax.f32 %v2628_v47, %v2629_v54  ;;  %v1975_v42 = vrot.slane %v1969_v14, 2  ;;  %v2040_v27 = vmul.f32 %v2038_v41, %v6442_v48  ;;  %v2014_v54 = vmul.f32 %v2013_v32, %v6422_v12 }
 0x56c   : > { %v2640_v51 = vrot.slane %v2639_v61, 1  ;;  %1959 = vrot.lane.b32.xlu1 %v1953_v17, %s8901_s24  ;;  %2029 = vrot.lane.b32.xlu0 %v2023_v59, %s8948_s17  ;;  %v2626_v22 = vrot.slane %v2625_v25, 1  ;;  %v2646_v13 = vadd.f32 %v2645_v8, %v2644_v9  ;;  %v2039_v14 = vmul.f32 %v2038_v41, %v6422_v12 }
 0x56d   : > { %v1977_v49 = vsel %vm1721_vm8, %v1975_v42, %v1976_v33  ;;  %v2046_v6 = vrot.slane %v2040_v27, 2  ;;  %v2020_v9 = vrot.slane %v2014_v54, 1 }
 0x56e   : > { %v2641_v57 = vadd.f32 %v2640_v51, %v2639_v61  ;;  %v2627_v46 = vmax.f32 %v2625_v25, %v2626_v22  ;;  %v2647_v60 = vrot.slane %v2646_v13, 1  ;;  %v1979_v25 = vsel %vm1721_vm8, %v1976_v33, %v1978_v18 }
 0x56f   : > { %v2024_v61 = vsel %vm1701_vm7, %v2021_v31, %v2023_v59  ;;  %v2045_v22 = vrot.slane %v2039_v14, 2  ;;  %v2022_v41 = vsel %vm1701_vm7, %v2020_v9, %v2021_v31 }
 0x570   : > { %v2649_v38 = vmul.f32 0.0625, %v2641_v57  ;;  %2054 = vrot.lane.b32.xlu1 %v2048_v26, %s8948_s17  ;;  %1955 = vrot.lane.b32.xlu0 %v1952_v4, %s8901_s24  ;;  %v2631_v57 = vrot.slane %v2630_v63, 2  ;;  %v2648_v32 = vadd.f32 %v2647_v60, %v2646_v13 }
 0x571   : > { %v2047_v4 = vsel %vm1721_vm8, %v2045_v22, %v2046_v6  ;;  %v6644_v22 = vmul.f32 %v6309_v53, %v6348_v11  ;;  %v8973_v53 = vrot.slane %v6333_v0, 1 }
 0x572   : > { %v2651_v51 = vsel %vm502_vm3, %v2627_v46, %v2649_v38  ;;  %v2632_v17 = vmax.f32 %v2630_v63, %v2631_v57  ;;  %v2650_v33 = vmul.f32 0.0625, %v2648_v32  ;;  %v2049_v38 = vsel %vm1721_vm8, %v2046_v6, %v2048_v26 }
 0x573   : > { %v2666_v47 = vrot.slane %v2651_v51, %v6085_v15  ;;  %v8882_v32 = vrot.slane %v6644_v22, 1 }
 0x574   : > { %1957 = vrot.lane.b32.xlu1 %v1954_v45, %s8901_s24  ;;  %1980 = vrot.lane.b32.xlu0 %v1977_v49, %s8901_s24  ;;  %v2633_v18 = vrot.slane %v2632_v17, 1 }
 0x575   : > { %v2674_v8 = vrot.slane %v2666_v47, %v6085_v15  ;;  %v2667_v27 = vcombine.high %v2666_v47, %v2666_v47 }
 0x576   : > { %v2634_v46 = vmax.f32 %v2632_v17, %v2633_v18  ;;  %v1688_v18 = vmul.f32 %v6321_v5, %v6317_v2 }
 0x577   : > { %v2685_v59 = vrot.slane %v2674_v8, %v5991_v35  ;;  %v2681_v13 = vrot.slane %v2667_v27, %v6085_v15 }
 0x578   : > { %1982 = vrot.lane.b32.xlu1 %v1979_v25, %s8901_s24  ;;  %2027 = vrot.lane.b32.xlu0 %v2024_v61, %s8948_s17  ;;  %v2652_v63 = vsel %vm502_vm3, %v2634_v46, %v2650_v33  ;;  %v1706_v33 = vsel %vm1701_vm7, %v8973_v53, %v8882_v32 }
 0x579   : > { %v2761_v42 = vrot.slane %v2652_v63, %v6085_v15  ;;  %v2689_v51 = vrot.slane %v2681_v13, %v5991_v35  ;;  %v1691_v63 = vadd.f32 %v1688_v18, %v6350_v19 }
 0x57b   : > { %v2769_v3 = vrot.slane %v2761_v42, %v6085_v15  ;;  %v2762_v49 = vcombine.high %v2761_v42, %v2761_v42 }
 0x57c   : > { %2025 = vrot.lane.b32.xlu1 %v2022_v41, %s8948_s17  ;;  %2050 = vrot.lane.b32.xlu0 %v2047_v4, %s8948_s17 }
 0x57d   : > { %v2780_v26 = vrot.slane %v2769_v3, %v5991_v35  ;;  %v2776_v54 = vrot.slane %v2762_v49, %v6085_v15  ;;  %v1711_v3 = vadd.f32 %v1706_v33, %v1691_v63 }
 0x57f   : > { %v2784_v60 = vrot.slane %v2776_v54, %v5991_v35 }
 0x580   : > { %2052 = vrot.lane.b32.xlu1 %v2049_v38, %s8948_s17  ;;  %2690 = vrot.lane.b32.xlu0 %v2685_v59, %s8956_s22 }
 0x584   : > { %2698 = vrot.lane.b32.xlu1 %v2685_v59, %s8957_s28  ;;  %2706 = vrot.lane.b32.xlu0 %v2685_v59, %s8958_s29 }
 0x588   : > { %2714 = vrot.lane.b32.xlu1 %v2685_v59, %s8959_s16  ;;  %2722 = vrot.lane.b32.xlu0 %v2685_v59, %s8960_s21 }
 0x58c   : > { %2730 = vrot.lane.b32.xlu1 %v2685_v59, %s8961_s26  ;;  %2738 = vrot.lane.b32.xlu0 %v2685_v59, %s8947_s23 }
 0x590   : > { %2746 = vrot.lane.b32.xlu1 %v2685_v59, %s8962_s27  ;;  %2785 = vrot.lane.b32.xlu0 %v2780_v26, %s8956_s22  ;;  %v6658_v59 = vmul.f32 %v6311_v56, %v6348_v11  ;;  %v8977_v56 = vrot.slane %v6339_v1, 2  ;;  %v6683_v1 = vmul.f32 %v6444_v23, %v6464_v24 }
 0x592   : > { %v1742_v45 = vpop.permute.xlu0 %1741  ;;  %8972 = vst [vmem:[#allocation40_spill] sm:$0xff] %v6658_v59  ;;  %v8888_v42 = vrot.slane %v6658_v59, 2  ;;  %8979 = vst [vmem:[#allocation45_spill] sm:$0xff] %v6683_v1 }
 0x593   : > { %v1750_v27 = vadd.f32 %v1742_v45, %v6402_v21 }
 0x594   : > { %2793 = vrot.lane.b32.xlu1 %v2780_v26, %s8957_s28  ;;  %2801 = vrot.lane.b32.xlu0 %v2780_v26, %s8958_s29  ;;  %v1726_v0 = vsel %vm1721_vm8, %v8977_v56, %v8888_v42 }
 0x595   : > { %v1731_v13 = vadd.f32 %v1726_v0, %v1711_v3 }
 0x596   : > { %v1812_v57 = vpop.permute.xlu0 %1811 }
 0x598   : > { %2809 = vrot.lane.b32.xlu1 %v2780_v26, %s8959_s16  ;;  %2817 = vrot.lane.b32.xlu0 %v2780_v26, %s8960_s21 }
 0x59c   : > { %2825 = vrot.lane.b32.xlu1 %v2780_v26, %s8961_s26  ;;  %2833 = vrot.lane.b32.xlu0 %v2780_v26, %s8947_s23 }
 0x5a0   : > { %2841 = vrot.lane.b32.xlu1 %v2780_v26, %s8962_s27  ;;  %2692 = vrot.lane.b32.xlu0 %v2689_v51, %s8956_s22 }
 0x5a2   : > { %v1744_v31 = vpop.permute.xlu1 %1743 }
 0x5a3   : > { %v1751_v54 = vadd.f32 %v1744_v31, %v1731_v13  ;;  %v6687_v31 = vmul.f32 %v6449_v50, %v6464_v24 }
 0x5a4   : > { %2700 = vrot.lane.b32.xlu1 %v2689_v51, %s8957_s28  ;;  %2708 = vrot.lane.b32.xlu0 %v2689_v51, %s8958_s29 }
 0x5a5   : > { %8980 = vst [vmem:[#allocation46_spill] sm:$0xff] %v6687_v31 }
 0x5a6   : > { %v6619_v14 = vpop.permute.xlu0 %1745  ;;  %v1814_v47 = vpop.permute.xlu1 %1813 }
 0x5a7   : > { %8963 = vst [vmem:[#allocation31_spill] sm:$0xff] %v6619_v14 }
 0x5a8   : > { %2716 = vrot.lane.b32.xlu1 %v2689_v51, %s8959_s16  ;;  %2724 = vrot.lane.b32.xlu0 %v2689_v51, %s8960_s21 }
 0x5aa   : > { %v6624_v25 = vpop.permute.xlu0 %1795  ;;  %v6628_v61 = vpop.permute.xlu1 %1815 }
 0x5ab   : > { %8964 = vst [vmem:[#allocation32_spill] sm:$0xff] %v6624_v25  ;;  %8965 = vst [vmem:[#allocation33_spill] sm:$0xff] %v6628_v61 }
 0x5ac   : > { %2732 = vrot.lane.b32.xlu1 %v2689_v51, %s8961_s26  ;;  %2740 = vrot.lane.b32.xlu0 %v2689_v51, %s8947_s23 }
 0x5ae   : > { %v6632_v6 = vpop.permute.xlu0 %1840  ;;  %v6634_v17 = vpop.permute.xlu1 %1770 }
 0x5af   : > { %8966 = vst [vmem:[#allocation34_spill] sm:$0xff] %v6632_v6  ;;  %8967 = vst [vmem:[#allocation35_spill] sm:$0xff] %v6634_v17 }
 0x5b0   : > { %2748 = vrot.lane.b32.xlu1 %v2689_v51, %s8962_s27  ;;  %2787 = vrot.lane.b32.xlu0 %v2784_v60, %s8956_s22  ;;  %s5255_s22 = sld [smem:[#allocation4 + $0x102]] }
 0x5b2   : > { %v6638_v9 = vpop.permute.xlu0 %1930  ;;  %v6646_v8 = vpop.permute.xlu1 %1865 }
 0x5b3   : > { %8968 = vst [vmem:[#allocation36_spill] sm:$0xff] %v6638_v9  ;;  %8969 = vst [vmem:[#allocation37_spill] sm:$0xff] %v6646_v8 }
 0x5b4   : > { %2795 = vrot.lane.b32.xlu1 %v2784_v60, %s8957_s28  ;;  %2803 = vrot.lane.b32.xlu0 %v2784_v60, %s8958_s29  ;;  %s6755_s28 = sld [smem:[#allocation4 + $0x103]]  ;;  %s6761_s29 = sld [smem:[#allocation4 + $0x104]] }
 0x5b6   : > { %v6650_v41 = vpop.permute.xlu0 %2000 }
 0x5b7   : > { %8970 = vst [vmem:[#allocation38_spill] sm:$0xff] %v6650_v41 }
 0x5b8   : > { %2811 = vrot.lane.b32.xlu1 %v2784_v60, %s8959_s16  ;;  %2819 = vrot.lane.b32.xlu0 %v2784_v60, %s8960_s21  ;;  %s6770_s16 = sld [smem:[#allocation4 + $0x105]]  ;;  %s8896_s21 = smov 125  }
 0x5bc   : > { %2827 = vrot.lane.b32.xlu1 %v2784_v60, %s8961_s26  ;;  %2835 = vrot.lane.b32.xlu0 %v2784_v60, %s8947_s23  ;;  %s5207_s23 = sld [smem:[#allocation4 + $0x89]]  ;;  %s6779_s26 = sld [smem:[#allocation4 + $0x106]] }
 0x5c0   : > { %2843 = vrot.lane.b32.xlu1 %v2784_v60, %s8962_s27  ;;  %s8899_s27 = smov 124  }
 0x5c2   : > { %v6652_v4 = vpop.permute.xlu1 %1932  ;;  %v6679_v36 = vstv %s5207_s23  ;;  %s6792_s23 = sld [smem:[#allocation4 + $0x132]] }
 0x5c3   : > { %8971 = vst [vmem:[#allocation39_spill] sm:$0xff] %v6652_v4  ;;  %8978 = vst [vmem:[#allocation44_spill] sm:$0xff] %v6679_v36  ;;  %v1878_v56 = vmul.f32 %v6679_v36, %v6422_v12  ;;  %v1879_v23 = vmul.f32 %v6679_v36, %v6442_v48  ;;  %v8986_v48 = vrot.slane %v6455_v10, 2 }
 0x5c6   : > { %v6665_v38 = vpop.permute.xlu1 %2002  ;;  %v6667_v46 = vpop.permute.xlu0 %1934 }
 0x5c7   : > { %8974 = vst [vmem:[#allocation41_spill] sm:$0xff] %v6665_v38  ;;  %8975 = vst [vmem:[#allocation42_spill] sm:$0xff] %v6667_v46 }
 0x5ca   : > { %v6671_v2 = vpop.permute.xlu1 %2004  ;;  %v1767_v26 = vpop.permute.xlu0 %1766 }
 0x5cb   : > { %8976 = vst [vmem:[#allocation43_spill] sm:$0xff] %v6671_v2  ;;  %v1775_v60 = vadd.f32 %v1767_v26, %v1750_v27 }
 0x5ce   : > { %v1769_v51 = vpop.permute.xlu1 %1768  ;;  %v1792_v49 = vpop.permute.xlu0 %1791 }
 0x5cf   : > { %v1776_v18 = vadd.f32 %v1769_v51, %v1751_v54  ;;  %v1800_v53 = vadd.f32 %v1792_v49, %v1775_v60 }
 0x5d1   : > { %v1820_v58 = vadd.f32 %v1812_v57, %v1800_v53  ;;  %v8887_v57 = vrot.slane %v6683_v1, 1 }
 0x5d2   : > { %v1794_v33 = vpop.permute.xlu1 %1793  ;;  %v1839_v63 = vpop.permute.xlu0 %1838 }
 0x5d3   : > { %v1801_v32 = vadd.f32 %v1794_v33, %v1776_v18 }
 0x5d5   : > { %v1821_v55 = vadd.f32 %v1814_v47, %v1801_v32 }
 0x5d6   : > { %v1837_v21 = vpop.permute.xlu1 %1836  ;;  %v1862_v45 = vpop.permute.xlu0 %1861 }
 0x5d7   : > { %v1845_v3 = vadd.f32 %v1837_v21, %v1820_v58  ;;  %v1846_v26 = vadd.f32 %v1839_v63, %v1821_v55  ;;  %v8886_v58 = vrot.slane %v6687_v31, 2  ;;  %v8982_v55 = vrot.slane %v6459_v16, 1 }
 0x5d9   : > { %v1870_v0 = vadd.f32 %v1862_v45, %v1845_v3  ;;  %v1896_v12 = vsel %vm1701_vm7, %v8982_v55, %v8887_v57 }
 0x5da   : > { %v1864_v47 = vpop.permute.xlu1 %1863  ;;  %v6692_v32 = vpop.permute.xlu0 %1984 }
 0x5db   : > { %8981 = vst [vmem:[#allocation47_spill] sm:$0xff] %v6692_v32  ;;  %v1881_v27 = vadd.f32 %v1878_v56, %v1870_v0  ;;  %v1871_v13 = vadd.f32 %v1864_v47, %v1846_v26 }
 0x5dd   : > { %v1900_v50 = vadd.f32 %v6486_v7, %v1881_v27  ;;  %v1882_v51 = vadd.f32 %v1879_v23, %v1871_v13  ;;  %v1915_v7 = vsel %vm1721_vm8, %v8986_v48, %v8886_v58 }
 0x5de   : > { %v6703_v49 = vpop.permute.xlu1 %1959  ;;  %v6705_v54 = vpop.permute.xlu0 %2029 }
 0x5df   : > { %8983 = vst [vmem:[#allocation48_spill] sm:$0xff] %v6703_v49  ;;  %8984 = vst [vmem:[#allocation49_spill] sm:$0xff] %v6705_v54  ;;  %v1901_v60 = vadd.f32 %v1896_v12, %v1882_v51  ;;  %v6708_v18 = vadd.f32 %v6492_v30, %v1900_v50  ;;  %v2968_v51 = vstv %s6738_s14  ;;  %s8905_s14 = smov 123  }
 0x5e1   : > { %8985 = vst [vmem:[#allocation50_spill] sm:$0xff] %v6708_v18  ;;  %v6715_v53 = vadd.f32 %v1915_v7, %v1901_v60 }
 0x5e2   : > { %v6717_v33 = vpop.permute.xlu1 %2054  ;;  %v6719_v16 = vpop.permute.xlu0 %1955 }
 0x5e3   : > { %8987 = vst [vmem:[#allocation51_spill] sm:$0xff] %v6715_v53  ;;  %8988 = vst [vmem:[#allocation52_spill] sm:$0xff] %v6717_v33 }
 0x5e4   : > { %8989 = vst [vmem:[#allocation53_spill] sm:$0xff] %v6719_v16 }
 0x5e6   : > { %v6721_v63 = vpop.permute.xlu1 %1957  ;;  %v6723_v21 = vpop.permute.xlu0 %1980 }
 0x5e7   : > { %8990 = vst [vmem:[#allocation54_spill] sm:$0xff] %v6721_v63  ;;  %8991 = vst [vmem:[#allocation55_spill] sm:$0xff] %v6723_v21 }
 0x5ea   : > { %v6725_v45 = vpop.permute.xlu1 %1982  ;;  %v6727_v30 = vpop.permute.xlu0 %2027 }
 0x5eb   : > { %8992 = vst [vmem:[#allocation56_spill] sm:$0xff] %v6725_v45  ;;  %8993 = vst [vmem:[#allocation57_spill] sm:$0xff] %v6727_v30 }
 0x5ee   : > { %v6729_v3 = vpop.permute.xlu1 %2025  ;;  %v6731_v26 = vpop.permute.xlu0 %2050 }
 0x5ef   : > { %8994 = vst [vmem:[#allocation58_spill] sm:$0xff] %v6729_v3  ;;  %8995 = vst [vmem:[#allocation59_spill] sm:$0xff] %v6731_v26 }
 0x5f2   : > { %v6733_v10 = vpop.permute.xlu1 %2052  ;;  %v2691_v56 = vpop.permute.xlu0 %2690 }
 0x5f3   : > { %8996 = vst [vmem:[#allocation60_spill] sm:$0xff] %v6733_v10  ;;  %2696 = vst.msk [vmem:[#allocation2 + $0x3] sm:$0x1] %vm695_vm6, %v2691_v56 }
 0x5f6   : > { %v2699_v0 = vpop.permute.xlu1 %2698  ;;  %v2707_v47 = vpop.permute.xlu0 %2706 }
 0x5f7   : > { %2704 = vst.msk [vmem:[#allocation2 + $0x4] sm:$0x1] %vm695_vm6, %v2699_v0  ;;  %2712 = vst.msk [vmem:[#allocation2 + $0x5] sm:$0x1] %vm695_vm6, %v2707_v47 }
 0x5fa   : > { %v2715_v27 = vpop.permute.xlu1 %2714  ;;  %v2723_v23 = vpop.permute.xlu0 %2722 }
 0x5fb   : > { %2720 = vst.msk [vmem:[#allocation2 + $0x6] sm:$0x1] %vm695_vm6, %v2715_v27  ;;  %2728 = vst.msk [vmem:[#allocation2 + $0x7] sm:$0x1] %vm695_vm6, %v2723_v23 }
 0x5fe   : > { %v2731_v13 = vpop.permute.xlu1 %2730  ;;  %v2739_v50 = vpop.permute.xlu0 %2738 }
 0x5ff   : > { %2736 = vst.msk [vmem:[#allocation2 + $0x8] sm:$0x1] %vm695_vm6, %v2731_v13  ;;  %2744 = vst.msk [vmem:[#allocation2 + $0x9] sm:$0x1] %vm695_vm6, %v2739_v50 }
 0x602   : > { %v6745_v55 = vld [vmem:[#allocation2] sm:$0xff]  ;;  %v2747_v12 = vpop.permute.xlu1 %2746  ;;  %v2786_v60 = vpop.permute.xlu0 %2785 }
 0x603   : > { %2752 = vst.msk [vmem:[#allocation2 + $0xa] sm:$0x1] %vm695_vm6, %v2747_v12  ;;  %2791 = vst.msk [vmem:[#allocation2 + $0xb] sm:$0x1] %vm695_vm6, %v2786_v60  ;;  %v2969_v48 = vmul.f32 %v2968_v51, %v6745_v55  ;;  %v3108_v60 = vstv %s5255_s22  ;;  %s6801_s22 = sld [smem:[#allocation4 + $0x133]] }
 0x605   : > { %2973 = vrot.lane.b32.xlu1 %v2969_v48, %s8901_s24 }
 0x606   : > { %v2794_v7 = vpop.permute.xlu1 %2793  ;;  %v2802_v56 = vpop.permute.xlu0 %2801 }
 0x607   : > { %2799 = vst.msk [vmem:[#allocation2 + $0xc] sm:$0x1] %vm695_vm6, %v2794_v7  ;;  %2807 = vst.msk [vmem:[#allocation2 + $0xd] sm:$0x1] %vm695_vm6, %v2802_v56 }
 0x60a   : > { %v2810_v0 = vpop.permute.xlu1 %2809  ;;  %v2818_v47 = vpop.permute.xlu0 %2817 }
 0x60b   : > { %2815 = vst.msk [vmem:[#allocation2 + $0xe] sm:$0x1] %vm695_vm6, %v2810_v0  ;;  %2823 = vst.msk [vmem:[#allocation2 + $0xf] sm:$0x1] %vm695_vm6, %v2818_v47  ;;  %v3248_v47 = vstv %s6755_s28  ;;  %s8903_s28 = smov 122  }
 0x60e   : > { %v2826_v27 = vpop.permute.xlu1 %2825  ;;  %v2834_v23 = vpop.permute.xlu0 %2833 }
 0x60f   : > { %2831 = vst.msk [vmem:[#allocation2 + $0x10] sm:$0x1] %vm695_vm6, %v2826_v27  ;;  %2839 = vst.msk [vmem:[#allocation2 + $0x11] sm:$0x1] %vm695_vm6, %v2834_v23  ;;  %v3109_v23 = vmul.f32 %v3108_v60, %v6745_v55 }
 0x612   : > { %v6759_v13 = vld [vmem:[#allocation2 + $0x8] sm:$0xff]  ;;  %v2842_v50 = vpop.permute.xlu1 %2841  ;;  %v2693_v12 = vpop.permute.xlu0 %2692 }
 0x613   : > { %2847 = vst.msk [vmem:[#allocation2 + $0x12] sm:$0x1] %vm695_vm6, %v2842_v50  ;;  %2697 = vst.msk [vmem:[#allocation2 + $0x1b] sm:$0x1] %vm695_vm6, %v2693_v12  ;;  %v3110_v48 = vmul.f32 %v3108_v60, %v6759_v13  ;;  %v2970_v7 = vmul.f32 %v2968_v51, %v6759_v13  ;;  %v3250_v27 = vmul.f32 %v3248_v47, %v6759_v13  ;;  %v3388_v12 = vstv %s6761_s29  ;;  %s6809_s29 = sld [smem:[#allocation4 + $0x134]]  ;;  %v7194_v26 = vld [vmem:[#allocation2 + $0x8] sm:$0xff] }
 0x615   : > { %3115 = vrot.lane.b32.xlu1 %v3110_v48, %s8948_s17  ;;  %2975 = vrot.lane.b32.xlu0 %v2970_v7, %s8901_s24  ;;  %v3390_v48 = vmul.f32 %v3388_v12, %v6759_v13  ;;  %v3249_v7 = vmul.f32 %v3248_v47, %v6745_v55 }
 0x616   : > { %v2701_v56 = vpop.permute.xlu1 %2700  ;;  %v2709_v0 = vpop.permute.xlu0 %2708 }
 0x617   : > { %2705 = vst.msk [vmem:[#allocation2 + $0x1c] sm:$0x1] %vm695_vm6, %v2701_v56  ;;  %2713 = vst.msk [vmem:[#allocation2 + $0x1d] sm:$0x1] %vm695_vm6, %v2709_v0  ;;  %v3528_v0 = vstv %s6770_s16  ;;  %s6815_s16 = sld [smem:[#allocation4 + $0x135]] }
 0x619   : > { %3255 = vrot.lane.b32.xlu1 %v3250_v27, %s8896_s21  ;;  %3113 = vrot.lane.b32.xlu0 %v3109_v23, %s8948_s17  ;;  %v3530_v27 = vmul.f32 %v3528_v0, %v6759_v13  ;;  %v3389_v23 = vmul.f32 %v3388_v12, %v6745_v55 }
 0x61a   : > { %v2717_v51 = vpop.permute.xlu1 %2716  ;;  %v2725_v50 = vpop.permute.xlu0 %2724  ;;  %v7368_v59 = vld [vmem:[#allocation2 + $0x10] sm:$0x3f] }
 0x61b   : > { %2721 = vst.msk [vmem:[#allocation2 + $0x1e] sm:$0x1] %vm695_vm6, %v2717_v51  ;;  %2729 = vst.msk [vmem:[#allocation2 + $0x1f] sm:$0x1] %vm695_vm6, %v2725_v50  ;;  %v3668_v50 = vstv %s6779_s26  ;;  %s6821_s26 = sld [smem:[#allocation4 + $0x136]] }
 0x61d   : > { %3395 = vrot.lane.b32.xlu1 %v3390_v48, %s8899_s27  ;;  %3253 = vrot.lane.b32.xlu0 %v3249_v7, %s8896_s21  ;;  %v3670_v48 = vmul.f32 %v3668_v50, %v6759_v13  ;;  %v3529_v7 = vmul.f32 %v3528_v0, %v6745_v55 }
 0x61e   : > { %v2733_v60 = vpop.permute.xlu1 %2732  ;;  %v2741_v56 = vpop.permute.xlu0 %2740 }
 0x61f   : > { %2737 = vst.msk [vmem:[#allocation2 + $0x20] sm:$0x1] %vm695_vm6, %v2733_v60  ;;  %2745 = vst.msk [vmem:[#allocation2 + $0x21] sm:$0x1] %vm695_vm6, %v2741_v56  ;;  %v3669_v56 = vmul.f32 %v3668_v50, %v6745_v55 }
 0x621   : > { %3535 = vrot.lane.b32.xlu1 %v3530_v27, %s8905_s14  ;;  %3393 = vrot.lane.b32.xlu0 %v3389_v23, %s8899_s27  ;;  %v3919_v23 = vstv %s6792_s23  ;;  %s5249_s23 = sld [smem:[#allocation4 + $0x108]]  ;;  %v4479_v57 = vstv %s6821_s26  ;;  %s5252_s26 = sld [smem:[#allocation4 + $0x11d]] }
 0x622   : > { %v2749_v47 = vpop.permute.xlu1 %2748  ;;  %v2788_v51 = vpop.permute.xlu0 %2787  ;;  %v3807_v27 = vld [vmem:[#allocation2 + $0x18] sm:$0xff] }
 0x623   : > { %2753 = vst.msk [vmem:[#allocation2 + $0x22] sm:$0x1] %vm695_vm6, %v2749_v47  ;;  %2792 = vst.msk [vmem:[#allocation2 + $0x23] sm:$0x1] %vm695_vm6, %v2788_v51  ;;  %v3920_v51 = vmul.f32 %v3919_v23, %v3807_v27 }
 0x625   : > { %3675 = vrot.lane.b32.xlu1 %v3670_v48, %s8903_s28  ;;  %3533 = vrot.lane.b32.xlu0 %v3529_v7, %s8905_s14  ;;  %v4059_v48 = vstv %s6801_s22  ;;  %s6826_s22 = sld [smem:[#allocation4 + $0x137]] }
 0x626   : > { %v2796_v12 = vpop.permute.xlu1 %2795  ;;  %v2804_v60 = vpop.permute.xlu0 %2803 }
 0x627   : > { %2800 = vst.msk [vmem:[#allocation2 + $0x24] sm:$0x1] %vm695_vm6, %v2796_v12  ;;  %2808 = vst.msk [vmem:[#allocation2 + $0x25] sm:$0x1] %vm695_vm6, %v2804_v60  ;;  %v4060_v12 = vmul.f32 %v4059_v48, %v3807_v27  ;;  %v4199_v60 = vstv %s6809_s29  ;;  %s5250_s29 = sld [smem:[#allocation4 + $0x10f]]  ;;  %v2982_v42 = vstv %s5249_s23  ;;  %s5253_s23 = sld [smem:[#allocation4 + $0x124]] }
 0x629   : > { %3673 = vrot.lane.b32.xlu0 %v3669_v56, %s8903_s28 }
 0x62a   : > { %v2812_v0 = vpop.permute.xlu1 %2811  ;;  %v2820_v47 = vpop.permute.xlu0 %2819 }
 0x62b   : > { %2816 = vst.msk [vmem:[#allocation2 + $0x26] sm:$0x1] %vm695_vm6, %v2812_v0  ;;  %2824 = vst.msk [vmem:[#allocation2 + $0x27] sm:$0x1] %vm695_vm6, %v2820_v47  ;;  %v4200_v47 = vmul.f32 %v4199_v60, %v3807_v27  ;;  %v4619_v39 = vstv %s6826_s22  ;;  %s5254_s22 = sld [smem:[#allocation4 + $0x12b]] }
 0x62d   : > { %3924 = vrot.lane.b32.xlu0 %v3920_v51, %s8901_s24  ;;  %v4339_v51 = vstv %s6815_s16  ;;  %s5251_s16 = sld [smem:[#allocation4 + $0x116]]  ;;  %v3003_v40 = vstv %s5250_s29  ;;  %s5256_s29 = sld [smem:[#allocation4 + $0x109]] }
 0x62e   : > { %v2828_v50 = vpop.permute.xlu1 %2827  ;;  %v2836_v7 = vpop.permute.xlu0 %2835  ;;  %v3005_v35 = vmul.f32 %v3003_v40, %v6759_v13 }
 0x62f   : > { %2832 = vst.msk [vmem:[#allocation2 + $0x28] sm:$0x1] %vm695_vm6, %v2828_v50  ;;  %2840 = vst.msk [vmem:[#allocation2 + $0x29] sm:$0x1] %vm695_vm6, %v2836_v7  ;;  %v4340_v50 = vmul.f32 %v4339_v51, %v3807_v27 }
 0x631   : > { %4064 = vrot.lane.b32.xlu0 %v4060_v12, %s8948_s17  ;;  %v6831_v12 = vld [vmem:[#allocation2 + $0x10] sm:$0x3f] }
 0x632   : > { %v3808_v56 = vld [vmem:[#allocation2 + $0x20] sm:$0xff]  ;;  %v2844_v0 = vpop.permute.xlu1 %2843  ;;  %v2985_v37 = vmul.f32 %v2982_v42, %v6831_v12 }
 0x633   : > { %2848 = vst.msk [vmem:[#allocation2 + $0x2a] sm:$0x1] %vm695_vm6, %v2844_v0  ;;  %v3921_v58 = vmul.f32 %v3919_v23, %v3808_v56  ;;  %v4061_v7 = vmul.f32 %v4059_v48, %v3808_v56  ;;  %v4480_v23 = vmul.f32 %v4479_v57, %v3807_v27  ;;  %v4201_v0 = vmul.f32 %v4199_v60, %v3808_v56 }
 0x634   : > { %v4620_v48 = vmul.f32 %v4619_v39, %v3807_v27  ;;  %v4481_v34 = vmul.f32 %v4479_v57, %v3808_v56 }
 0x635   : > { %4204 = vrot.lane.b32.xlu0 %v4200_v47, %s8896_s21  ;;  %3926 = vrot.lane.b32.xlu1 %v3921_v58, %s8901_s24  ;;  %v2984_v58 = vmul.f32 %v2982_v42, %v6759_v13  ;;  %v4341_v47 = vmul.f32 %v4339_v51, %v3808_v56 }
 0x637   : > { %v2990_v60 = vrot.slane %v2984_v58, 1  ;;  %v4621_v58 = vmul.f32 %v4619_v39, %v3808_v56 }
 0x639   : > { %4344 = vrot.lane.b32.xlu0 %v4340_v50, %s8899_s27  ;;  %4066 = vrot.lane.b32.xlu1 %v4061_v7, %s8948_s17  ;;  %v2992_v50 = vrot.slane %v2985_v37, 1  ;;  %v3006_v7 = vmul.f32 %v3003_v40, %v6831_v12  ;;  %v3011_v37 = vrot.slane %v3005_v35, 2  ;;  %v3004_v35 = vmul.f32 %v3003_v40, %v6745_v55 }
 0x63b   : > { %v3013_v33 = vrot.slane %v3006_v7, 2 }
 0x63d   : > { %4484 = vrot.lane.b32.xlu0 %v4480_v23, %s8905_s14  ;;  %4206 = vrot.lane.b32.xlu1 %v4201_v0, %s8896_s21  ;;  %v3024_v23 = vstv %s5251_s16  ;;  %v2993_v0 = vsel %vm1701_vm7, %v2990_v60, %v2992_v50  ;;  %v3014_v57 = vsel %vm1721_vm8, %v3011_v37, %v3013_v33  ;;  %s5257_s16 = sld [smem:[#allocation4 + $0x110]] }
 0x63e   : > { %v3027_v27 = vmul.f32 %v3024_v23, %v6831_v12  ;;  %v3026_v51 = vmul.f32 %v3024_v23, %v6759_v13  ;;  %v3025_v40 = vmul.f32 %v3024_v23, %v6745_v55 }
 0x640   : > { %v3034_v54 = vrot.slane %v3027_v27, 3  ;;  %v3032_v7 = vrot.slane %v3026_v51, 3 }
 0x641   : > { %4624 = vrot.lane.b32.xlu0 %v4620_v48, %s8903_s28  ;;  %4346 = vrot.lane.b32.xlu1 %v4341_v47, %s8899_s27  ;;  %v2983_v48 = vmul.f32 %v2982_v42, %v6745_v55  ;;  %v3045_v47 = vstv %s5252_s26  ;;  %v3066_v42 = vstv %s5253_s23  ;;  %s5258_s26 = sld [smem:[#allocation4 + $0x117]]  ;;  %s5259_s23 = sld [smem:[#allocation4 + $0x11e]] }
 0x642   : > { %v3048_v50 = vmul.f32 %v3045_v47, %v6831_v12  ;;  %v3035_v39 = vsel %vm2903_vm9, %v3032_v7, %v3034_v54  ;;  %v3069_v27 = vmul.f32 %v3066_v42, %v6831_v12  ;;  %v3046_v23 = vmul.f32 %v3045_v47, %v6745_v55 }
 0x644   : > { %v3055_v56 = vrot.slane %v3048_v50, 4  ;;  %v3076_v50 = vrot.slane %v3069_v27, 5 }
 0x645   : > { %2996 = vrot.lane.b32.xlu0 %v2993_v0, %s8901_s24  ;;  %4486 = vrot.lane.b32.xlu1 %v4481_v34, %s8905_s14  ;;  %v2989_v0 = vrot.slane %v2983_v48, 1  ;;  %v3047_v34 = vmul.f32 %v3045_v47, %v6759_v13  ;;  %v3010_v48 = vrot.slane %v3004_v35, 2  ;;  %v3031_v35 = vrot.slane %v3025_v40, 3 }
 0x647   : > { %v2991_v33 = vsel %vm1701_vm7, %v2989_v0, %v2990_v60  ;;  %v3053_v51 = vrot.slane %v3047_v34, 4  ;;  %v3012_v60 = vsel %vm1721_vm8, %v3010_v48, %v3011_v37  ;;  %v3033_v37 = vsel %vm2903_vm9, %v3031_v35, %v3032_v7 }
 0x649   : > { %3017 = vrot.lane.b32.xlu0 %v3014_v57, %s8901_s24  ;;  %4626 = vrot.lane.b32.xlu1 %v4621_v58, %s8903_s28  ;;  %v3068_v58 = vmul.f32 %v3066_v42, %v6759_v13  ;;  %v3087_v57 = vstv %s5254_s22  ;;  %v3056_v54 = vsel %vm2921_vm10, %v3053_v51, %v3055_v56  ;;  %s5260_s22 = sld [smem:[#allocation4 + $0x125]]  ;;  %s7135_s28 = sld [smem:[#allocation4 + $0x123]] }
 0x64a   : > { %v3089_v0 = vmul.f32 %v3087_v57, %v6759_v13 }
 0x64b   : > { %v3074_v34 = vrot.slane %v3068_v58, 5  ;;  %v3067_v58 = vmul.f32 %v3066_v42, %v6745_v55 }
 0x64c   : > { %v3095_v27 = vrot.slane %v3089_v0, 6 }
 0x64d   : > { %3038 = vrot.lane.b32.xlu0 %v3035_v39, %s8901_s24  ;;  %2994 = vrot.lane.b32.xlu1 %v2991_v33, %s8901_s24  ;;  %v3088_v39 = vmul.f32 %v3087_v57, %v6745_v55  ;;  %v3122_v33 = vstv %s5256_s29  ;;  %v3077_v56 = vsel %vm2939_vm11, %v3074_v34, %v3076_v50  ;;  %v3073_v42 = vrot.slane %v3067_v58, 5  ;;  %s5261_s29 = sld [smem:[#allocation4 + $0x12c]] }
 0x64e   : > { %v3124_v48 = vmul.f32 %v3122_v33, %v6759_v13  ;;  %v3123_v47 = vmul.f32 %v3122_v33, %v6745_v55 }
 0x64f   : > { %v3094_v40 = vrot.slane %v3088_v39, 6  ;;  %v3075_v2 = vsel %vm2939_vm11, %v3073_v42, %v3074_v34 }
 0x650   : > { %v3130_v35 = vrot.slane %v3124_v48, 1  ;;  %v3129_v39 = vrot.slane %v3123_v47, 1  ;;  %v3185_v47 = vstv %s5259_s23  ;;  %s5265_s23 = sld [smem:[#allocation4 + $0x118]] }
 0x651   : > { %3059 = vrot.lane.b32.xlu0 %v3056_v54, %s8901_s24  ;;  %3015 = vrot.lane.b32.xlu1 %v3012_v60, %s8901_s24  ;;  %v3052_v54 = vrot.slane %v3046_v23, 4  ;;  %v3143_v60 = vstv %s5257_s16  ;;  %v3096_v7 = vsel %vm2957_vm12, %v3094_v40, %v3095_v27  ;;  %v3187_v34 = vmul.f32 %v3185_v47, %v6759_v13  ;;  %s5263_s16 = sld [smem:[#allocation4 + $0x10a]] }
 0x652   : > { %v3145_v50 = vmul.f32 %v3143_v60, %v6759_v13  ;;  %v3144_v23 = vmul.f32 %v3143_v60, %v6745_v55  ;;  %v3131_v40 = vsel %vm1701_vm7, %v3129_v39, %v3130_v35 }
 0x653   : > { %v3054_v0 = vsel %vm2921_vm10, %v3052_v54, %v3053_v51 }
 0x654   : > { %v3151_v51 = vrot.slane %v3145_v50, 2  ;;  %v3150_v54 = vrot.slane %v3144_v23, 2  ;;  %v3206_v23 = vstv %s5260_s22  ;;  %s5266_s22 = sld [smem:[#allocation4 + $0x11f]] }
 0x655   : > { %3080 = vrot.lane.b32.xlu0 %v3077_v56, %s8901_s24  ;;  %3036 = vrot.lane.b32.xlu1 %v3033_v37, %s8901_s24  ;;  %v3090_v56 = vmul.f32 %v3087_v57, %v6831_v12  ;;  %v3164_v37 = vstv %s5258_s26  ;;  %v3125_v57 = vmul.f32 %v3122_v33, %v6831_v12  ;;  %v3186_v33 = vmul.f32 %v3185_v47, %v6745_v55  ;;  %s5264_s26 = sld [smem:[#allocation4 + $0x111]] }
 0x656   : > { %v3166_v32 = vmul.f32 %v3164_v37, %v6759_v13  ;;  %v3165_v58 = vmul.f32 %v3164_v37, %v6745_v55 }
 0x657   : > { %v3097_v48 = vrot.slane %v3090_v56, 6  ;;  %v3132_v50 = vrot.slane %v3125_v57, 1  ;;  %v3146_v56 = vmul.f32 %v3143_v60, %v6831_v12  ;;  %v3192_v60 = vrot.slane %v3186_v33, 4 }
 0x658   : > { %v3207_v57 = vmul.f32 %v3206_v23, %v6745_v55  ;;  %v3262_v33 = vstv %s5263_s16  ;;  %s5268_s16 = sld [smem:[#allocation4 + $0x12d]] }
 0x659   : > { %3099 = vrot.lane.b32.xlu0 %v3096_v7, %s8901_s24  ;;  %3057 = vrot.lane.b32.xlu1 %v3054_v0, %s8901_s24  ;;  %v3172_v7 = vrot.slane %v3166_v32, 3  ;;  %v3152_v0 = vsel %vm1721_vm8, %v3150_v54, %v3151_v51  ;;  %v3098_v42 = vsel %vm2957_vm12, %v3095_v27, %v3097_v48  ;;  %v3193_v32 = vrot.slane %v3187_v34, 4 }
 0x65a   : > { %v3153_v54 = vrot.slane %v3146_v56, 2  ;;  %v3208_v27 = vmul.f32 %v3206_v23, %v6759_v13  ;;  %v3167_v48 = vmul.f32 %v3164_v37, %v6831_v12  ;;  %v3188_v56 = vmul.f32 %v3185_v47, %v6831_v12 }
 0x65b   : > { %v3213_v37 = vrot.slane %v3207_v57, 5  ;;  %v3263_v47 = vmul.f32 %v3262_v33, %v6745_v55 }
 0x65d   : > { %3134 = vrot.lane.b32.xlu0 %v3131_v40, %s8948_s17  ;;  %3078 = vrot.lane.b32.xlu1 %v3075_v2, %s8901_s24  ;;  %v3171_v2 = vrot.slane %v3165_v58, 3  ;;  %v3133_v40 = vsel %vm1701_vm7, %v3130_v35, %v3132_v50  ;;  %v3227_v58 = vstv %s5261_s29  ;;  %v3154_v35 = vsel %vm1721_vm8, %v3151_v51, %v3153_v54  ;;  %s5267_s29 = sld [smem:[#allocation4 + $0x126]] }
 0x65e   : > { %v3229_v34 = vmul.f32 %v3227_v58, %v6759_v13  ;;  %v3174_v50 = vrot.slane %v3167_v48, 3 }
 0x65f   : > { %v3173_v39 = vsel %vm2903_vm9, %v3171_v2, %v3172_v7  ;;  %v3228_v2 = vmul.f32 %v3227_v58, %v6745_v55 }
 0x660   : > { %v3175_v51 = vsel %vm2903_vm9, %v3172_v7, %v3174_v50  ;;  %v3235_v54 = vrot.slane %v3229_v34, 6  ;;  %v3230_v7 = vmul.f32 %v3227_v58, %v6831_v12  ;;  %v3269_v34 = vrot.slane %v3263_v47, 1 }
 0x661   : > { %3155 = vrot.lane.b32.xlu0 %v3152_v0, %s8948_s17  ;;  %3101 = vrot.lane.b32.xlu1 %v3098_v42, %s8901_s24  ;;  %v3194_v0 = vsel %vm2921_vm10, %v3192_v60, %v3193_v32  ;;  %v3214_v42 = vrot.slane %v3208_v27, 5  ;;  %v3195_v27 = vrot.slane %v3188_v56, 4  ;;  %v3234_v48 = vrot.slane %v3228_v2, 6  ;;  %s7120_s24 = sld [smem:[#allocation4 + $0x115]] }
 0x663   : > { %v3215_v60 = vsel %vm2939_vm11, %v3213_v37, %v3214_v42  ;;  %v3196_v49 = vsel %vm2921_vm10, %v3193_v32, %v3195_v27  ;;  %v3325_v27 = vstv %s5266_s22  ;;  %s5272_s22 = sld [smem:[#allocation4 + $0x119]] }
 0x664   : > { %v3327_v47 = vmul.f32 %v3325_v27, %v6759_v13 }
 0x665   : > { %3176 = vrot.lane.b32.xlu0 %v3173_v39, %s8948_s17  ;;  %3136 = vrot.lane.b32.xlu1 %v3133_v40, %s8948_s17  ;;  %v3264_v39 = vmul.f32 %v3262_v33, %v6759_v13  ;;  %v3209_v40 = vmul.f32 %v3206_v23, %v6831_v12  ;;  %v3236_v23 = vsel %vm2957_vm12, %v3234_v48, %v3235_v54 }
 0x667   : > { %v3270_v57 = vrot.slane %v3264_v39, 1  ;;  %v3304_v39 = vstv %s5265_s23  ;;  %s5271_s23 = sld [smem:[#allocation4 + $0x112]]  ;;  %v7202_v45 = vstv %s7120_s24  ;;  %s7218_s24 = sld [smem:[#allocation4 + $0x139]] }
 0x668   : > { %v3306_v32 = vmul.f32 %v3304_v39, %v6759_v13  ;;  %v3305_v58 = vmul.f32 %v3304_v39, %v6745_v55 }
 0x669   : > { %3197 = vrot.lane.b32.xlu0 %v3194_v0, %s8948_s17  ;;  %3157 = vrot.lane.b32.xlu1 %v3154_v35, %s8948_s17  ;;  %v3216_v0 = vrot.slane %v3209_v40, 5  ;;  %v3283_v35 = vstv %s5264_s26  ;;  %v3271_v56 = vsel %vm1701_vm7, %v3269_v34, %v3270_v57  ;;  %v3346_v34 = vstv %s5267_s29  ;;  %s5270_s26 = sld [smem:[#allocation4 + $0x10b]]  ;;  %s5273_s29 = sld [smem:[#allocation4 + $0x120]] }
 0x66a   : > { %v3285_v37 = vmul.f32 %v3283_v35, %v6759_v13  ;;  %v3284_v50 = vmul.f32 %v3283_v35, %v6745_v55 }
 0x66b   : > { %v3217_v2 = vsel %vm2939_vm11, %v3214_v42, %v3216_v0  ;;  %v3286_v42 = vmul.f32 %v3283_v35, %v6831_v12 }
 0x66c   : > { %v3291_v40 = vrot.slane %v3285_v37, 2 }
 0x66d   : > { %3218 = vrot.lane.b32.xlu0 %v3215_v60, %s8948_s17  ;;  %3178 = vrot.lane.b32.xlu1 %v3175_v51, %s8948_s17  ;;  %v3237_v60 = vrot.slane %v3230_v7, 6  ;;  %v3265_v51 = vmul.f32 %v3262_v33, %v6831_v12  ;;  %v3311_v33 = vrot.slane %v3305_v58, 3  ;;  %v3326_v7 = vmul.f32 %v3325_v27, %v6745_v55 }
 0x66f   : > { %v3238_v0 = vsel %vm2957_vm12, %v3235_v54, %v3237_v60  ;;  %v3272_v37 = vrot.slane %v3265_v51, 1  ;;  %v3307_v54 = vmul.f32 %v3304_v39, %v6831_v12  ;;  %v3347_v60 = vmul.f32 %v3346_v34, %v6745_v55 }
 0x670   : > { %v3367_v51 = vstv %s5268_s16  ;;  %s5274_s16 = sld [smem:[#allocation4 + $0x127]]  ;;  %v3465_v31 = vstv %s5273_s29  ;;  %s5177_s29 = sld [smem:[#allocation7 + $0x3]] }
 0x671   : > { %3239 = vrot.lane.b32.xlu0 %v3236_v23, %s8948_s17  ;;  %3199 = vrot.lane.b32.xlu1 %v3196_v49, %s8948_s17  ;;  %v3290_v49 = vrot.slane %v3284_v50, 2  ;;  %v3312_v23 = vrot.slane %v3306_v32, 3  ;;  %v3333_v50 = vrot.slane %v3327_v47, 4  ;;  %v3332_v32 = vrot.slane %v3326_v7, 4 }
 0x672   : > { %v3369_v47 = vmul.f32 %v3367_v51, %v6759_v13  ;;  %v3353_v39 = vrot.slane %v3347_v60, 5  ;;  %v3423_v60 = vstv %s5271_s23  ;;  %s5277_s23 = sld [smem:[#allocation4 + $0x10c]] }
 0x673   : > { %v3292_v48 = vsel %vm1721_vm8, %v3290_v49, %v3291_v40  ;;  %v3313_v35 = vsel %vm2903_vm9, %v3311_v33, %v3312_v23  ;;  %v3293_v49 = vrot.slane %v3286_v42, 2  ;;  %v3328_v42 = vmul.f32 %v3325_v27, %v6831_v12 }
 0x674   : > { %v3375_v7 = vrot.slane %v3369_v47, 6 }
 0x675   : > { %3274 = vrot.lane.b32.xlu0 %v3271_v56, %s8896_s21  ;;  %3220 = vrot.lane.b32.xlu1 %v3217_v2, %s8948_s17  ;;  %v3348_v56 = vmul.f32 %v3346_v34, %v6759_v13  ;;  %v3273_v2 = vsel %vm1701_vm7, %v3270_v57, %v3272_v37  ;;  %v3314_v57 = vrot.slane %v3307_v54, 3  ;;  %v3368_v37 = vmul.f32 %v3367_v51, %v6745_v55 }
 0x677   : > { %v3354_v58 = vrot.slane %v3348_v56, 5  ;;  %v3402_v56 = vstv %s5270_s26  ;;  %v3374_v27 = vrot.slane %v3368_v37, 6  ;;  %s5275_s26 = sld [smem:[#allocation4 + $0x12e]] }
 0x678   : > { %v3403_v54 = vmul.f32 %v3402_v56, %v6745_v55 }
 0x679   : > { %3295 = vrot.lane.b32.xlu0 %v3292_v48, %s8896_s21  ;;  %3241 = vrot.lane.b32.xlu1 %v3238_v0, %s8948_s17  ;;  %v3334_v48 = vsel %vm2921_vm10, %v3332_v32, %v3333_v50  ;;  %v3294_v0 = vsel %vm1721_vm8, %v3291_v40, %v3293_v49  ;;  %v3355_v33 = vsel %vm2939_vm11, %v3353_v39, %v3354_v58  ;;  %v6961_v32 = vpop.permute.xlu1 %2973 }
 0x67a   : > { %v3404_v40 = vmul.f32 %v3402_v56, %v6759_v13  ;;  %v3349_v49 = vmul.f32 %v3346_v34, %v6831_v12  ;;  %v3376_v47 = vsel %vm2957_vm12, %v3374_v27, %v3375_v7  ;;  %v3424_v39 = vmul.f32 %v3423_v60, %v6745_v55 }
 0x67b   : > { %v3409_v37 = vrot.slane %v3403_v54, 1 }
 0x67c   : > { %v3410_v34 = vrot.slane %v3404_v40, 1  ;;  %v3430_v54 = vrot.slane %v3424_v39, 2 }
 0x67d   : > { %3316 = vrot.lane.b32.xlu0 %v3313_v35, %s8896_s21  ;;  %3276 = vrot.lane.b32.xlu1 %v3273_v2, %s8896_s21  ;;  %v3315_v35 = vsel %vm2903_vm9, %v3312_v23, %v3314_v57  ;;  %v3335_v2 = vrot.slane %v3328_v42, 4  ;;  %v3425_v23 = vmul.f32 %v3423_v60, %v6759_v13  ;;  %v3356_v57 = vrot.slane %v3349_v49, 5 }
 0x67e   : > { %v3370_v42 = vmul.f32 %v3367_v51, %v6831_v12  ;;  %v3405_v49 = vmul.f32 %v3402_v56, %v6831_v12  ;;  %v3426_v56 = vmul.f32 %v3423_v60, %v6831_v12 }
 0x67f   : > { %v3431_v46 = vrot.slane %v3425_v23, 2  ;;  %v3357_v51 = vsel %vm2939_vm11, %v3354_v58, %v3356_v57  ;;  %v3467_v57 = vmul.f32 %v3465_v31, %v6759_v13 }
 0x680   : > { %v3377_v40 = vrot.slane %v3370_v42, 6  ;;  %v3412_v58 = vrot.slane %v3405_v49, 1  ;;  %v3433_v49 = vrot.slane %v3426_v56, 2 }
 0x681   : > { %3337 = vrot.lane.b32.xlu0 %v3334_v48, %s8896_s21  ;;  %3297 = vrot.lane.b32.xlu1 %v3294_v0, %s8896_s21  ;;  %v3336_v0 = vsel %vm2921_vm10, %v3333_v50, %v3335_v2  ;;  %v3411_v2 = vsel %vm1701_vm7, %v3409_v37, %v3410_v34  ;;  %v3432_v23 = vsel %vm1721_vm8, %v3430_v54, %v3431_v46 }
 0x682   : > { %v3378_v37 = vsel %vm2957_vm12, %v3375_v7, %v3377_v40  ;;  %v3413_v60 = vsel %vm1701_vm7, %v3410_v34, %v3412_v58  ;;  %v3473_v40 = vrot.slane %v3467_v57, 4  ;;  %v3434_v57 = vsel %vm1721_vm8, %v3431_v46, %v3433_v49 }
 0x685   : > { %3358 = vrot.lane.b32.xlu0 %v3355_v33, %s8896_s21  ;;  %3318 = vrot.lane.b32.xlu1 %v3315_v35, %s8896_s21  ;;  %v3444_v33 = vstv %s5272_s22  ;;  %s5278_s22 = sld [smem:[#allocation4 + $0x113]] }
 0x686   : > { %v3446_v50 = vmul.f32 %v3444_v33, %v6759_v13 }
 0x687   : > { %v6963_v48 = vpop.permute.xlu0 %2975  ;;  %v6972_v35 = vpop.permute.xlu1 %3115 }
 0x688   : > { %8997 = vst [vmem:[#allocation61_spill] sm:$0xff] %v6972_v35  ;;  %v3452_v10 = vrot.slane %v3446_v50, 3 }
 0x689   : > { %3379 = vrot.lane.b32.xlu0 %v3376_v47, %s8896_s21  ;;  %3339 = vrot.lane.b32.xlu1 %v3336_v0, %s8896_s21  ;;  %v3445_v47 = vmul.f32 %v3444_v33, %v6745_v55 }
 0x68b   : > { %v6974_v27 = vpop.permute.xlu0 %3113  ;;  %v6989_v42 = vpop.permute.xlu1 %3255  ;;  %v3451_v39 = vrot.slane %v3445_v47, 3 }
 0x68c   : > { %8999 = vst [vmem:[#allocation63_spill] sm:$0xff] %v6989_v42 }
 0x68d   : > { %3414 = vrot.lane.b32.xlu0 %v3411_v2, %s8899_s27  ;;  %3360 = vrot.lane.b32.xlu1 %v3357_v51, %s8896_s21  ;;  %v3466_v2 = vmul.f32 %v3465_v31, %v6745_v55  ;;  %v3486_v51 = vstv %s5274_s16  ;;  %v3453_v50 = vsel %vm2903_vm9, %v3451_v39, %v3452_v10  ;;  %s7019_s16 = sld [smem:[#allocation4 + $0x11a]] }
 0x68e   : > { %v6998_v7 = vmul.f32 %v3486_v51, %v6759_v13  ;;  %v3487_v47 = vmul.f32 %v3486_v51, %v6745_v55 }
 0x68f   : > { %v6983_v0 = vpop.permute.xlu0 %3253  ;;  %v7005_v39 = vpop.permute.xlu1 %3395 }
 0x690   : > { %8998 = vst [vmem:[#allocation62_spill] sm:$0xff] %v6983_v0  ;;  %9001 = vst [vmem:[#allocation65_spill] sm:$0xff] %v7005_v39  ;;  %v3494_v34 = vrot.slane %v6998_v7, 5  ;;  %v3542_v39 = vstv %s5277_s23  ;;  %s7045_s23 = sld [smem:[#allocation4 + $0x121]] }
 0x691   : > { %3435 = vrot.lane.b32.xlu0 %v3432_v23, %s8899_s27  ;;  %3381 = vrot.lane.b32.xlu1 %v3378_v37, %s8896_s21  ;;  %v3447_v23 = vmul.f32 %v3444_v33, %v6831_v12  ;;  %v3472_v37 = vrot.slane %v3466_v2, 4  ;;  %v3493_v2 = vrot.slane %v3487_v47, 5  ;;  %s5445_s21 = spop %5444 }
 0x693   : > { %v6994_v54 = vpop.permute.xlu0 %3393  ;;  %v3474_v33 = vsel %vm2921_vm10, %v3472_v37, %v3473_v40  ;;  %v3454_v56 = vrot.slane %v3447_v23, 3  ;;  %v3489_v23 = vmul.f32 %v3486_v51, %v6831_v12  ;;  %v7030_v47 = vpop.permute.xlu1 %3535 }
 0x694   : > { %9000 = vst [vmem:[#allocation64_spill] sm:$0xff] %v6994_v54  ;;  %v3507_v54 = vstv %s5275_s26  ;;  %9004 = vst [vmem:[#allocation68_spill] sm:$0xff] %v7030_v47  ;;  %s7035_s26 = sld [smem:[#allocation7 + $0x1]]  ;;  %v3584_v47 = vstv %s7019_s16  ;;  %s7094_s16 = sld [smem:[#allocation4 + $0x100]] }
 0x695   : > { %3456 = vrot.lane.b32.xlu0 %v3453_v50, %s8899_s27  ;;  %3416 = vrot.lane.b32.xlu1 %v3413_v60, %s8899_s27  ;;  %v7011_v58 = vmul.f32 %v3507_v54, %v6759_v13  ;;  %v3468_v50 = vmul.f32 %v3465_v31, %v6831_v12  ;;  %v3508_v60 = vmul.f32 %v3507_v54, %v6745_v55 }
 0x696   : > { %v3455_v46 = vsel %vm2903_vm9, %v3452_v10, %v3454_v56  ;;  %v7027_v31 = vmul.f32 %v3542_v39, %v6759_v13  ;;  %v7037_v10 = vstv %s5177_s29  ;;  %s7058_s29 = sld [smem:[#allocation7 + $0x2]] }
 0x697   : > { %v7007_v30 = vpop.permute.xlu0 %3533  ;;  %v3515_v37 = vrot.slane %v7011_v58, 6  ;;  %v3475_v49 = vrot.slane %v3468_v50, 4 }
 0x698   : > { %9002 = vst [vmem:[#allocation66_spill] sm:$0xff] %v7007_v30  ;;  %v3495_v30 = vsel %vm2939_vm11, %v3493_v2, %v3494_v34  ;;  %v3563_v2 = vstv %s5278_s22  ;;  %v3550_v50 = vrot.slane %v7027_v31, 1  ;;  %s7056_s22 = sld [smem:[#allocation4 + $0x128]] }
 0x699   : > { %3477 = vrot.lane.b32.xlu0 %v3474_v33, %s8899_s27  ;;  %3437 = vrot.lane.b32.xlu1 %v3434_v57, %s8899_s27  ;;  %v3514_v33 = vrot.slane %v3508_v60, 6  ;;  %v3543_v57 = vmul.f32 %v3542_v39, %v6745_v55  ;;  %v7043_v51 = vmul.f32 %v3563_v2, %v6759_v13  ;;  %v3496_v60 = vrot.slane %v3489_v23, 5 }
 0x69a   : > { %v7068_v23 = vmul.f32 %v3584_v47, %v6759_v13  ;;  %v7080_v1 = vstv %s7035_s26  ;;  %s7099_s26 = sld [smem:[#allocation4 + $0x107]]  ;;  %v9022_v36 = vstv %s7094_s16 }
 0x69b   : > { %v7021_v7 = vpop.permute.xlu0 %3673  ;;  %v3516_v56 = vsel %vm2957_vm12, %v3514_v33, %v3515_v37  ;;  %v881_v33 = vsub.f32 %v6186_v43, %v7037_v10  ;;  %v3571_v31 = vrot.slane %v7043_v51, 2 }
 0x69c   : > { %9003 = vst [vmem:[#allocation67_spill] sm:$0xff] %v7021_v7  ;;  %v3549_v7 = vrot.slane %v3543_v57, 1  ;;  %v3497_v57 = vsel %vm2939_vm11, %v3494_v34, %v3496_v60  ;;  %v3605_v60 = vstv %s7045_s23  ;;  %s7101_s23 = sld [smem:[#allocation4 + $0x10e]] }
 0x69d   : > { %3498 = vrot.lane.b32.xlu0 %v3495_v30, %s8899_s27  ;;  %3458 = vrot.lane.b32.xlu1 %v3455_v46, %s8899_s27  ;;  %v3476_v30 = vsel %vm2921_vm10, %v3473_v40, %v3475_v49  ;;  %v3510_v46 = vmul.f32 %v3507_v54, %v6831_v12  ;;  %v7060_v40 = vstv %s5445_s21  ;;  %v7062_v49 = vpop.permute.xlu1 %3675  ;;  %s7077_s21 = sld [smem:[#allocation4 + $0x12f]] }
 0x69e   : > { %9006 = vst [vmem:[#allocation70_spill] sm:$0xff] %v7062_v49  ;;  %v3551_v43 = vsel %vm1701_vm7, %v3549_v7, %v3550_v50  ;;  %v889_v51 = vmul.f32 %v7060_v40, %v881_v33  ;;  %v7091_v33 = vmul.f32 %v3605_v60, %v6759_v13 }
 0x69f   : > { %v7039_v58 = vpop.permute.xlu0 %3924 }
 0x6a0   : > { %9005 = vst [vmem:[#allocation69_spill] sm:$0xff] %v7039_v58  ;;  %v3564_v58 = vmul.f32 %v3563_v2, %v6745_v55  ;;  %v9021_v8 = vrot.slane %v7091_v33, 4 }
 0x6a1   : > { %3519 = vrot.lane.b32.xlu0 %v3516_v56, %s8899_s27  ;;  %3479 = vrot.lane.b32.xlu1 %v3476_v30, %s8899_s27  ;;  %v3517_v56 = vrot.slane %v3510_v46, 6  ;;  %v3545_v30 = vmul.f32 %v3542_v39, %v6831_v12 }
 0x6a2   : > { %v3570_v49 = vrot.slane %v3564_v58, 2 }
 0x6a3   : > { %v7064_v54 = vpop.permute.xlu0 %4064  ;;  %v3518_v58 = vsel %vm2957_vm12, %v3515_v37, %v3517_v56  ;;  %v3552_v46 = vrot.slane %v3545_v30, 1  ;;  %v3606_v37 = vmul.f32 %v3605_v60, %v6745_v55  ;;  %v3626_v56 = vstv %s7056_s22  ;;  %s7127_s22 = sld [smem:[#allocation7 + $0x100]] }
 0x6a4   : > { %9007 = vst [vmem:[#allocation71_spill] sm:$0xff] %v7064_v54  ;;  %v3585_v54 = vmul.f32 %v3584_v47, %v6745_v55  ;;  %v3572_v39 = vsel %vm1721_vm8, %v3570_v49, %v3571_v31  ;;  %v893_v49 = vmul.f32 %v7080_v1, %v889_v51  ;;  %v7106_v30 = vstv %s7058_s29  ;;  %s7129_s29 = sld [smem:[#allocation4 + $0x11c]] }
 0x6a5   : > { %3554 = vrot.lane.b32.xlu0 %v3551_v43, %s8905_s14  ;;  %3500 = vrot.lane.b32.xlu1 %v3497_v57, %s8899_s27  ;;  %v3566_v43 = vmul.f32 %v3563_v2, %v6831_v12  ;;  %v3553_v51 = vsel %vm1701_vm7, %v3550_v50, %v3552_v46  ;;  %v3612_v46 = vrot.slane %v3606_v37, 4 }
 0x6a6   : > { %v3591_v57 = vrot.slane %v3585_v54, 3  ;;  %v7116_v54 = vmul.f32 %v3626_v56, %v6759_v13  ;;  %v897_v50 = vadd.f32 %v7106_v30, %v893_v49 }
 0x6a7   : > { %v7082_v38 = vpop.permute.xlu1 %3926  ;;  %v7084_v7 = vpop.permute.xlu0 %4204 }
 0x6a8   : > { %9008 = vst [vmem:[#allocation72_spill] sm:$0xff] %v7082_v38  ;;  %9009 = vst [vmem:[#allocation73_spill] sm:$0xff] %v7084_v7  ;;  %v8907_v7 = vrot.slane %v7091_v33, 4  ;;  %v3573_v38 = vrot.slane %v3566_v43, 2  ;;  %v3647_v43 = vstv %s7077_s21  ;;  %s7163_s21 = sld [smem:[#allocation4 + $0x11b]]  ;;  %v9025_v21 = vrot.slane %v7116_v54, 5 }
 0x6a9   : > { %3575 = vrot.lane.b32.xlu0 %v3572_v39, %s8905_s14  ;;  %3521 = vrot.lane.b32.xlu1 %v3518_v58, %s8899_s27  ;;  %v9012_v39 = vrot.slane %v7068_v23, 3  ;;  %s7118_s27 = sld [smem:[#allocation4 + $0x10d]]  ;;  %v9026_v53 = vstv %s7127_s22 }
 0x6aa   : > { %v3614_v49 = vsel %vm2921_vm10, %v3612_v46, %v8907_v7  ;;  %v3574_v37 = vsel %vm1721_vm8, %v3571_v31, %v3573_v38  ;;  %v7165_v46 = vmul.f32 -1.442695, %v897_v50  ;;  %v7169_v31 = vstv %s7099_s26  ;;  %s7216_s26 = sld [smem:[#allocation4 + $0x130]] }
 0x6ab   : > { %v7108_v34 = vpop.permute.xlu1 %4066  ;;  %v7110_v2 = vpop.permute.xlu0 %4344  ;;  %v3593_v58 = vsel %vm2903_vm9, %v3591_v57, %v9012_v39  ;;  %v3627_v57 = vmul.f32 %v3626_v56, %v6745_v55  ;;  %v7148_v55 = vmul.f32 %v3647_v43, %v6759_v13  ;;  %v9018_v38 = vrot.slane %v7068_v23, 3 }
 0x6ac   : > { %9010 = vst [vmem:[#allocation74_spill] sm:$0xff] %v7108_v34  ;;  %9011 = vst [vmem:[#allocation75_spill] sm:$0xff] %v7110_v2  ;;  %v3587_v34 = vmul.f32 %v3584_v47, %v6831_v12  ;;  %v859_v2 = vmul.f32 %v6169_v62, %v6188_v44  ;;  %5581 = vpow2.f32 %v7165_v46 }
 0x6ad   : > { %3596 = vrot.lane.b32.xlu0 %v3593_v58, %s8905_s14  ;;  %3556 = vrot.lane.b32.xlu1 %v3553_v51, %s8905_s14  ;;  %v3608_v58 = vmul.f32 %v3605_v60, %v6831_v12  ;;  %v3633_v47 = vrot.slane %v3627_v57, 5  ;;  %v9017_v57 = vrot.slane %v7116_v54, 5  ;;  %v9029_v54 = vrot.slane %v7148_v55, 6 }
 0x6ae   : > { %v3594_v39 = vrot.slane %v3587_v34, 3  ;;  %v7156_v51 = vadd.f32 %v859_v2, %v6174_v28  ;;  %v7172_v28 = vstv %s7101_s23  ;;  %v7180_v34 = vmul.f32 %v7169_v31, %v6759_v13  ;;  %s7495_s23 = sld [smem:[#allocation4 + $0x15c]] }
 0x6af   : > { %v7142_v62 = vpop.permute.xlu1 %4206  ;;  %v7144_v44 = vpop.permute.xlu0 %4484  ;;  %v3635_v50 = vsel %vm2939_vm11, %v3633_v47, %v9017_v57  ;;  %v3615_v13 = vrot.slane %v3608_v58, 4  ;;  %v7212_v58 = vstv %s7135_s28  ;;  %v3703_v57 = vstv %s7138_s0  ;;  %s9027_s0 = smov 122   ;;  %s7469_s28 = sld [smem:[#allocation4 + $0x155]] }
 0x6b0   : > { %9013 = vst [vmem:[#allocation76_spill] sm:$0xff] %v7142_v62  ;;  %9014 = vst [vmem:[#allocation77_spill] sm:$0xff] %v7144_v44  ;;  %v7160_v44 = vld [vmem:[#allocation2] sm:$0xff]  ;;  %v3595_v7 = vsel %vm2903_vm9, %v9018_v38, %v3594_v39  ;;  %v7209_v39 = vstv %s7129_s29  ;;  %v7232_v3 = vmul.f32 %v7194_v26, %v3703_v57  ;;  %s7555_s29 = sld [smem:[#allocation4 + $0x141]] }
 0x6b1   : > { %3617 = vrot.lane.b32.xlu0 %v3614_v49, %s8905_s14  ;;  %3577 = vrot.lane.b32.xlu1 %v3574_v37, %s8905_s14  ;;  %v3648_v62 = vmul.f32 %v7160_v44, %v3647_v43  ;;  %s7176_s14 = sld [smem:[#allocation4 + $0x129]]  ;;  %v8910_v49 = vrot.slane %v7148_v55, 6  ;;  %v3682_v37 = vstv %s7118_s27  ;;  %v2863_v47 = vmul.f32 %v7160_v44, %v7169_v31  ;;  %s9019_s27 = smov 123  }
 0x6b2   : > { %v3683_v38 = vmul.f32 %v7160_v44, %v3682_v37  ;;  %v3616_v41 = vsel %vm2921_vm10, %v9021_v8, %v3615_v13  ;;  %v2857_v24 = vmul.f32 %v7160_v44, %v9022_v36  ;;  %v7248_v8 = vmul.f32 %v7194_v26, %v7172_v28 }
 0x6b3   : > { %v7182_v60 = vpop.permute.xlu1 %4346  ;;  %v7184_v2 = vpop.permute.xlu0 %4624  ;;  %v3654_v23 = vrot.slane %v3648_v62, 6  ;;  %v2869_v6 = vrot.slane %v2863_v47, 1  ;;  %v9023_v36 = vrot.slane %v7180_v34, 1  ;;  %v3685_v4 = vmul.f32 %v3682_v37, %v6831_v12 }
 0x6b4   : > { %9015 = vst [vmem:[#allocation78_spill] sm:$0xff] %v7182_v60  ;;  %9016 = vst [vmem:[#allocation79_spill] sm:$0xff] %v7184_v2  ;;  %v7197_v60 = vmul.f32 %v7194_v26, %v3682_v37  ;;  %v3629_v2 = vmul.f32 %v3626_v56, %v6831_v12  ;;  %v7221_v56 = vstv %s7140_s1  ;;  %v3689_v33 = vrot.slane %v3683_v38, 1  ;;  %s7281_s1 = sld [smem:[#allocation4 + $0x140]] }
 0x6b5   : > { %3638 = vrot.lane.b32.xlu0 %v3635_v50, %s9019_s27  ;;  %3598 = vrot.lane.b32.xlu1 %v3595_v7, %s9019_s27  ;;  %v3656_v62 = vsel %vm2957_vm12, %v3654_v23, %v8910_v49  ;;  %v3704_v23 = vmul.f32 %v7160_v44, %v3703_v57  ;;  %v3724_v49 = vstv %s7163_s21  ;;  %v2897_v61 = vmul.f32 %v7160_v44, %v7202_v45  ;;  %s7578_s21 = sld [smem:[#allocation4 + $0x148]] }
 0x6b6   : > { %v3690_v63 = vrot.slane %v7197_v60, 1  ;;  %v3636_v50 = vrot.slane %v3629_v2, 5  ;;  %v7251_v60 = vstv %s7174_s2  ;;  %v2871_v2 = vsel %vm1701_vm7, %v2869_v6, %v9023_v36  ;;  %s7392_s2 = sld [smem:[#allocation4 + $0x147]] }
 0x6b7   : > { %v7224_v42 = vpop.permute.xlu1 %4486  ;;  %v7226_v7 = vpop.permute.xlu0 %2996  ;;  %v7267_v38 = vmul.f32 %v7194_v26, %v3724_v49  ;;  %v3725_v16 = vmul.f32 %v7160_v44, %v3724_v49  ;;  %v3692_v15 = vrot.slane %v3685_v4, 1  ;;  %v7307_v35 = vmul.f32 %v7194_v26, %v7251_v60 }
 0x6b8   : > { %9020 = vst [vmem:[#allocation80_spill] sm:$0xff] %v7224_v42  ;;  %v3650_v42 = vmul.f32 %v3647_v43, %v6831_v12  ;;  %v7254_v43 = vstv %s7176_s14  ;;  %v3691_v0 = vsel %vm1701_vm7, %v3689_v33, %v3690_v63  ;;  %v3637_v6 = vsel %vm2939_vm11, %v9025_v21, %v3636_v50  ;;  %s7433_s14 = sld [smem:[#allocation4 + $0x14e]] }
 0x6b9   : > { %3659 = vrot.lane.b32.xlu0 %v3656_v62, %s9019_s27  ;;  %3619 = vrot.lane.b32.xlu1 %v3616_v41, %s9019_s27  ;;  %v2880_v41 = vmul.f32 %v7160_v44, %v7172_v28  ;;  %v3710_v62 = vrot.slane %v3704_v23, 2  ;;  %v7286_v21 = vmul.f32 %v7194_v26, %v7202_v45  ;;  %v9028_v23 = vrot.slane %v7232_v3, 2 }
 0x6ba   : > { %v3657_v36 = vrot.slane %v3650_v42, 6  ;;  %v7289_v42 = vstv %s7216_s26  ;;  %v3731_v55 = vrot.slane %v3725_v16, 3  ;;  %v9030_v4 = vrot.slane %v7248_v8, 2  ;;  %s7600_s26 = sld [smem:[#allocation4 + $0x14f]] }
 0x6bb   : > { %v7261_v13 = vpop.permute.xlu1 %4626  ;;  %v7263_v47 = vpop.permute.xlu0 %3017  ;;  %v2886_v37 = vrot.slane %v2880_v41, 2  ;;  %v3712_v33 = vsel %vm1721_vm8, %v3710_v62, %v9028_v23  ;;  %v2904_v41 = vrot.slane %v2897_v61, 3  ;;  %v7314_v62 = vmul.f32 %v7160_v44, %v7212_v58 }
 0x6bc   : > { %9024 = vst [vmem:[#allocation81_spill] sm:$0xff] %v7261_v13  ;;  %v2859_v13 = vadd.f32 %v2857_v24, %v9026_v53  ;;  %v7292_v24 = vstv %s7218_s24  ;;  %v3658_v25 = vsel %vm2957_vm12, %v9029_v54, %v3657_v36  ;;  %v7324_v61 = vmul.f32 %v7194_v26, %v7209_v39  ;;  %s7622_s24 = sld [smem:[#allocation4 + $0x156]] }
 0x6bd   : > { %3694 = vrot.lane.b32.xlu0 %v3691_v0, %s9027_s0  ;;  %3640 = vrot.lane.b32.xlu1 %v3637_v6, %s9019_s27  ;;  %v8913_v6 = vrot.slane %v7267_v38, 3  ;;  %v2888_v36 = vsel %vm1721_vm8, %v2886_v37, %v9030_v4  ;;  %v7339_v4 = vmul.f32 %v7194_v26, %v7254_v43  ;;  %v3693_v54 = vsel %vm1701_vm7, %v3690_v63, %v3692_v15 }
 0x6be   : > { %v2876_v53 = vadd.f32 %v2871_v2, %v2859_v13  ;;  %v3706_v2 = vmul.f32 %v3703_v57, %v6831_v12  ;;  %v2915_v13 = vmul.f32 %v7160_v44, %v7209_v39  ;;  %v3746_v57 = vmul.f32 %v7160_v44, %v7251_v60 }
 0x6bf   : > { %v7294_v0 = vpop.permute.xlu1 %2994  ;;  %v7296_v50 = vpop.permute.xlu0 %3038  ;;  %v3733_v37 = vsel %vm2903_vm9, %v3731_v55, %v8913_v6  ;;  %v7350_v18 = vmul.f32 %v7160_v44, %v7221_v56  ;;  %v3767_v15 = vmul.f32 %v7160_v44, %v7254_v43  ;;  %v7357_v63 = vstv %s7281_s1  ;;  %s7654_s1 = sld [smem:[#allocation4 + $0x15d]] }
 0x6c0   : > { %v2893_v23 = vadd.f32 %v2888_v36, %v2876_v53  ;;  %v3713_v53 = vrot.slane %v3706_v2, 2  ;;  %v3727_v36 = vmul.f32 %v3724_v49, %v6831_v12  ;;  %v9032_v2 = vrot.slane %v7286_v21, 3 }
 0x6c1   : > { %3715 = vrot.lane.b32.xlu0 %v3712_v33, %s9027_s0  ;;  %3661 = vrot.lane.b32.xlu1 %v3658_v25, %s9019_s27  ;;  %v2865_v33 = vmul.f32 %v7169_v31, %v6831_v12  ;;  %v7346_v31 = vmul.f32 %v7194_v26, %v7212_v58  ;;  %v2922_v49 = vrot.slane %v2915_v13, 4  ;;  %v3752_v6 = vrot.slane %v3746_v57, 4 }
 0x6c2   : > { %v2906_v12 = vsel %vm2903_vm9, %v2904_v41, %v9032_v2  ;;  %v9033_v41 = vrot.slane %v7307_v35, 4  ;;  %v9034_v2 = vrot.slane %v7232_v3, 2  ;;  %v3773_v3 = vrot.slane %v3767_v15, 5 }
 0x6c3   : > { %v7330_v25 = vpop.permute.xlu1 %3015  ;;  %v7332_v16 = vpop.permute.xlu0 %3059  ;;  %v2911_v9 = vadd.f32 %v2906_v12, %v2893_v23  ;;  %v2872_v17 = vrot.slane %v2865_v33, 1  ;;  %v3734_v23 = vrot.slane %v3727_v36, 3  ;;  %v7380_v33 = vmul.f32 %v7194_v26, %v7289_v42 }
 0x6c4   : > { %9031 = vst [vmem:[#allocation82_spill] sm:$0xff] %v7332_v16  ;;  %v3748_v16 = vmul.f32 %v7368_v59, %v7251_v60  ;;  %v3754_v13 = vsel %vm2921_vm10, %v3752_v6, %v9033_v41  ;;  %v3714_v57 = vsel %vm1721_vm8, %v9034_v2, %v3713_v53  ;;  %v9035_v60 = vstv %s7094_s16  ;;  %s9047_s16 = smov 127  }
 0x6c5   : > { %3736 = vrot.lane.b32.xlu0 %v3733_v37, %s9027_s0  ;;  %3696 = vrot.lane.b32.xlu1 %v3693_v54, %s9027_s0  ;;  %v7385_v54 = vmul.f32 %v7194_v26, %v7221_v56  ;;  %v2858_v55 = vmul.f32 %v7194_v26, %v9035_v60  ;;  %v9036_v6 = vrot.slane %v7324_v61, 4  ;;  %v2940_v36 = vrot.slane %v7314_v62, 5 }
 0x6c6   : > { %v2882_v41 = vmul.f32 %v7368_v59, %v7172_v28  ;;  %v3788_v26 = vmul.f32 %v7160_v44, %v7289_v42  ;;  %v9039_v28 = vrot.slane %v7267_v38, 3  ;;  %v7437_v44 = vld [vmem:[#allocation2 + $0x18] sm:$0xff] }
 0x6c7   : > { %v7363_v14 = vpop.permute.xlu1 %3036  ;;  %v7365_v37 = vpop.permute.xlu0 %3080  ;;  %v2924_v53 = vsel %vm2921_vm10, %v2922_v49, %v9036_v6  ;;  %v9038_v49 = vrot.slane %v7339_v4, 5  ;;  %v3755_v6 = vrot.slane %v3748_v16, 4  ;;  %v2958_v16 = vrot.slane %v7350_v18, 6 }
 0x6c8   : > { %v2929_v2 = vadd.f32 %v2924_v53, %v2911_v9  ;;  %v3735_v12 = vsel %vm2903_vm9, %v9039_v28, %v3734_v23  ;;  %v3769_v9 = vmul.f32 %v7368_v59, %v7254_v43  ;;  %v9040_v53 = vrot.slane %v7346_v31, 5 }
 0x6c9   : > { %3757 = vrot.lane.b32.xlu0 %v3754_v13, %s9027_s0  ;;  %3717 = vrot.lane.b32.xlu1 %v3714_v57, %s9027_s0  ;;  %v9037_v13 = vrot.slane %v7180_v34, 1  ;;  %v3775_v62 = vsel %vm2939_vm11, %v3773_v3, %v9038_v49  ;;  %v7418_v34 = vld [vmem:[#allocation2 + $0x20] sm:$0xff]  ;;  %v9041_v23 = vstv %s7127_s22  ;;  %v2889_v43 = vrot.slane %v2882_v41, 2  ;;  %s7530_s22 = sld [smem:[#allocation4 + $0x13a]] }
 0x6ca   : > { %v2942_v3 = vsel %vm2939_vm11, %v2940_v36, %v9040_v53  ;;  %v2899_v49 = vmul.f32 %v7368_v59, %v7202_v45  ;;  %v3794_v28 = vrot.slane %v3788_v26, 6  ;;  %v3934_v18 = vmul.f32 %v7437_v44, %v7292_v24  ;;  %v7450_v26 = vld [vmem:[#allocation2 + $0x28] sm:$0x3f] }
 0x6cb   : > { %v2873_v15 = vsel %vm1701_vm7, %v9037_v13, %v2872_v17  ;;  %v7405_v57 = vpop.permute.xlu1 %3057  ;;  %v7407_v60 = vpop.permute.xlu0 %3099  ;;  %v7422_v17 = vmul.f32 %v7418_v34, %v7292_v24  ;;  %v2860_v13 = vadd.f32 %v2858_v55, %v9041_v23  ;;  %v2947_v36 = vadd.f32 %v2942_v3, %v2929_v2 }
 0x6cc   : > { %v3790_v45 = vmul.f32 %v7368_v59, %v7289_v42  ;;  %v9043_v23 = vrot.slane %v7380_v33, 6  ;;  %v3776_v2 = vrot.slane %v3769_v9, 5  ;;  %v7458_v3 = vmul.f32 %v7418_v34, %v7357_v63 }
 0x6cd   : > { %3778 = vrot.lane.b32.xlu0 %v3775_v62, %s9027_s0  ;;  %3738 = vrot.lane.b32.xlu1 %v3735_v12, %s9027_s0  ;;  %v2877_v53 = vadd.f32 %v2873_v15, %v2860_v13  ;;  %v9042_v12 = vrot.slane %v7307_v35, 4  ;;  %v3941_v15 = vrot.slane %v7422_v17, 1  ;;  %v9044_v35 = vrot.slane %v7385_v54, 6 }
 0x6ce   : > { %v3796_v38 = vsel %vm2957_vm12, %v3794_v28, %v9043_v23  ;;  %v2917_v42 = vmul.f32 %v7368_v59, %v7209_v39  ;;  %v3975_v9 = vstv %s7392_s2  ;;  %v9045_v17 = vrot.slane %v7248_v8, 2  ;;  %s7670_s2 = sld [smem:[#allocation4 + $0x13b]] }
 0x6cf   : > { %v7441_v55 = vpop.permute.xlu1 %3078  ;;  %v7443_v62 = vpop.permute.xlu0 %3134  ;;  %v3756_v41 = vsel %vm2921_vm10, %v9042_v12, %v3755_v6  ;;  %v2960_v6 = vsel %vm2957_vm12, %v2958_v16, %v9044_v35  ;;  %v2907_v28 = vrot.slane %v2899_v49, 3  ;;  %v3940_v46 = vrot.slane %v3934_v18, 1 }
 0x6d0   : > { %v2890_v13 = vsel %vm1721_vm8, %v9045_v17, %v2889_v43  ;;  %v3955_v16 = vmul.f32 %v7437_v44, %v7357_v63  ;;  %v2965_v12 = vadd.f32 %v2960_v6, %v2947_v36  ;;  %v3936_v35 = vmul.f32 %v7292_v24, %v7450_v26 }
 0x6d1   : > { %3759 = vrot.lane.b32.xlu1 %v3756_v41, %s9027_s0  ;;  %3799 = vrot.lane.b32.xlu0 %v3796_v38, %s9027_s0  ;;  %v2894_v23 = vadd.f32 %v2890_v13, %v2877_v53  ;;  %v3797_v38 = vrot.slane %v3790_v45, 6  ;;  %v9046_v8 = vrot.slane %v7339_v4, 5  ;;  %v3942_v49 = vsel %vm1701_vm7, %v3940_v46, %v3941_v15 }
 0x6d2   : > { %v3962_v18 = vrot.slane %v7458_v3, 2  ;;  %v7488_v17 = vmul.f32 %v7418_v34, %v3975_v9  ;;  %v2925_v36 = vrot.slane %v2917_v42, 4  ;;  %v2935_v53 = vmul.f32 %v7368_v59, %v7212_v58 }
 0x6d3   : > { %v7476_v39 = vpop.permute.xlu1 %3101  ;;  %v7478_v41 = vpop.permute.xlu0 %3155  ;;  %v3777_v43 = vsel %vm2939_vm11, %v9046_v8, %v3776_v2  ;;  %v3996_v24 = vstv %s7433_s14  ;;  %v882_v4 = vsub.f32 %v6229_v20, %v7037_v10  ;;  %v2979_v45 = vadd.f32 %v6961_v32, %v2965_v12  ;;  %s7694_s14 = sld [smem:[#allocation4 + $0x142]] }
 0x6d4   : > { %v9048_v2 = vrot.slane %v7286_v21, 3  ;;  %v3961_v6 = vrot.slane %v3955_v16, 2  ;;  %v3976_v58 = vmul.f32 %v7437_v44, %v3975_v9  ;;  %v9049_v8 = vrot.slane %v7380_v33, 6 }
 0x6d5   : > { %3780 = vrot.lane.b32.xlu1 %v3777_v43, %s9027_s0  ;;  %3945 = vrot.lane.b32.xlu0 %v3942_v49, %s9047_s16  ;;  %v3943_v20 = vrot.slane %v3936_v35, 1  ;;  %v3957_v32 = vmul.f32 %v7357_v63, %v7450_v26  ;;  %v3000_v21 = vadd.f32 %v7294_v0, %v2979_v45  ;;  %v3983_v16 = vrot.slane %v7488_v17, 3 }
 0x6d6   : > { %v2908_v3 = vsel %vm2903_vm9, %v9048_v2, %v2907_v28  ;;  %v3798_v43 = vsel %vm2957_vm12, %v9049_v8, %v3797_v38  ;;  %v3963_v28 = vsel %vm1721_vm8, %v3961_v6, %v3962_v18  ;;  %v7517_v12 = vmul.f32 %v7418_v34, %v3996_v24 }
 0x6d7   : > { %v2912_v42 = vadd.f32 %v2908_v3, %v2894_v23  ;;  %v7504_v13 = vpop.permute.xlu1 %3136  ;;  %v7506_v46 = vpop.permute.xlu0 %3176  ;;  %v2943_v23 = vrot.slane %v2935_v53, 5  ;;  %v2953_v49 = vmul.f32 %v7368_v59, %v7221_v56  ;;  %v4017_v33 = vstv %s7469_s28  ;;  %s7721_s28 = sld [smem:[#allocation4 + $0x149]] }
 0x6d8   : > { %v890_v63 = vmul.f32 %v7060_v40, %v882_v4  ;;  %v9050_v0 = vrot.slane %v7324_v61, 4  ;;  %v3021_v35 = vadd.f32 %v7330_v25, %v3000_v21  ;;  %v3982_v17 = vrot.slane %v3976_v58, 3  ;;  %v5582_v59 = vpop.eup %5581 }
 0x6d9   : > { %3801 = vrot.lane.b32.xlu1 %v3798_v43, %s9027_s0  ;;  %3966 = vrot.lane.b32.xlu0 %v3963_v28, %s9047_s16  ;;  %v3997_v45 = vmul.f32 %v7437_v44, %v3996_v24  ;;  %v3944_v4 = vsel %vm1701_vm7, %v3941_v15, %v3943_v20  ;;  %v3964_v3 = vrot.slane %v3957_v32, 2  ;;  %v3978_v61 = vmul.f32 %v3975_v9, %v7450_v26 }
 0x6da   : > { %v2926_v38 = vsel %vm2921_vm10, %v9050_v0, %v2925_v36  ;;  %v3042_v36 = vadd.f32 %v7363_v14, %v3021_v35  ;;  %v3984_v25 = vsel %vm2903_vm9, %v3982_v17, %v3983_v16  ;;  %v4004_v6 = vrot.slane %v7517_v12, 4 }
 0x6db   : > { %v2930_v56 = vadd.f32 %v2926_v38, %v2912_v42  ;;  %v7532_v53 = vpop.permute.xlu1 %3157  ;;  %v7534_v2 = vpop.permute.xlu0 %3197  ;;  %v7542_v58 = vmul.f32 %v7418_v34, %v4017_v33  ;;  %v2961_v8 = vrot.slane %v2953_v49, 6  ;;  %v4038_v42 = vstv %s7495_s23  ;;  %s7762_s23 = sld [smem:[#allocation4 + $0x150]] }
 0x6dc   : > { %v894_v15 = vmul.f32 %v7080_v1, %v890_v63  ;;  %v871_v9 = vmul.f32 %v6176_v29, %v6202_v52  ;;  %v9051_v14 = vrot.slane %v7346_v31, 5  ;;  %v3063_v20 = vadd.f32 %v7405_v57, %v3042_v36 }
 0x6dd   : > { %3947 = vrot.lane.b32.xlu1 %v3944_v4, %s9047_s16  ;;  %3987 = vrot.lane.b32.xlu0 %v3984_v25, %s9047_s16  ;;  %v4003_v32 = vrot.slane %v3997_v45, 4  ;;  %v4018_v21 = vmul.f32 %v7437_v44, %v4017_v33  ;;  %v3965_v63 = vsel %vm1721_vm8, %v3962_v18, %v3964_v3  ;;  %v3985_v29 = vrot.slane %v3978_v61, 3 }
 0x6de   : > { %v2944_v43 = vsel %vm2939_vm11, %v9051_v14, %v2943_v23  ;;  %v3999_v52 = vmul.f32 %v3996_v24, %v7450_v26  ;;  %v3084_v31 = vadd.f32 %v7441_v55, %v3063_v20  ;;  %v4025_v23 = vrot.slane %v7542_v58, 5 }
 0x6df   : > { %v2948_v28 = vadd.f32 %v2944_v43, %v2930_v56  ;;  %v7557_v12 = vpop.permute.xlu1 %3178  ;;  %v7559_v49 = vpop.permute.xlu0 %3218  ;;  %v4005_v57 = vsel %vm2921_vm10, %v4003_v32, %v4004_v6  ;;  %v7567_v0 = vmul.f32 %v7418_v34, %v4038_v42  ;;  %v898_v38 = vadd.f32 %v7106_v30, %v894_v15 }
 0x6e0   : > { %v874_v18 = vadd.f32 %v871_v9, %v7156_v51  ;;  %v9052_v35 = vrot.slane %v7385_v54, 6  ;;  %v4024_v55 = vrot.slane %v4018_v21, 5  ;;  %v4039_v17 = vmul.f32 %v7437_v44, %v4038_v42 }
 0x6e1   : > { %3968 = vrot.lane.b32.xlu1 %v3965_v63, %s9047_s16  ;;  %4008 = vrot.lane.b32.xlu0 %v4005_v57, %s9047_s16  ;;  %v4073_v45 = vstv %s7530_s22  ;;  %v3986_v61 = vsel %vm2903_vm9, %v3983_v16, %v3985_v29  ;;  %v4006_v36 = vrot.slane %v3999_v52, 4  ;;  %v4020_v51 = vmul.f32 %v4017_v33, %v7450_v26  ;;  %s7772_s22 = sld [smem:[#allocation7 + $0x81]] }
 0x6e2   : > { %v2962_v24 = vsel %vm2957_vm12, %v9052_v35, %v2961_v8  ;;  %v3105_v54 = vadd.f32 %v7407_v60, %v3084_v31  ;;  %v4026_v25 = vsel %vm2939_vm11, %v4024_v55, %v4025_v23  ;;  %v4046_v58 = vrot.slane %v7567_v0, 6 }
 0x6e3   : > { %v2966_v56 = vadd.f32 %v2962_v24, %v2948_v28  ;;  %v7580_v4 = vpop.permute.xlu1 %3199  ;;  %v7582_v3 = vpop.permute.xlu0 %3239  ;;  %v7590_v8 = vmul.f32 %v7418_v34, %v4073_v45  ;;  %v909_v15 = vadd.f32 1.0, %v5582_v59  ;;  %v1689_v9 = vmul.f32 %v6321_v5, %v6348_v11 }
 0x6e4   : > { %v5181_v16 = vmul.f32 -1.442695, %v898_v38  ;;  %v883_v33 = vsub.f32 %v874_v18, %v7037_v10  ;;  %v4045_v14 = vrot.slane %v4039_v17, 6  ;;  %v4074_v43 = vmul.f32 %v7437_v44, %v4073_v45 }
 0x6e5   : > { %3989 = vrot.lane.b32.xlu1 %v3986_v61, %s9047_s16  ;;  %4029 = vrot.lane.b32.xlu0 %v4026_v25, %s9047_s16  ;;  %v2980_v60 = vadd.f32 %v6963_v48, %v2966_v56  ;;  %v4094_v20 = vstv %s7555_s29  ;;  %v4007_v5 = vsel %vm2921_vm10, %v4004_v6, %v4006_v36  ;;  %v4027_v11 = vrot.slane %v4020_v51, 5  ;;  %s7791_s29 = sld [smem:[#allocation4 + $0x157]] }
 0x6e6   : > { %v4041_v21 = vmul.f32 %v4038_v42, %v7450_v26  ;;  %v7609_v10 = vmul.f32 %v7418_v34, %v4094_v20  ;;  %v3119_v28 = vadd.f32 %v6974_v27, %v3105_v54  ;;  %v4047_v63 = vsel %vm2957_vm12, %v4045_v14, %v4046_v58 }
 0x6e7   : > { %v7602_v32 = vpop.permute.xlu1 %3220  ;;  %v7604_v59 = vpop.permute.xlu0 %3274  ;;  %v3001_v48 = vadd.f32 %v7226_v7, %v2980_v60  ;;  %v4081_v29 = vrot.slane %v7590_v8, 1  ;;  %5583 = vrcp.f32 %v909_v15  ;;  %v1692_v52 = vadd.f32 %v1689_v9, %v6350_v19 }
 0x6e8   : > { %v4095_v6 = vmul.f32 %v7437_v44, %v4094_v20  ;;  %v891_v42 = vmul.f32 %v7060_v40, %v883_v33  ;;  %v4080_v7 = vrot.slane %v4074_v43, 1  ;;  %v4115_v57 = vstv %s7578_s21  ;;  %s9077_s21 = smov 125  }
 0x6e9   : > { %4010 = vrot.lane.b32.xlu1 %v4007_v5, %s9047_s16  ;;  %4050 = vrot.lane.b32.xlu0 %v4047_v63, %s9047_s16  ;;  %v3022_v31 = vadd.f32 %v7263_v47, %v3001_v48  ;;  %5585 = vpow2.f32 %v5181_v16  ;;  %v4028_v19 = vsel %vm2939_vm11, %v4025_v23, %v4027_v11  ;;  %v4048_v38 = vrot.slane %v4041_v21, 6  ;;  %v9057_v21 = vld [vmem:[#allocation31_spill] sm:$0xff] }
 0x6ea   : > { %v4102_v18 = vrot.slane %v7609_v10, 2  ;;  %v4076_v35 = vmul.f32 %v4073_v45, %v7450_v26  ;;  %v3140_v47 = vadd.f32 %v7443_v62, %v3119_v28  ;;  %v4082_v24 = vsel %vm1701_vm7, %v4080_v7, %v4081_v29  ;;  %v9054_v45 = vld [vmem:[#allocation82_spill] sm:$0xff] }
 0x6eb   : > { %v7624_v27 = vpop.permute.xlu1 %3241  ;;  %v7626_v0 = vpop.permute.xlu0 %3295  ;;  %v3043_v40 = vadd.f32 %v7296_v50, %v3022_v31  ;;  %v7635_v55 = vmul.f32 %v7418_v34, %v4115_v57  ;;  %v9053_v17 = vrot.slane %v6644_v22, 1  ;;  %v4101_v23 = vrot.slane %v4095_v6, 2 }
 0x6ec   : > { %v895_v61 = vmul.f32 %v7080_v1, %v891_v42  ;;  %v4116_v50 = vmul.f32 %v7437_v44, %v4115_v57  ;;  %v4136_v62 = vstv %s7600_s26  ;;  %v4049_v25 = vsel %vm2957_vm12, %v4046_v58, %v4048_v38  ;;  %v9055_v58 = vld [vmem:[#allocation40_spill] sm:$0xff]  ;;  %v9058_v38 = vld [vmem:[#allocation35_spill] sm:$0xff]  ;;  %s7805_s26 = sld [smem:[#allocation4 + $0x15e]] }
 0x6ed   : > { %v1712_v56 = vadd.f32 %v9053_v17, %v1692_v52  ;;  %4031 = vrot.lane.b32.xlu1 %v4028_v19, %s9047_s16  ;;  %4085 = vrot.lane.b32.xlu0 %v4082_v24, %s8948_s17  ;;  %v3064_v36 = vadd.f32 %v9054_v45, %v3043_v40  ;;  %v4103_v22 = vsel %vm1721_vm8, %v4101_v23, %v4102_v18  ;;  %v4083_v8 = vrot.slane %v4076_v35, 1  ;;  %v9059_v40 = vld [vmem:[#allocation50_spill] sm:$0xff]  ;;  %v9062_v17 = vld [vmem:[#allocation21_spill] sm:$0xff] }
 0x6ee   : > { %v4097_v15 = vmul.f32 %v4094_v20, %v7450_v26  ;;  %v3161_v9 = vadd.f32 %v7478_v41, %v3140_v47  ;;  %v4123_v16 = vrot.slane %v7635_v55, 3  ;;  %v7660_v33 = vmul.f32 %v7418_v34, %v4136_v62  ;;  %v9060_v47 = vld [vmem:[#allocation36_spill] sm:$0xff] }
 0x6ef   : > { %v7645_v51 = vpop.permute.xlu1 %3276  ;;  %v7647_v54 = vpop.permute.xlu0 %3316  ;;  %v3085_v1 = vadd.f32 %v7365_v37, %v3064_v36  ;;  %v9056_v60 = vrot.slane %v9055_v58, 2  ;;  %v899_v43 = vadd.f32 %v7106_v30, %v895_v61  ;;  %v4122_v5 = vrot.slane %v4116_v50, 3 }
 0x6f0   : > { %v4137_v37 = vmul.f32 %v7437_v44, %v4136_v62  ;;  %v4157_v41 = vstv %s7622_s24  ;;  %v4084_v52 = vsel %vm1701_vm7, %v4081_v29, %v4083_v8  ;;  %v4118_v30 = vmul.f32 %v4115_v57, %v7450_v26  ;;  %v9061_v57 = vld [vmem:[#allocation61_spill] sm:$0xff]  ;;  %s7846_s24 = sld [smem:[#allocation4 + $0x13c]] }
 0x6f1   : > { %v1732_v14 = vadd.f32 %v9056_v60, %v1712_v56  ;;  %4052 = vrot.lane.b32.xlu1 %v4049_v25, %s9047_s16  ;;  %4106 = vrot.lane.b32.xlu0 %v4103_v22, %s8948_s17  ;;  %v3106_v20 = vadd.f32 %v7476_v39, %v3085_v1  ;;  %v7672_v11 = vpop.eup %5583  ;;  %v7682_v39 = vmul.f32 %v7418_v34, %v4157_v41  ;;  %v4104_v7 = vrot.slane %v4097_v15, 2  ;;  %v9064_v60 = vld [vmem:[#allocation53_spill] sm:$0xff]  ;;  %s7743_s16 = sld [smem:[#allocation7 + $0x83]] }
 0x6f2   : > { %v3182_v42 = vadd.f32 %v7506_v46, %v3161_v9  ;;  %v4124_v31 = vsel %vm2903_vm9, %v4122_v5, %v4123_v16  ;;  %v4144_v19 = vrot.slane %v7660_v33, 4  ;;  %v1939_v24 = vadd.f32 %v9060_v47, %v9059_v40  ;;  %v9063_v33 = vld [vmem:[#allocation32_spill] sm:$0xff]  ;;  %v9068_v40 = vld [vmem:[#allocation55_spill] sm:$0xff] }
 0x6f3   : > { %v1752_v48 = vadd.f32 %v9057_v21, %v1732_v14  ;;  %v7675_v28 = vpop.permute.xlu1 %3297  ;;  %v7677_v63 = vpop.permute.xlu0 %3337  ;;  %v4158_v29 = vmul.f32 %v7437_v44, %v4157_v41  ;;  %v3120_v55 = vadd.f32 %v9061_v57, %v3106_v20  ;;  %v4143_v46 = vrot.slane %v4137_v37, 4 }
 0x6f4   : > { %v5586_v6 = vpop.eup %5585  ;;  %v7698_v56 = vrot.slane %v7672_v11, %v9062_v17  ;;  %v7700_v23 = vmul.f32 -1.442695, %v899_v43  ;;  %v4125_v36 = vrot.slane %v4118_v30, 3  ;;  %v4165_v50 = vrot.slane %v7682_v39, 5  ;;  %v9076_v39 = vld [vmem:[#allocation58_spill] sm:$0xff] }
 0x6f5   : > { %v1777_v35 = vadd.f32 %v9058_v38, %v1752_v48  ;;  %4087 = vrot.lane.b32.xlu1 %v4084_v52, %s8948_s17  ;;  %4127 = vrot.lane.b32.xlu0 %v4124_v31, %s8948_s17  ;;  %v4139_v25 = vmul.f32 %v4136_v62, %v7450_v26  ;;  %v4178_v22 = vstv %s7654_s1  ;;  %v3203_v8 = vadd.f32 %v7534_v2, %v3182_v42  ;;  %v9065_v31 = vld [vmem:[#allocation33_spill] sm:$0xff]  ;;  %v9067_v38 = vld [vmem:[#allocation39_spill] sm:$0xff]  ;;  %s5447_s1 = spop %5446 }
 0x6f6   : > { %v4105_v15 = vsel %vm1721_vm8, %v4102_v18, %v4104_v7  ;;  %v4145_v1 = vsel %vm2921_vm10, %v4143_v46, %v4144_v19  ;;  %v7715_v9 = vmul.f32 %v7418_v34, %v4178_v22  ;;  %v1964_v14 = vadd.f32 %v9064_v60, %v1939_v24  ;;  %v9071_v60 = vld [vmem:[#allocation26_spill] sm:$0xff] }
 0x6f7   : > { %v7702_v61 = vpop.permute.xlu1 %3318  ;;  %v7704_v45 = vpop.permute.xlu0 %3358  ;;  %v1802_v58 = vadd.f32 %v9063_v33, %v1777_v35  ;;  %v4164_v62 = vrot.slane %v4158_v29, 5  ;;  %v910_v2 = vadd.f32 1.0, %v5586_v6  ;;  %v3141_v10 = vadd.f32 %v7504_v13, %v3120_v55  ;;  %v9070_v33 = vld [vmem:[#allocation34_spill] sm:$0xff] }
 0x6f8   : > { %v3224_v18 = vadd.f32 %v7559_v49, %v3203_v8  ;;  %v4179_v43 = vmul.f32 %v7437_v44, %v4178_v22  ;;  %v4213_v20 = vstv %s7670_s2  ;;  %v4126_v21 = vsel %vm2903_vm9, %v4123_v16, %v4125_v36  ;;  %v9066_v16 = vld [vmem:[#allocation51_spill] sm:$0xff]  ;;  %v9069_v8 = vld [vmem:[#allocation62_spill] sm:$0xff]  ;;  %s7864_s2 = sld [smem:[#allocation4 + $0x143]] }
 0x6f9   : > { %4108 = vrot.lane.b32.xlu1 %v4105_v15, %s8948_s17  ;;  %4148 = vrot.lane.b32.xlu0 %v4145_v1, %s8948_s17  ;;  %v4166_v48 = vsel %vm2939_vm11, %v4164_v62, %v4165_v50  ;;  %v4146_v52 = vrot.slane %v4139_v25, 4  ;;  %v4160_v30 = vmul.f32 %v4157_v41, %v7450_v26  ;;  %v3162_v13 = vadd.f32 %v7532_v53, %v3141_v10  ;;  %v9073_v62 = vld [vmem:[#allocation54_spill] sm:$0xff] }
 0x6fa   : > { %v3245_v49 = vadd.f32 %v7582_v3, %v3224_v18  ;;  %v4186_v6 = vrot.slane %v7715_v9, 6  ;;  %v7740_v42 = vmul.f32 %v7418_v34, %v4213_v20  ;;  %v1822_v7 = vadd.f32 %v9065_v31, %v1802_v58 }
 0x6fb   : > { %v7727_v5 = vpop.permute.xlu1 %3339  ;;  %v7729_v37 = vpop.permute.xlu0 %3379  ;;  %v1940_v35 = vadd.f32 %v9067_v38, %v9066_v16  ;;  %v1989_v47 = vadd.f32 %v9068_v40, %v1964_v14  ;;  %5587 = vrcp.f32 %v910_v2  ;;  %v3183_v53 = vadd.f32 %v7557_v12, %v3162_v13  ;;  %v9075_v16 = vld [vmem:[#allocation37_spill] sm:$0xff] }
 0x6fc   : > { %v4185_v3 = vrot.slane %v4179_v43, 6  ;;  %v4214_v41 = vmul.f32 %v7437_v44, %v4213_v20  ;;  %v4234_v24 = vstv %s7694_s14  ;;  %v4147_v55 = vsel %vm2921_vm10, %v4144_v19, %v4146_v52  ;;  %v9072_v19 = vld [vmem:[#allocation44_spill] sm:$0xff]  ;;  %s7876_s14 = sld [smem:[#allocation4 + $0x14a]] }
 0x6fd   : > { %4129 = vrot.lane.b32.xlu1 %v4126_v21, %s8948_s17  ;;  %4169 = vrot.lane.b32.xlu0 %v4166_v48, %s8948_s17  ;;  %v4167_v46 = vrot.slane %v4160_v30, 5  ;;  %v4181_v36 = vmul.f32 %v4178_v22, %v7450_v26  ;;  %v7760_v25 = vmul.f32 %v7418_v34, %v4234_v24  ;;  %v3204_v12 = vadd.f32 %v7580_v4, %v3183_v53  ;;  %v9074_v21 = vld [vmem:[#allocation38_spill] sm:$0xff] }
 0x6fe   : > { %v3259_v15 = vadd.f32 %v9069_v8, %v3245_v49  ;;  %v4187_v1 = vsel %vm2957_vm12, %v4185_v3, %v4186_v6  ;;  %v4221_v9 = vrot.slane %v7740_v42, 1  ;;  %v1847_v58 = vadd.f32 %v9070_v33, %v1822_v7 }
 0x6ff   : > { %v7753_v29 = vpop.permute.xlu1 %3360  ;;  %v7755_v57 = vpop.permute.xlu0 %3414  ;;  %v1880_v14 = vmul.f32 %v9072_v19, %v9071_v60  ;;  %v1965_v22 = vadd.f32 %v9073_v62, %v1940_v35  ;;  %v4255_v4 = vstv %s7721_s28  ;;  %v3225_v2 = vadd.f32 %v7602_v32, %v3204_v12  ;;  %s7912_s28 = sld [smem:[#allocation4 + $0x151]] }
 0x700   : > { %v4220_v10 = vrot.slane %v4214_v41, 1  ;;  %v4235_v18 = vmul.f32 %v7437_v44, %v4234_v24  ;;  %v4216_v43 = vmul.f32 %v4213_v20, %v7450_v26  ;;  %v2009_v48 = vadd.f32 %v9074_v21, %v1989_v47 }
 0x701   : > { %4150 = vrot.lane.b32.xlu1 %v4147_v55, %s8948_s17  ;;  %4190 = vrot.lane.b32.xlu0 %v4187_v1, %s8948_s17  ;;  %v4168_v13 = vsel %vm2939_vm11, %v4165_v50, %v4167_v46  ;;  %v4188_v49 = vrot.slane %v4181_v36, 6  ;;  %v7789_v42 = vmul.f32 %v7418_v34, %v4255_v4  ;;  %v3280_v32 = vadd.f32 %v7604_v59, %v3259_v15  ;;  %v9078_v59 = vld [vmem:[#allocation56_spill] sm:$0xff]  ;;  %v9079_v1 = vld [vmem:[#allocation63_spill] sm:$0xff] }
 0x702   : > { %v3246_v20 = vadd.f32 %v7624_v27, %v3225_v2  ;;  %v4222_v31 = vsel %vm1701_vm7, %v4220_v10, %v4221_v9  ;;  %v4242_v7 = vrot.slane %v7760_v25, 2  ;;  %v1872_v38 = vadd.f32 %v9075_v16, %v1847_v58  ;;  %v9081_v2 = vld [vmem:[#allocation41_spill] sm:$0xff] }
 0x703   : > { %v7781_v52 = vpop.permute.xlu1 %3381  ;;  %v7783_v30 = vpop.permute.xlu0 %3435  ;;  %v7799_v35 = vstv %s7743_s16  ;;  %v2034_v50 = vadd.f32 %v9076_v39, %v2009_v48  ;;  %v4256_v40 = vmul.f32 %v7437_v44, %v4255_v4  ;;  %v1990_v27 = vadd.f32 %v9078_v59, %v1965_v22  ;;  %v9082_v16 = vld [vmem:[#allocation45_spill] sm:$0xff]  ;;  %s7925_s16 = sld [smem:[#allocation4 + $0x158]] }
 0x704   : > { %v3301_v47 = vadd.f32 %v7626_v0, %v3280_v32  ;;  %v4241_v53 = vrot.slane %v4235_v18, 2  ;;  %v4223_v3 = vrot.slane %v4216_v43, 1  ;;  %v4189_v36 = vsel %vm2957_vm12, %v4186_v6, %v4188_v49  ;;  %v9080_v6 = vld [vmem:[#allocation59_spill] sm:$0xff] }
 0x705   : > { %4171 = vrot.lane.b32.xlu1 %v4168_v13, %s8948_s17  ;;  %4225 = vrot.lane.b32.xlu0 %v4222_v31, %s9077_s21  ;;  %v7809_v41 = vpop.eup %5587  ;;  %v4263_v12 = vrot.slane %v7789_v42, 3  ;;  %v4237_v8 = vmul.f32 %v4234_v24, %v7450_v26  ;;  %v4276_v15 = vstv %s7762_s23  ;;  %v3260_v33 = vadd.f32 %v9079_v1, %v3246_v20  ;;  %s7929_s23 = sld [smem:[#allocation4 + $0x15f]] }
 0x706   : > { %v3322_v58 = vadd.f32 %v7647_v54, %v3301_v47  ;;  %v4243_v0 = vsel %vm1721_vm8, %v4241_v53, %v4242_v7  ;;  %v7825_v60 = vmul.f32 %v7418_v34, %v4276_v15  ;;  %v1883_v19 = vadd.f32 %v1880_v14, %v1872_v38  ;;  %v9084_v53 = vld [vmem:[#allocation57_spill] sm:$0xff] }
 0x707   : > { %v7811_v55 = vpop.permute.xlu1 %3416  ;;  %v7813_v46 = vpop.permute.xlu0 %3456  ;;  %v7828_v62 = vstv %s7772_s22  ;;  %v2059_v22 = vadd.f32 %v9080_v6, %v2034_v50  ;;  %v4262_v24 = vrot.slane %v4256_v40, 3  ;;  %v2010_v54 = vadd.f32 %v9081_v2, %v1990_v27  ;;  %v9087_v6 = vld [vmem:[#allocation60_spill] sm:$0xff]  ;;  %s7943_s22 = sld [smem:[#allocation4 + $0x13d]] }
 0x708   : > { %v3343_v10 = vadd.f32 %v7677_v63, %v3322_v58  ;;  %v4224_v18 = vsel %vm1701_vm7, %v4221_v9, %v4223_v3  ;;  %v4277_v43 = vmul.f32 %v7437_v44, %v4276_v15  ;;  %v4244_v13 = vrot.slane %v4237_v8, 2  ;;  %v9088_v2 = vld [vmem:[#allocation64_spill] sm:$0xff] }
 0x709   : > { %4192 = vrot.lane.b32.xlu1 %v4189_v36, %s8948_s17  ;;  %4246 = vrot.lane.b32.xlu0 %v4243_v0, %s9077_s21  ;;  %v4264_v48 = vsel %vm2903_vm9, %v4262_v24, %v4263_v12  ;;  %v4258_v49 = vmul.f32 %v4255_v4, %v7450_v26  ;;  %v4297_v32 = vstv %s7791_s29  ;;  %v3281_v63 = vadd.f32 %v7645_v51, %v3260_v33  ;;  %v9085_v0 = vld [vmem:[#allocation46_spill] sm:$0xff]  ;;  %s7957_s29 = sld [smem:[#allocation4 + $0x144]] }
 0x70a   : > { %v3364_v9 = vadd.f32 %v7704_v45, %v3343_v10  ;;  %v4284_v20 = vrot.slane %v7825_v60, 4  ;;  %v7852_v31 = vmul.f32 %v7418_v34, %v4297_v32  ;;  %v9083_v38 = vrot.slane %v9082_v16, 1 }
 0x70b   : > { %v7837_v21 = vpop.permute.xlu1 %3437  ;;  %v7839_v14 = vpop.permute.xlu0 %3477  ;;  %v2068_v50 = vsub.f32 %v2059_v22, %v7799_v35  ;;  %v4279_v4 = vmul.f32 %v4276_v15, %v7450_v26  ;;  %v4318_v40 = vstv %s7805_s26  ;;  %v3302_v51 = vadd.f32 %v7675_v28, %v3281_v63  ;;  %s9091_s26 = smov 124  }
 0x70c   : > { %v1902_v39 = vadd.f32 %v9083_v38, %v1883_v19  ;;  %v3385_v45 = vadd.f32 %v7729_v37, %v3364_v9  ;;  %v4283_v59 = vrot.slane %v4277_v43, 4  ;;  %v4298_v27 = vmul.f32 %v7437_v44, %v4297_v32 }
 0x70d   : > { %4227 = vrot.lane.b32.xlu1 %v4224_v18, %s9077_s21  ;;  %4267 = vrot.lane.b32.xlu0 %v4264_v48, %s9077_s21  ;;  %v7866_v47 = vstv %s5447_s1  ;;  %v2035_v3 = vadd.f32 %v9084_v53, %v2010_v54  ;;  %v4265_v1 = vrot.slane %v4258_v49, 3  ;;  %v7874_v15 = vmul.f32 %v7418_v34, %v4318_v40  ;;  %s7999_s1 = sld [smem:[#allocation4 + $0x152]] }
 0x70e   : > { %v3323_v28 = vadd.f32 %v7702_v61, %v3302_v51  ;;  %v4245_v37 = vsel %vm1721_vm8, %v4242_v7, %v4244_v13  ;;  %v4285_v33 = vsel %vm2921_vm10, %v4283_v59, %v4284_v20  ;;  %v4305_v58 = vrot.slane %v7852_v31, 5 }
 0x70f   : > { %v7869_v36 = vpop.permute.xlu1 %3458  ;;  %v7871_v8 = vpop.permute.xlu0 %3498  ;;  %v9086_v60 = vrot.slane %v9085_v0, 2  ;;  %v2060_v22 = vadd.f32 %v9087_v6, %v2035_v3  ;;  %v4286_v24 = vrot.slane %v4279_v4, 4  ;;  %v4319_v61 = vmul.f32 %v7437_v44, %v4318_v40 }
 0x710   : > { %v2076_v25 = vmul.f32 %v7866_v47, %v2068_v50  ;;  %v3344_v7 = vadd.f32 %v7727_v5, %v3323_v28  ;;  %v3399_v54 = vadd.f32 %v9088_v2, %v3385_v45  ;;  %v4304_v10 = vrot.slane %v4298_v27, 5 }
 0x711   : > { %v1921_v19 = vadd.f32 %v9086_v60, %v1902_v39  ;;  %4248 = vrot.lane.b32.xlu1 %v4245_v37, %s9077_s21  ;;  %4288 = vrot.lane.b32.xlu0 %v4285_v33, %s9077_s21  ;;  %v4266_v48 = vsel %vm2903_vm9, %v4263_v12, %v4265_v1  ;;  %v4326_v13 = vrot.slane %v7874_v15, 6  ;;  %v4300_v49 = vmul.f32 %v4297_v32, %v7450_v26  ;;  %v9089_v1 = vld [vmem:[#allocation42_spill] sm:$0xff] }
 0x712   : > { %v4353_v63 = vstv %s7846_s24  ;;  %v3365_v9 = vadd.f32 %v7753_v29, %v3344_v7  ;;  %v4306_v5 = vsel %vm2939_vm11, %v4304_v10, %v4305_v58  ;;  %v4321_v16 = vmul.f32 %v4318_v40, %v7450_v26  ;;  %s7988_s24 = sld [smem:[#allocation4 + $0x14b]] }
 0x713   : > { %v7893_v18 = vpop.permute.xlu1 %3479  ;;  %v7895_v43 = vpop.permute.xlu0 %3519  ;;  %v4355_v31 = vmul.f32 %v7418_v34, %v4353_v63  ;;  %v2069_v38 = vsub.f32 %v2060_v22, %v7799_v35  ;;  %v4287_v42 = vsel %vm2921_vm10, %v4284_v20, %v4286_v24  ;;  %v4325_v12 = vrot.slane %v4319_v61, 6 }
 0x714   : > { %v4356_v32 = vmul.f32 %v4353_v63, %v7450_v26  ;;  %v3420_v29 = vadd.f32 %v7755_v57, %v3399_v54  ;;  %v3386_v39 = vadd.f32 %v7781_v52, %v3365_v9  ;;  %v4354_v50 = vmul.f32 %v7437_v44, %v4353_v63 }
 0x715   : > { %4269 = vrot.lane.b32.xlu1 %v4266_v48, %s9077_s21  ;;  %4309 = vrot.lane.b32.xlu0 %v4306_v5, %s9077_s21  ;;  %v4374_v4 = vstv %s7864_s2  ;;  %v4327_v45 = vsel %vm2957_vm12, %v4325_v12, %v4326_v13  ;;  %v4307_v59 = vrot.slane %v4300_v49, 5  ;;  %v4395_v27 = vstv %s7876_s14  ;;  %s8005_s2 = sld [smem:[#allocation7 + $0x104]]  ;;  %s8007_s14 = sld [smem:[#allocation7 + $0x105]] }
 0x716   : > { %v4377_v20 = vmul.f32 %v4374_v4, %v7450_v26  ;;  %v3441_v53 = vadd.f32 %v7783_v30, %v3420_v29  ;;  %v4361_v57 = vrot.slane %v4355_v31, 1  ;;  %v4328_v3 = vrot.slane %v4321_v16, 6  ;;  %v9090_v30 = vld [vmem:[#allocation65_spill] sm:$0xff] }
 0x717   : > { %v7918_v40 = vpop.permute.xlu1 %3500  ;;  %v7920_v51 = vpop.permute.xlu0 %3554  ;;  %v4376_v52 = vmul.f32 %v7418_v34, %v4374_v4  ;;  %v7932_v15 = vadd.f32 %v9089_v1, %v1921_v19  ;;  %v7935_v28 = vmul.f32 %v7828_v62, %v2076_v25  ;;  %v4363_v37 = vrot.slane %v4356_v32, 1 }
 0x718   : > { %v4397_v33 = vmul.f32 %v7418_v34, %v4395_v27  ;;  %v3400_v0 = vadd.f32 %v9090_v30, %v3386_v39  ;;  %v3462_v60 = vadd.f32 %v7813_v46, %v3441_v53  ;;  %v4360_v6 = vrot.slane %v4354_v50, 1  ;;  %v9092_v30 = vld [vmem:[#allocation66_spill] sm:$0xff] }
 0x719   : > { %4290 = vrot.lane.b32.xlu1 %v4287_v42, %s9077_s21  ;;  %4330 = vrot.lane.b32.xlu0 %v4327_v45, %s9077_s21  ;;  %v4396_v22 = vmul.f32 %v7437_v44, %v4395_v27  ;;  %v7946_v19 = vmul.f32 %v7866_v47, %v2069_v38  ;;  %v4308_v25 = vsel %vm2939_vm11, %v4305_v58, %v4307_v59  ;;  %v4384_v7 = vrot.slane %v4377_v20, 2 }
 0x71a   : > { %v4398_v2 = vmul.f32 %v4395_v27, %v7450_v26  ;;  %v3483_v46 = vadd.f32 %v7839_v14, %v3462_v60  ;;  %v4362_v54 = vsel %vm1701_vm7, %v4360_v6, %v4361_v57  ;;  %v4329_v10 = vsel %vm2957_vm12, %v4326_v13, %v4328_v3 }
 0x71b   : > { %v7948_v24 = vpop.permute.xlu1 %3521  ;;  %v7950_v61 = vpop.permute.xlu0 %3575  ;;  %v4382_v48 = vrot.slane %v4376_v52, 2  ;;  %v4364_v49 = vsel %vm1701_vm7, %v4361_v57, %v4363_v37  ;;  %v4403_v58 = vrot.slane %v4397_v33, 3  ;;  %v4375_v63 = vmul.f32 %v7437_v44, %v4374_v4 }
 0x71c   : > { %v4416_v9 = vstv %s7912_s28  ;;  %v3421_v14 = vadd.f32 %v7811_v55, %v3400_v0  ;;  %v3504_v5 = vadd.f32 %v7871_v8, %v3483_v46  ;;  %v4402_v13 = vrot.slane %v4396_v22, 3  ;;  %s8026_s28 = sld [smem:[#allocation4 + $0x131]] }
 0x71d   : > { %4311 = vrot.lane.b32.xlu1 %v4308_v25, %s9077_s21  ;;  %4365 = vrot.lane.b32.xlu0 %v4362_v54, %s9091_s26  ;;  %v4419_v31 = vmul.f32 %v4416_v9, %v7450_v26  ;;  %v4385_v42 = vsel %vm1721_vm8, %v4382_v48, %v4384_v7  ;;  %v4418_v12 = vmul.f32 %v7418_v34, %v4416_v9  ;;  %v4405_v32 = vrot.slane %v4398_v2, 3 }
 0x71e   : > { %v4437_v29 = vstv %s7925_s16  ;;  %v3442_v39 = vadd.f32 %v7837_v21, %v3421_v14  ;;  %v3525_v55 = vadd.f32 %v7895_v43, %v3504_v5  ;;  %v4458_v50 = vstv %s7929_s23  ;;  %s8032_s16 = sld [smem:[#allocation4 + $0x138]]  ;;  %s8038_s23 = sld [smem:[#allocation4 + $0x13f]] }
 0x71f   : > { %v7967_v16 = vpop.permute.xlu1 %3556  ;;  %v7969_v38 = vpop.permute.xlu0 %3596  ;;  %v7977_v8 = vmul.f32 %v7418_v34, %v4437_v29  ;;  %v4404_v4 = vsel %vm2903_vm9, %v4402_v13, %v4403_v58  ;;  %v4381_v45 = vrot.slane %v4375_v63, 2  ;;  %v4417_v59 = vmul.f32 %v7437_v44, %v4416_v9 }
 0x720   : > { %v4461_v20 = vmul.f32 %v4458_v50, %v7450_v26  ;;  %v3463_v21 = vadd.f32 %v7869_v36, %v3442_v39  ;;  %v4426_v27 = vrot.slane %v4419_v31, 4  ;;  %v4438_v43 = vmul.f32 %v7437_v44, %v4437_v29 }
 0x721   : > { %4332 = vrot.lane.b32.xlu1 %v4329_v10, %s9077_s21  ;;  %4388 = vrot.lane.b32.xlu0 %v4385_v42, %s9091_s26  ;;  %v4493_v53 = vstv %s7943_s22  ;;  %v4383_v52 = vsel %vm1721_vm8, %v4381_v45, %v4382_v48  ;;  %v4424_v1 = vrot.slane %v4418_v12, 4  ;;  %v4406_v37 = vsel %vm2903_vm9, %v4403_v58, %v4405_v32  ;;  %s8046_s22 = sld [smem:[#allocation4 + $0x146]] }
 0x722   : > { %v7997_v33 = vmul.f32 %v7418_v34, %v4458_v50  ;;  %v3484_v36 = vadd.f32 %v7893_v18, %v3463_v21  ;;  %v3539_v0 = vadd.f32 %v9092_v30, %v3525_v55  ;;  %v4445_v60 = vrot.slane %v7977_v8, 5 }
 0x723   : > { %v7990_v57 = vpop.permute.xlu1 %3577  ;;  %v7992_v3 = vpop.permute.xlu0 %3617  ;;  %v4514_v6 = vstv %s7957_s29  ;;  %v4423_v22 = vrot.slane %v4417_v59, 4  ;;  %v4468_v25 = vrot.slane %v4461_v20, 6  ;;  %v4440_v7 = vmul.f32 %v4437_v29, %v7450_v26  ;;  %s4766_s29 = sadd.f32 %s8007_s14, %s8005_s2  ;;  %s8075_s2 = sld [smem:[#allocation4 + $0x159]] }
 0x724   : > { %v4494_v2 = vmul.f32 %v7437_v44, %v4493_v53  ;;  %v3505_v18 = vadd.f32 %v7918_v40, %v3484_v36  ;;  %v4427_v46 = vsel %vm2921_vm10, %v4424_v1, %v4426_v27  ;;  %v4444_v54 = vrot.slane %v4438_v43, 5  ;;  %s8093_s14 = sld [smem:[#allocation4 + $0x154]] }
 0x725   : > { %4367 = vrot.lane.b32.xlu1 %v4364_v49, %s9091_s26  ;;  %4407 = vrot.lane.b32.xlu0 %v4404_v4, %s9091_s26  ;;  %v8016_v10 = vmul.f32 %v7418_v34, %v4493_v53  ;;  %v4466_v49 = vrot.slane %v7997_v33, 6  ;;  %v4459_v63 = vmul.f32 %v7437_v44, %v4458_v50  ;;  %v4515_v9 = vmul.f32 %v7437_v44, %v4514_v6 }
 0x726   : > { %v8024_v14 = vmul.f32 %v7418_v34, %v4514_v6  ;;  %v3560_v40 = vadd.f32 %v7920_v51, %v3539_v0  ;;  %v3526_v5 = vadd.f32 %v7948_v24, %v3505_v18  ;;  %v4446_v13 = vsel %vm2939_vm11, %v4444_v54, %v4445_v60 }
 0x727   : > { %v8018_v48 = vpop.permute.xlu1 %3598  ;;  %v3639_v58 = vpop.permute.xlu0 %3638  ;;  %v4425_v31 = vsel %vm2921_vm10, %v4423_v22, %v4424_v1  ;;  %v4469_v42 = vsel %vm2957_vm12, %v4466_v49, %v4468_v25  ;;  %v4447_v12 = vrot.slane %v4440_v7, 5  ;;  %v4500_v32 = vrot.slane %v4494_v2, 1 }
 0x728   : > { %v4496_v51 = vmul.f32 %v4493_v53, %v7450_v26  ;;  %v3581_v24 = vadd.f32 %v7950_v61, %v3560_v40  ;;  %v4501_v29 = vrot.slane %v8016_v10, 1  ;;  %v8043_v39 = vstv %s7988_s24  ;;  %v9093_v61 = vld [vmem:[#allocation68_spill] sm:$0xff]  ;;  %s8062_s24 = sld [smem:[#allocation7 + $0x82]] }
 0x729   : > { %4386 = vrot.lane.b32.xlu1 %v4383_v52, %s9091_s26  ;;  %4430 = vrot.lane.b32.xlu0 %v4427_v46, %s9091_s26  ;;  %v4517_v55 = vmul.f32 %v4514_v6, %v7450_v26  ;;  %v4465_v4 = vrot.slane %v4459_v63, 6  ;;  %v4521_v45 = vrot.slane %v4515_v9, 2  ;;  %v4522_v59 = vrot.slane %v8024_v14, 2  ;;  %v8081_v6 = vld [vmem:[#allocation2 + $0x20] sm:$0xff] }
 0x72a   : > { %v8055_v20 = vmul.f32 %v7418_v34, %v8043_v39  ;;  %v3540_v21 = vadd.f32 %v9093_v61, %v3526_v5  ;;  %v3602_v27 = vadd.f32 %v7969_v38, %v3581_v24  ;;  %v8060_v43 = vstv %s7999_s1  ;;  %s8073_s1 = sld [smem:[#allocation4 + $0x14d]]  ;;  %v8111_v5 = vld [vmem:[#allocation2 + $0x18] sm:$0xff] }
 0x72b   : > { %v8050_v8 = vpop.permute.xlu1 %3619  ;;  %v3660_v50 = vpop.permute.xlu0 %3659  ;;  %v4767_v53 = vstv %s4766_s29  ;;  %v4503_v52 = vrot.slane %v4496_v51, 1  ;;  %v4536_v1 = vmul.f32 %v7437_v44, %v8043_v39  ;;  %v4559_v34 = vmul.f32 %v8060_v43, %v7450_v26  ;;  %s8267_s29 = sld [smem:[#allocation4 + $0x14c]] }
 0x72c   : > { %5589 = vrsqrt.f32 %v4767_v53  ;;  %v3623_v38 = vadd.f32 %v7992_v3, %v3602_v27  ;;  %v4448_v33 = vsel %vm2939_vm11, %v4445_v60, %v4447_v12  ;;  %v4502_v36 = vsel %vm1701_vm7, %v4500_v32, %v4501_v29 }
 0x72d   : > { %4409 = vrot.lane.b32.xlu1 %v4406_v37, %s9091_s26  ;;  %4449 = vrot.lane.b32.xlu0 %v4446_v13, %s9091_s26  ;;  %v4524_v30 = vrot.slane %v4517_v55, 2  ;;  %v4467_v44 = vsel %vm2957_vm12, %v4465_v4, %v4466_v49  ;;  %v4523_v26 = vsel %vm1721_vm8, %v4521_v45, %v4522_v59  ;;  %v8085_v3 = vmul.f32 %v8081_v6, %v8060_v43  ;;  %v9094_v4 = vld [vmem:[#allocation67_spill] sm:$0xff] }
 0x72e   : > { %v3811_v60 = vstv %s8026_s28  ;;  %v3561_v22 = vadd.f32 %v7967_v16, %v3540_v21  ;;  %v3644_v25 = vadd.f32 %v3639_v58, %v3623_v38  ;;  %v4543_v7 = vrot.slane %v8055_v20, 3  ;;  %s8294_s28 = sld [smem:[#allocation4 + $0x153]] }
 0x72f   : > { %v3641_v37 = vpop.permute.xlu1 %3640  ;;  %v8077_v0 = vpop.permute.xlu0 %3694  ;;  %v8091_v2 = vstv %s8032_s16  ;;  %v8098_v18 = vsel %vm1701_vm7, %v4501_v29, %v4503_v52  ;;  %v4542_v46 = vrot.slane %v4536_v1, 3  ;;  %v4566_v54 = vrot.slane %v4559_v34, 4  ;;  %s8123_s16 = sld [smem:[#allocation4 + $0x15b]] }
 0x730   : > { %v8101_v10 = vstv %s8038_s23  ;;  %v3582_v16 = vadd.f32 %v7990_v57, %v3561_v22  ;;  %v3665_v58 = vadd.f32 %v3660_v50, %v3644_v25  ;;  %v8105_v49 = vsel %vm1721_vm8, %v4522_v59, %v4524_v30  ;;  %s8166_s23 = sld [smem:[#allocation4 + $0x160]] }
 0x731   : > { %4428 = vrot.lane.b32.xlu1 %v4425_v31, %s9091_s26  ;;  %4472 = vrot.lane.b32.xlu0 %v4469_v42, %s9091_s26  ;;  %v8108_v63 = vstv %s8046_s22  ;;  %v4564_v40 = vrot.slane %v8085_v3, 4  ;;  %v3818_v13 = vmul.f32 %v8111_v5, %v8091_v2  ;;  %v8117_v57 = vmul.f32 %v8081_v6, %v8091_v2  ;;  %s8223_s22 = sld [smem:[#allocation4 + $0x145]] }
 0x732   : > { %v8121_v31 = vmul.f32 %v8081_v6, %v8101_v10  ;;  %v3603_v42 = vadd.f32 %v8018_v48, %v3582_v16  ;;  %v4544_v12 = vsel %vm2903_vm9, %v4542_v46, %v4543_v7  ;;  %v8132_v32 = vmul.f32 %v8111_v5, %v3811_v60 }
 0x733   : > { %v3662_v9 = vpop.permute.xlu1 %3661  ;;  %v3716_v14 = vpop.permute.xlu0 %3715  ;;  %v3835_v51 = vmul.f32 %v8111_v5, %v8101_v10  ;;  %v8137_v24 = vstv %s8062_s24  ;;  %v8144_v48 = vsel %vm2921_vm10, %v4564_v40, %v4566_v54  ;;  %v3852_v29 = vmul.f32 %v8111_v5, %v8108_v63  ;;  %s8315_s24 = sld [smem:[#allocation4 + $0x15a]] }
 0x734   : > { %v8150_v55 = vmul.f32 %v8081_v6, %v8108_v63  ;;  %v3624_v50 = vadd.f32 %v8050_v8, %v3603_v42  ;;  %v3679_v45 = vadd.f32 %v9094_v4, %v3665_v58  ;;  %v8155_v59 = vstv %s8073_s1  ;;  %s8340_s1 = sld [smem:[#allocation4 + $0x161]] }
 0x735   : > { %4451 = vrot.lane.b32.xlu1 %v4448_v33, %s9091_s26  ;;  %4505 = vrot.lane.b32.xlu0 %v4502_v36, %s9019_s27  ;;  %v8158_v61 = vstv %s8075_s2  ;;  %v3824_v52 = vrot.slane %v3818_v13, 1  ;;  %v8915_v1 = vrot.slane %v8117_v57, 1  ;;  %v8916_v34 = vrot.slane %v8121_v31, 2  ;;  %v8168_v33 = vld [vmem:[#allocation2 + $0x28] sm:$0x3f]  ;;  %s5757_s2 = smov 61  }
 0x736   : > { %v5590_v21 = vpop.eup %5589  ;;  %v8164_v38 = vmul.f32 %v8081_v6, %v8155_v59  ;;  %v3645_v8 = vadd.f32 %v3641_v37, %v3624_v50  ;;  %v4538_v36 = vmul.f32 %v8168_v33, %v8043_v39  ;;  %v8174_v30 = vmul.f32 %v8081_v6, %v8158_v61 }
 0x737   : > { %v3697_v27 = vpop.permute.xlu1 %3696  ;;  %v3737_v53 = vpop.permute.xlu0 %3736  ;;  %v8177_v22 = vstv %s8093_s14  ;;  %5448 = vpush %v5590_v21  ;;  %v3841_v25 = vrot.slane %v3835_v51, 2  ;;  %v3869_v37 = vmul.f32 %v8111_v5, %v8155_v59  ;;  %v4578_v46 = vmul.f32 %v8111_v5, %v8158_v61  ;;  %s5758_s14 = smov 77  }
 0x738   : > { %v8187_v39 = vmul.f32 %v8081_v6, %v8177_v22  ;;  %v3700_v54 = vadd.f32 %v8077_v0, %v3679_v45  ;;  %v3666_v16 = vadd.f32 %v3662_v9, %v3645_v8  ;;  %v3858_v58 = vrot.slane %v3852_v29, 3 }
 0x739   : > { %4470 = vrot.lane.b32.xlu1 %v4467_v44, %s9091_s26  ;;  %4526 = vrot.lane.b32.xlu0 %v4523_v26, %s9019_s27  ;;  %v3859_v13 = vrot.slane %v8150_v55, 3  ;;  %v8194_v26 = vsel %vm1701_vm7, %v3824_v52, %v8915_v1  ;;  %v8917_v51 = vrot.slane %v8164_v38, 4  ;;  %v3886_v50 = vmul.f32 %v8111_v5, %v8177_v22  ;;  %s8202_s26 = sld [smem:[#allocation4 + $0x13e]] }
 0x73a   : > { %v8200_v4 = vstv %s8123_s16  ;;  %v3721_v0 = vadd.f32 %v3716_v14, %v3700_v54  ;;  %v8207_v9 = vsel %vm1721_vm8, %v3841_v25, %v8916_v34  ;;  %v4545_v29 = vrot.slane %v4538_v36, 3  ;;  %v9095_v54 = vld [vmem:[#allocation70_spill] sm:$0xff]  ;;  %s5759_s16 = smov 93  }
 0x73b   : > { %v3718_v44 = vpop.permute.xlu1 %3717  ;;  %v3758_v42 = vpop.permute.xlu0 %3757  ;;  %v4585_v45 = vrot.slane %v8174_v30, 5  ;;  %v3875_v21 = vrot.slane %v3869_v37, 4  ;;  %v4584_v52 = vrot.slane %v4578_v46, 5  ;;  %v8918_v8 = vrot.slane %v8187_v39, 5 }
 0x73c   : > { %v4557_v14 = vmul.f32 %v8111_v5, %v8060_v43  ;;  %v3680_v1 = vadd.f32 %v9095_v54, %v3666_v16  ;;  %v3742_v25 = vadd.f32 %v3737_v53, %v3721_v0  ;;  %v3903_v36 = vmul.f32 %v8111_v5, %v8200_v4 }
 0x73d   : > { %4507 = vrot.lane.b32.xlu1 %v8098_v18, %s9019_s27  ;;  %4547 = vrot.lane.b32.xlu0 %v4544_v12, %s9019_s27  ;;  %v8221_v34 = vmul.f32 %v8081_v6, %v8200_v4  ;;  %v8228_v37 = vsel %vm2903_vm9, %v3858_v58, %v3859_v13  ;;  %v8233_v43 = vsel %vm2921_vm10, %v3875_v21, %v8917_v51  ;;  %v3892_v53 = vrot.slane %v3886_v50, 5 }
 0x73e   : > { %v4598_v46 = vstv %s8166_s23  ;;  %v3763_v16 = vadd.f32 %v3758_v42, %v3742_v25  ;;  %v4546_v0 = vsel %vm2903_vm9, %v4543_v7, %v4545_v29  ;;  %v4586_v54 = vsel %vm2939_vm11, %v4584_v52, %v4585_v45  ;;  %s5760_s23 = smov 109  }
 0x73f   : > { %v3739_v18 = vpop.permute.xlu1 %3738  ;;  %v3779_v12 = vpop.permute.xlu0 %3778  ;;  %v4601_v58 = vmul.f32 %v8168_v33, %v4598_v46  ;;  %v8250_v20 = vsel %vm2939_vm11, %v3892_v53, %v8918_v8  ;;  %v4563_v7 = vrot.slane %v4557_v14, 4  ;;  %v8253_v42 = vmul.f32 %v8081_v6, %v4598_v46 }
 0x740   : > { %v3820_v50 = vmul.f32 %v8168_v33, %v8091_v2  ;;  %v3701_v29 = vadd.f32 %v3697_v27, %v3680_v1  ;;  %v3784_v21 = vadd.f32 %v3779_v12, %v3763_v16  ;;  %v3909_v52 = vrot.slane %v3903_v36, 6 }
 0x741   : > { %4528 = vrot.lane.b32.xlu1 %v8105_v49, %s9019_s27  ;;  %4570 = vrot.lane.b32.xlu0 %v8144_v48, %s9019_s27  ;;  %v3910_v49 = vrot.slane %v8221_v34, 6  ;;  %v4565_v48 = vsel %vm2921_vm10, %v4563_v7, %v4564_v40  ;;  %v3813_v14 = vmul.f32 %v8081_v6, %v3811_v60  ;;  %v4580_v53 = vmul.f32 %v8168_v33, %v8158_v61 }
 0x742   : > { %v4633_v8 = vstv %s8202_s26  ;;  %v3722_v2 = vadd.f32 %v3718_v44, %v3701_v29  ;;  %v4608_v1 = vrot.slane %v4601_v58, 6  ;;  %v4606_v3 = vrot.slane %v8253_v42, 6  ;;  %s5761_s26 = smov 14  }
 0x743   : > { %v3760_v25 = vpop.permute.xlu1 %3759  ;;  %v3800_v51 = vpop.permute.xlu0 %3799  ;;  %v4636_v36 = vmul.f32 %v8168_v33, %v4633_v8  ;;  %v3827_v40 = vrot.slane %v3820_v50, 1  ;;  %v3837_v60 = vmul.f32 %v8168_v33, %v8101_v10  ;;  %v3854_v61 = vmul.f32 %v8168_v33, %v8108_v63 }
 0x744   : > { %v3805_v27 = vadd.f32 %v3800_v51, %v3784_v21  ;;  %v3743_v12 = vadd.f32 %v3739_v18, %v3722_v2  ;;  %v8279_v51 = vmul.f32 %v8081_v6, %v4633_v8  ;;  %v4654_v16 = vstv %s8223_s22  ;;  %s5762_s22 = smov 30  }
 0x745   : > { %4549 = vrot.lane.b32.xlu1 %v4546_v0, %s9019_s27  ;;  %4589 = vrot.lane.b32.xlu0 %v4586_v54, %s9019_s27  ;;  %v3911_v0 = vsel %vm2957_vm12, %v3909_v52, %v3910_v49  ;;  %v8289_v10 = vmul.f32 %v8168_v33, %v8155_v59  ;;  %v4587_v7 = vrot.slane %v4580_v53, 5  ;;  %v8292_v63 = vmul.f32 %v8081_v6, %v4654_v16 }
 0x746   : > { %v3814_v44 = vadd.f32 %v8132_v32, %v3805_v27  ;;  %v3764_v32 = vadd.f32 %v3760_v25, %v3743_v12  ;;  %v4609_v42 = vsel %vm2957_vm12, %v4606_v3, %v4608_v1  ;;  %v4643_v50 = vrot.slane %v4636_v36, 1 }
 0x747   : > { %v3781_v58 = vpop.permute.xlu1 %3780  ;;  %v8285_v54 = vpop.permute.xlu0 %3945  ;;  %v3844_v29 = vrot.slane %v3837_v60, 2  ;;  %v3861_v59 = vrot.slane %v3854_v61, 3  ;;  %v4599_v21 = vmul.f32 %v8111_v5, %v4598_v46  ;;  %v4655_v52 = vmul.f32 %v8111_v5, %v4654_v16 }
 0x748   : > { %v3831_v18 = vadd.f32 %v8194_v26, %v3814_v44  ;;  %v3785_v2 = vadd.f32 %v3781_v58, %v3764_v32  ;;  %v9096_v25 = vrot.slane %v8117_v57, 1  ;;  %v4641_v27 = vrot.slane %v8279_v51, 1 }
 0x749   : > { %4568 = vrot.lane.b32.xlu1 %v4565_v48, %s9019_s27  ;;  %4612 = vrot.lane.b32.xlu0 %v4609_v42, %s9019_s27  ;;  %v3878_v48 = vrot.slane %v8289_v10, 4  ;;  %v4588_v46 = vsel %vm2939_vm11, %v4585_v45, %v4587_v7  ;;  %v4662_v60 = vrot.slane %v8292_v63, 2  ;;  %v4675_v61 = vstv %s8267_s29  ;;  %s5763_s29 = smov 46  }
 0x74a   : > { %v3848_v53 = vadd.f32 %v8207_v9, %v3831_v18  ;;  %v3828_v26 = vsel %vm1701_vm7, %v9096_v25, %v3827_v40  ;;  %v4644_v40 = vsel %vm1701_vm7, %v4641_v27, %v4643_v50  ;;  %v8320_v12 = vmul.f32 %v8081_v6, %v4675_v61 }
 0x74b   : > { %v3802_v1 = vpop.permute.xlu1 %3801  ;;  %v8308_v36 = vpop.permute.xlu0 %3966  ;;  %v3888_v30 = vmul.f32 %v8168_v33, %v8177_v22  ;;  %v4605_v45 = vrot.slane %v4599_v21, 6  ;;  %v4661_v44 = vrot.slane %v4655_v52, 2  ;;  %v4634_v51 = vmul.f32 %v8111_v5, %v4633_v8 }
 0x74c   : > { %v3865_v57 = vadd.f32 %v8228_v37, %v3848_v53  ;;  %v3806_v9 = vadd.f32 %v3802_v1, %v3785_v2  ;;  %v9097_v10 = vrot.slane %v8121_v31, 2  ;;  %v4676_v63 = vmul.f32 %v8111_v5, %v4675_v61 }
 0x74d   : > { %4591 = vrot.lane.b32.xlu1 %v4588_v46, %s9019_s27  ;;  %4647 = vrot.lane.b32.xlu0 %v4644_v40, %s9027_s0  ;;  %v4607_v42 = vsel %vm2957_vm12, %v4605_v45, %v4606_v3  ;;  %v4663_v22 = vsel %vm1721_vm8, %v4661_v44, %v4662_v60  ;;  %v4657_v50 = vmul.f32 %v8168_v33, %v4654_v16  ;;  %v4696_v8 = vstv %s8294_s28  ;;  %v9100_v44 = vld [vmem:[#allocation69_spill] sm:$0xff]  ;;  %s5765_s28 = smov 78  }
 0x74e   : > { %v3882_v37 = vadd.f32 %v8233_v43, %v3865_v57  ;;  %v3815_v58 = vadd.f32 %v3813_v14, %v3806_v9  ;;  %v3845_v7 = vsel %vm1721_vm8, %v9097_v10, %v3844_v29  ;;  %v4683_v14 = vrot.slane %v8320_v12, 3 }
 0x74f   : > { %v8332_v32 = vpop.permute.xlu1 %3947  ;;  %v8334_v18 = vpop.permute.xlu0 %3987  ;;  %v8345_v29 = vmul.f32 %v8081_v6, %v4696_v8  ;;  %v3862_v3 = vsel %vm2903_vm9, %v3859_v13, %v3861_v59  ;;  %v3895_v21 = vrot.slane %v3888_v30, 5  ;;  %v3905_v16 = vmul.f32 %v8168_v33, %v8200_v4 }
 0x750   : > { %v3899_v43 = vadd.f32 %v8250_v20, %v3882_v37  ;;  %v3832_v31 = vadd.f32 %v3828_v26, %v3815_v58  ;;  %v4640_v20 = vrot.slane %v4634_v51, 1  ;;  %v4682_v2 = vrot.slane %v4676_v63, 3 }
 0x751   : > { %4610 = vrot.lane.b32.xlu1 %v4607_v42, %s9019_s27  ;;  %4666 = vrot.lane.b32.xlu0 %v4663_v22, %s9027_s0  ;;  %v4697_v25 = vmul.f32 %v8111_v5, %v4696_v8  ;;  %v4664_v59 = vrot.slane %v4657_v50, 2  ;;  %v4678_v1 = vmul.f32 %v8168_v33, %v4675_v61  ;;  %v4717_v4 = vstv %s8315_s24  ;;  %s5754_s27 = smov 13   ;;  %s5766_s24 = smov 94  }
 0x752   : > { %v3916_v52 = vadd.f32 %v3911_v0, %v3899_v43  ;;  %v3849_v53 = vadd.f32 %v3845_v7, %v3832_v31  ;;  %v4642_v13 = vsel %vm1701_vm7, %v4640_v20, %v4641_v27  ;;  %v4684_v57 = vsel %vm2903_vm9, %v4682_v2, %v4683_v14  ;;  %v9101_v31 = vld [vmem:[#allocation48_spill] sm:$0xff] }
 0x753   : > { %v8355_v26 = vpop.permute.xlu1 %3968  ;;  %v8357_v55 = vpop.permute.xlu0 %4008  ;;  %v4704_v9 = vrot.slane %v8345_v29, 4  ;;  %v8365_v0 = vmul.f32 %v8081_v6, %v4717_v4  ;;  %v2084_v40 = vadd.f32 %v8137_v24, %v7935_v28  ;;  %v9098_v12 = vrot.slane %v8164_v38, 4 }
 0x754   : > { %v3866_v46 = vadd.f32 %v3862_v3, %v3849_v53  ;;  %v9099_v30 = vrot.slane %v8187_v39, 5  ;;  %v3912_v45 = vrot.slane %v3905_v16, 6  ;;  %v3930_v51 = vadd.f32 %v9100_v44, %v3916_v52 }
 0x755   : > { %v3879_v27 = vsel %vm2921_vm10, %v9098_v12, %v3878_v48  ;;  %4645 = vrot.lane.b32.xlu1 %v4642_v13, %s9027_s0  ;;  %4687 = vrot.lane.b32.xlu0 %v4684_v57, %s9027_s0  ;;  %v4703_v58 = vrot.slane %v4697_v25, 4  ;;  %v4718_v10 = vmul.f32 %v8111_v5, %v4717_v4  ;;  %v4665_v48 = vsel %vm1721_vm8, %v4662_v60, %v4664_v59  ;;  %v9102_v25 = vld [vmem:[#allocation47_spill] sm:$0xff] }
 0x756   : > { %v3896_v61 = vsel %vm2939_vm11, %v9099_v30, %v3895_v21  ;;  %v3883_v37 = vadd.f32 %v3879_v27, %v3866_v46  ;;  %v4685_v39 = vrot.slane %v4678_v1, 3  ;;  %v4699_v7 = vmul.f32 %v8168_v33, %v4696_v8  ;;  %v9104_v30 = vld [vmem:[#allocation43_spill] sm:$0xff] }
 0x757   : > { %v8379_v28 = vpop.permute.xlu1 %3989  ;;  %v8381_v38 = vpop.permute.xlu0 %4029  ;;  %v4738_v63 = vstv %s8340_s1  ;;  %v4705_v22 = vsel %vm2921_vm10, %v4703_v58, %v4704_v9  ;;  %v4725_v50 = vrot.slane %v8365_v0, 5  ;;  %v1966_v29 = vadd.f32 %v9101_v31, %v7932_v15  ;;  %s5767_s1 = smov 110  }
 0x758   : > { %v3900_v42 = vadd.f32 %v3896_v61, %v3883_v37  ;;  %v8389_v43 = vmul.f32 %v8081_v6, %v4738_v63  ;;  %v5221_v3 = vmul.f32 -1.442695, %v2084_v40  ;;  %v2081_v21 = vmul.f32 %v7828_v62, %v7946_v19 }
 0x759   : > { %v3913_v60 = vsel %vm2957_vm12, %v3910_v49, %v3912_v45  ;;  %4668 = vrot.lane.b32.xlu1 %v4665_v48, %s9027_s0  ;;  %4708 = vrot.lane.b32.xlu0 %v4705_v22, %s9027_s0  ;;  %v3951_v8 = vadd.f32 %v8285_v54, %v3930_v51  ;;  %v4724_v6 = vrot.slane %v4718_v10, 5  ;;  %v4739_v20 = vmul.f32 %v8111_v5, %v4738_v63 }
 0x75a   : > { %v3917_v16 = vadd.f32 %v3913_v60, %v3900_v42  ;;  %v4686_v19 = vsel %vm2903_vm9, %v4683_v14, %v4685_v39  ;;  %v926_v34 = vcombine.high %v7698_v56, %v7698_v56  ;;  %5591 = vpow2.f32 %v7700_v23  ;;  %v9103_v14 = vld [vmem:[#allocation72_spill] sm:$0xff] }
 0x75b   : > { %v8402_v52 = vpop.permute.xlu1 %4010  ;;  %v8404_v15 = vpop.permute.xlu0 %4050  ;;  %v4726_v49 = vsel %vm2939_vm11, %v4724_v6, %v4725_v50  ;;  %v4706_v53 = vrot.slane %v4699_v7, 4  ;;  %v4746_v54 = vrot.slane %v8389_v43, 6  ;;  %v4720_v2 = vmul.f32 %v8168_v33, %v4717_v4  ;;  %v9105_v7 = vld [vmem:[#allocation49_spill] sm:$0xff]  ;;  %v9106_v60 = vld [vmem:[#allocation52_spill] sm:$0xff] }
 0x75c   : > { %v1991_v5 = vadd.f32 %v9102_v25, %v1966_v29  ;;  %5593 = vpow2.f32 %v5221_v3  ;;  %v2085_v13 = vadd.f32 %v8137_v24, %v2081_v21  ;;  %v3972_v56 = vadd.f32 %v8308_v36, %v3951_v8 }
 0x75d   : > { %4689 = vrot.lane.b32.xlu1 %v4686_v19, %s9027_s0  ;;  %4729 = vrot.lane.b32.xlu0 %v4726_v49, %s9027_s0  ;;  %v3931_v23 = vadd.f32 %v9103_v14, %v3917_v16  ;;  %v4745_v59 = vrot.slane %v4739_v20, 6  ;;  %v933_v4 = vrot.slane %v926_v34, %v9062_v17  ;;  %v943_v57 = vcombine.high %v7672_v11, %v7672_v11 }
 0x75e   : > { %v8428_v0 = vrot.slane %v7809_v41, %v9062_v17  ;;  %v4707_v40 = vsel %vm2921_vm10, %v4704_v9, %v4706_v53  ;;  %v4727_v12 = vrot.slane %v4720_v2, 5  ;;  %v4741_v27 = vmul.f32 %v8168_v33, %v4738_v63 }
 0x75f   : > { %v8419_v1 = vpop.permute.xlu1 %4031  ;;  %v8421_v46 = vpop.permute.xlu0 %4085  ;;  %v4747_v36 = vsel %vm2957_vm12, %v4745_v59, %v4746_v54  ;;  %v2011_v61 = vadd.f32 %v9104_v30, %v1991_v5  ;;  %v5222_v45 = vmul.f32 -1.442695, %v2085_v13  ;;  %v3952_v11 = vadd.f32 %v8332_v32, %v3931_v23  ;;  %v9107_v59 = vld [vmem:[#allocation71_spill] sm:$0xff] }
 0x760   : > { %v3993_v44 = vadd.f32 %v8334_v18, %v3972_v56  ;;  %v934_v9 = vcombine.high %v933_v4, %v933_v4  ;;  %v950_v58 = vrot.slane %v943_v57, %v9062_v17  ;;  %v1018_v33 = vcombine.high %v8428_v0, %v8428_v0 }
 0x761   : > { %4710 = vrot.lane.b32.xlu1 %v4707_v40, %s9027_s0  ;;  %4750 = vrot.lane.b32.xlu0 %v4747_v36, %s9027_s0  ;;  %v4728_v10 = vsel %vm2939_vm11, %v4725_v50, %v4727_v12  ;;  %v4748_v48 = vrot.slane %v4741_v27, 6  ;;  %v2036_v63 = vadd.f32 %v9105_v7, %v2011_v61  ;;  %5595 = vpow2.f32 %v5222_v45 }
 0x762   : > { %v3973_v32 = vadd.f32 %v8355_v26, %v3952_v11  ;;  %v4014_v18 = vadd.f32 %v8357_v55, %v3993_v44  ;;  %v957_v50 = vrot.slane %v950_v58, %v9062_v17  ;;  %v8457_v31 = vrot.slane %v1018_v33, %v9062_v17 }
 0x763   : > { %v8438_v51 = vpop.permute.xlu1 %4052  ;;  %v8440_v37 = vpop.permute.xlu0 %4106  ;;  %v965_v29 = vcombine.high %v950_v58, %v950_v58  ;;  %v1046_v3 = vcombine.high %v7809_v41, %v7809_v41  ;;  %v4749_v21 = vsel %vm2957_vm12, %v4746_v54, %v4748_v48  ;;  %v2061_v26 = vadd.f32 %v9106_v60, %v2036_v63 }
 0x764   : > { %v5592_v39 = vpop.eup %5591  ;;  %v3994_v16 = vadd.f32 %v8379_v28, %v3973_v32  ;;  %v4035_v6 = vadd.f32 %v8381_v38, %v4014_v18  ;;  %v1041_v41 = vcombine.high %v8457_v31, %v8457_v31  ;;  %v980_v13 = vcombine.high %v957_v50, %v957_v50 }
 0x765   : > { %4731 = vrot.lane.b32.xlu1 %v4728_v10, %s9027_s0  ;;  %935 = vrot.lane.b32.xlu0 %v934_v9, %s9077_s21  ;;  %v911_v55 = vadd.f32 1.0, %v5592_v39  ;;  %v972_v34 = vrot.slane %v965_v29, %v9062_v17  ;;  %v1053_v49 = vrot.slane %v1046_v3, %v9062_v17  ;;  %v2070_v53 = vsub.f32 %v2061_v26, %v7799_v35  ;;  %v9108_v9 = vld [vmem:[#allocation74_spill] sm:$0xff] }
 0x766   : > { %v5594_v42 = vpop.eup %5593  ;;  %v4015_v28 = vadd.f32 %v8402_v52, %v3994_v16  ;;  %v4056_v38 = vadd.f32 %v8404_v15, %v4035_v6  ;;  %v1010_v45 = vrot.slane %v8428_v0, %v9062_v17 }
 0x767   : > { %v8451_v22 = vpop.permute.xlu1 %4087  ;;  %v8453_v43 = vpop.permute.xlu0 %4127  ;;  %v2096_v8 = vadd.f32 1.0, %v5594_v42  ;;  %5597 = vrcp.f32 %v911_v55  ;;  %v1060_v5 = vrot.slane %v1053_v49, %v9062_v17  ;;  %v1065_v56 = vcombine.high %v1053_v49, %v1053_v49 }
 0x768   : > { %v2078_v35 = vmul.f32 %v7866_v47, %v2070_v53  ;;  %v4036_v23 = vadd.f32 %v8419_v1, %v4015_v28  ;;  %v4070_v52 = vadd.f32 %v9107_v59, %v4056_v38  ;;  %v988_v40 = vcombine.high %v972_v34, %v972_v34 }
 0x769   : > { %4752 = vrot.lane.b32.xlu1 %v4749_v21, %s9027_s0  ;;  %958 = vrot.lane.b32.xlu0 %v957_v50, %s5754_s27  ;;  %s5755_s0 = smov 29   ;;  %5599 = vrcp.f32 %v2096_v8  ;;  %v1072_v57 = vrot.slane %v1065_v56, %v9062_v17  ;;  %v1077_v61 = vcombine.high %v1060_v5, %v1060_v5  ;;  %v1033_v18 = vcombine.high %v1010_v45, %v1010_v45 }
 0x76a   : > { %v2082_v36 = vmul.f32 %v7828_v62, %v2078_v35  ;;  %v4091_v47 = vadd.f32 %v8421_v46, %v4070_v52  ;;  %v4057_v12 = vadd.f32 %v8438_v51, %v4036_v23 }
 0x76b   : > { %v8466_v20 = vpop.permute.xlu1 %4108  ;;  %v8468_v19 = vpop.permute.xlu0 %4148  ;;  %v1082_v10 = vcombine.high %v1072_v57, %v1072_v57 }
 0x76c   : > { %v5596_v54 = vpop.eup %5595  ;;  %v2086_v44 = vadd.f32 %v8137_v24, %v2082_v36  ;;  %v4112_v62 = vadd.f32 %v8440_v37, %v4091_v47  ;;  %v4071_v46 = vadd.f32 %v9108_v9, %v4057_v12 }
 0x76d   : > { %1042 = vrot.lane.b32.xlu1 %v1041_v41, %s9077_s21  ;;  %973 = vrot.lane.b32.xlu0 %v972_v34, %s5755_s0  ;;  %s5756_s21 = smov 45   ;;  %v2097_v14 = vadd.f32 1.0, %v5596_v54 }
 0x76e   : > { %v5223_v39 = vmul.f32 -1.442695, %v2086_v44  ;;  %v4092_v24 = vadd.f32 %v8451_v22, %v4071_v46  ;;  %v4133_v0 = vadd.f32 %v8453_v43, %v4112_v62 }
 0x76f   : > { %v8478_v2 = vpop.permute.xlu1 %4129  ;;  %v4170_v25 = vpop.permute.xlu0 %4169  ;;  %5601 = vrcp.f32 %v2097_v14 }
 0x770   : > { %v4154_v3 = vadd.f32 %v8468_v19, %v4133_v0  ;;  %5603 = vpow2.f32 %v5223_v39  ;;  %v4113_v22 = vadd.f32 %v8466_v20, %v4092_v24 }
 0x771   : > { %1061 = vrot.lane.b32.xlu1 %v1060_v5, %s5754_s27  ;;  %981 = vrot.lane.b32.xlu0 %v980_v13, %s5756_s21  ;;  %v5598_v27 = vpop.eup %5597  ;;  %s8540_s27 = sld [smem:[#allocation7 + $0x103]] }
 0x772   : > { %v1094_v51 = vrot.slane %v5598_v27, %v9062_v17  ;;  %v4175_v43 = vadd.f32 %v4170_v25, %v4154_v3  ;;  %v4134_v19 = vadd.f32 %v8478_v2, %v4113_v22  ;;  %v9109_v25 = vld [vmem:[#allocation73_spill] sm:$0xff] }
 0x773   : > { %v8484_v4 = vpop.permute.xlu1 %4150  ;;  %v4191_v15 = vpop.permute.xlu0 %4190 }
 0x774   : > { %v5600_v11 = vpop.eup %5599  ;;  %v1106_v7 = vcombine.high %v1094_v51, %v1094_v51  ;;  %v1101_v32 = vrot.slane %v1094_v51, %v9062_v17  ;;  %v4196_v6 = vadd.f32 %v4191_v15, %v4175_v43  ;;  %v4155_v54 = vadd.f32 %v8484_v4, %v4134_v19 }
 0x775   : > { %1073 = vrot.lane.b32.xlu1 %v1072_v57, %s5755_s0  ;;  %989 = vrot.lane.b32.xlu0 %v988_v40, %s5757_s2  ;;  %v2112_v48 = vrot.slane %v5600_v11, %v9062_v17  ;;  %v2138_v16 = vcombine.high %v5600_v11, %v5600_v11  ;;  %s8543_s0 = sld [smem:[#allocation7 + $0x101]] }
 0x776   : > { %v1118_v41 = vcombine.high %v1101_v32, %v1101_v32  ;;  %v4210_v5 = vadd.f32 %v9109_v25, %v4196_v6  ;;  %v9112_v6 = vld [vmem:[#allocation78_spill] sm:$0xff] }
 0x777   : > { %v4172_v1 = vpop.permute.xlu1 %4171  ;;  %v8490_v30 = vpop.permute.xlu0 %4225  ;;  %v2119_v42 = vrot.slane %v2112_v48, %v9062_v17  ;;  %v2125_v50 = vcombine.high %v2112_v48, %v2112_v48  ;;  %v2145_v28 = vrot.slane %v2138_v16, %v9062_v17 }
 0x778   : > { %v4176_v13 = vadd.f32 %v4172_v1, %v4155_v54  ;;  %v4231_v4 = vadd.f32 %v8490_v30, %v4210_v5 }
 0x779   : > { %1078 = vrot.lane.b32.xlu1 %v1077_v61, %s5756_s21  ;;  %1011 = vrot.lane.b32.xlu0 %v1010_v45, %s5758_s14  ;;  %v5602_v29 = vpop.eup %5601  ;;  %v2120_v26 = vcombine.high %v2119_v42, %v2119_v42  ;;  %v2132_v55 = vrot.slane %v2125_v50, %v9062_v17  ;;  %v2152_v59 = vrot.slane %v2145_v28, %v9062_v17  ;;  %v9110_v45 = vld [vmem:[#allocation76_spill] sm:$0xff]  ;;  %v9111_v42 = vld [vmem:[#allocation75_spill] sm:$0xff]  ;;  %s8545_s21 = sld [smem:[#allocation7 + $0x102]] }
 0x77a   : > { %v2186_v8 = vrot.slane %v5602_v29, %v9062_v17  ;;  %v2220_v56 = vcombine.high %v5602_v29, %v5602_v29  ;;  %v5604_v2 = vpop.eup %5603  ;;  %v2157_v15 = vcombine.high %v2145_v28, %v2145_v28 }
 0x77b   : > { %v4193_v58 = vpop.permute.xlu1 %4192  ;;  %v4247_v33 = vpop.permute.xlu0 %4246  ;;  %v2133_v49 = vcombine.high %v2132_v55, %v2132_v55  ;;  %v2098_v40 = vadd.f32 1.0, %v5604_v2  ;;  %v2169_v51 = vcombine.high %v2152_v59, %v2152_v59 }
 0x77c   : > { %v8514_v53 = vrot.slane %v2186_v8, %v9062_v17  ;;  %v2198_v38 = vcombine.high %v2186_v8, %v2186_v8  ;;  %v4197_v57 = vadd.f32 %v4193_v58, %v4176_v13  ;;  %v4252_v36 = vadd.f32 %v4247_v33, %v4231_v4  ;;  %v9113_v4 = vld [vmem:[#allocation77_spill] sm:$0xff] }
 0x77d   : > { %1083 = vrot.lane.b32.xlu1 %v1082_v10, %s5757_s2  ;;  %1026 = vrot.lane.b32.xlu0 %v8457_v31, %s5759_s16  ;;  %v1113_v31 = vrot.slane %v1106_v7, %v9062_v17  ;;  %v2164_v1 = vrot.slane %v2157_v15, %v9062_v17  ;;  %v2227_v61 = vrot.slane %v2220_v56, %v9062_v17  ;;  %5605 = vrcp.f32 %v2098_v40  ;;  %s8547_s2 = spop %5448 }
 0x77e   : > { %v2210_v23 = vcombine.high %v8514_v53, %v8514_v53  ;;  %v2205_v52 = vrot.slane %v2198_v38, %v9062_v17  ;;  %v4211_v11 = vadd.f32 %v9110_v45, %v4197_v57 }
 0x77f   : > { %v8502_v37 = vpop.permute.xlu1 %4227  ;;  %v4268_v63 = vpop.permute.xlu0 %4267  ;;  %v2234_v46 = vrot.slane %v2227_v61, %v9062_v17  ;;  %v2239_v58 = vcombine.high %v2227_v61, %v2227_v61 }
 0x780   : > { %v2215_v27 = vcombine.high %v2205_v52, %v2205_v52  ;;  %v4273_v44 = vadd.f32 %v4268_v63, %v4252_v36  ;;  %v4232_v33 = vadd.f32 %v8502_v37, %v4211_v11  ;;  %v2174_v63 = vcombine.high %v2164_v1, %v2164_v1  ;;  %v9114_v11 = vld [vmem:[#allocation80_spill] sm:$0xff] }
 0x781   : > { %1102 = vrot.lane.b32.xlu1 %v1101_v32, %s5758_s14  ;;  %1034 = vrot.lane.b32.xlu0 %v1033_v18, %s5760_s23  ;;  %v2246_v7 = vrot.slane %v2239_v58, %v9062_v17  ;;  %v2251_v3 = vcombine.high %v2234_v46, %v2234_v46  ;;  %s5768_s14 = smov 16  }
 0x783   : > { %v4249_v21 = vpop.permute.xlu1 %4248  ;;  %v4289_v60 = vpop.permute.xlu0 %4288  ;;  %v2256_v55 = vcombine.high %v2246_v7, %v2246_v7 }
 0x784   : > { %v4294_v30 = vadd.f32 %v4289_v60, %v4273_v44  ;;  %v4253_v48 = vadd.f32 %v4249_v21, %v4232_v33 }
 0x785   : > { %1114 = vrot.lane.b32.xlu1 %v1113_v31, %s5759_s16  ;;  %2121 = vrot.lane.b32.xlu0 %v2120_v26, %s8948_s17  ;;  %s5769_s16 = smov 32  }
 0x787   : > { %v4270_v34 = vpop.permute.xlu1 %4269  ;;  %v4310_v20 = vpop.permute.xlu0 %4309 }
 0x788   : > { %v4315_v10 = vadd.f32 %v4310_v20, %v4294_v30  ;;  %v4274_v32 = vadd.f32 %v4270_v34, %v4253_v48  ;;  %v5606_v22 = vpop.eup %5605 }
 0x789   : > { %1119 = vrot.lane.b32.xlu1 %v1118_v41, %s5760_s23  ;;  %2134 = vrot.lane.b32.xlu0 %v2133_v49, %s5761_s26  ;;  %v2268_v8 = vrot.slane %v5606_v22, %v9062_v17  ;;  %s5770_s23 = smov 64  }
 0x78b   : > { %v4291_v35 = vpop.permute.xlu1 %4290  ;;  %v4331_v14 = vpop.permute.xlu0 %4330  ;;  %v2275_v20 = vrot.slane %v2268_v8, %v9062_v17  ;;  %v2280_v49 = vcombine.high %v2268_v8, %v2268_v8 }
 0x78c   : > { %v4336_v39 = vadd.f32 %v4331_v14, %v4315_v10  ;;  %v4295_v18 = vadd.f32 %v4291_v35, %v4274_v32 }
 0x78d   : > { %2211 = vrot.lane.b32.xlu1 %v2210_v23, %s8948_s17  ;;  %2153 = vrot.lane.b32.xlu0 %v2152_v59, %s5762_s22  ;;  %s5764_s17 = smov 62   ;;  %v2287_v5 = vrot.slane %v2280_v49, %v9062_v17 }
 0x78e   : > { %v4350_v50 = vadd.f32 %v9111_v42, %v4336_v39 }
 0x78f   : > { %v4312_v47 = vpop.permute.xlu1 %4311  ;;  %v4366_v12 = vpop.permute.xlu0 %4365 }
 0x790   : > { %v4316_v43 = vadd.f32 %v4312_v47, %v4295_v18  ;;  %v4371_v31 = vadd.f32 %v4366_v12, %v4350_v50  ;;  %v9115_v18 = vld [vmem:[#allocation79_spill] sm:$0xff] }
 0x791   : > { %2216 = vrot.lane.b32.xlu1 %v2215_v27, %s5761_s26  ;;  %2165 = vrot.lane.b32.xlu0 %v2164_v1, %s5763_s29  ;;  %s5771_s26 = smov 48  }
 0x793   : > { %v4333_v62 = vpop.permute.xlu1 %4332  ;;  %v4389_v9 = vpop.permute.xlu0 %4388 }
 0x794   : > { %v4337_v21 = vadd.f32 %v4333_v62, %v4316_v43 }
 0x795   : > { %2235 = vrot.lane.b32.xlu1 %v2234_v46, %s5762_s22  ;;  %2170 = vrot.lane.b32.xlu0 %v2169_v51, %s5764_s17 }
 0x796   : > { %v4351_v19 = vadd.f32 %v9112_v6, %v4337_v21 }
 0x797   : > { %v4368_v24 = vpop.permute.xlu1 %4367  ;;  %v4408_v0 = vpop.permute.xlu0 %4407 }
 0x799   : > { %2247 = vrot.lane.b32.xlu1 %v2246_v7, %s5763_s29  ;;  %2175 = vrot.lane.b32.xlu0 %v2174_v63, %s5765_s28 }
 0x79b   : > { %v4387_v29 = vpop.permute.xlu1 %4386  ;;  %v4431_v37 = vpop.permute.xlu0 %4430 }
 0x79c   : > { %v4392_v16 = vadd.f32 %v4387_v29, %v4371_v31 }
 0x79d   : > { %2252 = vrot.lane.b32.xlu1 %v2251_v3, %s5764_s17  ;;  %2194 = vrot.lane.b32.xlu0 %v8514_v53, %s5766_s24  ;;  %v4372_v53 = vadd.f32 %v4368_v24, %v4351_v19  ;;  %s5772_s17 = smov 80  }
 0x79e   : > { %v4413_v28 = vadd.f32 %v4408_v0, %v4392_v16 }
 0x79f   : > { %v4410_v60 = vpop.permute.xlu1 %4409  ;;  %v4450_v26 = vpop.permute.xlu0 %4449  ;;  %v4393_v13 = vadd.f32 %v4389_v9, %v4372_v53  ;;  %v4770_v53 = vstv %s8547_s2 }
 0x7a1   : > { %2257 = vrot.lane.b32.xlu1 %v2256_v55, %s5765_s28  ;;  %2206 = vrot.lane.b32.xlu0 %v2205_v52, %s5767_s1  ;;  %v4414_v14 = vadd.f32 %v4410_v60, %v4393_v13  ;;  %v9116_v60 = vld [vmem:[#allocation81_spill] sm:$0xff]  ;;  %v4773_v13 = vstv %s8543_s0 }
 0x7a3   : > { %v4429_v41 = vpop.permute.xlu1 %4428  ;;  %v4473_v34 = vpop.permute.xlu0 %4472  ;;  %v4435_v15 = vadd.f32 %v4431_v37, %v4414_v14 }
 0x7a4   : > { %v4434_v38 = vadd.f32 %v4429_v41, %v4413_v28 }
 0x7a5   : > { %2276 = vrot.lane.b32.xlu1 %v2275_v20, %s5766_s24 }
 0x7a6   : > { %v4455_v56 = vadd.f32 %v4450_v26, %v4434_v38  ;;  %v9117_v38 = vlaneseq }
 0x7a7   : > { %v4452_v54 = vpop.permute.xlu1 %4451  ;;  %v4506_v25 = vpop.permute.xlu0 %4505 }
 0x7a8   : > { %v4456_v40 = vadd.f32 %v4452_v54, %v4435_v15  ;;  %vm8552_vm13 = vcmp.lt.s32.totalorder %v9117_v38, 16  ;;  %vm961_vm14 = vcmp.ge.s32.totalorder %v9117_v38, 16  ;;  %vm962_vm15 = vcmp.lt.s32.totalorder %v9117_v38, 32  ;;  %v5224_v54 = vld [vmem:[%s8838_s5 + $0x10] sm:$0xff] }
 0x7a9   : > { %2288 = vrot.lane.b32.xlu1 %v2287_v5, %s5767_s1  ;;  %vm8562_vm0 = vmand %vm961_vm14, %vm962_vm15  ;;  %vm976_vm1 = vcmp.ge.s32.totalorder %v9117_v38, 32  ;;  %vm977_vm3 = vcmp.lt.s32.totalorder %v9117_v38, 48  ;;  %vm984_vm5 = vcmp.ge.s32.totalorder %v9117_v38, 48  ;;  %vm985_vm6 = vcmp.lt.s32.totalorder %v9117_v38, 64  ;;  %s5773_s1 = smov 96  }
 0x7aa   : > { %v4477_v27 = vadd.f32 %v4473_v34, %v4456_v40  ;;  %v4763_v34 = vstv %s8540_s27  ;;  %vm8570_vm4 = vmand %vm976_vm1, %vm977_vm3  ;;  %vm992_vm8 = vcmp.ge.s32.totalorder %v9117_v38, 64  ;;  %vm993_vm9 = vcmp.lt.s32.totalorder %v9117_v38, 80  ;;  %s5774_s27 = smov 112  }
 0x7ab   : > { %v4471_v2 = vpop.permute.xlu1 %4470  ;;  %v4527_v35 = vpop.permute.xlu0 %4526  ;;  %vm8580_vm7 = vmand %vm984_vm5, %vm985_vm6  ;;  %vm1014_vm11 = vcmp.ge.s32.totalorder %v9117_v38, 80  ;;  %vm1015_vm12 = vcmp.lt.s32.totalorder %v9117_v38, 96  ;;  %vm1029_vm15 = vcmp.ge.s32.totalorder %v9117_v38, 96  ;;  %vm1030_vm1 = vcmp.lt.s32.totalorder %v9117_v38, 112 }
 0x7ac   : > { %v4476_v23 = vadd.f32 %v4471_v2, %v4455_v56  ;;  %v4491_v44 = vadd.f32 %v9114_v11, %v4477_v27  ;;  %vm8590_vm10 = vmand %vm992_vm8, %vm993_vm9  ;;  %vm1037_vm5 = vcmp.ge.s32.totalorder %v9117_v38, 112  ;;  %vm1038_vm6 = vcmp.lt.s32.totalorder %v9117_v38, 128 }
 0x7ad   : > { %vm8600_vm14 = vmand %vm1014_vm11, %vm1015_vm12 }
 0x7ae   : > { %v4490_v57 = vadd.f32 %v9113_v4, %v4476_v23  ;;  %v4776_v23 = vstv %s8545_s21  ;;  %vm8610_vm3 = vmand %vm1029_vm15, %vm1030_vm1 }
 0x7af   : > { %v4508_v59 = vpop.permute.xlu1 %4507  ;;  %v4548_v52 = vpop.permute.xlu0 %4547  ;;  %vm8620_vm8 = vmand %vm1037_vm5, %vm1038_vm6 }
 0x7b0   : > { %v4511_v12 = vadd.f32 %v4506_v25, %v4490_v57  ;;  %v4512_v9 = vadd.f32 %v4508_v59, %v4491_v44 }
 0x7b2   : > { %v4532_v45 = vadd.f32 %v4527_v35, %v4511_v12 }
 0x7b3   : > { %v4529_v36 = vpop.permute.xlu1 %4528  ;;  %v4571_v47 = vpop.permute.xlu0 %4570 }
 0x7b4   : > { %v4553_v46 = vadd.f32 %v4548_v52, %v4532_v45  ;;  %v4533_v51 = vadd.f32 %v4529_v36, %v4512_v9 }
 0x7b7   : > { %v4550_v1 = vpop.permute.xlu1 %4549  ;;  %v4590_v61 = vpop.permute.xlu0 %4589 }
 0x7b8   : > { %v4554_v48 = vadd.f32 %v4550_v1, %v4533_v51 }
 0x7ba   : > { %v4575_v7 = vadd.f32 %v4571_v47, %v4554_v48 }
 0x7bb   : > { %v4569_v30 = vpop.permute.xlu1 %4568  ;;  %v4613_v62 = vpop.permute.xlu0 %4612 }
 0x7bc   : > { %v4574_v58 = vadd.f32 %v4569_v30, %v4553_v46 }
 0x7be   : > { %v4595_v39 = vadd.f32 %v4590_v61, %v4574_v58 }
 0x7bf   : > { %v4592_v33 = vpop.permute.xlu1 %4591  ;;  %v4648_v10 = vpop.permute.xlu0 %4647 }
 0x7c0   : > { %v4596_v32 = vadd.f32 %v4592_v33, %v4575_v7 }
 0x7c2   : > { %v4617_v3 = vadd.f32 %v4613_v62, %v4596_v32 }
 0x7c3   : > { %v4611_v24 = vpop.permute.xlu1 %4610  ;;  %v4667_v0 = vpop.permute.xlu0 %4666 }
 0x7c4   : > { %v4616_v63 = vadd.f32 %v4611_v24, %v4595_v39  ;;  %v4631_v26 = vadd.f32 %v9116_v60, %v4617_v3 }
 0x7c6   : > { %v4630_v42 = vadd.f32 %v9115_v18, %v4616_v63  ;;  %v4652_v6 = vadd.f32 %v4648_v10, %v4631_v26  ;;  %v5346_v18 = vld [vmem:[%s8838_s5 + $0x20] sm:$0xff] }
 0x7c7   : > { %v4646_v50 = vpop.permute.xlu1 %4645  ;;  %v4688_v29 = vpop.permute.xlu0 %4687 }
 0x7c8   : > { %v4651_v37 = vadd.f32 %v4646_v50, %v4630_v42 }
 0x7ca   : > { %v4672_v22 = vadd.f32 %v4667_v0, %v4651_v37 }
 0x7cb   : > { %v4669_v43 = vpop.permute.xlu1 %4668  ;;  %v4709_v31 = vpop.permute.xlu0 %4708 }
 0x7cc   : > { %v4693_v21 = vadd.f32 %v4688_v29, %v4672_v22  ;;  %v4673_v49 = vadd.f32 %v4669_v43, %v4652_v6 }
 0x7ce   : > { %v4714_v55 = vadd.f32 %v4709_v31, %v4693_v21 }
 0x7cf   : > { %v4690_v8 = vpop.permute.xlu1 %4689  ;;  %v4730_v16 = vpop.permute.xlu0 %4729 }
 0x7d0   : > { %v4735_v19 = vadd.f32 %v4730_v16, %v4714_v55  ;;  %v4694_v25 = vadd.f32 %v4690_v8, %v4673_v49 }
 0x7d3   : > { %v4711_v41 = vpop.permute.xlu1 %4710  ;;  %v4751_v20 = vpop.permute.xlu0 %4750 }
 0x7d4   : > { %v4756_v28 = vadd.f32 %v4751_v20, %v4735_v19  ;;  %v4715_v35 = vadd.f32 %v4711_v41, %v4694_v25 }
 0x7d6   : > { %v4764_v5 = vsub.f32 %v4756_v28, %v4763_v34  ;;  %v9134_v28 = vld [vmem:[#allocation13_spill] sm:$0xff] }
 0x7d7   : > { %v4732_v56 = vpop.permute.xlu1 %4731  ;;  %v936_v2 = vpop.permute.xlu0 %935 }
 0x7d8   : > { %v4771_v14 = vmul.f32 %v4770_v53, %v4764_v5  ;;  %942 = vst.msk [vmem:[#allocation3] sm:$0x1] %vm8552_vm13, %v936_v2  ;;  %v4736_v15 = vadd.f32 %v4732_v56, %v4715_v35 }
 0x7da   : > { %v4774_v52 = vmul.f32 %v4773_v13, %v4771_v14 }
 0x7db   : > { %v4753_v4 = vpop.permute.xlu1 %4752  ;;  %v959_v57 = vpop.permute.xlu0 %958 }
 0x7dc   : > { %v4777_v40 = vadd.f32 %v4776_v23, %v4774_v52  ;;  %v4757_v36 = vadd.f32 %v4753_v4, %v4736_v15  ;;  %964 = vst.msk [vmem:[#allocation3] sm:$0x1] %vm8562_vm0, %v959_v57  ;;  %v9135_v52 = vld [vmem:[#allocation14_spill] sm:$0xff]  ;;  %v9136_v4 = vld [vmem:[#allocation20_spill] sm:$0xff] }
 0x7de   : > { %v5344_v12 = vmul.f32 -1.442695, %v4777_v40  ;;  %v4765_v27 = vsub.f32 %v4757_v36, %v4763_v34  ;;  %v9137_v40 = vld [vmem:[#allocation18_spill] sm:$0xff] }
 0x7df   : > { %v1043_v1 = vpop.permute.xlu1 %1042  ;;  %v974_v61 = vpop.permute.xlu0 %973 }
 0x7e0   : > { %5607 = vpow2.f32 %v5344_v12  ;;  %v4772_v45 = vmul.f32 %v4770_v53, %v4765_v27  ;;  %1045 = vst.msk [vmem:[#allocation3 + $0x1] sm:$0x1] %vm8552_vm13, %v1043_v1  ;;  %v8647_v53 = vsub.s32 1, %v9134_v28  ;;  %v9138_v12 = vld [vmem:[#allocation19_spill] sm:$0xff] }
 0x7e1   : > { %979 = vst.msk [vmem:[#allocation3] sm:$0x1] %vm8570_vm4, %v974_v61  ;;  %v9142_v28 = vld [vmem:[#allocation23_spill] sm:$0xff] }
 0x7e2   : > { %v4775_v44 = vmul.f32 %v4773_v13, %v4772_v45  ;;  %v9139_v45 = vld [vmem:[#allocation17_spill] sm:$0xff] }
 0x7e3   : > { %v1062_v30 = vpop.permute.xlu1 %1061  ;;  %v982_v62 = vpop.permute.xlu0 %981 }
 0x7e4   : > { %v4778_v9 = vadd.f32 %v4776_v23, %v4775_v44  ;;  %1064 = vst.msk [vmem:[#allocation3 + $0x1] sm:$0x1] %vm8562_vm0, %v1062_v30 }
 0x7e5   : > { %987 = vst.msk [vmem:[#allocation3] sm:$0x1] %vm8580_vm7, %v982_v62 }
 0x7e6   : > { %v5345_v51 = vmul.f32 -1.442695, %v4778_v9 }
 0x7e7   : > { %v1074_v58 = vpop.permute.xlu1 %1073  ;;  %v990_v33 = vpop.permute.xlu0 %989 }
 0x7e8   : > { %5609 = vpow2.f32 %v5345_v51  ;;  %1076 = vst.msk [vmem:[#allocation3 + $0x1] sm:$0x1] %vm8570_vm4, %v1074_v58 }
 0x7e9   : > { %995 = vst.msk [vmem:[#allocation3] sm:$0x1] %vm8590_vm10, %v990_v33 }
 0x7ea   : > { %v5608_v48 = vpop.eup %5607 }
 0x7eb   : > { %v4785_v39 = vadd.f32 1.0, %v5608_v48  ;;  %v1079_v24 = vpop.permute.xlu1 %1078  ;;  %v1012_v0 = vpop.permute.xlu0 %1011 }
 0x7ec   : > { %1081 = vst.msk [vmem:[#allocation3 + $0x1] sm:$0x1] %vm8580_vm7, %v1079_v24 }
 0x7ed   : > { %1017 = vst.msk [vmem:[#allocation3] sm:$0x1] %vm8600_vm14, %v1012_v0  ;;  %5611 = vrcp.f32 %v4785_v39 }
 0x7ef   : > { %v1084_v63 = vpop.permute.xlu1 %1083  ;;  %v1027_v32 = vpop.permute.xlu0 %1026 }
 0x7f0   : > { %1086 = vst.msk [vmem:[#allocation3 + $0x1] sm:$0x1] %vm8590_vm10, %v1084_v63  ;;  %v1139_v63 = vld [vmem:[%s8838_s5] sm:$0xff] }
 0x7f1   : > { %1032 = vst.msk [vmem:[#allocation3] sm:$0x1] %vm8610_vm3, %v1027_v32 }
 0x7f2   : > { %v5610_v42 = vpop.eup %5609 }
 0x7f3   : > { %v4786_v50 = vadd.f32 1.0, %v5610_v42  ;;  %v1103_v29 = vpop.permute.xlu1 %1102  ;;  %v1035_v37 = vpop.permute.xlu0 %1034 }
 0x7f4   : > { %1105 = vst.msk [vmem:[#allocation3 + $0x1] sm:$0x1] %vm8600_vm14, %v1103_v29 }
 0x7f5   : > { %1040 = vst.msk [vmem:[#allocation3] sm:$0x1] %vm8620_vm8, %v1035_v37  ;;  %5613 = vrcp.f32 %v4786_v50 }
 0x7f7   : > { %v8628_v3 = vpop.eup %5611  ;;  %v1115_v22 = vpop.permute.xlu1 %1114 }
 0x7f8   : > { %v2122_v43 = vpop.permute.xlu0 %2121  ;;  %1117 = vst.msk [vmem:[#allocation3 + $0x1] sm:$0x1] %vm8610_vm3, %v1115_v22  ;;  %v4799_v31 = vrot.slane %v8628_v3, %v9062_v17  ;;  %v4829_v55 = vcombine.high %v8628_v3, %v8628_v3  ;;  %v9140_v22 = vmov 0.0  }
 0x7fa   : > { %v4800_v21 = vcombine.high %v4799_v31, %v4799_v31  ;;  %v4807_v16 = vrot.slane %v4799_v31, %v9062_v17  ;;  %v4836_v34 = vrot.slane %v4829_v55, %v9062_v17 }
 0x7fb   : > { %v1120_v60 = vpop.permute.xlu1 %1119 }
 0x7fc   : > { %v2135_v26 = vpop.permute.xlu0 %2134  ;;  %1122 = vst.msk [vmem:[#allocation3 + $0x1] sm:$0x1] %vm8620_vm8, %v1120_v60  ;;  %v4814_v8 = vrot.slane %v4800_v21, %v9062_v17  ;;  %v4819_v20 = vcombine.high %v4807_v16, %v4807_v16  ;;  %v4843_v56 = vrot.slane %v4836_v34, %v9062_v17  ;;  %v4848_v30 = vcombine.high %v4836_v34, %v4836_v34 }
 0x7fe   : > { %4815 = vrot.lane.b32.xlu0 %v4814_v8, %s5768_s14  ;;  %v4824_v9 = vcombine.high %v4814_v8, %v4814_v8  ;;  %v4855_v0 = vrot.slane %v4848_v30, %v9062_v17  ;;  %v4860_v29 = vcombine.high %v4843_v56, %v4843_v56  ;;  %v9146_v30 = vld [vmem:[#allocation28_spill] sm:$0xff] }
 0x7ff   : > { %v8641_v6 = vpop.eup %5613  ;;  %v2212_v19 = vpop.permute.xlu1 %2211 }
 0x800   : > { %v2154_v41 = vpop.permute.xlu0 %2153  ;;  %v4878_v49 = vrot.slane %v8641_v6, %v9062_v17  ;;  %v4908_v2 = vcombine.high %v8641_v6, %v8641_v6 }
 0x802   : > { %4820 = vrot.lane.b32.xlu0 %v4819_v20, %s5769_s16  ;;  %v4879_v38 = vcombine.high %v4878_v49, %v4878_v49  ;;  %v4886_v14 = vrot.slane %v4878_v49, %v9062_v17  ;;  %v4915_v58 = vrot.slane %v4908_v2, %v9062_v17  ;;  %v9141_v20 = vld [vmem:[#allocation25_spill] sm:$0xff] }
 0x803   : > { %v1123_v25 = vld [vmem:[#allocation3] sm:$0x3]  ;;  %v2217_v5 = vpop.permute.xlu1 %2216 }
 0x804   : > { %v2166_v13 = vpop.permute.xlu0 %2165  ;;  %2124 = vst.msk [vmem:[#allocation3] sm:$0x1] %vm8552_vm13, %v2122_v43  ;;  %2214 = vst.msk [vmem:[#allocation3 + $0x1] sm:$0x1] %vm8552_vm13, %v2212_v19  ;;  %v4893_v35 = vrot.slane %v4879_v38, %v9062_v17  ;;  %v1132_v23 = vrot.slane %v1123_v25, %v8647_v53  ;;  %v1128_v15 = vrot.slane %v1123_v25, %v9135_v52  ;;  %v1140_v43 = vld [vmem:[%s8838_s5 + $0x8] sm:$0xff] }
 0x805   : > { %2137 = vst.msk [vmem:[#allocation3] sm:$0x1] %vm8562_vm0, %v2135_v26  ;;  %2219 = vst.msk [vmem:[#allocation3 + $0x1] sm:$0x1] %vm8562_vm0, %v2217_v5  ;;  %v4898_v62 = vcombine.high %v4886_v14, %v4886_v14  ;;  %v4922_v24 = vrot.slane %v4915_v58, %v9062_v17  ;;  %v4927_v37 = vcombine.high %v4915_v58, %v4915_v58  ;;  %v9143_v25 = vld [vmem:[#allocation24_spill] sm:$0xff]  ;;  %v9148_v58 = vld [vmem:[#allocation27_spill] sm:$0xff] }
 0x806   : > { %2156 = vst.msk [vmem:[#allocation3] sm:$0x1] %vm8570_vm4, %v2154_v41  ;;  %4894 = vrot.lane.b32.xlu1 %v4893_v35, %s5768_s14  ;;  %4844 = vrot.lane.b32.xlu0 %v4843_v56, %s5770_s23  ;;  %v1136_v57 = vmul.f32 %v1132_v23, %v9136_v4  ;;  %v1138_v36 = vmul.f32 %v1132_v23, %v9137_v40 }
 0x807   : > { %v1135_v27 = vmul.f32 %v1128_v15, %v9138_v12  ;;  %2168 = vst.msk [vmem:[#allocation3] sm:$0x1] %vm8580_vm7, %v2166_v13  ;;  %v2236_v1 = vpop.permute.xlu1 %2235  ;;  %v1137_v44 = vmul.f32 %v1128_v15, %v9139_v45  ;;  %v4903_v50 = vcombine.high %v4893_v35, %v4893_v35  ;;  %v4934_v60 = vrot.slane %v4927_v37, %v9062_v17  ;;  %v9144_v13 = vld [vmem:[#allocation22_spill] sm:$0xff]  ;;  %v5629_v37 = vld [vmem:[%s5915_s25 + $0x10] sm:$0xff] }
 0x808   : > { %v2171_v61 = vpop.permute.xlu0 %2170  ;;  %2238 = vst.msk [vmem:[#allocation3 + $0x1] sm:$0x1] %vm8570_vm4, %v2236_v1  ;;  %v5414_v51 = vpack.c.bf16 %v1138_v36, %v1136_v57  ;;  %v4865_v26 = vcombine.high %v4855_v0, %v4855_v0  ;;  %v4939_v8 = vcombine.high %v4922_v24, %v4922_v24 }
 0x809   : > { %2173 = vst.msk [vmem:[#allocation3] sm:$0x1] %vm8590_vm10, %v2171_v61  ;;  %v5416_v33 = vpack.c.bf16 %v1137_v44, %v1135_v27  ;;  %v4944_v19 = vcombine.high %v4934_v60, %v4934_v60  ;;  %v9145_v44 = vld [vmem:[#allocation30_spill] sm:$0xff] }
 0x80a   : > { %4899 = vrot.lane.b32.xlu1 %v4898_v62, %s5769_s16  ;;  %4825 = vrot.lane.b32.xlu0 %v4824_v9, %s5771_s26  ;;  %v9147_v9 = vld [vmem:[#allocation29_spill] sm:$0xff]  ;;  %s5775_s16 = smov [#allocation9]  }
 0x80b   : > { %5415 = vmatprep.subr.bf16.mxu1 %v5414_v51  ;;  %v2248_v48 = vpop.permute.xlu1 %2247 }
 0x80c   : > { %v2176_v39 = vpop.permute.xlu0 %2175  ;;  %2250 = vst.msk [vmem:[#allocation3 + $0x1] sm:$0x1] %vm8580_vm7, %v2248_v48  ;;  %5417 = vmatpush1.bf16.msra.mxu1 %v5416_v33 }
 0x80d   : > { %2178 = vst.msk [vmem:[#allocation3] sm:$0x1] %vm8600_vm14, %v2176_v39  ;;  %v9149_v39 = vld [vmem:[#allocation16_spill] sm:$0xff] }
 0x80e   : > { %4923 = vrot.lane.b32.xlu1 %v4922_v24, %s5770_s23  ;;  %4856 = vrot.lane.b32.xlu0 %v4855_v0, %s5772_s17  ;;  %s5665_s23 = sshll.u32 %s5775_s16, 4  ;;  %s5666_s23 = int_to_ptr.vmem [resolvable:$false] %s5665_s23 }
 0x80f   : > { %v2253_v32 = vpop.permute.xlu1 %2252  ;;  %5183 = vmatmul.mubr.msk.f32.vlgmr.msra.gmra.mrb[0].mxu1 %vm407_vm2, %v1139_v63  ;;  %v5628_v63 = vld [vmem:[%s5915_s25 + $0x8] sm:$0xff] }
 0x810   : > { %v2195_v42 = vpop.permute.xlu0 %2194  ;;  %2255 = vst.msk [vmem:[#allocation3 + $0x1] sm:$0x1] %vm8590_vm10, %v2253_v32  ;;  %1217 = vmatprep.mubr.f32.mxu1 %v9140_v22  ;;  %v393_v32 = vadd.f32 %v5628_v63, %v9149_v39 }
 0x811   : > { %2197 = vst.msk [vmem:[#allocation3] sm:$0x1] %vm8610_vm3, %v2195_v42 }
 0x812   : > { %4904 = vrot.lane.b32.xlu1 %v4903_v50, %s5771_s26  ;;  %4861 = vrot.lane.b32.xlu0 %v4860_v29, %s5773_s1  ;;  %s5667_s26 = scalar_lea.vmem %s5666_s23, 1024 }
 0x813   : > { %v2258_v31 = vpop.permute.xlu1 %2257  ;;  %5184 = vmatmul.mubr.msk.f32.gmra.mrb[2].mxu1 %vm407_vm2, %v1140_v43 }
 0x814   : > { %v2207_v21 = vpop.permute.xlu0 %2206  ;;  %2260 = vst.msk [vmem:[#allocation3 + $0x1] sm:$0x1] %vm8600_vm14, %v2258_v31  ;;  %2381 = vmatprep.mubr.f32.mxu1 %v9140_v22 }
 0x815   : > { %2209 = vst.msk [vmem:[#allocation3] sm:$0x1] %vm8620_vm8, %v2207_v21  ;;  %v5630_v21 = vld [vmem:[%s5915_s25 + $0x18] sm:$0xff] }
 0x816   : > { %4935 = vrot.lane.b32.xlu1 %v4934_v60, %s5772_s17  ;;  %4866 = vrot.lane.b32.xlu0 %v4865_v26, %s5774_s27  ;;  %s350_s17 = sand.u32 1, %s5723_s10  }
 0x817   : > { %v2277_v55 = vpop.permute.xlu1 %2276  ;;  %s5165_s28 = sshll.u32 %s350_s17, 5 }
 0x818   : > { %2279 = vst.msk [vmem:[#allocation3 + $0x1] sm:$0x1] %vm8610_vm3, %v2277_v55  ;;  %s352_s24 = scalar_lea.vmem [#allocation9], %s5165_s28 }
 0x81a   : > { %4940 = vrot.lane.b32.xlu1 %v4939_v8, %s5773_s1  ;;  %s5073_s1 = sshll.u32 %s352_s24, 4  ;;  %s8784_s1 = int_to_ptr.vmem [resolvable:$true] %s5073_s1 }
 0x81b   : > { %v2289_v16 = vpop.permute.xlu1 %2288  ;;  %p5668_p8 = scmp.lt.s32.totalorder %s8784_s1, %s5666_s23 }
 0x81c   : > { %2291 = vst.msk [vmem:[#allocation3 + $0x1] sm:$0x1] %vm8620_vm8, %v2289_v16 }
 0x81e   : > { %4945 = vrot.lane.b32.xlu1 %v4944_v19, %s5774_s27  ;;  %s5356_s27 = sshll.u32 %s5848_s13, 9  ;;  %s8791_s13 = scalar_lea.sflag [#allocation5], %s350_s17 }
 0x81f   : > { %s8789_s2 = scalar_lea.hbm %s8842_s9, %s5356_s27 }
 0x823   : > { %v2292_v41 = vld [vmem:[#allocation3] sm:$0x3] }
 0x824   : > { %4870 = vst.msk [vmem:[#allocation3 + $0x1] sm:$0x1] %vm8552_vm13, %v8641_v6  ;;  %4791 = vst.msk [vmem:[#allocation3] sm:$0x1] %vm8552_vm13, %v8628_v3  ;;  %v2301_v17 = vrot.slane %v2292_v41, %v8647_v53  ;;  %v2297_v34 = vrot.slane %v2292_v41, %v9135_v52  ;;  %v5225_v3 = vld [vmem:[%s8838_s5 + $0x18] sm:$0xff] }
 0x826   : > { %v2305_v49 = vmul.f32 %v2301_v17, %v9141_v20  ;;  %v2307_v38 = vmul.f32 %v2301_v17, %v9142_v28  ;;  %v2304_v5 = vmul.f32 %v2297_v34, %v9143_v25  ;;  %v2306_v56 = vmul.f32 %v2297_v34, %v9144_v13 }
 0x828   : > { %v5421_v2 = vpack.c.bf16 %v2307_v38, %v2305_v49  ;;  %v5423_v35 = vpack.c.bf16 %v2306_v56, %v2304_v5 }
 0x82a   : > { %5422 = vmatprep.subr.bf16.mxu1 %v5421_v2 }
 0x82b   : > { %5424 = vmatpush1.bf16.msra.mxu1 %v5423_v35 }
 0x82e   : > { %5226 = vmatmul.mubr.msk.f32.vlgmr.msra.gmra.mrb[0].mxu1 %vm407_vm2, %v5224_v54 }
 0x82f   : > { %2387 = vmatprep.mubr.f32.mxu1 %v9140_v22 }
 0x832   : > { %5227 = vmatmul.mubr.msk.f32.gmra.mrb[2].mxu1 %vm407_vm2, %v5225_v3 }
 0x833   : > { %5038 = vmatprep.mubr.f32.mxu1 %v9140_v22 }
 0x870   : > { %v4816_v6 = vpop.permute.xlu0 %4815 }
 0x871   : > { %4818 = vst.msk [vmem:[#allocation3] sm:$0x1] %vm8562_vm0, %v4816_v6 }
 0x874   : > { %v4821_v14 = vpop.permute.xlu0 %4820 }
 0x875   : > { %4823 = vst.msk [vmem:[#allocation3] sm:$0x1] %vm8570_vm4, %v4821_v14 }
 0x878   : > { %v4895_v23 = vpop.permute.xlu1 %4894  ;;  %v4845_v15 = vpop.permute.xlu0 %4844 }
 0x879   : > { %4897 = vst.msk [vmem:[#allocation3 + $0x1] sm:$0x1] %vm8562_vm0, %v4895_v23 }
 0x87c   : > { %v4900_v4 = vpop.permute.xlu1 %4899  ;;  %v4826_v57 = vpop.permute.xlu0 %4825 }
 0x87d   : > { %4902 = vst.msk [vmem:[#allocation3 + $0x1] sm:$0x1] %vm8570_vm4, %v4900_v4 }
 0x87e   : > { %4828 = vst.msk [vmem:[#allocation3] sm:$0x1] %vm8580_vm7, %v4826_v57 }
 0x87f   : > { %4847 = vst.msk [vmem:[#allocation3] sm:$0x1] %vm8590_vm10, %v4845_v15 }
 0x880   : > { %v4924_v40 = vpop.permute.xlu1 %4923  ;;  %v4857_v36 = vpop.permute.xlu0 %4856 }
 0x881   : > { %4859 = vst.msk [vmem:[#allocation3] sm:$0x1] %vm8600_vm14, %v4857_v36 }
 0x884   : > { %v4905_v12 = vpop.permute.xlu1 %4904  ;;  %v4862_v27 = vpop.permute.xlu0 %4861 }
 0x885   : > { %4907 = vst.msk [vmem:[#allocation3 + $0x1] sm:$0x1] %vm8580_vm7, %v4905_v12 }
 0x886   : > { %4864 = vst.msk [vmem:[#allocation3] sm:$0x1] %vm8610_vm3, %v4862_v27 }
 0x887   : > { %4926 = vst.msk [vmem:[#allocation3 + $0x1] sm:$0x1] %vm8590_vm10, %v4924_v40 }
 0x888   : > { %v4936_v59 = vpop.permute.xlu1 %4935  ;;  %v4867_v47 = vpop.permute.xlu0 %4866 }
 0x889   : > { %4938 = vst.msk [vmem:[#allocation3 + $0x1] sm:$0x1] %vm8600_vm14, %v4936_v59 }
 0x88a   : > { %4869 = vst.msk [vmem:[#allocation3] sm:$0x1] %vm8620_vm8, %v4867_v47 }
 0x88c   : > { %v4941_v1 = vpop.permute.xlu1 %4940 }
 0x88d   : > { %4943 = vst.msk [vmem:[#allocation3 + $0x1] sm:$0x1] %vm8610_vm3, %v4941_v1 }
 0x890   : > { %v4946_v11 = vpop.permute.xlu1 %4945 }
 0x891   : > { %4948 = vst.msk [vmem:[#allocation3 + $0x1] sm:$0x1] %vm8620_vm8, %v4946_v11 }
 0x898   : > { %v4949_v61 = vld [vmem:[#allocation3] sm:$0x3] }
 0x899   : > { %v4954_v46 = vrot.slane %v4949_v61, %v9135_v52  ;;  %v4958_v45 = vrot.slane %v4949_v61, %v8647_v53  ;;  %v5347_v53 = vld [vmem:[%s8838_s5 + $0x28] sm:$0xff]  ;;  %v5627_v52 = vld [vmem:[%s5915_s25] sm:$0xff]  ;;  %s5661_s25 = scalar_lea.vmem %s8784_s1, 512 }
 0x89a   : > { %v392_v24 = vadd.f32 %v5627_v52, %v9149_v39  ;;  %p5662_p10 = scmp.ne.s32.totalorder %s8784_s1, %s5661_s25  ;;  %p5669_p11 = scmp.lt.s32.totalorder %s5667_s26, %s5661_s25 }
 0x89b   : > { %v4962_v10 = vmul.f32 %v4958_v45, %v9145_v44  ;;  %v4964_v62 = vmul.f32 %v4958_v45, %v9146_v30  ;;  %v4961_v51 = vmul.f32 %v4954_v46, %v9147_v9  ;;  %v4963_v7 = vmul.f32 %v4954_v46, %v9148_v58 }
 0x89c   : > { %p5663_p0 = pnand %p5662_p10, %p9151_p12  ;;  %p5670_p13 = por %p5669_p11, %p5668_p8 }
 0x89d   : > { %v5428_v33 = vpack.c.bf16 %v4964_v62, %v4962_v10  ;;  %v5430_v48 = vpack.c.bf16 %v4963_v7, %v4961_v51 }
 0x89e   : > { %p5664_p7 = pneg %p5663_p0 }
 0x89f   : > { %5429 = vmatprep.subr.bf16.mxu1 %v5428_v33 }
 0x8a0   : > { %5431 = vmatpush1.bf16.msra.mxu1 %v5430_v48  ;;  %p5671_p1 = pnand %p5670_p13, %p5664_p7 }
 0x8a3   : > { %5348 = vmatmul.mubr.msk.f32.vlgmr.msra.gmra.mrb[0].mxu1 %vm407_vm2, %v5346_v18 }
 0x8a4   : > { %5044 = vmatprep.mubr.f32.mxu1 %v9140_v22  ;;  %v9150_v22 = vld [vmem:[#allocation15_spill] sm:$0xff] }
 0x8a5   : > { %v394_v43 = vadd.f32 %v5629_v37, %v9150_v22  ;;  %v395_v60 = vadd.f32 %v5630_v21, %v9150_v22 }
 0x8a7   : > { %5349 = vmatmul.mubr.msk.f32.gmra.mrb[2].mxu1 %vm407_vm2, %v5347_v53 }
 0x976   : > { %v5040_v0 = vpop.f32.mrb[0].mxu1 }
 0x977   : > { %v5432_v42 = vadd.f32 %v5040_v0, %v392_v24  ;;  %v5042_v50 = vpop.f32.mrb[1].mxu1 }
 0x978   : > { %v5433_v29 = vadd.f32 %v5042_v50, %v393_v32 }
 0x979   : > { %5055 = vst [vmem:[%s352_s24] sm:$0xff] %v5432_v42 }
 0x97a   : > { %5056 = vst [vmem:[%s352_s24 + $0x8] sm:$0xff] %v5433_v29  ;;  %v5046_v31 = vpop.f32.mrb[2].mxu1 }
 0x97b   : > { %v5434_v26 = vadd.f32 %v5046_v31, %v394_v43  ;;  %v5048_v55 = vpop.f32.mrb[3].mxu1 }
 0x97c   : > { %v5435_v8 = vadd.f32 %v5048_v55, %v395_v60 }
 0x97d   : > { %5057 = vst [vmem:[%s352_s24 + $0x10] sm:$0xff] %v5434_v26 }
 0x97e   : > { %5058 = vst [vmem:[%s352_s24 + $0x18] sm:$0xff] %v5435_v8 }
 0x97f   : > { %5674 = shalt.err (!%p5671_p1)
}
 0x980   : > { %s5675_s22 = scalar_lea.hbm %s8789_s2, 512  ;;  %s5679_s28 = scalar_lea.hbm %s8842_s9, 1024 }
 0x981   : > { %p5676_p2 = scmp.ne.s32.totalorder %s8789_s2, %s5675_s22  ;;  %p5680_p9 = scmp.lt.u32.totalorder %s8789_s2, %s8842_s9 }
 0x982   : > { %p5681_p5 = scmp.lt.u32.totalorder %s5679_s28, %s5675_s22  ;;  %p5683_p10 = scmp.lt.u32.totalorder %s5675_s22, %s8789_s2 }
 0x983   : > { %p5677_p3 = pnand %p5676_p2, %p9151_p12 }
 0x984   : > { %p5682_p6 = por %p5681_p5, %p5680_p9 }
 0x985   : > { %p5678_p4 = pneg %p5677_p3 }
 0x986   : > { %p5684_p0 = por %p5683_p10, %p5682_p6 }
 0x988   : > { %p5685_p7 = pnand %p5684_p0, %p5678_p4 }
 0x98a   : > { %5688 = shalt.err (!%p5685_p7)
}
 0x98b   : > { %s5776_s0 = smov 256  }
 0x98c   : > { %5458 = dma.vmem_to_hbm [thread:$0]  (%p9151_p12), %s8784_s1, 512, %s8789_s2, %s8791_s13, %s5776_s0, %s5776_s0, %s5768_s14  }
 0x98d PF: > { %p5475_p8 = scmp.ge.s32.totalorder %s5731_s12, 2  ;;  %s5088_s21 = sand.u32 1, %s5719_s30  }
 0x98e   : > { %p9152_p11 = scmp.ne.s32.totalorder %s8923_s20, 0  ;;  %s5089_s25 = scalar_lea.sflag [#allocation5], %s5088_s21 }
 0x990   : > { %p5468_p13 = pnand %p5475_p8, %p9152_p11 }
 0x992   : > { %5714 = dma.done.wait (!%p5468_p13), %s5089_s25, 512  }
 0x993   : > { %5716 = vsyncadd (!%p5468_p13), %s5089_s25, 4294966784  ;;  %p21_p1 = scmp.ge.s32.totalorder %s5852_s15, 4   ;;  %s9153_s30 = smov %s5723_s10 }
 0x994   : > { %s9154_s10 = smov %s5727_s11  ;;  %s9155_s11 = smov %s5863_s18 }
 0x995   : > { %s9156_s12 = smov %s5852_s15  ;;  %23 = sbr.rel (!%p21_p1) target bundleno = 9 (0x9), region = 111 }
 0x99c   :  { %5094 = vsyncpa [#allocation5], 1 }
 0x99d   :  { %5096 = vsyncpa [#allocation5 + $0x1], 1 }
 0x99e   :  { %5097 = vsyncpa [#allocation6], 1 }
 0x99f   :  { %5099 = vsyncpa [#allocation6 + $0x1], 1 }
 0x9a0   :  { %5100 = vsyncpa [#allocation8], 1 }

</bundles_post_ra>
